<compile_context>
chip_gen: v7x
topology: tpu7x:2x2x1
jax: 0.10.0
libtpu: 0.0.40
codegen_flags: <defaults>
</compile_context>

<pallas_src>
import functools
import math

import numpy as np
import jax
import jax.numpy as jnp
from jax.experimental import pallas as pl
from jax.experimental.pallas import tpu as pltpu

LN_EPS = 1e-5                      # torch.nn.LayerNorm default
_INV_SQRT2 = 1.0 / math.sqrt(2.0)
_NEG_BIG = -1e30


# ----------------------------------------------------------------------------
# In-kernel building blocks (operate on VMEM-resident values)
# ----------------------------------------------------------------------------
def _layernorm(x, g, b):
    mu = jnp.mean(x, axis=-1, keepdims=True)
    var = jnp.mean((x - mu) ** 2, axis=-1, keepdims=True)
    return (x - mu) * jax.lax.rsqrt(var + LN_EPS) * g + b


def _attn_branch(x, ln_g, ln_b, w_qkv, w_0, gid_row, gid_col, o_scr,
                 heads, dim_head):
    """LayerNorm -> QKV -> group-masked attention -> single W_0 GEMM -> +x.

    The TimeSformer attention pattern (CLS attends / is attended by every
    token; non-CLS tokens attend CLS plus their same-frame or same-patch
    group) is expressed by comparing tiny int32 group-id vectors (CLS = -1)
    built once on the host -- no (T,T) mask operand, no token reshuffling.
    Per-head PV outputs land in `o_scr` (T, H*d) so W_0 + residual is one
    GEMM and one add.  The softmax scale is pre-folded into the q columns
    of `w_qkv`.
    """
    hd = heads * dim_head
    xn = _layernorm(x, ln_g, ln_b)
    # (T, 3*H*d) f32 accumulation from bf16 operands (single big GEMM, K=D).
    qkv = jnp.dot(xn.astype(jnp.bfloat16), w_qkv,
                  preferred_element_type=jnp.float32)

    # allowed[i, j] = CLS row or CLS col or same group.  (T, T) bool, built
    # once per branch from (T,1)/(1,T) int32 vectors (VPU compares only).
    allowed = (gid_row == gid_col) | (gid_row < 0) | (gid_col < 0)

    for h in range(heads):                              # H=4, unrolled
        lo, hi = h * dim_head, (h + 1) * dim_head
        q_h = qkv[:, lo:hi].astype(jnp.bfloat16)                     # (T, d)
        k_h = qkv[:, hd + lo:hd + hi].astype(jnp.bfloat16)           # (T, d)
        v_h = qkv[:, 2 * hd + lo:2 * hd + hi].astype(jnp.bfloat16)   # (T, d)
        # scores = q k^T (scale already folded into q), shape (T, T), f32.
        s = jax.lax.dot_general(q_h, k_h, (((1,), (1,)), ((), ())),
                                preferred_element_type=jnp.float32)
        s = jnp.where(allowed, s, _NEG_BIG)
        s = s - jnp.max(s, axis=-1, keepdims=True)
        p = jnp.exp(s)
        p = p * pl.reciprocal(jnp.sum(p, axis=-1, keepdims=True), approx=True)
        # Per-head PV into the head-concatenated scratch (lane slice store).
        o_scr[:, lo:hi] = jnp.dot(p.astype(jnp.bfloat16), v_h,
                                  preferred_element_type=jnp.float32)
    # One (T, HD) x (HD, D) GEMM for W_0 and a single residual add.
    return x + jnp.dot(o_scr[...].astype(jnp.bfloat16), w_0,
                       preferred_element_type=jnp.float32)


def _mlp(x, ln_g, ln_b, w1, b1, w2, b2):
    xn = _layernorm(x, ln_g, ln_b)
    h = jnp.dot(xn.astype(jnp.bfloat16), w1,
                preferred_element_type=jnp.float32) + b1
    h = 0.5 * h * (1.0 + jax.lax.erf(h * _INV_SQRT2))   # exact GELU (torch default)
    y = jnp.dot(h.astype(jnp.bfloat16), w2,
                preferred_element_type=jnp.float32) + b2
    return y + x


def _block_kernel(x_ref,
                  tgr_ref, tgc_ref, sgr_ref, sgc_ref,
                  t_g_ref, t_b_ref, t_wqkv_ref, t_w0_ref,
                  s_g_ref, s_b_ref, s_wqkv_ref, s_w0_ref,
                  m_g_ref, m_b_ref, m_w1_ref, m_b1_ref, m_w2_ref, m_b2_ref,
                  o_ref, o_scr, *, heads, dim_head):
    x = x_ref[0]                                        # (T, D)
    x = _attn_branch(x, t_g_ref[...], t_b_ref[...], t_wqkv_ref[...],
                     t_w0_ref[...], tgr_ref[...], tgc_ref[...], o_scr,
                     heads, dim_head)
    x = _attn_branch(x, s_g_ref[...], s_b_ref[...], s_wqkv_ref[...],
                     s_w0_ref[...], sgr_ref[...], sgc_ref[...], o_scr,
                     heads, dim_head)
    x = _mlp(x, m_g_ref[...], m_b_ref[...], m_w1_ref[...], m_b1_ref[...],
             m_w2_ref[...], m_b2_ref[...])
    o_ref[0] = x


# ----------------------------------------------------------------------------
# Host-side wrapper
# ----------------------------------------------------------------------------
def _group_ids(T, patches, space_att):
    """int32 group id per token: CLS = -1, else frame (space) / patch (time)."""
    idx = np.arange(T)
    body = (idx - 1) // patches if space_att else (idx - 1) % patches
    return np.where(idx == 0, -1, body).astype(np.int32)


def timesformer_block_pallas(x, params, *, frames, patches, heads, dim_head):
    del frames  # token count is implied by x.shape; groups come from `patches`
    B, T, D = x.shape
    hd = heads * dim_head
    scale = float(dim_head) ** -0.5

    def prep_attn(p):
        # fold softmax scale into the q columns; bf16 weights for the MXU.
        col_scale = jnp.concatenate([jnp.full((hd,), scale, jnp.float32),
                                     jnp.ones((2 * hd,), jnp.float32)])
        w_qkv = (p['w_qkv'] * col_scale[None, :]).astype(jnp.bfloat16)
        w_0 = p['w_0'].astype(jnp.bfloat16)
        return p['ln_g'], p['ln_b'], w_qkv, w_0

    t_g, t_b, t_wqkv, t_w0 = prep_attn(params['time'])
    s_g, s_b, s_wqkv, s_w0 = prep_attn(params['space'])
    m = params['mlp']
    m_w1 = m['w1'].astype(jnp.bfloat16)
    m_w2 = m['w2'].astype(jnp.bfloat16)

    tgid = _group_ids(T, patches, space_att=False)   # same patch position
    sgid = _group_ids(T, patches, space_att=True)    # same frame
    tg_row = jnp.asarray(tgid.reshape(T, 1))
    tg_col = jnp.asarray(tgid.reshape(1, T))
    sg_row = jnp.asarray(sgid.reshape(T, 1))
    sg_col = jnp.asarray(sgid.reshape(1, T))

    invariants = (tg_row, tg_col, sg_row, sg_col,
                  t_g, t_b, t_wqkv, t_w0,
                  s_g, s_b, s_wqkv, s_w0,
                  m['ln_g'], m['ln_b'], m_w1, m['b1'], m_w2, m['b2'])

    kern = functools.partial(_block_kernel, heads=heads, dim_head=dim_head)
    out_shape = jax.ShapeDtypeStruct((B, T, D), jnp.float32)

    def build(single_buffer):
        def inv_spec(a):
            nd = a.ndim
            kw = {}
            if single_buffer:
                # grid-invariant operands: no need to double-buffer them.
                kw['pipeline_mode'] = pl.Buffered(1)
            return pl.BlockSpec(a.shape, lambda i, _nd=nd: (0,) * _nd, **kw)

        in_specs = [pl.BlockSpec((1, T, D), lambda i: (i, 0, 0))]
        in_specs += [inv_spec(a) for a in invariants]
        return pl.pallas_call(
            kern,
            out_shape=out_shape,
            grid=(B,),
            in_specs=in_specs,
            out_specs=pl.BlockSpec((1, T, D), lambda i: (i, 0, 0)),
            scratch_shapes=[pltpu.VMEM((T, hd), jnp.float32)],
            compiler_params=pltpu.CompilerParams(
                dimension_semantics=("parallel",),      # batch across TCs (v7x)
                vmem_limit_bytes=64 * 1024 * 1024),
        )

    try:
        return build(single_buffer=True)(x, *invariants)
    except Exception:
        # TODO(synk): pl.Buffered(1) not honoured on this jax version; fall
        # back to default double buffering of the grid-invariant weights.
        return build(single_buffer=False)(x, *invariants)


# ----------------------------------------------------------------------------
# Pure-JAX reference (mirrors the PyTorch module, f32 HIGHEST precision)
# ----------------------------------------------------------------------------
_HI = jax.lax.Precision.HIGHEST


def _ref_layernorm(x, g, b):
    mu = jnp.mean(x, axis=-1, keepdims=True)
    var = jnp.mean((x - mu) ** 2, axis=-1, keepdims=True)
    return (x - mu) * jax.lax.rsqrt(var + LN_EPS) * g + b


def _ref_mhsa(q, k, v, scale):
    s = jnp.einsum('bhid,bhjd->bhij', q, k, precision=_HI) * scale
    a = jax.nn.softmax(s, axis=-1)
    return jnp.einsum('bhij,bhjd->bhid', a, v, precision=_HI)


def _ref_attention_branch(x, prm, *, space_att, frames, patches, heads, dim_head):
    B, T, D = x.shape
    hd = heads * dim_head
    scale = float(dim_head) ** -0.5
    xn = _ref_layernorm(x, prm['ln_g'], prm['ln_b'])
    qkv = jnp.einsum('btd,de->bte', xn, prm['w_qkv'], precision=_HI)
    qkv = qkv.reshape(B, T, 3, heads, dim_head)            # columns = (which, head, d)
    q = jnp.transpose(qkv[:, :, 0], (0, 2, 1, 3))          # (B, H, T, d)
    k = jnp.transpose(qkv[:, :, 1], (0, 2, 1, 3))
    v = jnp.transpose(qkv[:, :, 2], (0, 2, 1, 3))

    out_cls = _ref_mhsa(q[:, :, 0:1], k, v, scale)         # CLS attends everything
    q3, k3, v3 = q[:, :, 1:], k[:, :, 1:], v[:, :, 1:]
    ck, cv = k[:, :, 0:1], v[:, :, 0:1]

    if space_att:
        def sep(t):
            t = t.reshape(B, heads, frames, patches, dim_head)
            return jnp.transpose(t, (0, 2, 1, 3, 4)).reshape(
                B * frames, heads, patches, dim_head)
        tile = frames
    else:
        def sep(t):
            t = t.reshape(B, heads, frames, patches, dim_head)
            return jnp.transpose(t, (0, 3, 1, 2, 4)).reshape(
                B * patches, heads, frames, dim_head)
        tile = patches

    qs, ks, vs = sep(q3), sep(k3), sep(v3)
    cke = jnp.repeat(ck, tile, axis=0)                     # expand_to_batch
    cve = jnp.repeat(cv, tile, axis=0)
    k_cat = jnp.concatenate([cke, ks], axis=2)
    v_cat = jnp.concatenate([cve, vs], axis=2)
    out_sep = _ref_mhsa(qs, k_cat, v_cat, scale)

    if space_att:
        om = out_sep.reshape(B, frames, heads, patches, dim_head)
        om = jnp.transpose(om, (0, 2, 1, 3, 4)).reshape(
            B, heads, frames * patches, dim_head)
    else:
        om = out_sep.reshape(B, patches, heads, frames, dim_head)
        om = jnp.transpose(om, (0, 2, 3, 1, 4)).reshape(
            B, heads, frames * patches, dim_head)

    out = jnp.concatenate([out_cls, om], axis=2)           # (B, H, T, d)
    out = jnp.transpose(out, (0, 2, 1, 3)).reshape(B, T, hd)
    out = jnp.einsum('bte,ed->btd', out, prm['w_0'], precision=_HI)
    return out + x


def _ref_mlp(x, prm):
    xn = _ref_layernorm(x, prm['ln_g'], prm['ln_b'])
    h = jnp.einsum('btd,de->bte', xn, prm['w1'], precision=_HI) + prm['b1']
    h = 0.5 * h * (1.0 + jax.lax.erf(h * _INV_SQRT2))
    y = jnp.einsum('btd,de->bte', h, prm['w2'], precision=_HI) + prm['b2']
    return y + x


def timesformer_block_ref(x, params, *, frames, patches, heads, dim_head):
    x = _ref_attention_branch(x, params['time'], space_att=False, frames=frames,
                              patches=patches, heads=heads, dim_head=dim_head)
    x = _ref_attention_branch(x, params['space'], space_att=True, frames=frames,
                              patches=patches, heads=heads, dim_head=dim_head)
    x = _ref_mlp(x, params['mlp'])
    return x


# ----------------------------------------------------------------------------
# Deterministic parameter initialization
# ----------------------------------------------------------------------------
def init_params(key, dim, heads, dim_head, dim_linear_block):
    hd = heads * dim_head
    ks = jax.random.split(key, 14)

    def lin(k, fin, fout):
        return (jax.random.normal(k, (fin, fout), jnp.float32)
                / jnp.sqrt(jnp.float32(fin)))

    def attn(k0, k1, k2, k3):
        return {'ln_g': 1.0 + 0.1 * jax.random.normal(k0, (1, dim), jnp.float32),
                'ln_b': 0.1 * jax.random.normal(k1, (1, dim), jnp.float32),
                'w_qkv': lin(k2, dim, hd * 3),
                'w_0': lin(k3, hd, dim)}

    return {
        'time': attn(ks[0], ks[1], ks[2], ks[3]),
        'space': attn(ks[4], ks[5], ks[6], ks[7]),
        'mlp': {
            'ln_g': 1.0 + 0.1 * jax.random.normal(ks[8], (1, dim), jnp.float32),
            'ln_b': 0.1 * jax.random.normal(ks[9], (1, dim), jnp.float32),
            'w1': lin(ks[10], dim, dim_linear_block),
            'b1': 0.1 * jax.random.normal(ks[11], (1, dim_linear_block), jnp.float32),
            'w2': lin(ks[12], dim_linear_block, dim),
            'b2': 0.1 * jax.random.normal(ks[13], (1, dim), jnp.float32),
        },
    }


# ----------------------------------------------------------------------------
# Main
# ----------------------------------------------------------------------------
if __name__ == "__main__":
    frames, patches = 4, 8
    dim, heads = 32, 4
    dim_head = dim // heads
    dim_linear_block = 64
    batch = 2
    T = 1 + frames * patches            # CLS + frames*patches tokens

    key = jax.random.PRNGKey(0)
    kx, kp = jax.random.split(key)
    x = jax.random.normal(kx, (batch, T, dim), jnp.float32)
    params = init_params(kp, dim, heads, dim_head, dim_linear_block)

    out = timesformer_block_pallas(x, params, frames=frames, patches=patches,
                                   heads=heads, dim_head=dim_head)
    out = jax.block_until_ready(out)

    ref = timesformer_block_ref(x, params, frames=frames, patches=patches,
                                heads=heads, dim_head=dim_head)
    ref = jax.block_until_ready(ref)

    assert out.shape == (batch, T, dim)
    assert bool(jnp.all(jnp.isfinite(out)))
    np.testing.assert_allclose(np.asarray(out), np.asarray(ref),
                               atol=5e-2, rtol=5e-2)
    print("KERNEL_OK")
</pallas_src>

<mosaic_0001>
module attributes {stable_mosaic.version = 11 : i64} {
  func.func @_block_kernel(%arg0: i32, %arg1: memref<1x33x32xf32, #tpu.memory_space<vmem>>, %arg2: memref<33x1xi32, #tpu.memory_space<vmem>>, %arg3: memref<1x33xi32, #tpu.memory_space<vmem>>, %arg4: memref<33x1xi32, #tpu.memory_space<vmem>>, %arg5: memref<1x33xi32, #tpu.memory_space<vmem>>, %arg6: memref<1x32xf32, #tpu.memory_space<vmem>>, %arg7: memref<1x32xf32, #tpu.memory_space<vmem>>, %arg8: memref<32x96xbf16, #tpu.memory_space<vmem>>, %arg9: memref<32x32xbf16, #tpu.memory_space<vmem>>, %arg10: memref<1x32xf32, #tpu.memory_space<vmem>>, %arg11: memref<1x32xf32, #tpu.memory_space<vmem>>, %arg12: memref<32x96xbf16, #tpu.memory_space<vmem>>, %arg13: memref<32x32xbf16, #tpu.memory_space<vmem>>, %arg14: memref<1x32xf32, #tpu.memory_space<vmem>>, %arg15: memref<1x32xf32, #tpu.memory_space<vmem>>, %arg16: memref<32x64xbf16, #tpu.memory_space<vmem>>, %arg17: memref<1x64xf32, #tpu.memory_space<vmem>>, %arg18: memref<64x32xbf16, #tpu.memory_space<vmem>>, %arg19: memref<1x32xf32, #tpu.memory_space<vmem>>, %arg20: memref<1x33x32xf32, #tpu.memory_space<vmem>>, %arg21: memref<33x32xf32, #tpu.memory_space<vmem>>) attributes {dimension_semantics = [#tpu.dimension_semantics<parallel>], iteration_bounds = array<i64: 2>, scalar_prefetch = 0 : i64, scratch_operands = 1 : i64, tpu.core_type = #tpu.core_type<tc>, window_params = [{transform_indices = @transform_0, window_bounds = array<i64: 1, 33, 32>}, {pipeline_mode = #tpu.pipeline_mode<synchronous>, transform_indices = @transform_1, window_bounds = array<i64: 33, 1>}, {pipeline_mode = #tpu.pipeline_mode<synchronous>, transform_indices = @transform_2, window_bounds = array<i64: 1, 33>}, {pipeline_mode = #tpu.pipeline_mode<synchronous>, transform_indices = @transform_3, window_bounds = array<i64: 33, 1>}, {pipeline_mode = #tpu.pipeline_mode<synchronous>, transform_indices = @transform_4, window_bounds = array<i64: 1, 33>}, {pipeline_mode = #tpu.pipeline_mode<synchronous>, transform_indices = @transform_5, window_bounds = array<i64: 1, 32>}, {pipeline_mode = #tpu.pipeline_mode<synchronous>, transform_indices = @transform_6, window_bounds = array<i64: 1, 32>}, {pipeline_mode = #tpu.pipeline_mode<synchronous>, transform_indices = @transform_7, window_bounds = array<i64: 32, 96>}, {pipeline_mode = #tpu.pipeline_mode<synchronous>, transform_indices = @transform_8, window_bounds = array<i64: 32, 32>}, {pipeline_mode = #tpu.pipeline_mode<synchronous>, transform_indices = @transform_9, window_bounds = array<i64: 1, 32>}, {pipeline_mode = #tpu.pipeline_mode<synchronous>, transform_indices = @transform_10, window_bounds = array<i64: 1, 32>}, {pipeline_mode = #tpu.pipeline_mode<synchronous>, transform_indices = @transform_11, window_bounds = array<i64: 32, 96>}, {pipeline_mode = #tpu.pipeline_mode<synchronous>, transform_indices = @transform_12, window_bounds = array<i64: 32, 32>}, {pipeline_mode = #tpu.pipeline_mode<synchronous>, transform_indices = @transform_13, window_bounds = array<i64: 1, 32>}, {pipeline_mode = #tpu.pipeline_mode<synchronous>, transform_indices = @transform_14, window_bounds = array<i64: 1, 32>}, {pipeline_mode = #tpu.pipeline_mode<synchronous>, transform_indices = @transform_15, window_bounds = array<i64: 32, 64>}, {pipeline_mode = #tpu.pipeline_mode<synchronous>, transform_indices = @transform_16, window_bounds = array<i64: 1, 64>}, {pipeline_mode = #tpu.pipeline_mode<synchronous>, transform_indices = @transform_17, window_bounds = array<i64: 64, 32>}, {pipeline_mode = #tpu.pipeline_mode<synchronous>, transform_indices = @transform_18, window_bounds = array<i64: 1, 32>}, {transform_indices = @transform_19, window_bounds = array<i64: 1, 33, 32>}]} {
    %c0 = arith.constant 0 : index
    %c0_0 = arith.constant 0 : index
    %c0_1 = arith.constant 0 : index
    %0 = vector.load %arg1[%c0, %c0_0, %c0_1] : memref<1x33x32xf32, #tpu.memory_space<vmem>>, vector<1x33x32xf32>
    %1 = vector.shape_cast %0 : vector<1x33x32xf32> to vector<33x32xf32>
    %c0_2 = arith.constant 0 : index
    %c0_3 = arith.constant 0 : index
    %2 = vector.load %arg6[%c0_2, %c0_3] : memref<1x32xf32, #tpu.memory_space<vmem>>, vector<1x32xf32>
    %c0_4 = arith.constant 0 : index
    %c0_5 = arith.constant 0 : index
    %3 = vector.load %arg7[%c0_4, %c0_5] : memref<1x32xf32, #tpu.memory_space<vmem>>, vector<1x32xf32>
    %c0_6 = arith.constant 0 : index
    %c0_7 = arith.constant 0 : index
    %4 = vector.load %arg8[%c0_6, %c0_7] : memref<32x96xbf16, #tpu.memory_space<vmem>>, vector<32x96xbf16>
    %c0_8 = arith.constant 0 : index
    %c0_9 = arith.constant 0 : index
    %5 = vector.load %arg9[%c0_8, %c0_9] : memref<32x32xbf16, #tpu.memory_space<vmem>>, vector<32x32xbf16>
    %c0_10 = arith.constant 0 : index
    %c0_11 = arith.constant 0 : index
    %6 = vector.load %arg2[%c0_10, %c0_11] : memref<33x1xi32, #tpu.memory_space<vmem>>, vector<33x1xi32>
    %c0_12 = arith.constant 0 : index
    %c0_13 = arith.constant 0 : index
    %7 = vector.load %arg3[%c0_12, %c0_13] : memref<1x33xi32, #tpu.memory_space<vmem>>, vector<1x33xi32>
    %cst = arith.constant dense<0.000000e+00> : vector<33xf32>
    %8 = vector.multi_reduction <add>, %1, %cst [1] : vector<33x32xf32> to vector<33xf32>
    %9 = vector.shape_cast %8 : vector<33xf32> to vector<33x1xf32>
    %cst_14 = arith.constant 3.200000e+01 : f32
    %10 = vector.broadcast %cst_14 : f32 to vector<33x1xf32>
    %11 = arith.divf %9, %10 : vector<33x1xf32>
    %12 = vector.broadcast %11 : vector<33x1xf32> to vector<33x32xf32>
    %13 = arith.subf %1, %12 : vector<33x32xf32>
    %14 = arith.mulf %13, %13 : vector<33x32xf32>
    %cst_15 = arith.constant dense<0.000000e+00> : vector<33xf32>
    %15 = vector.multi_reduction <add>, %14, %cst_15 [1] : vector<33x32xf32> to vector<33xf32>
    %16 = vector.shape_cast %15 : vector<33xf32> to vector<33x1xf32>
    %cst_16 = arith.constant 3.200000e+01 : f32
    %17 = vector.broadcast %cst_16 : f32 to vector<33x1xf32>
    %18 = arith.divf %16, %17 : vector<33x1xf32>
    %19 = vector.broadcast %11 : vector<33x1xf32> to vector<33x32xf32>
    %20 = arith.subf %1, %19 : vector<33x32xf32>
    %cst_17 = arith.constant 9.99999974E-6 : f32
    %21 = vector.broadcast %cst_17 : f32 to vector<33x1xf32>
    %22 = arith.addf %18, %21 : vector<33x1xf32>
    %23 = math.rsqrt %22 : vector<33x1xf32>
    %24 = vector.broadcast %23 : vector<33x1xf32> to vector<33x32xf32>
    %25 = arith.mulf %20, %24 : vector<33x32xf32>
    %26 = vector.broadcast %2 : vector<1x32xf32> to vector<33x32xf32>
    %27 = arith.mulf %25, %26 : vector<33x32xf32>
    %28 = vector.broadcast %3 : vector<1x32xf32> to vector<33x32xf32>
    %29 = arith.addf %27, %28 : vector<33x32xf32>
    %30 = arith.truncf %29 : vector<33x32xf32> to vector<33x32xbf16>
    %cst_18 = arith.constant dense<0.000000e+00> : vector<33x96xf32>
    %31 = tpu.matmul %30, %4, %cst_18 {dimension_numbers = #tpu.dot_dimension_numbers<[1], [0], [0], [1], [0, 0, 1, 1], [], []>} : vector<33x32xbf16>, vector<32x96xbf16>, vector<33x96xf32> -> vector<33x96xf32>
    %32 = vector.broadcast %6 : vector<33x1xi32> to vector<33x33xi32>
    %33 = vector.broadcast %7 : vector<1x33xi32> to vector<33x33xi32>
    %34 = arith.cmpi eq, %32, %33 : vector<33x33xi32>
    %c0_i32 = arith.constant 0 : i32
    %35 = vector.broadcast %c0_i32 : i32 to vector<33x1xi32>
    %36 = arith.cmpi slt, %6, %35 : vector<33x1xi32>
    %37 = vector.broadcast %36 : vector<33x1xi1> to vector<33x33xi1>
    %38 = arith.ori %34, %37 : vector<33x33xi1>
    %c0_i32_19 = arith.constant 0 : i32
    %39 = vector.broadcast %c0_i32_19 : i32 to vector<1x33xi32>
    %40 = arith.cmpi slt, %7, %39 : vector<1x33xi32>
    %41 = vector.broadcast %40 : vector<1x33xi1> to vector<33x33xi1>
    %42 = arith.ori %38, %41 : vector<33x33xi1>
    %43 = vector.extract_strided_slice %31 {offsets = [0, 0], sizes = [33, 8], strides = [1, 1]} : vector<33x96xf32> to vector<33x8xf32>
    %44 = arith.truncf %43 : vector<33x8xf32> to vector<33x8xbf16>
    %45 = vector.extract_strided_slice %31 {offsets = [0, 32], sizes = [33, 8], strides = [1, 1]} : vector<33x96xf32> to vector<33x8xf32>
    %46 = arith.truncf %45 : vector<33x8xf32> to vector<33x8xbf16>
    %47 = vector.extract_strided_slice %31 {offsets = [0, 64], sizes = [33, 8], strides = [1, 1]} : vector<33x96xf32> to vector<33x8xf32>
    %48 = arith.truncf %47 : vector<33x8xf32> to vector<33x8xbf16>
    %cst_20 = arith.constant dense<0.000000e+00> : vector<33x33xf32>
    %49 = tpu.matmul %44, %46, %cst_20 {dimension_numbers = #tpu.dot_dimension_numbers<[1], [1], [0], [0], [0, 0, 1, 0], [], []>} : vector<33x8xbf16>, vector<33x8xbf16>, vector<33x33xf32> -> vector<33x33xf32>
    %cst_21 = arith.constant -1.000000e+30 : f32
    %50 = vector.broadcast %cst_21 : f32 to vector<33x33xf32>
    %51 = arith.select %42, %49, %50 : vector<33x33xi1>, vector<33x33xf32>
    %cst_22 = arith.constant dense<0xFF800000> : vector<33xf32>
    %52 = vector.multi_reduction <maximumf>, %51, %cst_22 [1] : vector<33x33xf32> to vector<33xf32>
    %53 = vector.shape_cast %52 : vector<33xf32> to vector<33x1xf32>
    %54 = vector.broadcast %53 : vector<33x1xf32> to vector<33x33xf32>
    %55 = arith.subf %51, %54 : vector<33x33xf32>
    %56 = math.exp %55 : vector<33x33xf32>
    %cst_23 = arith.constant dense<0.000000e+00> : vector<33xf32>
    %57 = vector.multi_reduction <add>, %56, %cst_23 [1] : vector<33x33xf32> to vector<33xf32>
    %58 = vector.shape_cast %57 : vector<33xf32> to vector<33x1xf32>
    %59 = tpu.reciprocal %58 {approx = true} : vector<33x1xf32> -> vector<33x1xf32>
    %60 = vector.broadcast %59 : vector<33x1xf32> to vector<33x33xf32>
    %61 = arith.mulf %56, %60 : vector<33x33xf32>
    %62 = arith.truncf %61 : vector<33x33xf32> to vector<33x33xbf16>
    %cst_24 = arith.constant dense<0.000000e+00> : vector<33x8xf32>
    %63 = tpu.matmul %62, %48, %cst_24 {dimension_numbers = #tpu.dot_dimension_numbers<[1], [0], [0], [1], [0, 0, 1, 1], [], []>} : vector<33x33xbf16>, vector<33x8xbf16>, vector<33x8xf32> -> vector<33x8xf32>
    %c0_25 = arith.constant 0 : index
    %c0_26 = arith.constant 0 : index
    %64 = vector.load %arg21[%c0_25, %c0_26] : memref<33x32xf32, #tpu.memory_space<vmem>>, vector<33x8xf32>
    tpu.vector_store %arg21[%c0_25, %c0_26], %63 {strides = array<i32>} : memref<33x32xf32, #tpu.memory_space<vmem>>, vector<33x8xf32>,
    %65 = vector.extract_strided_slice %31 {offsets = [0, 8], sizes = [33, 8], strides = [1, 1]} : vector<33x96xf32> to vector<33x8xf32>
    %66 = arith.truncf %65 : vector<33x8xf32> to vector<33x8xbf16>
    %67 = vector.extract_strided_slice %31 {offsets = [0, 40], sizes = [33, 8], strides = [1, 1]} : vector<33x96xf32> to vector<33x8xf32>
    %68 = arith.truncf %67 : vector<33x8xf32> to vector<33x8xbf16>
    %69 = vector.extract_strided_slice %31 {offsets = [0, 72], sizes = [33, 8], strides = [1, 1]} : vector<33x96xf32> to vector<33x8xf32>
    %70 = arith.truncf %69 : vector<33x8xf32> to vector<33x8xbf16>
    %cst_27 = arith.constant dense<0.000000e+00> : vector<33x33xf32>
    %71 = tpu.matmul %66, %68, %cst_27 {dimension_numbers = #tpu.dot_dimension_numbers<[1], [1], [0], [0], [0, 0, 1, 0], [], []>} : vector<33x8xbf16>, vector<33x8xbf16>, vector<33x33xf32> -> vector<33x33xf32>
    %cst_28 = arith.constant -1.000000e+30 : f32
    %72 = vector.broadcast %cst_28 : f32 to vector<33x33xf32>
    %73 = arith.select %42, %71, %72 : vector<33x33xi1>, vector<33x33xf32>
    %cst_29 = arith.constant dense<0xFF800000> : vector<33xf32>
    %74 = vector.multi_reduction <maximumf>, %73, %cst_29 [1] : vector<33x33xf32> to vector<33xf32>
    %75 = vector.shape_cast %74 : vector<33xf32> to vector<33x1xf32>
    %76 = vector.broadcast %75 : vector<33x1xf32> to vector<33x33xf32>
    %77 = arith.subf %73, %76 : vector<33x33xf32>
    %78 = math.exp %77 : vector<33x33xf32>
    %cst_30 = arith.constant dense<0.000000e+00> : vector<33xf32>
    %79 = vector.multi_reduction <add>, %78, %cst_30 [1] : vector<33x33xf32> to vector<33xf32>
    %80 = vector.shape_cast %79 : vector<33xf32> to vector<33x1xf32>
    %81 = tpu.reciprocal %80 {approx = true} : vector<33x1xf32> -> vector<33x1xf32>
    %82 = vector.broadcast %81 : vector<33x1xf32> to vector<33x33xf32>
    %83 = arith.mulf %78, %82 : vector<33x33xf32>
    %84 = arith.truncf %83 : vector<33x33xf32> to vector<33x33xbf16>
    %cst_31 = arith.constant dense<0.000000e+00> : vector<33x8xf32>
    %85 = tpu.matmul %84, %70, %cst_31 {dimension_numbers = #tpu.dot_dimension_numbers<[1], [0], [0], [1], [0, 0, 1, 1], [], []>} : vector<33x33xbf16>, vector<33x8xbf16>, vector<33x8xf32> -> vector<33x8xf32>
    %c0_32 = arith.constant 0 : index
    %c8 = arith.constant 8 : index
    %86 = vector.load %arg21[%c0_32, %c8] : memref<33x32xf32, #tpu.memory_space<vmem>>, vector<33x8xf32>
    tpu.vector_store %arg21[%c0_32, %c8], %85 {strides = array<i32>} : memref<33x32xf32, #tpu.memory_space<vmem>>, vector<33x8xf32>,
    %87 = vector.extract_strided_slice %31 {offsets = [0, 16], sizes = [33, 8], strides = [1, 1]} : vector<33x96xf32> to vector<33x8xf32>
    %88 = arith.truncf %87 : vector<33x8xf32> to vector<33x8xbf16>
    %89 = vector.extract_strided_slice %31 {offsets = [0, 48], sizes = [33, 8], strides = [1, 1]} : vector<33x96xf32> to vector<33x8xf32>
    %90 = arith.truncf %89 : vector<33x8xf32> to vector<33x8xbf16>
    %91 = vector.extract_strided_slice %31 {offsets = [0, 80], sizes = [33, 8], strides = [1, 1]} : vector<33x96xf32> to vector<33x8xf32>
    %92 = arith.truncf %91 : vector<33x8xf32> to vector<33x8xbf16>
    %cst_33 = arith.constant dense<0.000000e+00> : vector<33x33xf32>
    %93 = tpu.matmul %88, %90, %cst_33 {dimension_numbers = #tpu.dot_dimension_numbers<[1], [1], [0], [0], [0, 0, 1, 0], [], []>} : vector<33x8xbf16>, vector<33x8xbf16>, vector<33x33xf32> -> vector<33x33xf32>
    %cst_34 = arith.constant -1.000000e+30 : f32
    %94 = vector.broadcast %cst_34 : f32 to vector<33x33xf32>
    %95 = arith.select %42, %93, %94 : vector<33x33xi1>, vector<33x33xf32>
    %cst_35 = arith.constant dense<0xFF800000> : vector<33xf32>
    %96 = vector.multi_reduction <maximumf>, %95, %cst_35 [1] : vector<33x33xf32> to vector<33xf32>
    %97 = vector.shape_cast %96 : vector<33xf32> to vector<33x1xf32>
    %98 = vector.broadcast %97 : vector<33x1xf32> to vector<33x33xf32>
    %99 = arith.subf %95, %98 : vector<33x33xf32>
    %100 = math.exp %99 : vector<33x33xf32>
    %cst_36 = arith.constant dense<0.000000e+00> : vector<33xf32>
    %101 = vector.multi_reduction <add>, %100, %cst_36 [1] : vector<33x33xf32> to vector<33xf32>
    %102 = vector.shape_cast %101 : vector<33xf32> to vector<33x1xf32>
    %103 = tpu.reciprocal %102 {approx = true} : vector<33x1xf32> -> vector<33x1xf32>
    %104 = vector.broadcast %103 : vector<33x1xf32> to vector<33x33xf32>
    %105 = arith.mulf %100, %104 : vector<33x33xf32>
    %106 = arith.truncf %105 : vector<33x33xf32> to vector<33x33xbf16>
    %cst_37 = arith.constant dense<0.000000e+00> : vector<33x8xf32>
    %107 = tpu.matmul %106, %92, %cst_37 {dimension_numbers = #tpu.dot_dimension_numbers<[1], [0], [0], [1], [0, 0, 1, 1], [], []>} : vector<33x33xbf16>, vector<33x8xbf16>, vector<33x8xf32> -> vector<33x8xf32>
    %c0_38 = arith.constant 0 : index
    %c16 = arith.constant 16 : index
    %108 = vector.load %arg21[%c0_38, %c16] : memref<33x32xf32, #tpu.memory_space<vmem>>, vector<33x8xf32>
    tpu.vector_store %arg21[%c0_38, %c16], %107 {strides = array<i32>} : memref<33x32xf32, #tpu.memory_space<vmem>>, vector<33x8xf32>,
    %109 = vector.extract_strided_slice %31 {offsets = [0, 24], sizes = [33, 8], strides = [1, 1]} : vector<33x96xf32> to vector<33x8xf32>
    %110 = arith.truncf %109 : vector<33x8xf32> to vector<33x8xbf16>
    %111 = vector.extract_strided_slice %31 {offsets = [0, 56], sizes = [33, 8], strides = [1, 1]} : vector<33x96xf32> to vector<33x8xf32>
    %112 = arith.truncf %111 : vector<33x8xf32> to vector<33x8xbf16>
    %113 = vector.extract_strided_slice %31 {offsets = [0, 88], sizes = [33, 8], strides = [1, 1]} : vector<33x96xf32> to vector<33x8xf32>
    %114 = arith.truncf %113 : vector<33x8xf32> to vector<33x8xbf16>
    %cst_39 = arith.constant dense<0.000000e+00> : vector<33x33xf32>
    %115 = tpu.matmul %110, %112, %cst_39 {dimension_numbers = #tpu.dot_dimension_numbers<[1], [1], [0], [0], [0, 0, 1, 0], [], []>} : vector<33x8xbf16>, vector<33x8xbf16>, vector<33x33xf32> -> vector<33x33xf32>
    %cst_40 = arith.constant -1.000000e+30 : f32
    %116 = vector.broadcast %cst_40 : f32 to vector<33x33xf32>
    %117 = arith.select %42, %115, %116 : vector<33x33xi1>, vector<33x33xf32>
    %cst_41 = arith.constant dense<0xFF800000> : vector<33xf32>
    %118 = vector.multi_reduction <maximumf>, %117, %cst_41 [1] : vector<33x33xf32> to vector<33xf32>
    %119 = vector.shape_cast %118 : vector<33xf32> to vector<33x1xf32>
    %120 = vector.broadcast %119 : vector<33x1xf32> to vector<33x33xf32>
    %121 = arith.subf %117, %120 : vector<33x33xf32>
    %122 = math.exp %121 : vector<33x33xf32>
    %cst_42 = arith.constant dense<0.000000e+00> : vector<33xf32>
    %123 = vector.multi_reduction <add>, %122, %cst_42 [1] : vector<33x33xf32> to vector<33xf32>
    %124 = vector.shape_cast %123 : vector<33xf32> to vector<33x1xf32>
    %125 = tpu.reciprocal %124 {approx = true} : vector<33x1xf32> -> vector<33x1xf32>
    %126 = vector.broadcast %125 : vector<33x1xf32> to vector<33x33xf32>
    %127 = arith.mulf %122, %126 : vector<33x33xf32>
    %128 = arith.truncf %127 : vector<33x33xf32> to vector<33x33xbf16>
    %cst_43 = arith.constant dense<0.000000e+00> : vector<33x8xf32>
    %129 = tpu.matmul %128, %114, %cst_43 {dimension_numbers = #tpu.dot_dimension_numbers<[1], [0], [0], [1], [0, 0, 1, 1], [], []>} : vector<33x33xbf16>, vector<33x8xbf16>, vector<33x8xf32> -> vector<33x8xf32>
    %c0_44 = arith.constant 0 : index
    %c24 = arith.constant 24 : index
    %130 = vector.load %arg21[%c0_44, %c24] : memref<33x32xf32, #tpu.memory_space<vmem>>, vector<33x8xf32>
    tpu.vector_store %arg21[%c0_44, %c24], %129 {strides = array<i32>} : memref<33x32xf32, #tpu.memory_space<vmem>>, vector<33x8xf32>,
    %c0_45 = arith.constant 0 : index
    %c0_46 = arith.constant 0 : index
    %131 = vector.load %arg21[%c0_45, %c0_46] : memref<33x32xf32, #tpu.memory_space<vmem>>, vector<33x32xf32>
    %132 = arith.truncf %131 : vector<33x32xf32> to vector<33x32xbf16>
    %cst_47 = arith.constant dense<0.000000e+00> : vector<33x32xf32>
    %133 = tpu.matmul %132, %5, %cst_47 {dimension_numbers = #tpu.dot_dimension_numbers<[1], [0], [0], [1], [0, 0, 1, 1], [], []>} : vector<33x32xbf16>, vector<32x32xbf16>, vector<33x32xf32> -> vector<33x32xf32>
    %134 = arith.addf %1, %133 : vector<33x32xf32>
    %c0_48 = arith.constant 0 : index
    %c0_49 = arith.constant 0 : index
    %135 = vector.load %arg10[%c0_48, %c0_49] : memref<1x32xf32, #tpu.memory_space<vmem>>, vector<1x32xf32>
    %c0_50 = arith.constant 0 : index
    %c0_51 = arith.constant 0 : index
    %136 = vector.load %arg11[%c0_50, %c0_51] : memref<1x32xf32, #tpu.memory_space<vmem>>, vector<1x32xf32>
    %c0_52 = arith.constant 0 : index
    %c0_53 = arith.constant 0 : index
    %137 = vector.load %arg12[%c0_52, %c0_53] : memref<32x96xbf16, #tpu.memory_space<vmem>>, vector<32x96xbf16>
    %c0_54 = arith.constant 0 : index
    %c0_55 = arith.constant 0 : index
    %138 = vector.load %arg13[%c0_54, %c0_55] : memref<32x32xbf16, #tpu.memory_space<vmem>>, vector<32x32xbf16>
    %c0_56 = arith.constant 0 : index
    %c0_57 = arith.constant 0 : index
    %139 = vector.load %arg4[%c0_56, %c0_57] : memref<33x1xi32, #tpu.memory_space<vmem>>, vector<33x1xi32>
    %c0_58 = arith.constant 0 : index
    %c0_59 = arith.constant 0 : index
    %140 = vector.load %arg5[%c0_58, %c0_59] : memref<1x33xi32, #tpu.memory_space<vmem>>, vector<1x33xi32>
    %cst_60 = arith.constant dense<0.000000e+00> : vector<33xf32>
    %141 = vector.multi_reduction <add>, %134, %cst_60 [1] : vector<33x32xf32> to vector<33xf32>
    %142 = vector.shape_cast %141 : vector<33xf32> to vector<33x1xf32>
    %cst_61 = arith.constant 3.200000e+01 : f32
    %143 = vector.broadcast %cst_61 : f32 to vector<33x1xf32>
    %144 = arith.divf %142, %143 : vector<33x1xf32>
    %145 = vector.broadcast %144 : vector<33x1xf32> to vector<33x32xf32>
    %146 = arith.subf %134, %145 : vector<33x32xf32>
    %147 = arith.mulf %146, %146 : vector<33x32xf32>
    %cst_62 = arith.constant dense<0.000000e+00> : vector<33xf32>
    %148 = vector.multi_reduction <add>, %147, %cst_62 [1] : vector<33x32xf32> to vector<33xf32>
    %149 = vector.shape_cast %148 : vector<33xf32> to vector<33x1xf32>
    %cst_63 = arith.constant 3.200000e+01 : f32
    %150 = vector.broadcast %cst_63 : f32 to vector<33x1xf32>
    %151 = arith.divf %149, %150 : vector<33x1xf32>
    %152 = vector.broadcast %144 : vector<33x1xf32> to vector<33x32xf32>
    %153 = arith.subf %134, %152 : vector<33x32xf32>
    %cst_64 = arith.constant 9.99999974E-6 : f32
    %154 = vector.broadcast %cst_64 : f32 to vector<33x1xf32>
    %155 = arith.addf %151, %154 : vector<33x1xf32>
    %156 = math.rsqrt %155 : vector<33x1xf32>
    %157 = vector.broadcast %156 : vector<33x1xf32> to vector<33x32xf32>
    %158 = arith.mulf %153, %157 : vector<33x32xf32>
    %159 = vector.broadcast %135 : vector<1x32xf32> to vector<33x32xf32>
    %160 = arith.mulf %158, %159 : vector<33x32xf32>
    %161 = vector.broadcast %136 : vector<1x32xf32> to vector<33x32xf32>
    %162 = arith.addf %160, %161 : vector<33x32xf32>
    %163 = arith.truncf %162 : vector<33x32xf32> to vector<33x32xbf16>
    %cst_65 = arith.constant dense<0.000000e+00> : vector<33x96xf32>
    %164 = tpu.matmul %163, %137, %cst_65 {dimension_numbers = #tpu.dot_dimension_numbers<[1], [0], [0], [1], [0, 0, 1, 1], [], []>} : vector<33x32xbf16>, vector<32x96xbf16>, vector<33x96xf32> -> vector<33x96xf32>
    %165 = vector.broadcast %139 : vector<33x1xi32> to vector<33x33xi32>
    %166 = vector.broadcast %140 : vector<1x33xi32> to vector<33x33xi32>
    %167 = arith.cmpi eq, %165, %166 : vector<33x33xi32>
    %c0_i32_66 = arith.constant 0 : i32
    %168 = vector.broadcast %c0_i32_66 : i32 to vector<33x1xi32>
    %169 = arith.cmpi slt, %139, %168 : vector<33x1xi32>
    %170 = vector.broadcast %169 : vector<33x1xi1> to vector<33x33xi1>
    %171 = arith.ori %167, %170 : vector<33x33xi1>
    %c0_i32_67 = arith.constant 0 : i32
    %172 = vector.broadcast %c0_i32_67 : i32 to vector<1x33xi32>
    %173 = arith.cmpi slt, %140, %172 : vector<1x33xi32>
    %174 = vector.broadcast %173 : vector<1x33xi1> to vector<33x33xi1>
    %175 = arith.ori %171, %174 : vector<33x33xi1>
    %176 = vector.extract_strided_slice %164 {offsets = [0, 0], sizes = [33, 8], strides = [1, 1]} : vector<33x96xf32> to vector<33x8xf32>
    %177 = arith.truncf %176 : vector<33x8xf32> to vector<33x8xbf16>
    %178 = vector.extract_strided_slice %164 {offsets = [0, 32], sizes = [33, 8], strides = [1, 1]} : vector<33x96xf32> to vector<33x8xf32>
    %179 = arith.truncf %178 : vector<33x8xf32> to vector<33x8xbf16>
    %180 = vector.extract_strided_slice %164 {offsets = [0, 64], sizes = [33, 8], strides = [1, 1]} : vector<33x96xf32> to vector<33x8xf32>
    %181 = arith.truncf %180 : vector<33x8xf32> to vector<33x8xbf16>
    %cst_68 = arith.constant dense<0.000000e+00> : vector<33x33xf32>
    %182 = tpu.matmul %177, %179, %cst_68 {dimension_numbers = #tpu.dot_dimension_numbers<[1], [1], [0], [0], [0, 0, 1, 0], [], []>} : vector<33x8xbf16>, vector<33x8xbf16>, vector<33x33xf32> -> vector<33x33xf32>
    %cst_69 = arith.constant -1.000000e+30 : f32
    %183 = vector.broadcast %cst_69 : f32 to vector<33x33xf32>
    %184 = arith.select %175, %182, %183 : vector<33x33xi1>, vector<33x33xf32>
    %cst_70 = arith.constant dense<0xFF800000> : vector<33xf32>
    %185 = vector.multi_reduction <maximumf>, %184, %cst_70 [1] : vector<33x33xf32> to vector<33xf32>
    %186 = vector.shape_cast %185 : vector<33xf32> to vector<33x1xf32>
    %187 = vector.broadcast %186 : vector<33x1xf32> to vector<33x33xf32>
    %188 = arith.subf %184, %187 : vector<33x33xf32>
    %189 = math.exp %188 : vector<33x33xf32>
    %cst_71 = arith.constant dense<0.000000e+00> : vector<33xf32>
    %190 = vector.multi_reduction <add>, %189, %cst_71 [1] : vector<33x33xf32> to vector<33xf32>
    %191 = vector.shape_cast %190 : vector<33xf32> to vector<33x1xf32>
    %192 = tpu.reciprocal %191 {approx = true} : vector<33x1xf32> -> vector<33x1xf32>
    %193 = vector.broadcast %192 : vector<33x1xf32> to vector<33x33xf32>
    %194 = arith.mulf %189, %193 : vector<33x33xf32>
    %195 = arith.truncf %194 : vector<33x33xf32> to vector<33x33xbf16>
    %cst_72 = arith.constant dense<0.000000e+00> : vector<33x8xf32>
    %196 = tpu.matmul %195, %181, %cst_72 {dimension_numbers = #tpu.dot_dimension_numbers<[1], [0], [0], [1], [0, 0, 1, 1], [], []>} : vector<33x33xbf16>, vector<33x8xbf16>, vector<33x8xf32> -> vector<33x8xf32>
    %c0_73 = arith.constant 0 : index
    %c0_74 = arith.constant 0 : index
    %197 = vector.load %arg21[%c0_73, %c0_74] : memref<33x32xf32, #tpu.memory_space<vmem>>, vector<33x8xf32>
    tpu.vector_store %arg21[%c0_73, %c0_74], %196 {strides = array<i32>} : memref<33x32xf32, #tpu.memory_space<vmem>>, vector<33x8xf32>,
    %198 = vector.extract_strided_slice %164 {offsets = [0, 8], sizes = [33, 8], strides = [1, 1]} : vector<33x96xf32> to vector<33x8xf32>
    %199 = arith.truncf %198 : vector<33x8xf32> to vector<33x8xbf16>
    %200 = vector.extract_strided_slice %164 {offsets = [0, 40], sizes = [33, 8], strides = [1, 1]} : vector<33x96xf32> to vector<33x8xf32>
    %201 = arith.truncf %200 : vector<33x8xf32> to vector<33x8xbf16>
    %202 = vector.extract_strided_slice %164 {offsets = [0, 72], sizes = [33, 8], strides = [1, 1]} : vector<33x96xf32> to vector<33x8xf32>
    %203 = arith.truncf %202 : vector<33x8xf32> to vector<33x8xbf16>
    %cst_75 = arith.constant dense<0.000000e+00> : vector<33x33xf32>
    %204 = tpu.matmul %199, %201, %cst_75 {dimension_numbers = #tpu.dot_dimension_numbers<[1], [1], [0], [0], [0, 0, 1, 0], [], []>} : vector<33x8xbf16>, vector<33x8xbf16>, vector<33x33xf32> -> vector<33x33xf32>
    %cst_76 = arith.constant -1.000000e+30 : f32
    %205 = vector.broadcast %cst_76 : f32 to vector<33x33xf32>
    %206 = arith.select %175, %204, %205 : vector<33x33xi1>, vector<33x33xf32>
    %cst_77 = arith.constant dense<0xFF800000> : vector<33xf32>
    %207 = vector.multi_reduction <maximumf>, %206, %cst_77 [1] : vector<33x33xf32> to vector<33xf32>
    %208 = vector.shape_cast %207 : vector<33xf32> to vector<33x1xf32>
    %209 = vector.broadcast %208 : vector<33x1xf32> to vector<33x33xf32>
    %210 = arith.subf %206, %209 : vector<33x33xf32>
    %211 = math.exp %210 : vector<33x33xf32>
    %cst_78 = arith.constant dense<0.000000e+00> : vector<33xf32>
    %212 = vector.multi_reduction <add>, %211, %cst_78 [1] : vector<33x33xf32> to vector<33xf32>
    %213 = vector.shape_cast %212 : vector<33xf32> to vector<33x1xf32>
    %214 = tpu.reciprocal %213 {approx = true} : vector<33x1xf32> -> vector<33x1xf32>
    %215 = vector.broadcast %214 : vector<33x1xf32> to vector<33x33xf32>
    %216 = arith.mulf %211, %215 : vector<33x33xf32>
    %217 = arith.truncf %216 : vector<33x33xf32> to vector<33x33xbf16>
    %cst_79 = arith.constant dense<0.000000e+00> : vector<33x8xf32>
    %218 = tpu.matmul %217, %203, %cst_79 {dimension_numbers = #tpu.dot_dimension_numbers<[1], [0], [0], [1], [0, 0, 1, 1], [], []>} : vector<33x33xbf16>, vector<33x8xbf16>, vector<33x8xf32> -> vector<33x8xf32>
    %c0_80 = arith.constant 0 : index
    %c8_81 = arith.constant 8 : index
    %219 = vector.load %arg21[%c0_80, %c8_81] : memref<33x32xf32, #tpu.memory_space<vmem>>, vector<33x8xf32>
    tpu.vector_store %arg21[%c0_80, %c8_81], %218 {strides = array<i32>} : memref<33x32xf32, #tpu.memory_space<vmem>>, vector<33x8xf32>,
    %220 = vector.extract_strided_slice %164 {offsets = [0, 16], sizes = [33, 8], strides = [1, 1]} : vector<33x96xf32> to vector<33x8xf32>
    %221 = arith.truncf %220 : vector<33x8xf32> to vector<33x8xbf16>
    %222 = vector.extract_strided_slice %164 {offsets = [0, 48], sizes = [33, 8], strides = [1, 1]} : vector<33x96xf32> to vector<33x8xf32>
    %223 = arith.truncf %222 : vector<33x8xf32> to vector<33x8xbf16>
    %224 = vector.extract_strided_slice %164 {offsets = [0, 80], sizes = [33, 8], strides = [1, 1]} : vector<33x96xf32> to vector<33x8xf32>
    %225 = arith.truncf %224 : vector<33x8xf32> to vector<33x8xbf16>
    %cst_82 = arith.constant dense<0.000000e+00> : vector<33x33xf32>
    %226 = tpu.matmul %221, %223, %cst_82 {dimension_numbers = #tpu.dot_dimension_numbers<[1], [1], [0], [0], [0, 0, 1, 0], [], []>} : vector<33x8xbf16>, vector<33x8xbf16>, vector<33x33xf32> -> vector<33x33xf32>
    %cst_83 = arith.constant -1.000000e+30 : f32
    %227 = vector.broadcast %cst_83 : f32 to vector<33x33xf32>
    %228 = arith.select %175, %226, %227 : vector<33x33xi1>, vector<33x33xf32>
    %cst_84 = arith.constant dense<0xFF800000> : vector<33xf32>
    %229 = vector.multi_reduction <maximumf>, %228, %cst_84 [1] : vector<33x33xf32> to vector<33xf32>
    %230 = vector.shape_cast %229 : vector<33xf32> to vector<33x1xf32>
    %231 = vector.broadcast %230 : vector<33x1xf32> to vector<33x33xf32>
    %232 = arith.subf %228, %231 : vector<33x33xf32>
    %233 = math.exp %232 : vector<33x33xf32>
    %cst_85 = arith.constant dense<0.000000e+00> : vector<33xf32>
    %234 = vector.multi_reduction <add>, %233, %cst_85 [1] : vector<33x33xf32> to vector<33xf32>
    %235 = vector.shape_cast %234 : vector<33xf32> to vector<33x1xf32>
    %236 = tpu.reciprocal %235 {approx = true} : vector<33x1xf32> -> vector<33x1xf32>
    %237 = vector.broadcast %236 : vector<33x1xf32> to vector<33x33xf32>
    %238 = arith.mulf %233, %237 : vector<33x33xf32>
    %239 = arith.truncf %238 : vector<33x33xf32> to vector<33x33xbf16>
    %cst_86 = arith.constant dense<0.000000e+00> : vector<33x8xf32>
    %240 = tpu.matmul %239, %225, %cst_86 {dimension_numbers = #tpu.dot_dimension_numbers<[1], [0], [0], [1], [0, 0, 1, 1], [], []>} : vector<33x33xbf16>, vector<33x8xbf16>, vector<33x8xf32> -> vector<33x8xf32>
    %c0_87 = arith.constant 0 : index
    %c16_88 = arith.constant 16 : index
    %241 = vector.load %arg21[%c0_87, %c16_88] : memref<33x32xf32, #tpu.memory_space<vmem>>, vector<33x8xf32>
    tpu.vector_store %arg21[%c0_87, %c16_88], %240 {strides = array<i32>} : memref<33x32xf32, #tpu.memory_space<vmem>>, vector<33x8xf32>,
    %242 = vector.extract_strided_slice %164 {offsets = [0, 24], sizes = [33, 8], strides = [1, 1]} : vector<33x96xf32> to vector<33x8xf32>
    %243 = arith.truncf %242 : vector<33x8xf32> to vector<33x8xbf16>
    %244 = vector.extract_strided_slice %164 {offsets = [0, 56], sizes = [33, 8], strides = [1, 1]} : vector<33x96xf32> to vector<33x8xf32>
    %245 = arith.truncf %244 : vector<33x8xf32> to vector<33x8xbf16>
    %246 = vector.extract_strided_slice %164 {offsets = [0, 88], sizes = [33, 8], strides = [1, 1]} : vector<33x96xf32> to vector<33x8xf32>
    %247 = arith.truncf %246 : vector<33x8xf32> to vector<33x8xbf16>
    %cst_89 = arith.constant dense<0.000000e+00> : vector<33x33xf32>
    %248 = tpu.matmul %243, %245, %cst_89 {dimension_numbers = #tpu.dot_dimension_numbers<[1], [1], [0], [0], [0, 0, 1, 0], [], []>} : vector<33x8xbf16>, vector<33x8xbf16>, vector<33x33xf32> -> vector<33x33xf32>
    %cst_90 = arith.constant -1.000000e+30 : f32
    %249 = vector.broadcast %cst_90 : f32 to vector<33x33xf32>
    %250 = arith.select %175, %248, %249 : vector<33x33xi1>, vector<33x33xf32>
    %cst_91 = arith.constant dense<0xFF800000> : vector<33xf32>
    %251 = vector.multi_reduction <maximumf>, %250, %cst_91 [1] : vector<33x33xf32> to vector<33xf32>
    %252 = vector.shape_cast %251 : vector<33xf32> to vector<33x1xf32>
    %253 = vector.broadcast %252 : vector<33x1xf32> to vector<33x33xf32>
    %254 = arith.subf %250, %253 : vector<33x33xf32>
    %255 = math.exp %254 : vector<33x33xf32>
    %cst_92 = arith.constant dense<0.000000e+00> : vector<33xf32>
    %256 = vector.multi_reduction <add>, %255, %cst_92 [1] : vector<33x33xf32> to vector<33xf32>
    %257 = vector.shape_cast %256 : vector<33xf32> to vector<33x1xf32>
    %258 = tpu.reciprocal %257 {approx = true} : vector<33x1xf32> -> vector<33x1xf32>
    %259 = vector.broadcast %258 : vector<33x1xf32> to vector<33x33xf32>
    %260 = arith.mulf %255, %259 : vector<33x33xf32>
    %261 = arith.truncf %260 : vector<33x33xf32> to vector<33x33xbf16>
    %cst_93 = arith.constant dense<0.000000e+00> : vector<33x8xf32>
    %262 = tpu.matmul %261, %247, %cst_93 {dimension_numbers = #tpu.dot_dimension_numbers<[1], [0], [0], [1], [0, 0, 1, 1], [], []>} : vector<33x33xbf16>, vector<33x8xbf16>, vector<33x8xf32> -> vector<33x8xf32>
    %c0_94 = arith.constant 0 : index
    %c24_95 = arith.constant 24 : index
    %263 = vector.load %arg21[%c0_94, %c24_95] : memref<33x32xf32, #tpu.memory_space<vmem>>, vector<33x8xf32>
    tpu.vector_store %arg21[%c0_94, %c24_95], %262 {strides = array<i32>} : memref<33x32xf32, #tpu.memory_space<vmem>>, vector<33x8xf32>,
    %c0_96 = arith.constant 0 : index
    %c0_97 = arith.constant 0 : index
    %264 = vector.load %arg21[%c0_96, %c0_97] : memref<33x32xf32, #tpu.memory_space<vmem>>, vector<33x32xf32>
    %265 = arith.truncf %264 : vector<33x32xf32> to vector<33x32xbf16>
    %cst_98 = arith.constant dense<0.000000e+00> : vector<33x32xf32>
    %266 = tpu.matmul %265, %138, %cst_98 {dimension_numbers = #tpu.dot_dimension_numbers<[1], [0], [0], [1], [0, 0, 1, 1], [], []>} : vector<33x32xbf16>, vector<32x32xbf16>, vector<33x32xf32> -> vector<33x32xf32>
    %267 = arith.addf %134, %266 : vector<33x32xf32>
    %c0_99 = arith.constant 0 : index
    %c0_100 = arith.constant 0 : index
    %268 = vector.load %arg14[%c0_99, %c0_100] : memref<1x32xf32, #tpu.memory_space<vmem>>, vector<1x32xf32>
    %c0_101 = arith.constant 0 : index
    %c0_102 = arith.constant 0 : index
    %269 = vector.load %arg15[%c0_101, %c0_102] : memref<1x32xf32, #tpu.memory_space<vmem>>, vector<1x32xf32>
    %c0_103 = arith.constant 0 : index
    %c0_104 = arith.constant 0 : index
    %270 = vector.load %arg16[%c0_103, %c0_104] : memref<32x64xbf16, #tpu.memory_space<vmem>>, vector<32x64xbf16>
    %c0_105 = arith.constant 0 : index
    %c0_106 = arith.constant 0 : index
    %271 = vector.load %arg17[%c0_105, %c0_106] : memref<1x64xf32, #tpu.memory_space<vmem>>, vector<1x64xf32>
    %c0_107 = arith.constant 0 : index
    %c0_108 = arith.constant 0 : index
    %272 = vector.load %arg18[%c0_107, %c0_108] : memref<64x32xbf16, #tpu.memory_space<vmem>>, vector<64x32xbf16>
    %c0_109 = arith.constant 0 : index
    %c0_110 = arith.constant 0 : index
    %273 = vector.load %arg19[%c0_109, %c0_110] : memref<1x32xf32, #tpu.memory_space<vmem>>, vector<1x32xf32>
    %cst_111 = arith.constant dense<0.000000e+00> : vector<33xf32>
    %274 = vector.multi_reduction <add>, %267, %cst_111 [1] : vector<33x32xf32> to vector<33xf32>
    %275 = vector.shape_cast %274 : vector<33xf32> to vector<33x1xf32>
    %cst_112 = arith.constant 3.200000e+01 : f32
    %276 = vector.broadcast %cst_112 : f32 to vector<33x1xf32>
    %277 = arith.divf %275, %276 : vector<33x1xf32>
    %278 = vector.broadcast %277 : vector<33x1xf32> to vector<33x32xf32>
    %279 = arith.subf %267, %278 : vector<33x32xf32>
    %280 = arith.mulf %279, %279 : vector<33x32xf32>
    %cst_113 = arith.constant dense<0.000000e+00> : vector<33xf32>
    %281 = vector.multi_reduction <add>, %280, %cst_113 [1] : vector<33x32xf32> to vector<33xf32>
    %282 = vector.shape_cast %281 : vector<33xf32> to vector<33x1xf32>
    %cst_114 = arith.constant 3.200000e+01 : f32
    %283 = vector.broadcast %cst_114 : f32 to vector<33x1xf32>
    %284 = arith.divf %282, %283 : vector<33x1xf32>
    %285 = vector.broadcast %277 : vector<33x1xf32> to vector<33x32xf32>
    %286 = arith.subf %267, %285 : vector<33x32xf32>
    %cst_115 = arith.constant 9.99999974E-6 : f32
    %287 = vector.broadcast %cst_115 : f32 to vector<33x1xf32>
    %288 = arith.addf %284, %287 : vector<33x1xf32>
    %289 = math.rsqrt %288 : vector<33x1xf32>
    %290 = vector.broadcast %289 : vector<33x1xf32> to vector<33x32xf32>
    %291 = arith.mulf %286, %290 : vector<33x32xf32>
    %292 = vector.broadcast %268 : vector<1x32xf32> to vector<33x32xf32>
    %293 = arith.mulf %291, %292 : vector<33x32xf32>
    %294 = vector.broadcast %269 : vector<1x32xf32> to vector<33x32xf32>
    %295 = arith.addf %293, %294 : vector<33x32xf32>
    %296 = arith.truncf %295 : vector<33x32xf32> to vector<33x32xbf16>
    %cst_116 = arith.constant dense<0.000000e+00> : vector<33x64xf32>
    %297 = tpu.matmul %296, %270, %cst_116 {dimension_numbers = #tpu.dot_dimension_numbers<[1], [0], [0], [1], [0, 0, 1, 1], [], []>} : vector<33x32xbf16>, vector<32x64xbf16>, vector<33x64xf32> -> vector<33x64xf32>
    %298 = vector.broadcast %271 : vector<1x64xf32> to vector<33x64xf32>
    %299 = arith.addf %297, %298 : vector<33x64xf32>
    %cst_117 = arith.constant 5.000000e-01 : f32
    %300 = vector.broadcast %cst_117 : f32 to vector<33x64xf32>
    %301 = arith.mulf %300, %299 : vector<33x64xf32>
    %cst_118 = arith.constant 0.707106769 : f32
    %302 = vector.broadcast %cst_118 : f32 to vector<33x64xf32>
    %303 = arith.mulf %299, %302 : vector<33x64xf32>
    %304 = math.erf %303 : vector<33x64xf32>
    %cst_119 = arith.constant 1.000000e+00 : f32
    %305 = vector.broadcast %cst_119 : f32 to vector<33x64xf32>
    %306 = arith.addf %305, %304 : vector<33x64xf32>
    %307 = arith.mulf %301, %306 : vector<33x64xf32>
    %308 = arith.truncf %307 : vector<33x64xf32> to vector<33x64xbf16>
    %cst_120 = arith.constant dense<0.000000e+00> : vector<33x32xf32>
    %309 = tpu.matmul %308, %272, %cst_120 {dimension_numbers = #tpu.dot_dimension_numbers<[1], [0], [0], [1], [0, 0, 1, 1], [], []>} : vector<33x64xbf16>, vector<64x32xbf16>, vector<33x32xf32> -> vector<33x32xf32>
    %310 = vector.broadcast %273 : vector<1x32xf32> to vector<33x32xf32>
    %311 = arith.addf %309, %310 : vector<33x32xf32>
    %312 = arith.addf %311, %267 : vector<33x32xf32>
    %c0_121 = arith.constant 0 : index
    %c0_122 = arith.constant 0 : index
    %c0_123 = arith.constant 0 : index
    %313 = vector.load %arg20[%c0_121, %c0_122, %c0_123] : memref<1x33x32xf32, #tpu.memory_space<vmem>>, vector<1x33x32xf32>
    %314 = vector.shape_cast %313 : vector<1x33x32xf32> to vector<33x32xf32>
    %315 = vector.shape_cast %312 : vector<33x32xf32> to vector<1x33x32xf32>
    tpu.vector_store %arg20[%c0_121, %c0_122, %c0_123], %315 {strides = array<i32>} : memref<1x33x32xf32, #tpu.memory_space<vmem>>, vector<1x33x32xf32>,
    return
  }
  func.func @transform_0(%arg0: i32) -> (i32, i32, i32) {
    %c0_i32 = arith.constant 0 : i32
    %c0_i32_0 = arith.constant 0 : i32
    %c0_i32_1 = arith.constant 0 : i32
    return %arg0, %c0_i32, %c0_i32_0 : i32, i32, i32
  }
  func.func @transform_1(%arg0: i32) -> (i32, i32) {
    %c0_i32 = arith.constant 0 : i32
    %c0_i32_0 = arith.constant 0 : i32
    %c0_i32_1 = arith.constant 0 : i32
    return %c0_i32, %c0_i32_0 : i32, i32
  }
  func.func @transform_2(%arg0: i32) -> (i32, i32) {
    %c0_i32 = arith.constant 0 : i32
    %c0_i32_0 = arith.constant 0 : i32
    %c0_i32_1 = arith.constant 0 : i32
    return %c0_i32, %c0_i32_0 : i32, i32
  }
  func.func @transform_3(%arg0: i32) -> (i32, i32) {
    %c0_i32 = arith.constant 0 : i32
    %c0_i32_0 = arith.constant 0 : i32
    %c0_i32_1 = arith.constant 0 : i32
    return %c0_i32, %c0_i32_0 : i32, i32
  }
  func.func @transform_4(%arg0: i32) -> (i32, i32) {
    %c0_i32 = arith.constant 0 : i32
    %c0_i32_0 = arith.constant 0 : i32
    %c0_i32_1 = arith.constant 0 : i32
    return %c0_i32, %c0_i32_0 : i32, i32
  }
  func.func @transform_5(%arg0: i32) -> (i32, i32) {
    %c0_i32 = arith.constant 0 : i32
    %c0_i32_0 = arith.constant 0 : i32
    %c0_i32_1 = arith.constant 0 : i32
    return %c0_i32, %c0_i32_0 : i32, i32
  }
  func.func @transform_6(%arg0: i32) -> (i32, i32) {
    %c0_i32 = arith.constant 0 : i32
    %c0_i32_0 = arith.constant 0 : i32
    %c0_i32_1 = arith.constant 0 : i32
    return %c0_i32, %c0_i32_0 : i32, i32
  }
  func.func @transform_7(%arg0: i32) -> (i32, i32) {
    %c0_i32 = arith.constant 0 : i32
    %c0_i32_0 = arith.constant 0 : i32
    %c0_i32_1 = arith.constant 0 : i32
    return %c0_i32, %c0_i32_0 : i32, i32
  }
  func.func @transform_8(%arg0: i32) -> (i32, i32) {
    %c0_i32 = arith.constant 0 : i32
    %c0_i32_0 = arith.constant 0 : i32
    %c0_i32_1 = arith.constant 0 : i32
    return %c0_i32, %c0_i32_0 : i32, i32
  }
  func.func @transform_9(%arg0: i32) -> (i32, i32) {
    %c0_i32 = arith.constant 0 : i32
    %c0_i32_0 = arith.constant 0 : i32
    %c0_i32_1 = arith.constant 0 : i32
    return %c0_i32, %c0_i32_0 : i32, i32
  }
  func.func @transform_10(%arg0: i32) -> (i32, i32) {
    %c0_i32 = arith.constant 0 : i32
    %c0_i32_0 = arith.constant 0 : i32
    %c0_i32_1 = arith.constant 0 : i32
    return %c0_i32, %c0_i32_0 : i32, i32
  }
  func.func @transform_11(%arg0: i32) -> (i32, i32) {
    %c0_i32 = arith.constant 0 : i32
    %c0_i32_0 = arith.constant 0 : i32
    %c0_i32_1 = arith.constant 0 : i32
    return %c0_i32, %c0_i32_0 : i32, i32
  }
  func.func @transform_12(%arg0: i32) -> (i32, i32) {
    %c0_i32 = arith.constant 0 : i32
    %c0_i32_0 = arith.constant 0 : i32
    %c0_i32_1 = arith.constant 0 : i32
    return %c0_i32, %c0_i32_0 : i32, i32
  }
  func.func @transform_13(%arg0: i32) -> (i32, i32) {
    %c0_i32 = arith.constant 0 : i32
    %c0_i32_0 = arith.constant 0 : i32
    %c0_i32_1 = arith.constant 0 : i32
    return %c0_i32, %c0_i32_0 : i32, i32
  }
  func.func @transform_14(%arg0: i32) -> (i32, i32) {
    %c0_i32 = arith.constant 0 : i32
    %c0_i32_0 = arith.constant 0 : i32
    %c0_i32_1 = arith.constant 0 : i32
    return %c0_i32, %c0_i32_0 : i32, i32
  }
  func.func @transform_15(%arg0: i32) -> (i32, i32) {
    %c0_i32 = arith.constant 0 : i32
    %c0_i32_0 = arith.constant 0 : i32
    %c0_i32_1 = arith.constant 0 : i32
    return %c0_i32, %c0_i32_0 : i32, i32
  }
  func.func @transform_16(%arg0: i32) -> (i32, i32) {
    %c0_i32 = arith.constant 0 : i32
    %c0_i32_0 = arith.constant 0 : i32
    %c0_i32_1 = arith.constant 0 : i32
    return %c0_i32, %c0_i32_0 : i32, i32
  }
  func.func @transform_17(%arg0: i32) -> (i32, i32) {
    %c0_i32 = arith.constant 0 : i32
    %c0_i32_0 = arith.constant 0 : i32
    %c0_i32_1 = arith.constant 0 : i32
    return %c0_i32, %c0_i32_0 : i32, i32
  }
  func.func @transform_18(%arg0: i32) -> (i32, i32) {
    %c0_i32 = arith.constant 0 : i32
    %c0_i32_0 = arith.constant 0 : i32
    %c0_i32_1 = arith.constant 0 : i32
    return %c0_i32, %c0_i32_0 : i32, i32
  }
  func.func @transform_19(%arg0: i32) -> (i32, i32, i32) {
    %c0_i32 = arith.constant 0 : i32
    %c0_i32_0 = arith.constant 0 : i32
    %c0_i32_1 = arith.constant 0 : i32
    return %arg0, %c0_i32, %c0_i32_0 : i32, i32, i32
  }
}

module attributes {stable_mosaic.version = 11 : i64} {
  func.func @_block_kernel(%arg0: i32, %arg1: memref<1x33x32xf32, #tpu.memory_space<vmem>>, %arg2: memref<33x1xi32, #tpu.memory_space<vmem>>, %arg3: memref<1x33xi32, #tpu.memory_space<vmem>>, %arg4: memref<33x1xi32, #tpu.memory_space<vmem>>, %arg5: memref<1x33xi32, #tpu.memory_space<vmem>>, %arg6: memref<1x32xf32, #tpu.memory_space<vmem>>, %arg7: memref<1x32xf32, #tpu.memory_space<vmem>>, %arg8: memref<32x96xbf16, #tpu.memory_space<vmem>>, %arg9: memref<32x32xbf16, #tpu.memory_space<vmem>>, %arg10: memref<1x32xf32, #tpu.memory_space<vmem>>, %arg11: memref<1x32xf32, #tpu.memory_space<vmem>>, %arg12: memref<32x96xbf16, #tpu.memory_space<vmem>>, %arg13: memref<32x32xbf16, #tpu.memory_space<vmem>>, %arg14: memref<1x32xf32, #tpu.memory_space<vmem>>, %arg15: memref<1x32xf32, #tpu.memory_space<vmem>>, %arg16: memref<32x64xbf16, #tpu.memory_space<vmem>>, %arg17: memref<1x64xf32, #tpu.memory_space<vmem>>, %arg18: memref<64x32xbf16, #tpu.memory_space<vmem>>, %arg19: memref<1x32xf32, #tpu.memory_space<vmem>>, %arg20: memref<1x33x32xf32, #tpu.memory_space<vmem>>, %arg21: memref<33x32xf32, #tpu.memory_space<vmem>>) attributes {dimension_semantics = [#tpu.dimension_semantics<parallel>], iteration_bounds = array<i64: 2>, scalar_prefetch = 0 : i64, scratch_operands = 1 : i64, tpu.core_type = #tpu.core_type<tc>, window_params = [{transform_indices = @transform_0, window_bounds = array<i64: 1, 33, 32>}, {pipeline_mode = #tpu.pipeline_mode<synchronous>, transform_indices = @transform_1, window_bounds = array<i64: 33, 1>}, {pipeline_mode = #tpu.pipeline_mode<synchronous>, transform_indices = @transform_2, window_bounds = array<i64: 1, 33>}, {pipeline_mode = #tpu.pipeline_mode<synchronous>, transform_indices = @transform_3, window_bounds = array<i64: 33, 1>}, {pipeline_mode = #tpu.pipeline_mode<synchronous>, transform_indices = @transform_4, window_bounds = array<i64: 1, 33>}, {pipeline_mode = #tpu.pipeline_mode<synchronous>, transform_indices = @transform_5, window_bounds = array<i64: 1, 32>}, {pipeline_mode = #tpu.pipeline_mode<synchronous>, transform_indices = @transform_6, window_bounds = array<i64: 1, 32>}, {pipeline_mode = #tpu.pipeline_mode<synchronous>, transform_indices = @transform_7, window_bounds = array<i64: 32, 96>}, {pipeline_mode = #tpu.pipeline_mode<synchronous>, transform_indices = @transform_8, window_bounds = array<i64: 32, 32>}, {pipeline_mode = #tpu.pipeline_mode<synchronous>, transform_indices = @transform_9, window_bounds = array<i64: 1, 32>}, {pipeline_mode = #tpu.pipeline_mode<synchronous>, transform_indices = @transform_10, window_bounds = array<i64: 1, 32>}, {pipeline_mode = #tpu.pipeline_mode<synchronous>, transform_indices = @transform_11, window_bounds = array<i64: 32, 96>}, {pipeline_mode = #tpu.pipeline_mode<synchronous>, transform_indices = @transform_12, window_bounds = array<i64: 32, 32>}, {pipeline_mode = #tpu.pipeline_mode<synchronous>, transform_indices = @transform_13, window_bounds = array<i64: 1, 32>}, {pipeline_mode = #tpu.pipeline_mode<synchronous>, transform_indices = @transform_14, window_bounds = array<i64: 1, 32>}, {pipeline_mode = #tpu.pipeline_mode<synchronous>, transform_indices = @transform_15, window_bounds = array<i64: 32, 64>}, {pipeline_mode = #tpu.pipeline_mode<synchronous>, transform_indices = @transform_16, window_bounds = array<i64: 1, 64>}, {pipeline_mode = #tpu.pipeline_mode<synchronous>, transform_indices = @transform_17, window_bounds = array<i64: 64, 32>}, {pipeline_mode = #tpu.pipeline_mode<synchronous>, transform_indices = @transform_18, window_bounds = array<i64: 1, 32>}, {transform_indices = @transform_19, window_bounds = array<i64: 1, 33, 32>}]} {
    %c0 = arith.constant 0 : index
    %c0_0 = arith.constant 0 : index
    %c0_1 = arith.constant 0 : index
    %0 = vector.load %arg1[%c0, %c0_0, %c0_1] : memref<1x33x32xf32, #tpu.memory_space<vmem>>, vector<1x33x32xf32>
    %1 = vector.shape_cast %0 : vector<1x33x32xf32> to vector<33x32xf32>
    %c0_2 = arith.constant 0 : index
    %c0_3 = arith.constant 0 : index
    %2 = vector.load %arg6[%c0_2, %c0_3] : memref<1x32xf32, #tpu.memory_space<vmem>>, vector<1x32xf32>
    %c0_4 = arith.constant 0 : index
    %c0_5 = arith.constant 0 : index
    %3 = vector.load %arg7[%c0_4, %c0_5] : memref<1x32xf32, #tpu.memory_space<vmem>>, vector<1x32xf32>
    %c0_6 = arith.constant 0 : index
    %c0_7 = arith.constant 0 : index
    %4 = vector.load %arg8[%c0_6, %c0_7] : memref<32x96xbf16, #tpu.memory_space<vmem>>, vector<32x96xbf16>
    %c0_8 = arith.constant 0 : index
    %c0_9 = arith.constant 0 : index
    %5 = vector.load %arg9[%c0_8, %c0_9] : memref<32x32xbf16, #tpu.memory_space<vmem>>, vector<32x32xbf16>
    %c0_10 = arith.constant 0 : index
    %c0_11 = arith.constant 0 : index
    %6 = vector.load %arg2[%c0_10, %c0_11] : memref<33x1xi32, #tpu.memory_space<vmem>>, vector<33x1xi32>
    %c0_12 = arith.constant 0 : index
    %c0_13 = arith.constant 0 : index
    %7 = vector.load %arg3[%c0_12, %c0_13] : memref<1x33xi32, #tpu.memory_space<vmem>>, vector<1x33xi32>
    %cst = arith.constant dense<0.000000e+00> : vector<33xf32>
    %8 = vector.multi_reduction <add>, %1, %cst [1] : vector<33x32xf32> to vector<33xf32>
    %9 = vector.shape_cast %8 : vector<33xf32> to vector<33x1xf32>
    %cst_14 = arith.constant 3.200000e+01 : f32
    %10 = vector.broadcast %cst_14 : f32 to vector<33x1xf32>
    %11 = arith.divf %9, %10 : vector<33x1xf32>
    %12 = vector.broadcast %11 : vector<33x1xf32> to vector<33x32xf32>
    %13 = arith.subf %1, %12 : vector<33x32xf32>
    %14 = arith.mulf %13, %13 : vector<33x32xf32>
    %cst_15 = arith.constant dense<0.000000e+00> : vector<33xf32>
    %15 = vector.multi_reduction <add>, %14, %cst_15 [1] : vector<33x32xf32> to vector<33xf32>
    %16 = vector.shape_cast %15 : vector<33xf32> to vector<33x1xf32>
    %cst_16 = arith.constant 3.200000e+01 : f32
    %17 = vector.broadcast %cst_16 : f32 to vector<33x1xf32>
    %18 = arith.divf %16, %17 : vector<33x1xf32>
    %19 = vector.broadcast %11 : vector<33x1xf32> to vector<33x32xf32>
    %20 = arith.subf %1, %19 : vector<33x32xf32>
    %cst_17 = arith.constant 9.99999974E-6 : f32
    %21 = vector.broadcast %cst_17 : f32 to vector<33x1xf32>
    %22 = arith.addf %18, %21 : vector<33x1xf32>
    %23 = math.rsqrt %22 : vector<33x1xf32>
    %24 = vector.broadcast %23 : vector<33x1xf32> to vector<33x32xf32>
    %25 = arith.mulf %20, %24 : vector<33x32xf32>
    %26 = vector.broadcast %2 : vector<1x32xf32> to vector<33x32xf32>
    %27 = arith.mulf %25, %26 : vector<33x32xf32>
    %28 = vector.broadcast %3 : vector<1x32xf32> to vector<33x32xf32>
    %29 = arith.addf %27, %28 : vector<33x32xf32>
    %30 = arith.truncf %29 : vector<33x32xf32> to vector<33x32xbf16>
    %cst_18 = arith.constant dense<0.000000e+00> : vector<33x96xf32>
    %31 = tpu.matmul %30, %4, %cst_18 {dimension_numbers = #tpu.dot_dimension_numbers<[1], [0], [0], [1], [0, 0, 1, 1], [], []>} : vector<33x32xbf16>, vector<32x96xbf16>, vector<33x96xf32> -> vector<33x96xf32>
    %32 = vector.broadcast %6 : vector<33x1xi32> to vector<33x33xi32>
    %33 = vector.broadcast %7 : vector<1x33xi32> to vector<33x33xi32>
    %34 = arith.cmpi eq, %32, %33 : vector<33x33xi32>
    %c0_i32 = arith.constant 0 : i32
    %35 = vector.broadcast %c0_i32 : i32 to vector<33x1xi32>
    %36 = arith.cmpi slt, %6, %35 : vector<33x1xi32>
    %37 = vector.broadcast %36 : vector<33x1xi1> to vector<33x33xi1>
    %38 = arith.ori %34, %37 : vector<33x33xi1>
    %c0_i32_19 = arith.constant 0 : i32
    %39 = vector.broadcast %c0_i32_19 : i32 to vector<1x33xi32>
    %40 = arith.cmpi slt, %7, %39 : vector<1x33xi32>
    %41 = vector.broadcast %40 : vector<1x33xi1> to vector<33x33xi1>
    %42 = arith.ori %38, %41 : vector<33x33xi1>
    %43 = vector.extract_strided_slice %31 {offsets = [0, 0], sizes = [33, 8], strides = [1, 1]} : vector<33x96xf32> to vector<33x8xf32>
    %44 = arith.truncf %43 : vector<33x8xf32> to vector<33x8xbf16>
    %45 = vector.extract_strided_slice %31 {offsets = [0, 32], sizes = [33, 8], strides = [1, 1]} : vector<33x96xf32> to vector<33x8xf32>
    %46 = arith.truncf %45 : vector<33x8xf32> to vector<33x8xbf16>
    %47 = vector.extract_strided_slice %31 {offsets = [0, 64], sizes = [33, 8], strides = [1, 1]} : vector<33x96xf32> to vector<33x8xf32>
    %48 = arith.truncf %47 : vector<33x8xf32> to vector<33x8xbf16>
    %cst_20 = arith.constant dense<0.000000e+00> : vector<33x33xf32>
    %49 = tpu.matmul %44, %46, %cst_20 {dimension_numbers = #tpu.dot_dimension_numbers<[1], [1], [0], [0], [0, 0, 1, 0], [], []>} : vector<33x8xbf16>, vector<33x8xbf16>, vector<33x33xf32> -> vector<33x33xf32>
    %cst_21 = arith.constant -1.000000e+30 : f32
    %50 = vector.broadcast %cst_21 : f32 to vector<33x33xf32>
    %51 = arith.select %42, %49, %50 : vector<33x33xi1>, vector<33x33xf32>
    %cst_22 = arith.constant dense<0xFF800000> : vector<33xf32>
    %52 = vector.multi_reduction <maximumf>, %51, %cst_22 [1] : vector<33x33xf32> to vector<33xf32>
    %53 = vector.shape_cast %52 : vector<33xf32> to vector<33x1xf32>
    %54 = vector.broadcast %53 : vector<33x1xf32> to vector<33x33xf32>
    %55 = arith.subf %51, %54 : vector<33x33xf32>
    %56 = math.exp %55 : vector<33x33xf32>
    %cst_23 = arith.constant dense<0.000000e+00> : vector<33xf32>
    %57 = vector.multi_reduction <add>, %56, %cst_23 [1] : vector<33x33xf32> to vector<33xf32>
    %58 = vector.shape_cast %57 : vector<33xf32> to vector<33x1xf32>
    %59 = tpu.reciprocal %58 {approx = true} : vector<33x1xf32> -> vector<33x1xf32>
    %60 = vector.broadcast %59 : vector<33x1xf32> to vector<33x33xf32>
    %61 = arith.mulf %56, %60 : vector<33x33xf32>
    %62 = arith.truncf %61 : vector<33x33xf32> to vector<33x33xbf16>
    %cst_24 = arith.constant dense<0.000000e+00> : vector<33x8xf32>
    %63 = tpu.matmul %62, %48, %cst_24 {dimension_numbers = #tpu.dot_dimension_numbers<[1], [0], [0], [1], [0, 0, 1, 1], [], []>} : vector<33x33xbf16>, vector<33x8xbf16>, vector<33x8xf32> -> vector<33x8xf32>
    %c0_25 = arith.constant 0 : index
    %c0_26 = arith.constant 0 : index
    %64 = vector.load %arg21[%c0_25, %c0_26] : memref<33x32xf32, #tpu.memory_space<vmem>>, vector<33x8xf32>
    tpu.vector_store %arg21[%c0_25, %c0_26], %63 {strides = array<i32>} : memref<33x32xf32, #tpu.memory_space<vmem>>, vector<33x8xf32>,
    %65 = vector.extract_strided_slice %31 {offsets = [0, 8], sizes = [33, 8], strides = [1, 1]} : vector<33x96xf32> to vector<33x8xf32>
    %66 = arith.truncf %65 : vector<33x8xf32> to vector<33x8xbf16>
    %67 = vector.extract_strided_slice %31 {offsets = [0, 40], sizes = [33, 8], strides = [1, 1]} : vector<33x96xf32> to vector<33x8xf32>
    %68 = arith.truncf %67 : vector<33x8xf32> to vector<33x8xbf16>
    %69 = vector.extract_strided_slice %31 {offsets = [0, 72], sizes = [33, 8], strides = [1, 1]} : vector<33x96xf32> to vector<33x8xf32>
    %70 = arith.truncf %69 : vector<33x8xf32> to vector<33x8xbf16>
    %cst_27 = arith.constant dense<0.000000e+00> : vector<33x33xf32>
    %71 = tpu.matmul %66, %68, %cst_27 {dimension_numbers = #tpu.dot_dimension_numbers<[1], [1], [0], [0], [0, 0, 1, 0], [], []>} : vector<33x8xbf16>, vector<33x8xbf16>, vector<33x33xf32> -> vector<33x33xf32>
    %cst_28 = arith.constant -1.000000e+30 : f32
    %72 = vector.broadcast %cst_28 : f32 to vector<33x33xf32>
    %73 = arith.select %42, %71, %72 : vector<33x33xi1>, vector<33x33xf32>
    %cst_29 = arith.constant dense<0xFF800000> : vector<33xf32>
    %74 = vector.multi_reduction <maximumf>, %73, %cst_29 [1] : vector<33x33xf32> to vector<33xf32>
    %75 = vector.shape_cast %74 : vector<33xf32> to vector<33x1xf32>
    %76 = vector.broadcast %75 : vector<33x1xf32> to vector<33x33xf32>
    %77 = arith.subf %73, %76 : vector<33x33xf32>
    %78 = math.exp %77 : vector<33x33xf32>
    %cst_30 = arith.constant dense<0.000000e+00> : vector<33xf32>
    %79 = vector.multi_reduction <add>, %78, %cst_30 [1] : vector<33x33xf32> to vector<33xf32>
    %80 = vector.shape_cast %79 : vector<33xf32> to vector<33x1xf32>
    %81 = tpu.reciprocal %80 {approx = true} : vector<33x1xf32> -> vector<33x1xf32>
    %82 = vector.broadcast %81 : vector<33x1xf32> to vector<33x33xf32>
    %83 = arith.mulf %78, %82 : vector<33x33xf32>
    %84 = arith.truncf %83 : vector<33x33xf32> to vector<33x33xbf16>
    %cst_31 = arith.constant dense<0.000000e+00> : vector<33x8xf32>
    %85 = tpu.matmul %84, %70, %cst_31 {dimension_numbers = #tpu.dot_dimension_numbers<[1], [0], [0], [1], [0, 0, 1, 1], [], []>} : vector<33x33xbf16>, vector<33x8xbf16>, vector<33x8xf32> -> vector<33x8xf32>
    %c0_32 = arith.constant 0 : index
    %c8 = arith.constant 8 : index
    %86 = vector.load %arg21[%c0_32, %c8] : memref<33x32xf32, #tpu.memory_space<vmem>>, vector<33x8xf32>
    tpu.vector_store %arg21[%c0_32, %c8], %85 {strides = array<i32>} : memref<33x32xf32, #tpu.memory_space<vmem>>, vector<33x8xf32>,
    %87 = vector.extract_strided_slice %31 {offsets = [0, 16], sizes = [33, 8], strides = [1, 1]} : vector<33x96xf32> to vector<33x8xf32>
    %88 = arith.truncf %87 : vector<33x8xf32> to vector<33x8xbf16>
    %89 = vector.extract_strided_slice %31 {offsets = [0, 48], sizes = [33, 8], strides = [1, 1]} : vector<33x96xf32> to vector<33x8xf32>
    %90 = arith.truncf %89 : vector<33x8xf32> to vector<33x8xbf16>
    %91 = vector.extract_strided_slice %31 {offsets = [0, 80], sizes = [33, 8], strides = [1, 1]} : vector<33x96xf32> to vector<33x8xf32>
    %92 = arith.truncf %91 : vector<33x8xf32> to vector<33x8xbf16>
    %cst_33 = arith.constant dense<0.000000e+00> : vector<33x33xf32>
    %93 = tpu.matmul %88, %90, %cst_33 {dimension_numbers = #tpu.dot_dimension_numbers<[1], [1], [0], [0], [0, 0, 1, 0], [], []>} : vector<33x8xbf16>, vector<33x8xbf16>, vector<33x33xf32> -> vector<33x33xf32>
    %cst_34 = arith.constant -1.000000e+30 : f32
    %94 = vector.broadcast %cst_34 : f32 to vector<33x33xf32>
    %95 = arith.select %42, %93, %94 : vector<33x33xi1>, vector<33x33xf32>
    %cst_35 = arith.constant dense<0xFF800000> : vector<33xf32>
    %96 = vector.multi_reduction <maximumf>, %95, %cst_35 [1] : vector<33x33xf32> to vector<33xf32>
    %97 = vector.shape_cast %96 : vector<33xf32> to vector<33x1xf32>
    %98 = vector.broadcast %97 : vector<33x1xf32> to vector<33x33xf32>
    %99 = arith.subf %95, %98 : vector<33x33xf32>
    %100 = math.exp %99 : vector<33x33xf32>
    %cst_36 = arith.constant dense<0.000000e+00> : vector<33xf32>
    %101 = vector.multi_reduction <add>, %100, %cst_36 [1] : vector<33x33xf32> to vector<33xf32>
    %102 = vector.shape_cast %101 : vector<33xf32> to vector<33x1xf32>
    %103 = tpu.reciprocal %102 {approx = true} : vector<33x1xf32> -> vector<33x1xf32>
    %104 = vector.broadcast %103 : vector<33x1xf32> to vector<33x33xf32>
    %105 = arith.mulf %100, %104 : vector<33x33xf32>
    %106 = arith.truncf %105 : vector<33x33xf32> to vector<33x33xbf16>
    %cst_37 = arith.constant dense<0.000000e+00> : vector<33x8xf32>
    %107 = tpu.matmul %106, %92, %cst_37 {dimension_numbers = #tpu.dot_dimension_numbers<[1], [0], [0], [1], [0, 0, 1, 1], [], []>} : vector<33x33xbf16>, vector<33x8xbf16>, vector<33x8xf32> -> vector<33x8xf32>
    %c0_38 = arith.constant 0 : index
    %c16 = arith.constant 16 : index
    %108 = vector.load %arg21[%c0_38, %c16] : memref<33x32xf32, #tpu.memory_space<vmem>>, vector<33x8xf32>
    tpu.vector_store %arg21[%c0_38, %c16], %107 {strides = array<i32>} : memref<33x32xf32, #tpu.memory_space<vmem>>, vector<33x8xf32>,
    %109 = vector.extract_strided_slice %31 {offsets = [0, 24], sizes = [33, 8], strides = [1, 1]} : vector<33x96xf32> to vector<33x8xf32>
    %110 = arith.truncf %109 : vector<33x8xf32> to vector<33x8xbf16>
    %111 = vector.extract_strided_slice %31 {offsets = [0, 56], sizes = [33, 8], strides = [1, 1]} : vector<33x96xf32> to vector<33x8xf32>
    %112 = arith.truncf %111 : vector<33x8xf32> to vector<33x8xbf16>
    %113 = vector.extract_strided_slice %31 {offsets = [0, 88], sizes = [33, 8], strides = [1, 1]} : vector<33x96xf32> to vector<33x8xf32>
    %114 = arith.truncf %113 : vector<33x8xf32> to vector<33x8xbf16>
    %cst_39 = arith.constant dense<0.000000e+00> : vector<33x33xf32>
    %115 = tpu.matmul %110, %112, %cst_39 {dimension_numbers = #tpu.dot_dimension_numbers<[1], [1], [0], [0], [0, 0, 1, 0], [], []>} : vector<33x8xbf16>, vector<33x8xbf16>, vector<33x33xf32> -> vector<33x33xf32>
    %cst_40 = arith.constant -1.000000e+30 : f32
    %116 = vector.broadcast %cst_40 : f32 to vector<33x33xf32>
    %117 = arith.select %42, %115, %116 : vector<33x33xi1>, vector<33x33xf32>
    %cst_41 = arith.constant dense<0xFF800000> : vector<33xf32>
    %118 = vector.multi_reduction <maximumf>, %117, %cst_41 [1] : vector<33x33xf32> to vector<33xf32>
    %119 = vector.shape_cast %118 : vector<33xf32> to vector<33x1xf32>
    %120 = vector.broadcast %119 : vector<33x1xf32> to vector<33x33xf32>
    %121 = arith.subf %117, %120 : vector<33x33xf32>
    %122 = math.exp %121 : vector<33x33xf32>
    %cst_42 = arith.constant dense<0.000000e+00> : vector<33xf32>
    %123 = vector.multi_reduction <add>, %122, %cst_42 [1] : vector<33x33xf32> to vector<33xf32>
    %124 = vector.shape_cast %123 : vector<33xf32> to vector<33x1xf32>
    %125 = tpu.reciprocal %124 {approx = true} : vector<33x1xf32> -> vector<33x1xf32>
    %126 = vector.broadcast %125 : vector<33x1xf32> to vector<33x33xf32>
    %127 = arith.mulf %122, %126 : vector<33x33xf32>
    %128 = arith.truncf %127 : vector<33x33xf32> to vector<33x33xbf16>
    %cst_43 = arith.constant dense<0.000000e+00> : vector<33x8xf32>
    %129 = tpu.matmul %128, %114, %cst_43 {dimension_numbers = #tpu.dot_dimension_numbers<[1], [0], [0], [1], [0, 0, 1, 1], [], []>} : vector<33x33xbf16>, vector<33x8xbf16>, vector<33x8xf32> -> vector<33x8xf32>
    %c0_44 = arith.constant 0 : index
    %c24 = arith.constant 24 : index
    %130 = vector.load %arg21[%c0_44, %c24] : memref<33x32xf32, #tpu.memory_space<vmem>>, vector<33x8xf32>
    tpu.vector_store %arg21[%c0_44, %c24], %129 {strides = array<i32>} : memref<33x32xf32, #tpu.memory_space<vmem>>, vector<33x8xf32>,
    %c0_45 = arith.constant 0 : index
    %c0_46 = arith.constant 0 : index
    %131 = vector.load %arg21[%c0_45, %c0_46] : memref<33x32xf32, #tpu.memory_space<vmem>>, vector<33x32xf32>
    %132 = arith.truncf %131 : vector<33x32xf32> to vector<33x32xbf16>
    %cst_47 = arith.constant dense<0.000000e+00> : vector<33x32xf32>
    %133 = tpu.matmul %132, %5, %cst_47 {dimension_numbers = #tpu.dot_dimension_numbers<[1], [0], [0], [1], [0, 0, 1, 1], [], []>} : vector<33x32xbf16>, vector<32x32xbf16>, vector<33x32xf32> -> vector<33x32xf32>
    %134 = arith.addf %1, %133 : vector<33x32xf32>
    %c0_48 = arith.constant 0 : index
    %c0_49 = arith.constant 0 : index
    %135 = vector.load %arg10[%c0_48, %c0_49] : memref<1x32xf32, #tpu.memory_space<vmem>>, vector<1x32xf32>
    %c0_50 = arith.constant 0 : index
    %c0_51 = arith.constant 0 : index
    %136 = vector.load %arg11[%c0_50, %c0_51] : memref<1x32xf32, #tpu.memory_space<vmem>>, vector<1x32xf32>
    %c0_52 = arith.constant 0 : index
    %c0_53 = arith.constant 0 : index
    %137 = vector.load %arg12[%c0_52, %c0_53] : memref<32x96xbf16, #tpu.memory_space<vmem>>, vector<32x96xbf16>
    %c0_54 = arith.constant 0 : index
    %c0_55 = arith.constant 0 : index
    %138 = vector.load %arg13[%c0_54, %c0_55] : memref<32x32xbf16, #tpu.memory_space<vmem>>, vector<32x32xbf16>
    %c0_56 = arith.constant 0 : index
    %c0_57 = arith.constant 0 : index
    %139 = vector.load %arg4[%c0_56, %c0_57] : memref<33x1xi32, #tpu.memory_space<vmem>>, vector<33x1xi32>
    %c0_58 = arith.constant 0 : index
    %c0_59 = arith.constant 0 : index
    %140 = vector.load %arg5[%c0_58, %c0_59] : memref<1x33xi32, #tpu.memory_space<vmem>>, vector<1x33xi32>
    %cst_60 = arith.constant dense<0.000000e+00> : vector<33xf32>
    %141 = vector.multi_reduction <add>, %134, %cst_60 [1] : vector<33x32xf32> to vector<33xf32>
    %142 = vector.shape_cast %141 : vector<33xf32> to vector<33x1xf32>
    %cst_61 = arith.constant 3.200000e+01 : f32
    %143 = vector.broadcast %cst_61 : f32 to vector<33x1xf32>
    %144 = arith.divf %142, %143 : vector<33x1xf32>
    %145 = vector.broadcast %144 : vector<33x1xf32> to vector<33x32xf32>
    %146 = arith.subf %134, %145 : vector<33x32xf32>
    %147 = arith.mulf %146, %146 : vector<33x32xf32>
    %cst_62 = arith.constant dense<0.000000e+00> : vector<33xf32>
    %148 = vector.multi_reduction <add>, %147, %cst_62 [1] : vector<33x32xf32> to vector<33xf32>
    %149 = vector.shape_cast %148 : vector<33xf32> to vector<33x1xf32>
    %cst_63 = arith.constant 3.200000e+01 : f32
    %150 = vector.broadcast %cst_63 : f32 to vector<33x1xf32>
    %151 = arith.divf %149, %150 : vector<33x1xf32>
    %152 = vector.broadcast %144 : vector<33x1xf32> to vector<33x32xf32>
    %153 = arith.subf %134, %152 : vector<33x32xf32>
    %cst_64 = arith.constant 9.99999974E-6 : f32
    %154 = vector.broadcast %cst_64 : f32 to vector<33x1xf32>
    %155 = arith.addf %151, %154 : vector<33x1xf32>
    %156 = math.rsqrt %155 : vector<33x1xf32>
    %157 = vector.broadcast %156 : vector<33x1xf32> to vector<33x32xf32>
    %158 = arith.mulf %153, %157 : vector<33x32xf32>
    %159 = vector.broadcast %135 : vector<1x32xf32> to vector<33x32xf32>
    %160 = arith.mulf %158, %159 : vector<33x32xf32>
    %161 = vector.broadcast %136 : vector<1x32xf32> to vector<33x32xf32>
    %162 = arith.addf %160, %161 : vector<33x32xf32>
    %163 = arith.truncf %162 : vector<33x32xf32> to vector<33x32xbf16>
    %cst_65 = arith.constant dense<0.000000e+00> : vector<33x96xf32>
    %164 = tpu.matmul %163, %137, %cst_65 {dimension_numbers = #tpu.dot_dimension_numbers<[1], [0], [0], [1], [0, 0, 1, 1], [], []>} : vector<33x32xbf16>, vector<32x96xbf16>, vector<33x96xf32> -> vector<33x96xf32>
    %165 = vector.broadcast %139 : vector<33x1xi32> to vector<33x33xi32>
    %166 = vector.broadcast %140 : vector<1x33xi32> to vector<33x33xi32>
    %167 = arith.cmpi eq, %165, %166 : vector<33x33xi32>
    %c0_i32_66 = arith.constant 0 : i32
    %168 = vector.broadcast %c0_i32_66 : i32 to vector<33x1xi32>
    %169 = arith.cmpi slt, %139, %168 : vector<33x1xi32>
    %170 = vector.broadcast %169 : vector<33x1xi1> to vector<33x33xi1>
    %171 = arith.ori %167, %170 : vector<33x33xi1>
    %c0_i32_67 = arith.constant 0 : i32
    %172 = vector.broadcast %c0_i32_67 : i32 to vector<1x33xi32>
    %173 = arith.cmpi slt, %140, %172 : vector<1x33xi32>
    %174 = vector.broadcast %173 : vector<1x33xi1> to vector<33x33xi1>
    %175 = arith.ori %171, %174 : vector<33x33xi1>
    %176 = vector.extract_strided_slice %164 {offsets = [0, 0], sizes = [33, 8], strides = [1, 1]} : vector<33x96xf32> to vector<33x8xf32>
    %177 = arith.truncf %176 : vector<33x8xf32> to vector<33x8xbf16>
    %178 = vector.extract_strided_slice %164 {offsets = [0, 32], sizes = [33, 8], strides = [1, 1]} : vector<33x96xf32> to vector<33x8xf32>
    %179 = arith.truncf %178 : vector<33x8xf32> to vector<33x8xbf16>
    %180 = vector.extract_strided_slice %164 {offsets = [0, 64], sizes = [33, 8], strides = [1, 1]} : vector<33x96xf32> to vector<33x8xf32>
    %181 = arith.truncf %180 : vector<33x8xf32> to vector<33x8xbf16>
    %cst_68 = arith.constant dense<0.000000e+00> : vector<33x33xf32>
    %182 = tpu.matmul %177, %179, %cst_68 {dimension_numbers = #tpu.dot_dimension_numbers<[1], [1], [0], [0], [0, 0, 1, 0], [], []>} : vector<33x8xbf16>, vector<33x8xbf16>, vector<33x33xf32> -> vector<33x33xf32>
    %cst_69 = arith.constant -1.000000e+30 : f32
    %183 = vector.broadcast %cst_69 : f32 to vector<33x33xf32>
    %184 = arith.select %175, %182, %183 : vector<33x33xi1>, vector<33x33xf32>
    %cst_70 = arith.constant dense<0xFF800000> : vector<33xf32>
    %185 = vector.multi_reduction <maximumf>, %184, %cst_70 [1] : vector<33x33xf32> to vector<33xf32>
    %186 = vector.shape_cast %185 : vector<33xf32> to vector<33x1xf32>
    %187 = vector.broadcast %186 : vector<33x1xf32> to vector<33x33xf32>
    %188 = arith.subf %184, %187 : vector<33x33xf32>
    %189 = math.exp %188 : vector<33x33xf32>
    %cst_71 = arith.constant dense<0.000000e+00> : vector<33xf32>
    %190 = vector.multi_reduction <add>, %189, %cst_71 [1] : vector<33x33xf32> to vector<33xf32>
    %191 = vector.shape_cast %190 : vector<33xf32> to vector<33x1xf32>
    %192 = tpu.reciprocal %191 {approx = true} : vector<33x1xf32> -> vector<33x1xf32>
    %193 = vector.broadcast %192 : vector<33x1xf32> to vector<33x33xf32>
    %194 = arith.mulf %189, %193 : vector<33x33xf32>
    %195 = arith.truncf %194 : vector<33x33xf32> to vector<33x33xbf16>
    %cst_72 = arith.constant dense<0.000000e+00> : vector<33x8xf32>
    %196 = tpu.matmul %195, %181, %cst_72 {dimension_numbers = #tpu.dot_dimension_numbers<[1], [0], [0], [1], [0, 0, 1, 1], [], []>} : vector<33x33xbf16>, vector<33x8xbf16>, vector<33x8xf32> -> vector<33x8xf32>
    %c0_73 = arith.constant 0 : index
    %c0_74 = arith.constant 0 : index
    %197 = vector.load %arg21[%c0_73, %c0_74] : memref<33x32xf32, #tpu.memory_space<vmem>>, vector<33x8xf32>
    tpu.vector_store %arg21[%c0_73, %c0_74], %196 {strides = array<i32>} : memref<33x32xf32, #tpu.memory_space<vmem>>, vector<33x8xf32>,
    %198 = vector.extract_strided_slice %164 {offsets = [0, 8], sizes = [33, 8], strides = [1, 1]} : vector<33x96xf32> to vector<33x8xf32>
    %199 = arith.truncf %198 : vector<33x8xf32> to vector<33x8xbf16>
    %200 = vector.extract_strided_slice %164 {offsets = [0, 40], sizes = [33, 8], strides = [1, 1]} : vector<33x96xf32> to vector<33x8xf32>
    %201 = arith.truncf %200 : vector<33x8xf32> to vector<33x8xbf16>
    %202 = vector.extract_strided_slice %164 {offsets = [0, 72], sizes = [33, 8], strides = [1, 1]} : vector<33x96xf32> to vector<33x8xf32>
    %203 = arith.truncf %202 : vector<33x8xf32> to vector<33x8xbf16>
    %cst_75 = arith.constant dense<0.000000e+00> : vector<33x33xf32>
    %204 = tpu.matmul %199, %201, %cst_75 {dimension_numbers = #tpu.dot_dimension_numbers<[1], [1], [0], [0], [0, 0, 1, 0], [], []>} : vector<33x8xbf16>, vector<33x8xbf16>, vector<33x33xf32> -> vector<33x33xf32>
    %cst_76 = arith.constant -1.000000e+30 : f32
    %205 = vector.broadcast %cst_76 : f32 to vector<33x33xf32>
    %206 = arith.select %175, %204, %205 : vector<33x33xi1>, vector<33x33xf32>
    %cst_77 = arith.constant dense<0xFF800000> : vector<33xf32>
    %207 = vector.multi_reduction <maximumf>, %206, %cst_77 [1] : vector<33x33xf32> to vector<33xf32>
    %208 = vector.shape_cast %207 : vector<33xf32> to vector<33x1xf32>
    %209 = vector.broadcast %208 : vector<33x1xf32> to vector<33x33xf32>
    %210 = arith.subf %206, %209 : vector<33x33xf32>
    %211 = math.exp %210 : vector<33x33xf32>
    %cst_78 = arith.constant dense<0.000000e+00> : vector<33xf32>
    %212 = vector.multi_reduction <add>, %211, %cst_78 [1] : vector<33x33xf32> to vector<33xf32>
    %213 = vector.shape_cast %212 : vector<33xf32> to vector<33x1xf32>
    %214 = tpu.reciprocal %213 {approx = true} : vector<33x1xf32> -> vector<33x1xf32>
    %215 = vector.broadcast %214 : vector<33x1xf32> to vector<33x33xf32>
    %216 = arith.mulf %211, %215 : vector<33x33xf32>
    %217 = arith.truncf %216 : vector<33x33xf32> to vector<33x33xbf16>
    %cst_79 = arith.constant dense<0.000000e+00> : vector<33x8xf32>
    %218 = tpu.matmul %217, %203, %cst_79 {dimension_numbers = #tpu.dot_dimension_numbers<[1], [0], [0], [1], [0, 0, 1, 1], [], []>} : vector<33x33xbf16>, vector<33x8xbf16>, vector<33x8xf32> -> vector<33x8xf32>
    %c0_80 = arith.constant 0 : index
    %c8_81 = arith.constant 8 : index
    %219 = vector.load %arg21[%c0_80, %c8_81] : memref<33x32xf32, #tpu.memory_space<vmem>>, vector<33x8xf32>
    tpu.vector_store %arg21[%c0_80, %c8_81], %218 {strides = array<i32>} : memref<33x32xf32, #tpu.memory_space<vmem>>, vector<33x8xf32>,
    %220 = vector.extract_strided_slice %164 {offsets = [0, 16], sizes = [33, 8], strides = [1, 1]} : vector<33x96xf32> to vector<33x8xf32>
    %221 = arith.truncf %220 : vector<33x8xf32> to vector<33x8xbf16>
    %222 = vector.extract_strided_slice %164 {offsets = [0, 48], sizes = [33, 8], strides = [1, 1]} : vector<33x96xf32> to vector<33x8xf32>
    %223 = arith.truncf %222 : vector<33x8xf32> to vector<33x8xbf16>
    %224 = vector.extract_strided_slice %164 {offsets = [0, 80], sizes = [33, 8], strides = [1, 1]} : vector<33x96xf32> to vector<33x8xf32>
    %225 = arith.truncf %224 : vector<33x8xf32> to vector<33x8xbf16>
    %cst_82 = arith.constant dense<0.000000e+00> : vector<33x33xf32>
    %226 = tpu.matmul %221, %223, %cst_82 {dimension_numbers = #tpu.dot_dimension_numbers<[1], [1], [0], [0], [0, 0, 1, 0], [], []>} : vector<33x8xbf16>, vector<33x8xbf16>, vector<33x33xf32> -> vector<33x33xf32>
    %cst_83 = arith.constant -1.000000e+30 : f32
    %227 = vector.broadcast %cst_83 : f32 to vector<33x33xf32>
    %228 = arith.select %175, %226, %227 : vector<33x33xi1>, vector<33x33xf32>
    %cst_84 = arith.constant dense<0xFF800000> : vector<33xf32>
    %229 = vector.multi_reduction <maximumf>, %228, %cst_84 [1] : vector<33x33xf32> to vector<33xf32>
    %230 = vector.shape_cast %229 : vector<33xf32> to vector<33x1xf32>
    %231 = vector.broadcast %230 : vector<33x1xf32> to vector<33x33xf32>
    %232 = arith.subf %228, %231 : vector<33x33xf32>
    %233 = math.exp %232 : vector<33x33xf32>
    %cst_85 = arith.constant dense<0.000000e+00> : vector<33xf32>
    %234 = vector.multi_reduction <add>, %233, %cst_85 [1] : vector<33x33xf32> to vector<33xf32>
    %235 = vector.shape_cast %234 : vector<33xf32> to vector<33x1xf32>
    %236 = tpu.reciprocal %235 {approx = true} : vector<33x1xf32> -> vector<33x1xf32>
    %237 = vector.broadcast %236 : vector<33x1xf32> to vector<33x33xf32>
    %238 = arith.mulf %233, %237 : vector<33x33xf32>
    %239 = arith.truncf %238 : vector<33x33xf32> to vector<33x33xbf16>
    %cst_86 = arith.constant dense<0.000000e+00> : vector<33x8xf32>
    %240 = tpu.matmul %239, %225, %cst_86 {dimension_numbers = #tpu.dot_dimension_numbers<[1], [0], [0], [1], [0, 0, 1, 1], [], []>} : vector<33x33xbf16>, vector<33x8xbf16>, vector<33x8xf32> -> vector<33x8xf32>
    %c0_87 = arith.constant 0 : index
    %c16_88 = arith.constant 16 : index
    %241 = vector.load %arg21[%c0_87, %c16_88] : memref<33x32xf32, #tpu.memory_space<vmem>>, vector<33x8xf32>
    tpu.vector_store %arg21[%c0_87, %c16_88], %240 {strides = array<i32>} : memref<33x32xf32, #tpu.memory_space<vmem>>, vector<33x8xf32>,
    %242 = vector.extract_strided_slice %164 {offsets = [0, 24], sizes = [33, 8], strides = [1, 1]} : vector<33x96xf32> to vector<33x8xf32>
    %243 = arith.truncf %242 : vector<33x8xf32> to vector<33x8xbf16>
    %244 = vector.extract_strided_slice %164 {offsets = [0, 56], sizes = [33, 8], strides = [1, 1]} : vector<33x96xf32> to vector<33x8xf32>
    %245 = arith.truncf %244 : vector<33x8xf32> to vector<33x8xbf16>
    %246 = vector.extract_strided_slice %164 {offsets = [0, 88], sizes = [33, 8], strides = [1, 1]} : vector<33x96xf32> to vector<33x8xf32>
    %247 = arith.truncf %246 : vector<33x8xf32> to vector<33x8xbf16>
    %cst_89 = arith.constant dense<0.000000e+00> : vector<33x33xf32>
    %248 = tpu.matmul %243, %245, %cst_89 {dimension_numbers = #tpu.dot_dimension_numbers<[1], [1], [0], [0], [0, 0, 1, 0], [], []>} : vector<33x8xbf16>, vector<33x8xbf16>, vector<33x33xf32> -> vector<33x33xf32>
    %cst_90 = arith.constant -1.000000e+30 : f32
    %249 = vector.broadcast %cst_90 : f32 to vector<33x33xf32>
    %250 = arith.select %175, %248, %249 : vector<33x33xi1>, vector<33x33xf32>
    %cst_91 = arith.constant dense<0xFF800000> : vector<33xf32>
    %251 = vector.multi_reduction <maximumf>, %250, %cst_91 [1] : vector<33x33xf32> to vector<33xf32>
    %252 = vector.shape_cast %251 : vector<33xf32> to vector<33x1xf32>
    %253 = vector.broadcast %252 : vector<33x1xf32> to vector<33x33xf32>
    %254 = arith.subf %250, %253 : vector<33x33xf32>
    %255 = math.exp %254 : vector<33x33xf32>
    %cst_92 = arith.constant dense<0.000000e+00> : vector<33xf32>
    %256 = vector.multi_reduction <add>, %255, %cst_92 [1] : vector<33x33xf32> to vector<33xf32>
    %257 = vector.shape_cast %256 : vector<33xf32> to vector<33x1xf32>
    %258 = tpu.reciprocal %257 {approx = true} : vector<33x1xf32> -> vector<33x1xf32>
    %259 = vector.broadcast %258 : vector<33x1xf32> to vector<33x33xf32>
    %260 = arith.mulf %255, %259 : vector<33x33xf32>
    %261 = arith.truncf %260 : vector<33x33xf32> to vector<33x33xbf16>
    %cst_93 = arith.constant dense<0.000000e+00> : vector<33x8xf32>
    %262 = tpu.matmul %261, %247, %cst_93 {dimension_numbers = #tpu.dot_dimension_numbers<[1], [0], [0], [1], [0, 0, 1, 1], [], []>} : vector<33x33xbf16>, vector<33x8xbf16>, vector<33x8xf32> -> vector<33x8xf32>
    %c0_94 = arith.constant 0 : index
    %c24_95 = arith.constant 24 : index
    %263 = vector.load %arg21[%c0_94, %c24_95] : memref<33x32xf32, #tpu.memory_space<vmem>>, vector<33x8xf32>
    tpu.vector_store %arg21[%c0_94, %c24_95], %262 {strides = array<i32>} : memref<33x32xf32, #tpu.memory_space<vmem>>, vector<33x8xf32>,
    %c0_96 = arith.constant 0 : index
    %c0_97 = arith.constant 0 : index
    %264 = vector.load %arg21[%c0_96, %c0_97] : memref<33x32xf32, #tpu.memory_space<vmem>>, vector<33x32xf32>
    %265 = arith.truncf %264 : vector<33x32xf32> to vector<33x32xbf16>
    %cst_98 = arith.constant dense<0.000000e+00> : vector<33x32xf32>
    %266 = tpu.matmul %265, %138, %cst_98 {dimension_numbers = #tpu.dot_dimension_numbers<[1], [0], [0], [1], [0, 0, 1, 1], [], []>} : vector<33x32xbf16>, vector<32x32xbf16>, vector<33x32xf32> -> vector<33x32xf32>
    %267 = arith.addf %134, %266 : vector<33x32xf32>
    %c0_99 = arith.constant 0 : index
    %c0_100 = arith.constant 0 : index
    %268 = vector.load %arg14[%c0_99, %c0_100] : memref<1x32xf32, #tpu.memory_space<vmem>>, vector<1x32xf32>
    %c0_101 = arith.constant 0 : index
    %c0_102 = arith.constant 0 : index
    %269 = vector.load %arg15[%c0_101, %c0_102] : memref<1x32xf32, #tpu.memory_space<vmem>>, vector<1x32xf32>
    %c0_103 = arith.constant 0 : index
    %c0_104 = arith.constant 0 : index
    %270 = vector.load %arg16[%c0_103, %c0_104] : memref<32x64xbf16, #tpu.memory_space<vmem>>, vector<32x64xbf16>
    %c0_105 = arith.constant 0 : index
    %c0_106 = arith.constant 0 : index
    %271 = vector.load %arg17[%c0_105, %c0_106] : memref<1x64xf32, #tpu.memory_space<vmem>>, vector<1x64xf32>
    %c0_107 = arith.constant 0 : index
    %c0_108 = arith.constant 0 : index
    %272 = vector.load %arg18[%c0_107, %c0_108] : memref<64x32xbf16, #tpu.memory_space<vmem>>, vector<64x32xbf16>
    %c0_109 = arith.constant 0 : index
    %c0_110 = arith.constant 0 : index
    %273 = vector.load %arg19[%c0_109, %c0_110] : memref<1x32xf32, #tpu.memory_space<vmem>>, vector<1x32xf32>
    %cst_111 = arith.constant dense<0.000000e+00> : vector<33xf32>
    %274 = vector.multi_reduction <add>, %267, %cst_111 [1] : vector<33x32xf32> to vector<33xf32>
    %275 = vector.shape_cast %274 : vector<33xf32> to vector<33x1xf32>
    %cst_112 = arith.constant 3.200000e+01 : f32
    %276 = vector.broadcast %cst_112 : f32 to vector<33x1xf32>
    %277 = arith.divf %275, %276 : vector<33x1xf32>
    %278 = vector.broadcast %277 : vector<33x1xf32> to vector<33x32xf32>
    %279 = arith.subf %267, %278 : vector<33x32xf32>
    %280 = arith.mulf %279, %279 : vector<33x32xf32>
    %cst_113 = arith.constant dense<0.000000e+00> : vector<33xf32>
    %281 = vector.multi_reduction <add>, %280, %cst_113 [1] : vector<33x32xf32> to vector<33xf32>
    %282 = vector.shape_cast %281 : vector<33xf32> to vector<33x1xf32>
    %cst_114 = arith.constant 3.200000e+01 : f32
    %283 = vector.broadcast %cst_114 : f32 to vector<33x1xf32>
    %284 = arith.divf %282, %283 : vector<33x1xf32>
    %285 = vector.broadcast %277 : vector<33x1xf32> to vector<33x32xf32>
    %286 = arith.subf %267, %285 : vector<33x32xf32>
    %cst_115 = arith.constant 9.99999974E-6 : f32
    %287 = vector.broadcast %cst_115 : f32 to vector<33x1xf32>
    %288 = arith.addf %284, %287 : vector<33x1xf32>
    %289 = math.rsqrt %288 : vector<33x1xf32>
    %290 = vector.broadcast %289 : vector<33x1xf32> to vector<33x32xf32>
    %291 = arith.mulf %286, %290 : vector<33x32xf32>
    %292 = vector.broadcast %268 : vector<1x32xf32> to vector<33x32xf32>
    %293 = arith.mulf %291, %292 : vector<33x32xf32>
    %294 = vector.broadcast %269 : vector<1x32xf32> to vector<33x32xf32>
    %295 = arith.addf %293, %294 : vector<33x32xf32>
    %296 = arith.truncf %295 : vector<33x32xf32> to vector<33x32xbf16>
    %cst_116 = arith.constant dense<0.000000e+00> : vector<33x64xf32>
    %297 = tpu.matmul %296, %270, %cst_116 {dimension_numbers = #tpu.dot_dimension_numbers<[1], [0], [0], [1], [0, 0, 1, 1], [], []>} : vector<33x32xbf16>, vector<32x64xbf16>, vector<33x64xf32> -> vector<33x64xf32>
    %298 = vector.broadcast %271 : vector<1x64xf32> to vector<33x64xf32>
    %299 = arith.addf %297, %298 : vector<33x64xf32>
    %cst_117 = arith.constant 5.000000e-01 : f32
    %300 = vector.broadcast %cst_117 : f32 to vector<33x64xf32>
    %301 = arith.mulf %300, %299 : vector<33x64xf32>
    %cst_118 = arith.constant 0.707106769 : f32
    %302 = vector.broadcast %cst_118 : f32 to vector<33x64xf32>
    %303 = arith.mulf %299, %302 : vector<33x64xf32>
    %304 = math.erf %303 : vector<33x64xf32>
    %cst_119 = arith.constant 1.000000e+00 : f32
    %305 = vector.broadcast %cst_119 : f32 to vector<33x64xf32>
    %306 = arith.addf %305, %304 : vector<33x64xf32>
    %307 = arith.mulf %301, %306 : vector<33x64xf32>
    %308 = arith.truncf %307 : vector<33x64xf32> to vector<33x64xbf16>
    %cst_120 = arith.constant dense<0.000000e+00> : vector<33x32xf32>
    %309 = tpu.matmul %308, %272, %cst_120 {dimension_numbers = #tpu.dot_dimension_numbers<[1], [0], [0], [1], [0, 0, 1, 1], [], []>} : vector<33x64xbf16>, vector<64x32xbf16>, vector<33x32xf32> -> vector<33x32xf32>
    %310 = vector.broadcast %273 : vector<1x32xf32> to vector<33x32xf32>
    %311 = arith.addf %309, %310 : vector<33x32xf32>
    %312 = arith.addf %311, %267 : vector<33x32xf32>
    %c0_121 = arith.constant 0 : index
    %c0_122 = arith.constant 0 : index
    %c0_123 = arith.constant 0 : index
    %313 = vector.load %arg20[%c0_121, %c0_122, %c0_123] : memref<1x33x32xf32, #tpu.memory_space<vmem>>, vector<1x33x32xf32>
    %314 = vector.shape_cast %313 : vector<1x33x32xf32> to vector<33x32xf32>
    %315 = vector.shape_cast %312 : vector<33x32xf32> to vector<1x33x32xf32>
    tpu.vector_store %arg20[%c0_121, %c0_122, %c0_123], %315 {strides = array<i32>} : memref<1x33x32xf32, #tpu.memory_space<vmem>>, vector<1x33x32xf32>,
    return
  }
  func.func @transform_0(%arg0: i32) -> (i32, i32, i32) {
    %c0_i32 = arith.constant 0 : i32
    %c0_i32_0 = arith.constant 0 : i32
    %c0_i32_1 = arith.constant 0 : i32
    return %arg0, %c0_i32, %c0_i32_0 : i32, i32, i32
  }
  func.func @transform_1(%arg0: i32) -> (i32, i32) {
    %c0_i32 = arith.constant 0 : i32
    %c0_i32_0 = arith.constant 0 : i32
    %c0_i32_1 = arith.constant 0 : i32
    return %c0_i32, %c0_i32_0 : i32, i32
  }
  func.func @transform_2(%arg0: i32) -> (i32, i32) {
    %c0_i32 = arith.constant 0 : i32
    %c0_i32_0 = arith.constant 0 : i32
    %c0_i32_1 = arith.constant 0 : i32
    return %c0_i32, %c0_i32_0 : i32, i32
  }
  func.func @transform_3(%arg0: i32) -> (i32, i32) {
    %c0_i32 = arith.constant 0 : i32
    %c0_i32_0 = arith.constant 0 : i32
    %c0_i32_1 = arith.constant 0 : i32
    return %c0_i32, %c0_i32_0 : i32, i32
  }
  func.func @transform_4(%arg0: i32) -> (i32, i32) {
    %c0_i32 = arith.constant 0 : i32
    %c0_i32_0 = arith.constant 0 : i32
    %c0_i32_1 = arith.constant 0 : i32
    return %c0_i32, %c0_i32_0 : i32, i32
  }
  func.func @transform_5(%arg0: i32) -> (i32, i32) {
    %c0_i32 = arith.constant 0 : i32
    %c0_i32_0 = arith.constant 0 : i32
    %c0_i32_1 = arith.constant 0 : i32
    return %c0_i32, %c0_i32_0 : i32, i32
  }
  func.func @transform_6(%arg0: i32) -> (i32, i32) {
    %c0_i32 = arith.constant 0 : i32
    %c0_i32_0 = arith.constant 0 : i32
    %c0_i32_1 = arith.constant 0 : i32
    return %c0_i32, %c0_i32_0 : i32, i32
  }
  func.func @transform_7(%arg0: i32) -> (i32, i32) {
    %c0_i32 = arith.constant 0 : i32
    %c0_i32_0 = arith.constant 0 : i32
    %c0_i32_1 = arith.constant 0 : i32
    return %c0_i32, %c0_i32_0 : i32, i32
  }
  func.func @transform_8(%arg0: i32) -> (i32, i32) {
    %c0_i32 = arith.constant 0 : i32
    %c0_i32_0 = arith.constant 0 : i32
    %c0_i32_1 = arith.constant 0 : i32
    return %c0_i32, %c0_i32_0 : i32, i32
  }
  func.func @transform_9(%arg0: i32) -> (i32, i32) {
    %c0_i32 = arith.constant 0 : i32
    %c0_i32_0 = arith.constant 0 : i32
    %c0_i32_1 = arith.constant 0 : i32
    return %c0_i32, %c0_i32_0 : i32, i32
  }
  func.func @transform_10(%arg0: i32) -> (i32, i32) {
    %c0_i32 = arith.constant 0 : i32
    %c0_i32_0 = arith.constant 0 : i32
    %c0_i32_1 = arith.constant 0 : i32
    return %c0_i32, %c0_i32_0 : i32, i32
  }
  func.func @transform_11(%arg0: i32) -> (i32, i32) {
    %c0_i32 = arith.constant 0 : i32
    %c0_i32_0 = arith.constant 0 : i32
    %c0_i32_1 = arith.constant 0 : i32
    return %c0_i32, %c0_i32_0 : i32, i32
  }
  func.func @transform_12(%arg0: i32) -> (i32, i32) {
    %c0_i32 = arith.constant 0 : i32
    %c0_i32_0 = arith.constant 0 : i32
    %c0_i32_1 = arith.constant 0 : i32
    return %c0_i32, %c0_i32_0 : i32, i32
  }
  func.func @transform_13(%arg0: i32) -> (i32, i32) {
    %c0_i32 = arith.constant 0 : i32
    %c0_i32_0 = arith.constant 0 : i32
    %c0_i32_1 = arith.constant 0 : i32
    return %c0_i32, %c0_i32_0 : i32, i32
  }
  func.func @transform_14(%arg0: i32) -> (i32, i32) {
    %c0_i32 = arith.constant 0 : i32
    %c0_i32_0 = arith.constant 0 : i32
    %c0_i32_1 = arith.constant 0 : i32
    return %c0_i32, %c0_i32_0 : i32, i32
  }
  func.func @transform_15(%arg0: i32) -> (i32, i32) {
    %c0_i32 = arith.constant 0 : i32
    %c0_i32_0 = arith.constant 0 : i32
    %c0_i32_1 = arith.constant 0 : i32
    return %c0_i32, %c0_i32_0 : i32, i32
  }
  func.func @transform_16(%arg0: i32) -> (i32, i32) {
    %c0_i32 = arith.constant 0 : i32
    %c0_i32_0 = arith.constant 0 : i32
    %c0_i32_1 = arith.constant 0 : i32
    return %c0_i32, %c0_i32_0 : i32, i32
  }
  func.func @transform_17(%arg0: i32) -> (i32, i32) {
    %c0_i32 = arith.constant 0 : i32
    %c0_i32_0 = arith.constant 0 : i32
    %c0_i32_1 = arith.constant 0 : i32
    return %c0_i32, %c0_i32_0 : i32, i32
  }
  func.func @transform_18(%arg0: i32) -> (i32, i32) {
    %c0_i32 = arith.constant 0 : i32
    %c0_i32_0 = arith.constant 0 : i32
    %c0_i32_1 = arith.constant 0 : i32
    return %c0_i32, %c0_i32_0 : i32, i32
  }
  func.func @transform_19(%arg0: i32) -> (i32, i32, i32) {
    %c0_i32 = arith.constant 0 : i32
    %c0_i32_0 = arith.constant 0 : i32
    %c0_i32_1 = arith.constant 0 : i32
    return %arg0, %c0_i32, %c0_i32_0 : i32, i32, i32
  }
}

</mosaic_0001>

<bundles_post_ra>
// kernel: tpu_custom_call.1
= control target key start
LH: loop header
LB: loop body
LE: loop exit
PB: predicated region body
PF: predicated region fallthrough
CT: control target
= control target key end

     0   :  { %s7922_s0 = inlined_call_operand.hbm [shape: f32[2,33,32], index: 0, kind: input, shape index: {}]   ;;  %s7923_s1 = inlined_call_operand.hbm [shape: s32[33,1], index: 1, kind: input, shape index: {}]   ;;  %s7924_s2 = inlined_call_operand.hbm [shape: s32[1,33], index: 2, kind: input, shape index: {}]   ;;  %s7925_s3 = inlined_call_operand.hbm [shape: s32[33,1], index: 3, kind: input, shape index: {}]   ;;  %s7926_s4 = inlined_call_operand.hbm [shape: s32[1,33], index: 4, kind: input, shape index: {}]   ;;  %s7927_s5 = inlined_call_operand.hbm [shape: f32[1,32], index: 5, kind: input, shape index: {}]   ;;  %s7928_s6 = inlined_call_operand.hbm [shape: f32[1,32], index: 6, kind: input, shape index: {}]   ;;  %s7929_s7 = inlined_call_operand.hbm [shape: bf16[32,96], index: 7, kind: input, shape index: {}]   ;;  %s7930_s8 = inlined_call_operand.hbm [shape: bf16[32,32], index: 8, kind: input, shape index: {}]   ;;  %s7931_s9 = inlined_call_operand.hbm [shape: f32[1,32], index: 9, kind: input, shape index: {}]   ;;  %s7932_s10 = inlined_call_operand.hbm [shape: f32[1,32], index: 10, kind: input, shape index: {}]   ;;  %s7933_s11 = inlined_call_operand.hbm [shape: bf16[32,96], index: 11, kind: input, shape index: {}]   ;;  %s7934_s12 = inlined_call_operand.hbm [shape: bf16[32,32], index: 12, kind: input, shape index: {}]   ;;  %s7935_s13 = inlined_call_operand.hbm [shape: f32[1,32], index: 13, kind: input, shape index: {}]   ;;  %s7936_s14 = inlined_call_operand.hbm [shape: f32[1,32], index: 14, kind: input, shape index: {}]   ;;  %s7937_s15 = inlined_call_operand.hbm [shape: bf16[32,64], index: 15, kind: input, shape index: {}]   ;;  %s7938_s16 = inlined_call_operand.hbm [shape: f32[1,64], index: 16, kind: input, shape index: {}]   ;;  %s7939_s17 = inlined_call_operand.hbm [shape: bf16[64,32], index: 17, kind: input, shape index: {}]   ;;  %s7940_s18 = inlined_call_operand.hbm [shape: f32[1,32], index: 18, kind: input, shape index: {}]   ;;  %s7941_s19 = inlined_call_operand.hbm [shape: f32[2,33,32], index: 19, kind: output, shape index: {}]  }
   0x1   :  { %7979 = sst [smem:[#allocation51_spill]] %s7922_s0 }
   0x2   :  { %7980 = sst [smem:[#allocation52_spill]] %s7923_s1 }
   0x3   :  { %7981 = sst [smem:[#allocation53_spill]] %s7924_s2 }
   0x4   :  { %7982 = sst [smem:[#allocation54_spill]] %s7925_s3 }
   0x5   :  { %7983 = sst [smem:[#allocation55_spill]] %s7926_s4 }
   0x6   :  { %7984 = sst [smem:[#allocation56_spill]] %s7927_s5 }
   0x7   :  { %7985 = sst [smem:[#allocation57_spill]] %s7928_s6 }
   0x8   :  { %7986 = sst [smem:[#allocation58_spill]] %s7929_s7 }
   0x9   :  { %7987 = sst [smem:[#allocation59_spill]] %s7936_s14 }
   0xa   :  { %7988 = sst [smem:[#allocation60_spill]] %s7938_s16 }
   0xb   :  { %7989 = sst [smem:[#allocation61_spill]] %s7940_s18 }
   0xc   :  { %7990 = sst [smem:[#allocation62_spill]] %s7941_s19 }
   0xd   :  { %24 = vsyncpa [#allocation4], 0 }
   0xe   :  { %26 = vsyncpa [#allocation4 + $0x1], 0 }
   0xf   :  { %27 = vsyncpa [#allocation7], 0 }
  0x10   :  { %28 = vsyncpa [#allocation10], 0 }
  0x11   :  { %29 = vsyncpa [#allocation13], 0 }
  0x12   :  { %30 = vsyncpa [#allocation16], 0 }
  0x13   :  { %31 = vsyncpa [#allocation19], 0 }
  0x14   :  { %32 = vsyncpa [#allocation22], 0 }
  0x15   :  { %33 = vsyncpa [#allocation25], 0 }
  0x16   :  { %34 = vsyncpa [#allocation28], 0 }
  0x17   :  { %35 = vsyncpa [#allocation31], 0 }
  0x18   :  { %36 = vsyncpa [#allocation5], 0 }
  0x19   :  { %38 = vsyncpa [#allocation5 + $0x1], 0  ;;  %s6019_s0 = smov 0   ;;  %s6021_s30 = smov 0  }
  0x1a   :  { %s6023_s20 = smov 0   ;;  %s6025_s21 = smov 0  }
  0x1b LB: > { %7991 = sst [smem:[#allocation45_spill]] %s5863_s0  ;;  %s5877_s1 = smov [#allocation6]   ;;  %s5875_s21 = sphi %s6025_s21, %s6490_s21   ;;  %s5871_s20 = sphi %s6023_s20, %s6501_s20   ;;  %s5867_s30 = sphi %s6021_s30, %s8122_s30   ;;  %s5863_s0 = sphi %s6019_s0, %s8121_s0  }
  0x1c   : > { %7992 = sst [smem:[#allocation46_spill]] %s5867_s30  ;;  %s491_s22 = sshll.u32 %s5877_s1, 4  ;;  %s6045_s22 = int_to_ptr.vmem [resolvable:$true] %s491_s22 }
  0x1d   : > { %7993 = sst [smem:[#allocation47_spill]] %s5871_s20  ;;  %s6040_s2 = sadd.s32 4294967295, %s5875_s21  }
  0x1e   : > { %7994 = sst [smem:[#allocation48_spill]] %s5875_s21  ;;  %p4114_p0 = scmp.ge.s32.totalorder %s5875_s21, 1 }
  0x1f   : > { %7995 = sst [smem:[#allocation49_spill]] %s6040_s2  ;;  %p7958_p1 = scmp.eq.s32.totalorder %s6040_s2, 0 }
  0x20   : > { %p479_p2 = scmp.lt.s32.totalorder %s5875_s21, 3  ;;  %s5878_s24 = smov [#allocation9]  }
  0x21   : > { %s515_s25 = sshll.u32 %s5878_s24, 4  ;;  %s5879_s26 = smov [#allocation12]   ;;  %s6060_s25 = int_to_ptr.vmem [resolvable:$true] %s515_s25 }
  0x22   : > { %p6047_p3 = pnand %p4114_p0, %p479_p2  ;;  %s540_s27 = sshll.u32 %s5879_s26, 4  ;;  %s6062_s27 = int_to_ptr.vmem [resolvable:$true] %s540_s27 }
  0x23   : > { %s7999_s1 = sld [smem:[#allocation52_spill]] }
  0x24   : > { %s7996_s23 = scalar_select %p6047_p3, 1, 0 }
  0x25   : > { %p4845_p5 = pneg %p6047_p3 }
  0x26   : > { %7997 = sst [smem:[#allocation50_spill]] %s7996_s23 }
  0x27   : > { %p6056_p6 = pnand %p4845_p5, %p7958_p1 }
  0x29   : > { %s5239_s19 = scalar_lea.hbm %s7999_s1, 640  ;;  %p6072_p8 = pneg %p6056_p6 }
  0x2a   : > { %p5240_p7 = scmp.ne.s32.totalorder %s7999_s1, %s5239_s19  ;;  %p5246_p11 = scmp.lt.u32.totalorder %s5239_s19, %s7999_s1 }
  0x2c   : > { %p5242_p9 = pnand %p6072_p8, %p5240_p7 }
  0x2e   : > { %p5243_p10 = pneg %p5242_p9 }
  0x30   : > { %p5248_p12 = pnand %p5246_p11, %p5243_p10 }
  0x32   : > { %5251 = shalt.err (!%p5248_p12)
}
  0x33   : > { %s5252_s0 = scalar_lea.vmem %s6045_s22, 640  ;;  %p5260_p5 = scmp.lt.s32.totalorder %s6045_s22, %s6045_s22 }
  0x34   : > { %p5253_p13 = scmp.ne.s32.totalorder %s6045_s22, %s5252_s0  ;;  %p5261_p4 = scmp.lt.s32.totalorder %s5252_s0, %s5252_s0 }
  0x36   : > { %p5255_p0 = pnand %p5253_p13, %p6072_p8  ;;  %p5262_p7 = por %p5261_p4, %p5260_p5 }
  0x38   : > { %p5256_p2 = pneg %p5255_p0 }
  0x3a   : > { %p5263_p9 = pnand %p5262_p7, %p5256_p2 }
  0x3c   : > { %5266 = shalt.err (!%p5263_p9)
}
  0x3d   : > { %s7960_s23 = smov 128   ;;  %s7961_s19 = smov 8  }
  0x3e   : > { %4848 = dma.hbm_to_vmem [thread:$0]  (!%p6056_p6), %s7999_s1, 640, %s6045_s22, [#allocation7], %s7960_s23, %s7960_s23, %s7961_s19  }
  0x3f   : > { %s8001_s30 = sld [smem:[#allocation54_spill]] }
  0x45   : > { %s8002_s18 = smov %s8001_s30  ;;  %s5267_s0 = scalar_lea.hbm %s8001_s30, 640 }
  0x46   : > { %p5268_p4 = scmp.ne.s32.totalorder %s8002_s18, %s5267_s0  ;;  %p5274_p12 = scmp.lt.u32.totalorder %s5267_s0, %s8002_s18 }
  0x48   : > { %p5270_p10 = pnand %p5268_p4, %p6072_p8 }
  0x4a   : > { %p5271_p11 = pneg %p5270_p10 }
  0x4c   : > { %p5276_p13 = pnand %p5274_p12, %p5271_p11 }
  0x4e   : > { %5279 = shalt.err (!%p5276_p13)
}
  0x4f   : > { %s5280_s22 = scalar_lea.vmem %s6060_s25, 640  ;;  %p5288_p7 = scmp.lt.s32.totalorder %s6060_s25, %s6060_s25 }
  0x50   : > { %p5281_p0 = scmp.ne.s32.totalorder %s6060_s25, %s5280_s22  ;;  %p5289_p9 = scmp.lt.s32.totalorder %s5280_s22, %s5280_s22 }
  0x52   : > { %p5283_p2 = pnand %p5281_p0, %p6072_p8  ;;  %p5290_p4 = por %p5289_p9, %p5288_p7 }
  0x54   : > { %p5284_p5 = pneg %p5283_p2 }
  0x56   : > { %p5291_p10 = pnand %p5290_p4, %p5284_p5 }
  0x58   : > { %5294 = shalt.err (!%p5291_p10)
}
  0x59   : > { %4854 = dma.hbm_to_vmem [thread:$0]  (!%p6056_p6), %s8002_s18, 640, %s6060_s25, [#allocation10], %s7960_s23, %s7960_s23, %s7961_s19  }
  0x5a   : > { %s8003_s5 = sld [smem:[#allocation56_spill]] }
  0x60   : > { %s5295_s21 = scalar_lea.hbm %s8003_s5, 16 }
  0x61   : > { %p5296_p11 = scmp.ne.s32.totalorder %s8003_s5, %s5295_s21  ;;  %p5302_p0 = scmp.lt.u32.totalorder %s5295_s21, %s8003_s5 }
  0x63   : > { %p5298_p12 = pnand %p5296_p11, %p6072_p8 }
  0x65   : > { %p5299_p13 = pneg %p5298_p12 }
  0x67   : > { %p5304_p2 = pnand %p5302_p0, %p5299_p13 }
  0x69   : > { %5307 = shalt.err (!%p5304_p2)
}
  0x6a   : > { %s5308_s25 = scalar_lea.vmem %s6062_s27, 16  ;;  %s5315_s0 = scalar_lea.vmem %s6062_s27, 32 }
  0x6b   : > { %p5309_p5 = scmp.ne.s32.totalorder %s6062_s27, %s5308_s25  ;;  %p5316_p4 = scmp.lt.s32.totalorder %s6062_s27, %s6062_s27 }
  0x6c   : > { %p5317_p10 = scmp.lt.s32.totalorder %s5315_s0, %s5308_s25 }
  0x6d   : > { %p5311_p7 = pnand %p5309_p5, %p6072_p8 }
  0x6e   : > { %p5318_p11 = por %p5317_p10, %p5316_p4 }
  0x6f   : > { %p5312_p9 = pneg %p5311_p7 }
  0x71   : > { %p5319_p12 = pnand %p5318_p11, %p5312_p9 }
  0x73   : > { %5322 = shalt.err (!%p5319_p12)
}
  0x74   : > { %4860 = dma.hbm_to_vmem [thread:$0]  (!%p6056_p6), %s8003_s5, 16, %s6062_s27, [#allocation13]  }
  0x75   : > { %s5882_s16 = smov [#allocation15]   ;;  %s8004_s7 = sld [smem:[#allocation58_spill]] }
  0x76   : > { %s561_s30 = sshll.u32 %s5882_s16, 4  ;;  %s562_s30 = int_to_ptr.vmem [resolvable:$true] %s561_s30 }
  0x7b   : > { %s5323_s2 = scalar_lea.hbm %s8004_s7, 256 }
  0x7c   : > { %p5324_p13 = scmp.ne.s32.totalorder %s8004_s7, %s5323_s2  ;;  %p5330_p5 = scmp.lt.u32.totalorder %s5323_s2, %s8004_s7 }
  0x7e   : > { %p5326_p0 = pnand %p5324_p13, %p6072_p8 }
  0x80   : > { %p5327_p2 = pneg %p5326_p0 }
  0x82   : > { %p5332_p7 = pnand %p5330_p5, %p5327_p2 }
  0x84   : > { %5335 = shalt.err (!%p5332_p7)
}
  0x85   : > { %s5336_s27 = scalar_lea.vmem %s562_s30, 256  ;;  %p5344_p11 = scmp.lt.s32.totalorder %s562_s30, %s562_s30 }
  0x86   : > { %p5337_p9 = scmp.ne.s32.totalorder %s562_s30, %s5336_s27  ;;  %p5345_p12 = scmp.lt.s32.totalorder %s5336_s27, %s5336_s27 }
  0x88   : > { %p5339_p4 = pnand %p5337_p9, %p6072_p8  ;;  %p5346_p1 = por %p5345_p12, %p5344_p11 }
  0x8a   : > { %p5340_p10 = pneg %p5339_p4 }
  0x8c   : > { %p5347_p3 = pnand %p5346_p1, %p5340_p10 }
  0x8e   : > { %5350 = shalt.err (!%p5347_p3)
}
  0x8f   : > { %s5883_s0 = smov 64   ;;  %s5884_s22 = smov 4  }
  0x90   : > { %4866 = dma.hbm_to_vmem [thread:$0]  (!%p6056_p6), %s8004_s7, 256, %s562_s30, [#allocation16], %s5883_s0, %s5883_s0, %s5884_s22  }
  0x91   : > { %s5885_s20 = smov [#allocation18]   ;;  %s5886_s2 = smov [#allocation21]  }
  0x92   : > { %s588_s21 = sshll.u32 %s5885_s20, 4  ;;  %s609_s28 = sshll.u32 %s5886_s2, 4  ;;  %s589_s21 = int_to_ptr.vmem [resolvable:$true] %s588_s21  ;;  %s6167_s28 = int_to_ptr.vmem [resolvable:$true] %s609_s28 }
  0x93   : > { %s5351_s25 = scalar_lea.hbm %s7931_s9, 16 }
  0x94   : > { %p5352_p1 = scmp.ne.s32.totalorder %s7931_s9, %s5351_s25  ;;  %p5358_p0 = scmp.lt.u32.totalorder %s5351_s25, %s7931_s9 }
  0x96   : > { %p5354_p3 = pnand %p5352_p1, %p6072_p8 }
  0x98   : > { %p5355_p13 = pneg %p5354_p3 }
  0x9a   : > { %p5360_p2 = pnand %p5358_p0, %p5355_p13 }
  0x9c   : > { %5363 = shalt.err (!%p5360_p2)
}
  0x9d   : > { %s5364_s16 = scalar_lea.vmem %s589_s21, 16  ;;  %s5371_s20 = scalar_lea.vmem %s589_s21, 32 }
  0x9e   : > { %p5365_p5 = scmp.ne.s32.totalorder %s589_s21, %s5364_s16  ;;  %p5372_p4 = scmp.lt.s32.totalorder %s589_s21, %s589_s21 }
  0x9f   : > { %p5373_p10 = scmp.lt.s32.totalorder %s5371_s20, %s5364_s16 }
  0xa0   : > { %p5367_p7 = pnand %p5365_p5, %p6072_p8 }
  0xa1   : > { %p5374_p11 = por %p5373_p10, %p5372_p4 }
  0xa2   : > { %p5368_p9 = pneg %p5367_p7 }
  0xa4   : > { %p5375_p12 = pnand %p5374_p11, %p5368_p9 }
  0xa6   : > { %5378 = shalt.err (!%p5375_p12)
}
  0xa7   : > { %4872 = dma.hbm_to_vmem [thread:$0]  (!%p6056_p6), %s7931_s9, 16, %s589_s21, [#allocation19]  }
  0xa8   : > { %s5379_s25 = scalar_lea.hbm %s7933_s11, 256 }
  0xa9   : > { %p5380_p1 = scmp.ne.s32.totalorder %s7933_s11, %s5379_s25  ;;  %p5386_p0 = scmp.lt.u32.totalorder %s5379_s25, %s7933_s11 }
  0xab   : > { %p5382_p3 = pnand %p5380_p1, %p6072_p8 }
  0xad   : > { %p5383_p13 = pneg %p5382_p3 }
  0xaf   : > { %p5388_p2 = pnand %p5386_p0, %p5383_p13 }
  0xb1   : > { %5391 = shalt.err (!%p5388_p2)
}
  0xb2   : > { %s5392_s21 = scalar_lea.vmem %s6167_s28, 256  ;;  %p5400_p4 = scmp.lt.s32.totalorder %s6167_s28, %s6167_s28 }
  0xb3   : > { %p5393_p5 = scmp.ne.s32.totalorder %s6167_s28, %s5392_s21  ;;  %p5401_p10 = scmp.lt.s32.totalorder %s5392_s21, %s5392_s21 }
  0xb5   : > { %p5395_p7 = pnand %p5393_p5, %p6072_p8  ;;  %p5402_p11 = por %p5401_p10, %p5400_p4 }
  0xb7   : > { %p5396_p9 = pneg %p5395_p7 }
  0xb9   : > { %p5403_p12 = pnand %p5402_p11, %p5396_p9 }
  0xbb   : > { %5406 = shalt.err (!%p5403_p12)
}
  0xbc   : > { %4878 = dma.hbm_to_vmem [thread:$0]  (!%p6056_p6), %s7933_s11, 256, %s6167_s28, [#allocation22], %s5883_s0, %s5883_s0, %s5884_s22  }
  0xbd   : > { %s5887_s2 = smov [#allocation24]   ;;  %s5888_s26 = smov [#allocation27]  }
  0xbe   : > { %s636_s29 = sshll.u32 %s5887_s2, 4  ;;  %s657_s25 = sshll.u32 %s5888_s26, 4  ;;  %s637_s29 = int_to_ptr.vmem [resolvable:$true] %s636_s29  ;;  %s6213_s25 = int_to_ptr.vmem [resolvable:$true] %s657_s25 }
  0xbf   : > { %s5407_s30 = scalar_lea.hbm %s7935_s13, 16 }
  0xc0   : > { %p5408_p1 = scmp.ne.s32.totalorder %s7935_s13, %s5407_s30  ;;  %p5414_p0 = scmp.lt.u32.totalorder %s5407_s30, %s7935_s13 }
  0xc2   : > { %p5410_p3 = pnand %p5408_p1, %p6072_p8 }
  0xc4   : > { %p5411_p13 = pneg %p5410_p3 }
  0xc6   : > { %p5416_p2 = pnand %p5414_p0, %p5411_p13 }
  0xc8   : > { %5419 = shalt.err (!%p5416_p2)
}
  0xc9   : > { %s5420_s23 = scalar_lea.vmem %s637_s29, 16  ;;  %s5427_s2 = scalar_lea.vmem %s637_s29, 32 }
  0xca   : > { %p5421_p5 = scmp.ne.s32.totalorder %s637_s29, %s5420_s23  ;;  %p5428_p4 = scmp.lt.s32.totalorder %s637_s29, %s637_s29 }
  0xcb   : > { %p5429_p10 = scmp.lt.s32.totalorder %s5427_s2, %s5420_s23 }
  0xcc   : > { %p5423_p7 = pnand %p5421_p5, %p6072_p8 }
  0xcd   : > { %p5430_p11 = por %p5429_p10, %p5428_p4 }
  0xce   : > { %p5424_p9 = pneg %p5423_p7 }
  0xd0   : > { %p5431_p12 = pnand %p5430_p11, %p5424_p9 }
  0xd2   : > { %5434 = shalt.err (!%p5431_p12)
}
  0xd3   : > { %4884 = dma.hbm_to_vmem [thread:$0]  (!%p6056_p6), %s7935_s13, 16, %s637_s29, [#allocation25]  }
  0xd4   : > { %s5435_s16 = scalar_lea.hbm %s7937_s15, 256 }
  0xd5   : > { %p5436_p1 = scmp.ne.s32.totalorder %s7937_s15, %s5435_s16  ;;  %p5442_p0 = scmp.lt.u32.totalorder %s5435_s16, %s7937_s15 }
  0xd7   : > { %p5438_p3 = pnand %p5436_p1, %p6072_p8 }
  0xd9   : > { %p5439_p13 = pneg %p5438_p3 }
  0xdb   : > { %p5444_p2 = pnand %p5442_p0, %p5439_p13 }
  0xdd   : > { %5447 = shalt.err (!%p5444_p2)
}
  0xde   : > { %s5448_s29 = scalar_lea.vmem %s6213_s25, 256  ;;  %p5456_p4 = scmp.lt.s32.totalorder %s6213_s25, %s6213_s25 }
  0xdf   : > { %p5449_p5 = scmp.ne.s32.totalorder %s6213_s25, %s5448_s29  ;;  %p5457_p10 = scmp.lt.s32.totalorder %s5448_s29, %s5448_s29 }
  0xe1   : > { %p5451_p7 = pnand %p5449_p5, %p6072_p8  ;;  %p5458_p11 = por %p5457_p10, %p5456_p4 }
  0xe3   : > { %p5452_p9 = pneg %p5451_p7 }
  0xe5   : > { %p5459_p12 = pnand %p5458_p11, %p5452_p9 }
  0xe7   : > { %5462 = shalt.err (!%p5459_p12)
}
  0xe8   : > { %4890 = dma.hbm_to_vmem [thread:$0]  (!%p6056_p6), %s7937_s15, 256, %s6213_s25, [#allocation28], %s5883_s0, %s5883_s0, %s5884_s22  }
  0xe9   : > { %s5889_s27 = smov [#allocation30]   ;;  %s5890_s30 = smov [#allocation8]  }
  0xea   : > { %s681_s14 = sshll.u32 %s5889_s27, 4  ;;  %s505_s16 = sshll.u32 %s5890_s30, 4  ;;  %s682_s14 = int_to_ptr.vmem [resolvable:$true] %s681_s14  ;;  %s6259_s16 = int_to_ptr.vmem [resolvable:$true] %s505_s16 }
  0xeb   : > { %s5463_s28 = scalar_lea.hbm %s7939_s17, 512 }
  0xec   : > { %p5464_p1 = scmp.ne.s32.totalorder %s7939_s17, %s5463_s28  ;;  %p5470_p0 = scmp.lt.u32.totalorder %s5463_s28, %s7939_s17 }
  0xee   : > { %p5466_p3 = pnand %p5464_p1, %p6072_p8 }
  0xf0   : > { %p5467_p13 = pneg %p5466_p3 }
  0xf2   : > { %p5472_p2 = pnand %p5470_p0, %p5467_p13 }
  0xf4   : > { %5475 = shalt.err (!%p5472_p2)
}
  0xf5   : > { %s5476_s26 = scalar_lea.vmem %s682_s14, 512  ;;  %p5484_p4 = scmp.lt.s32.totalorder %s682_s14, %s682_s14 }
  0xf6   : > { %p5477_p5 = scmp.ne.s32.totalorder %s682_s14, %s5476_s26  ;;  %p5485_p10 = scmp.lt.s32.totalorder %s5476_s26, %s5476_s26 }
  0xf8   : > { %p5479_p7 = pnand %p5477_p5, %p6072_p8  ;;  %p5486_p11 = por %p5485_p10, %p5484_p4 }
  0xfa   : > { %p5480_p9 = pneg %p5479_p7 }
  0xfc   : > { %p5487_p12 = pnand %p5486_p11, %p5480_p9 }
  0xfe   : > { %5490 = shalt.err (!%p5487_p12)
}
  0xff   : > { %4896 = dma.hbm_to_vmem [thread:$0]  (!%p6056_p6), %s7939_s17, 512, %s682_s14, [#allocation31], %s5883_s0, %s5883_s0, %s5884_s22  }
 0x100   : > { %s8005_s28 = sld [smem:[#allocation53_spill]] }
 0x106   : > { %s5491_s23 = scalar_lea.hbm %s8005_s28, 16 }
 0x107   : > { %p5492_p1 = scmp.ne.s32.totalorder %s8005_s28, %s5491_s23  ;;  %p5498_p0 = scmp.lt.u32.totalorder %s5491_s23, %s8005_s28 }
 0x109   : > { %p5494_p3 = pnand %p5492_p1, %p6072_p8 }
 0x10b   : > { %p5495_p13 = pneg %p5494_p3 }
 0x10d   : > { %p5500_p2 = pnand %p5498_p0, %p5495_p13 }
 0x10f   : > { %5503 = shalt.err (!%p5500_p2)
}
 0x110   : > { %s5504_s14 = scalar_lea.vmem %s6259_s16, 16  ;;  %s5511_s27 = scalar_lea.vmem %s6259_s16, 32 }
 0x111   : > { %p5505_p5 = scmp.ne.s32.totalorder %s6259_s16, %s5504_s14  ;;  %p5512_p4 = scmp.lt.s32.totalorder %s6259_s16, %s6259_s16 }
 0x112   : > { %p5513_p10 = scmp.lt.s32.totalorder %s5511_s27, %s5504_s14 }
 0x113   : > { %p5507_p7 = pnand %p5505_p5, %p6072_p8 }
 0x114   : > { %p5514_p11 = por %p5513_p10, %p5512_p4 }
 0x115   : > { %p5508_p9 = pneg %p5507_p7 }
 0x117   : > { %p5515_p12 = pnand %p5514_p11, %p5508_p9 }
 0x119   : > { %5518 = shalt.err (!%p5515_p12)
}
 0x11a   : > { %4851 = dma.hbm_to_vmem [thread:$0]  (!%p6056_p6), %s8005_s28, 16, %s6259_s16, [#allocation7]  }
 0x11b   : > { %s5891_s20 = smov [#allocation11]   ;;  %s5892_s29 = smov [#allocation14]  }
 0x11c   : > { %s529_s23 = sshll.u32 %s5891_s20, 4  ;;  %s551_s2 = sshll.u32 %s5892_s29, 4  ;;  %s530_s23 = int_to_ptr.vmem [resolvable:$true] %s529_s23  ;;  %s6306_s2 = int_to_ptr.vmem [resolvable:$true] %s551_s2 }
 0x11d   : > { %s8006_s4 = sld [smem:[#allocation55_spill]] }
 0x123   : > { %s5519_s14 = scalar_lea.hbm %s8006_s4, 16 }
 0x124   : > { %p5520_p1 = scmp.ne.s32.totalorder %s8006_s4, %s5519_s14  ;;  %p5526_p0 = scmp.lt.u32.totalorder %s5519_s14, %s8006_s4 }
 0x126   : > { %p5522_p3 = pnand %p5520_p1, %p6072_p8 }
 0x128   : > { %p5523_p13 = pneg %p5522_p3 }
 0x12a   : > { %p5528_p2 = pnand %p5526_p0, %p5523_p13 }
 0x12c   : > { %5531 = shalt.err (!%p5528_p2)
}
 0x12d   : > { %s5532_s21 = scalar_lea.vmem %s530_s23, 16  ;;  %s5539_s20 = scalar_lea.vmem %s530_s23, 32 }
 0x12e   : > { %p5533_p5 = scmp.ne.s32.totalorder %s530_s23, %s5532_s21  ;;  %p5540_p4 = scmp.lt.s32.totalorder %s530_s23, %s530_s23 }
 0x12f   : > { %p5541_p10 = scmp.lt.s32.totalorder %s5539_s20, %s5532_s21 }
 0x130   : > { %p5535_p7 = pnand %p5533_p5, %p6072_p8 }
 0x131   : > { %p5542_p11 = por %p5541_p10, %p5540_p4 }
 0x132   : > { %p5536_p9 = pneg %p5535_p7 }
 0x134   : > { %p5543_p12 = pnand %p5542_p11, %p5536_p9 }
 0x136   : > { %5546 = shalt.err (!%p5543_p12)
}
 0x137   : > { %4857 = dma.hbm_to_vmem [thread:$0]  (!%p6056_p6), %s8006_s4, 16, %s530_s23, [#allocation10]  }
 0x138   : > { %s8007_s6 = sld [smem:[#allocation57_spill]] }
 0x13e   : > { %s5547_s14 = scalar_lea.hbm %s8007_s6, 16 }
 0x13f   : > { %p5548_p1 = scmp.ne.s32.totalorder %s8007_s6, %s5547_s14  ;;  %p5554_p0 = scmp.lt.u32.totalorder %s5547_s14, %s8007_s6 }
 0x141   : > { %p5550_p3 = pnand %p5548_p1, %p6072_p8 }
 0x143   : > { %p5551_p13 = pneg %p5550_p3 }
 0x145   : > { %p5556_p2 = pnand %p5554_p0, %p5551_p13 }
 0x147   : > { %5559 = shalt.err (!%p5556_p2)
}
 0x148   : > { %s5560_s23 = scalar_lea.vmem %s6306_s2, 16  ;;  %s5567_s20 = scalar_lea.vmem %s6306_s2, 32 }
 0x149   : > { %p5561_p5 = scmp.ne.s32.totalorder %s6306_s2, %s5560_s23  ;;  %p5568_p4 = scmp.lt.s32.totalorder %s6306_s2, %s6306_s2 }
 0x14a   : > { %p5569_p10 = scmp.lt.s32.totalorder %s5567_s20, %s5560_s23 }
 0x14b   : > { %p5563_p7 = pnand %p5561_p5, %p6072_p8 }
 0x14c   : > { %p5570_p11 = por %p5569_p10, %p5568_p4 }
 0x14d   : > { %p5564_p9 = pneg %p5563_p7 }
 0x14f   : > { %p5571_p12 = pnand %p5570_p11, %p5564_p9 }
 0x151   : > { %5574 = shalt.err (!%p5571_p12)
}
 0x152   : > { %4863 = dma.hbm_to_vmem [thread:$0]  (!%p6056_p6), %s8007_s6, 16, %s6306_s2, [#allocation13]  }
 0x153   : > { %s5893_s25 = smov [#allocation17]   ;;  %s5894_s14 = smov [#allocation20]  }
 0x154   : > { %s574_s26 = sshll.u32 %s5893_s25, 4  ;;  %s599_s27 = sshll.u32 %s5894_s14, 4  ;;  %s575_s26 = int_to_ptr.vmem [resolvable:$true] %s574_s26  ;;  %s6350_s27 = int_to_ptr.vmem [resolvable:$true] %s599_s27 }
 0x155   : > { %s5575_s21 = scalar_lea.hbm %s7930_s8, 256 }
 0x156   : > { %p5576_p1 = scmp.ne.s32.totalorder %s7930_s8, %s5575_s21  ;;  %p5582_p0 = scmp.lt.u32.totalorder %s5575_s21, %s7930_s8 }
 0x158   : > { %p5578_p3 = pnand %p5576_p1, %p6072_p8 }
 0x15a   : > { %p5579_p13 = pneg %p5578_p3 }
 0x15c   : > { %p5584_p2 = pnand %p5582_p0, %p5579_p13 }
 0x15e   : > { %5587 = shalt.err (!%p5584_p2)
}
 0x15f   : > { %s5588_s29 = scalar_lea.vmem %s575_s26, 256  ;;  %p5596_p4 = scmp.lt.s32.totalorder %s575_s26, %s575_s26 }
 0x160   : > { %p5589_p5 = scmp.ne.s32.totalorder %s575_s26, %s5588_s29  ;;  %p5597_p10 = scmp.lt.s32.totalorder %s5588_s29, %s5588_s29 }
 0x162   : > { %p5591_p7 = pnand %p5589_p5, %p6072_p8  ;;  %p5598_p11 = por %p5597_p10, %p5596_p4 }
 0x164   : > { %p5592_p9 = pneg %p5591_p7 }
 0x166   : > { %p5599_p12 = pnand %p5598_p11, %p5592_p9 }
 0x168   : > { %5602 = shalt.err (!%p5599_p12)
}
 0x169   : > { %4869 = dma.hbm_to_vmem [thread:$0]  (!%p6056_p6), %s7930_s8, 256, %s575_s26, [#allocation16], %s5883_s0, %s5883_s0, %s5884_s22  }
 0x16a   : > { %s5603_s21 = scalar_lea.hbm %s7932_s10, 16 }
 0x16b   : > { %p5604_p1 = scmp.ne.s32.totalorder %s7932_s10, %s5603_s21  ;;  %p5610_p0 = scmp.lt.u32.totalorder %s5603_s21, %s7932_s10 }
 0x16d   : > { %p5606_p3 = pnand %p5604_p1, %p6072_p8 }
 0x16f   : > { %p5607_p13 = pneg %p5606_p3 }
 0x171   : > { %p5612_p2 = pnand %p5610_p0, %p5607_p13 }
 0x173   : > { %5615 = shalt.err (!%p5612_p2)
}
 0x174   : > { %s5616_s26 = scalar_lea.vmem %s6350_s27, 16  ;;  %s5623_s29 = scalar_lea.vmem %s6350_s27, 32 }
 0x175   : > { %p5617_p5 = scmp.ne.s32.totalorder %s6350_s27, %s5616_s26  ;;  %p5624_p4 = scmp.lt.s32.totalorder %s6350_s27, %s6350_s27 }
 0x176   : > { %p5625_p10 = scmp.lt.s32.totalorder %s5623_s29, %s5616_s26 }
 0x177   : > { %p5619_p7 = pnand %p5617_p5, %p6072_p8 }
 0x178   : > { %p5626_p11 = por %p5625_p10, %p5624_p4 }
 0x179   : > { %p5620_p9 = pneg %p5619_p7 }
 0x17b   : > { %p5627_p12 = pnand %p5626_p11, %p5620_p9 }
 0x17d   : > { %5630 = shalt.err (!%p5627_p12)
}
 0x17e   : > { %4875 = dma.hbm_to_vmem [thread:$0]  (!%p6056_p6), %s7932_s10, 16, %s6350_s27, [#allocation19]  }
 0x17f   : > { %s5895_s30 = smov [#allocation23]   ;;  %s5896_s21 = smov [#allocation26]  }
 0x180   : > { %s622_s16 = sshll.u32 %s5895_s30, 4  ;;  %s647_s23 = sshll.u32 %s5896_s21, 4  ;;  %s623_s16 = int_to_ptr.vmem [resolvable:$true] %s622_s16  ;;  %s6397_s23 = int_to_ptr.vmem [resolvable:$true] %s647_s23 }
 0x181   : > { %s5631_s2 = scalar_lea.hbm %s7934_s12, 256 }
 0x182   : > { %p5632_p1 = scmp.ne.s32.totalorder %s7934_s12, %s5631_s2  ;;  %p5638_p0 = scmp.lt.u32.totalorder %s5631_s2, %s7934_s12 }
 0x184   : > { %p5634_p3 = pnand %p5632_p1, %p6072_p8 }
 0x186   : > { %p5635_p13 = pneg %p5634_p3 }
 0x188   : > { %p5640_p2 = pnand %p5638_p0, %p5635_p13 }
 0x18a   : > { %5643 = shalt.err (!%p5640_p2)
}
 0x18b   : > { %s5644_s14 = scalar_lea.vmem %s623_s16, 256  ;;  %p5652_p4 = scmp.lt.s32.totalorder %s623_s16, %s623_s16 }
 0x18c   : > { %p5645_p5 = scmp.ne.s32.totalorder %s623_s16, %s5644_s14  ;;  %p5653_p10 = scmp.lt.s32.totalorder %s5644_s14, %s5644_s14 }
 0x18e   : > { %p5647_p7 = pnand %p5645_p5, %p6072_p8  ;;  %p5654_p11 = por %p5653_p10, %p5652_p4 }
 0x190   : > { %p5648_p9 = pneg %p5647_p7 }
 0x192   : > { %p5655_p12 = pnand %p5654_p11, %p5648_p9 }
 0x194   : > { %5658 = shalt.err (!%p5655_p12)
}
 0x195   : > { %4881 = dma.hbm_to_vmem [thread:$0]  (!%p6056_p6), %s7934_s12, 256, %s623_s16, [#allocation22], %s5883_s0, %s5883_s0, %s5884_s22  }
 0x196   : > { %s8008_s2 = sld [smem:[#allocation59_spill]] }
 0x19c   : > { %s5659_s26 = scalar_lea.hbm %s8008_s2, 16 }
 0x19d   : > { %p5660_p1 = scmp.ne.s32.totalorder %s8008_s2, %s5659_s26  ;;  %p5666_p0 = scmp.lt.u32.totalorder %s5659_s26, %s8008_s2 }
 0x19f   : > { %p5662_p3 = pnand %p5660_p1, %p6072_p8 }
 0x1a1   : > { %p5663_p13 = pneg %p5662_p3 }
 0x1a3   : > { %p5668_p2 = pnand %p5666_p0, %p5663_p13 }
 0x1a5   : > { %5671 = shalt.err (!%p5668_p2)
}
 0x1a6   : > { %s5672_s0 = scalar_lea.vmem %s6397_s23, 16  ;;  %s5679_s22 = scalar_lea.vmem %s6397_s23, 32 }
 0x1a7   : > { %p5673_p5 = scmp.ne.s32.totalorder %s6397_s23, %s5672_s0  ;;  %p5680_p4 = scmp.lt.s32.totalorder %s6397_s23, %s6397_s23 }
 0x1a8   : > { %p5681_p10 = scmp.lt.s32.totalorder %s5679_s22, %s5672_s0 }
 0x1a9   : > { %p5675_p7 = pnand %p5673_p5, %p6072_p8 }
 0x1aa   : > { %p5682_p11 = por %p5681_p10, %p5680_p4 }
 0x1ab   : > { %p5676_p9 = pneg %p5675_p7 }
 0x1ad   : > { %p5683_p12 = pnand %p5682_p11, %p5676_p9 }
 0x1af   : > { %5686 = shalt.err (!%p5683_p12)
}
 0x1b0   : > { %4887 = dma.hbm_to_vmem [thread:$0]  (!%p6056_p6), %s8008_s2, 16, %s6397_s23, [#allocation25]  }
 0x1b1   : > { %s5897_s21 = smov [#allocation29]   ;;  %s5898_s19 = smov [#allocation32]  }
 0x1b2   : > { %s671_s20 = sshll.u32 %s5897_s21, 4  ;;  %s695_s26 = sshll.u32 %s5898_s19, 4  ;;  %s672_s20 = int_to_ptr.vmem [resolvable:$true] %s671_s20  ;;  %s6444_s26 = int_to_ptr.vmem [resolvable:$true] %s695_s26 }
 0x1b3   : > { %s8009_s27 = sld [smem:[#allocation60_spill]] }
 0x1b9   : > { %s5687_s14 = scalar_lea.hbm %s8009_s27, 16 }
 0x1ba   : > { %p5688_p1 = scmp.ne.s32.totalorder %s8009_s27, %s5687_s14  ;;  %p5694_p0 = scmp.lt.u32.totalorder %s5687_s14, %s8009_s27 }
 0x1bc   : > { %p5690_p3 = pnand %p5688_p1, %p6072_p8 }
 0x1be   : > { %p5691_p13 = pneg %p5690_p3 }
 0x1c0   : > { %p5696_p2 = pnand %p5694_p0, %p5691_p13 }
 0x1c2   : > { %5699 = shalt.err (!%p5696_p2)
}
 0x1c3   : > { %s5700_s30 = scalar_lea.vmem %s672_s20, 16  ;;  %s5707_s21 = scalar_lea.vmem %s672_s20, 32 }
 0x1c4   : > { %p5701_p5 = scmp.ne.s32.totalorder %s672_s20, %s5700_s30  ;;  %p5708_p4 = scmp.lt.s32.totalorder %s672_s20, %s672_s20 }
 0x1c5   : > { %p5709_p10 = scmp.lt.s32.totalorder %s5707_s21, %s5700_s30 }
 0x1c6   : > { %p5703_p7 = pnand %p5701_p5, %p6072_p8 }
 0x1c7   : > { %p5710_p11 = por %p5709_p10, %p5708_p4 }
 0x1c8   : > { %p5704_p9 = pneg %p5703_p7 }
 0x1ca   : > { %p5711_p12 = pnand %p5710_p11, %p5704_p9 }
 0x1cc   : > { %5714 = shalt.err (!%p5711_p12)
}
 0x1cd   : > { %4893 = dma.hbm_to_vmem [thread:$0]  (!%p6056_p6), %s8009_s27, 16, %s672_s20, [#allocation28]  }
 0x1ce   : > { %s8010_s0 = sld [smem:[#allocation61_spill]] }
 0x1d4   : > { %s8011_s22 = smov %s8010_s0  ;;  %s5715_s16 = scalar_lea.hbm %s8010_s0, 16 }
 0x1d5   : > { %p5716_p1 = scmp.ne.s32.totalorder %s8011_s22, %s5715_s16  ;;  %p5722_p0 = scmp.lt.u32.totalorder %s5715_s16, %s8011_s22 }
 0x1d7   : > { %p5718_p3 = pnand %p5716_p1, %p6072_p8 }
 0x1d9   : > { %p5719_p13 = pneg %p5718_p3 }
 0x1db   : > { %p5724_p2 = pnand %p5722_p0, %p5719_p13 }
 0x1dd   : > { %5727 = shalt.err (!%p5724_p2)
}
 0x1de   : > { %s5728_s20 = scalar_lea.vmem %s6444_s26, 16  ;;  %s5735_s1 = scalar_lea.vmem %s6444_s26, 32 }
 0x1df   : > { %p5729_p5 = scmp.ne.s32.totalorder %s6444_s26, %s5728_s20  ;;  %p5736_p4 = scmp.lt.s32.totalorder %s6444_s26, %s6444_s26 }
 0x1e0   : > { %p5737_p10 = scmp.lt.s32.totalorder %s5735_s1, %s5728_s20 }
 0x1e1   : > { %p5731_p7 = pnand %p5729_p5, %p6072_p8 }
 0x1e2   : > { %p5738_p11 = por %p5737_p10, %p5736_p4 }
 0x1e3   : > { %p5732_p9 = pneg %p5731_p7 }
 0x1e5   : > { %p5739_p12 = pnand %p5738_p11, %p5732_p9 }
 0x1e7   : > { %5742 = shalt.err (!%p5739_p12)
}
 0x1e8   : > { %s8012_s25 = sld [smem:[#allocation48_spill]]  ;;  %s8013_s14 = sld [smem:[#allocation47_spill]] }
 0x1e9   : > { %s8014_s24 = sld [smem:[#allocation46_spill]]  ;;  %s8015_s0 = sld [smem:[#allocation45_spill]] }
 0x1ea   : > { %s8016_s16 = sld [smem:[#allocation49_spill]] }
 0x1eb   : > { %4899 = dma.hbm_to_vmem [thread:$0]  (!%p6056_p6), %s8011_s22, 16, %s6444_s26, [#allocation31]  }
 0x1ee   : > { %s4113_s3 = sadd.s32 4294967294, %s8012_s25   ;;  %s6490_s21 = sadd.s32 1, %s8012_s25  }
 0x1ef   : > { %s48_s23 = ssub.s32 %s8012_s25, %s6490_s21  ;;  %s51_s30 = sadd.s32 1, %s8013_s14 }
 0x1f0   : > { %p49_p8 = scmp.eq.s32.totalorder %s48_s23, 0  ;;  %p58_p1 = scmp.ne.s32.totalorder %s8013_s14, %s8014_s24 }
 0x1f1   : > { %p59_p3 = scmp.eq.s32.totalorder %s8012_s25, 0  ;;  %p64_p13 = scmp.ne.s32.totalorder %s8014_s24, %s8015_s0 }
 0x1f2   : > { %s6501_s20 = scalar_select %p49_p8, %s8013_s14, %s51_s30  }
 0x1f3   : > { %p60_p0 = por %p59_p3, %p58_p1  ;;  %p8017_p2 = scmp.eq.s32.totalorder %s8016_s16, 0 }
 0x1f4   : > { %p466_p6 = scmp.eq.s32.totalorder %s8016_s16, 1  ;;  %p472_p7 = scmp.eq.s32.totalorder %s4113_s3, 1 }
 0x1f5   : > { %p6505_p5 = por %p8017_p2, %p64_p13  ;;  %p4926_p9 = scmp.lt.s32.totalorder %s8012_s25, 2 }
 0x1f6   : > { %s706_s26 = sand.u32 1, %s8013_s14   ;;  %p6512_p4 = por %p466_p6, %p58_p1 }
 0x1f7   : > { %p6516_p10 = por %p472_p7, %p64_p13  ;;  %s4765_s24 = smul.u32 40, %s706_s26 }
 0x1f8   : > { %s8019_s19 = scalar_select %p6512_p4, 1, 0 }
 0x1f9   : > { %s8020_s29 = scalar_select %p6516_p10, 1, 0 }
 0x1fa   : > { %s4766_s0 = smul.u32 640, %s8012_s25  ;;  %p6521_p11 = pnand %p4926_p9, %p60_p0 }
 0x1fb   : > { %s8022_s16 = sld [smem:[#allocation51_spill]]  ;;  %s710_s3 = scalar_lea.vmem [#allocation3], %s4765_s24 }
 0x1fc   : > { %s717_s4 = sshll.u32 %s710_s3, 4  ;;  %s6532_s25 = scalar_lea.sflag [#allocation4], %s706_s26  ;;  %s6530_s4 = int_to_ptr.vmem [resolvable:$true] %s717_s4 }
 0x1fd   : > { %p5745_p8 = pneg %p6521_p11 }
 0x201   : > { %s6528_s14 = scalar_lea.hbm %s8022_s16, %s4766_s0  ;;  %s5748_s30 = scalar_lea.hbm %s8022_s16, 1280 }
 0x202   : > { %s5743_s5 = scalar_lea.hbm %s6528_s14, 640  ;;  %p5749_p13 = scmp.lt.u32.totalorder %s6528_s14, %s8022_s16 }
 0x203   : > { %p5744_p12 = scmp.ne.s32.totalorder %s6528_s14, %s5743_s5  ;;  %p5750_p0 = scmp.lt.u32.totalorder %s5748_s30, %s5743_s5 }
 0x204   : > { %p5752_p6 = scmp.lt.u32.totalorder %s5743_s5, %s6528_s14 }
 0x205   : > { %p5746_p1 = pnand %p5745_p8, %p5744_p12  ;;  %p5751_p2 = por %p5750_p0, %p5749_p13 }
 0x207   : > { %p5747_p3 = pneg %p5746_p1  ;;  %p5753_p7 = por %p5752_p6, %p5751_p2 }
 0x209   : > { %p5754_p9 = pnand %p5753_p7, %p5747_p3 }
 0x20b   : > { %5757 = shalt.err (!%p5754_p9)
}
 0x20c   : > { %s5758_s26 = scalar_lea.vmem %s6530_s4, 640  ;;  %s5899_s24 = smov [#allocation3]  }
 0x20d   : > { %p5759_p12 = scmp.ne.s32.totalorder %s6530_s4, %s5758_s26  ;;  %s5763_s3 = sshll.u32 %s5899_s24, 4  ;;  %s5764_s3 = int_to_ptr.vmem [resolvable:$false] %s5763_s3 }
 0x20e   : > { %s5765_s6 = scalar_lea.vmem %s5764_s3, 1280  ;;  %p5766_p4 = scmp.lt.s32.totalorder %s6530_s4, %s5764_s3 }
 0x20f   : > { %p5761_p1 = pnand %p5759_p12, %p5745_p8  ;;  %p5767_p13 = scmp.lt.s32.totalorder %s5765_s6, %s5758_s26 }
 0x211   : > { %p5762_p10 = pneg %p5761_p1  ;;  %p5768_p0 = por %p5767_p13, %p5766_p4 }
 0x213   : > { %p5769_p2 = pnand %p5768_p0, %p5762_p10 }
 0x215   : > { %5772 = shalt.err (!%p5769_p2)
}
 0x216   : > { %s8023_s5 = smov 8   ;;  %s8024_s7 = smov 128  }
 0x217   : > { %4903 = dma.hbm_to_vmem [thread:$0]  (!%p6521_p11), %s6528_s14, 640, %s6530_s4, %s6532_s25, %s8024_s7, %s8024_s7, %s8023_s5  }
 0x218   : > { %s8025_s2 = sld [smem:[#allocation50_spill]] }
 0x21e   : > { %p8026_p8 = scmp.ne.s32.totalorder %s8025_s2, 0 }
 0x21f   : > { %s8027_s0 = sld [smem:[#allocation46_spill]] (!%p8026_p8) }
 0x220   : > { %729 = sbr.rel (%p8026_p8) target bundleno = 5206 (0x1456), region = 96 }
 0x225   : > { %s6566_s30 = sand.u32 (!%p8026_p8), 1, %s8027_s0  }
 0x226   : > { %s7965_s26 = smul.u32 (!%p8026_p8), 40, %s6566_s30  ;;  %s732_s24 = scalar_lea.sflag (!%p8026_p8), [#allocation4], %s6566_s30 }
 0x228   : > { %s6572_s23 = scalar_lea.vmem [#allocation3], %s7965_s26 }
 0x229   : > { %5818 = dma.done.wait (%p6505_p5), %s732_s24, 640  }
 0x22a   : > { %5820 = vsyncadd (%p6505_p5), %s732_s24, 4294966656  ;;  %s8028_s4 = sld [smem:[#allocation49_spill]] }
 0x230   : > { %p8029_p4 = scmp.eq.s32.totalorder %s8028_s4, 0 }
 0x232   : > { %5822 = dma.done.wait (%p8029_p4), [#allocation7], 656   ;;  %p8030_p10 = pmov %p8029_p4 }
 0x233   : > { %p8031_p11 = pmov %p8029_p4 }
 0x234   : > { %5824 = vsyncadd (%p8030_p10), [#allocation7], 4294966640 }
 0x235   : > { %5826 = dma.done.wait (%p8031_p11), [#allocation10], 656   ;;  %p8032_p3 = pmov %p8029_p4 }
 0x237   : > { %5828 = vsyncadd (%p8032_p3), [#allocation10], 4294966640  ;;  %p8033_p6 = pmov %p8032_p3 }
 0x238   : > { %p8034_p7 = pmov %p8032_p3 }
 0x239   : > { %5830 = dma.done.wait (%p8033_p6), [#allocation13], 32  }
 0x23a   : > { %5832 = vsyncadd (%p8034_p7), [#allocation13], 4294967264  ;;  %p8035_p5 = pmov %p8032_p3 }
 0x23b   : > { %p8036_p9 = pmov %p8032_p3 }
 0x23c   : > { %5834 = dma.done.wait (%p8035_p5), [#allocation16], 512  }
 0x23d   : > { %5836 = vsyncadd (%p8036_p9), [#allocation16], 4294966784  ;;  %p8037_p12 = pmov %p8032_p3 }
 0x23e   : > { %p8038_p1 = pmov %p8032_p3 }
 0x23f   : > { %5838 = dma.done.wait (%p8037_p12), [#allocation19], 32  }
 0x240   : > { %5840 = vsyncadd (%p8038_p1), [#allocation19], 4294967264  ;;  %p8039_p13 = pmov %p8038_p1 }
 0x241   : > { %p8040_p0 = pmov %p8038_p1 }
 0x242   : > { %5842 = dma.done.wait (%p8039_p13), [#allocation22], 512  }
 0x243   : > { %5844 = vsyncadd (%p8040_p0), [#allocation22], 4294966784  ;;  %p8041_p2 = pmov %p8040_p0 }
 0x244   : > { %p8042_p8 = pmov %p8040_p0 }
 0x245   : > { %5846 = dma.done.wait (%p8041_p2), [#allocation25], 32  }
 0x246   : > { %5848 = vsyncadd (%p8042_p8), [#allocation25], 4294967264  ;;  %p8043_p4 = pmov %p8040_p0 }
 0x247   : > { %p8044_p10 = pmov %p8040_p0 }
 0x248   : > { %5850 = dma.done.wait (%p8043_p4), [#allocation28], 272  }
 0x249   : > { %5852 = vsyncadd (%p8044_p10), [#allocation28], 4294967024  ;;  %p8045_p11 = pmov %p8040_p0 }
 0x24a   : > { %p8046_p3 = pmov %p8040_p0 }
 0x24b   : > { %5854 = dma.done.wait (%p8045_p11), [#allocation31], 528  }
 0x24c   : > { %5856 = vsyncadd (%p8046_p3), [#allocation31], 4294966768  ;;  %vm7975_vm0 = vcmask 261120   ;;  %vm7972_vm1 = vcmask 253952   ;;  %v863_v0 = vld [vmem:[%s6572_s23] sm:$0xff]  ;;  %v865_v1 = vld [vmem:[%s6572_s23 + $0x10] sm:$0xff] }
 0x24d   : > { %v864_v2 = vld [vmem:[%s6572_s23 + $0x8] sm:$0xff]  ;;  %v885_v3 = vsel %vm7975_vm0, %v863_v0, 0.0  ;;  %v891_v4 = vsel %vm7975_vm0, %v865_v1, 0.0  ;;  %v866_v6 = vld [vmem:[%s6572_s23 + $0x18] sm:$0xff]  ;;  %v867_v7 = vld [vmem:[%s6572_s23 + $0x20] sm:$0x1] }
 0x24e   : > { %v888_v5 = vsel %vm7975_vm0, %v864_v2, 0.0  ;;  %886 = vadd.xlane.f32.xlu0 %v885_v3  ;;  %892 = vadd.xlane.f32.xlu1 %v891_v4  ;;  %v894_v8 = vsel %vm7975_vm0, %v866_v6, 0.0  ;;  %v898_v9 = vsel %vm7972_vm1, %v867_v7, 0.0  ;;  %v5020_v35 = vld [vmem:[#allocation15] sm:$0xff]   ;;  %v5900_v36 = vmov 0.0   ;;  %v5021_v37 = vld [vmem:[#allocation15 + $0x8] sm:$0xff]  }
 0x24f   : > { %4373 = vmatprep.subr.bf16.mxu0 %v5900_v36  ;;  %vm5901_vm2 = vmmov 0   ;;  %4389 = vmatprep.subr.bf16.mxu1 %v5900_v36  ;;  %v4154_v55 = vld [vmem:[#allocation12] ss:$0 sm:$0xff]  ;;  %v4155_v60 = vld [vmem:[#allocation14] ss:$0 sm:$0xff]  ;;  %s5903_s1 = smov 96  }
 0x250   : > { %4377 = vmatprep.mubr.msk.bf16.mxu0 %vm5901_vm2, %v5900_v36  ;;  %4374 = vmatpush3.bf16.msra.mxu0 %v5020_v35  ;;  %s5904_s14 = smov 88   ;;  %s5905_s25 = smov 120   ;;  %vm1137_vm8 = vcmask 64512   ;;  %vm1294_vm9 = vcmask 1040384  }
 0x251   : > { %4375 = vmatprep.subr.bf16.mxu0 %v5900_v36  ;;  %4395 = vmatprep.mubr.msk.bf16.mxu1 %vm5901_vm2, %v5900_v36  ;;  %s5906_s3 = smov 112   ;;  %s5907_s6 = smov 80  }
 0x252   : > { %889 = vadd.xlane.f32.xlu0 %v888_v5  ;;  %895 = vadd.xlane.f32.xlu1 %v894_v8  ;;  %s5908_s5 = smov 104   ;;  %s5909_s7 = smov 72  }
 0x253   : > { %s5910_s2 = smov 64   ;;  %s7970_s0 = smov 56  }
 0x254   : > { %4376 = vmatpush3.bf16.msra.mxu0 %v5021_v37  ;;  %s7968_s24 = smov 48   ;;  %s7966_s26 = smov 40  }
 0x255   : > { %4407 = vmatprep.subr.bf16.mxu0 %v5900_v36  ;;  %p8115_p7 = scmp.ne.s32.totalorder %s8019_s19, 0 }
 0x256   : > { %899 = vadd.xlane.f32.xlu0 %v898_v9 }
 0x2db   : > { %v887_v10 = vpop.xlane.xlu0 %886  ;;  %v893_v11 = vpop.xlane.xlu1 %892 }
 0x2dc   : > { %v902_v12 = vmul.f32 0.03125, %v887_v10  ;;  %v904_v13 = vmul.f32 0.03125, %v893_v11 }
 0x2de   : > { %v907_v14 = vsub.f32 %v863_v0, %v902_v12  ;;  %v6624_v15 = vsub.f32 %v865_v1, %v904_v13 }
 0x2df   : > { %v890_v16 = vpop.xlane.xlu0 %889  ;;  %v896_v17 = vpop.xlane.xlu1 %895 }
 0x2e0   : > { %v903_v18 = vmul.f32 0.03125, %v890_v16  ;;  %v905_v19 = vmul.f32 0.03125, %v896_v17  ;;  %v912_v20 = vmul.f32 %v907_v14, %v907_v14  ;;  %v914_v21 = vmul.f32 %v6624_v15, %v6624_v15 }
 0x2e2   : > { %v908_v22 = vsub.f32 %v864_v2, %v903_v18  ;;  %v910_v23 = vsub.f32 %v866_v6, %v905_v19  ;;  %v917_v24 = vsel %vm7975_vm0, %v912_v20, 0.0  ;;  %v923_v27 = vsel %vm7975_vm0, %v914_v21, 0.0 }
 0x2e3   : > { %918 = vadd.xlane.f32.xlu1 %v917_v24  ;;  %v900_v25 = vpop.xlane.xlu0 %899 }
 0x2e4   : > { %v906_v26 = vmul.f32 0.03125, %v900_v25  ;;  %v913_v28 = vmul.f32 %v908_v22, %v908_v22  ;;  %v915_v29 = vmul.f32 %v910_v23, %v910_v23 }
 0x2e6   : > { %v911_v30 = vsub.f32 %v867_v7, %v906_v26  ;;  %v920_v31 = vsel %vm7975_vm0, %v913_v28, 0.0  ;;  %v926_v32 = vsel %vm7975_vm0, %v915_v29, 0.0 }
 0x2e7   : > { %924 = vadd.xlane.f32.xlu1 %v923_v27  ;;  %921 = vadd.xlane.f32.xlu0 %v920_v31  ;;  %v880_v31 = vld [vmem:[#allocation6 + $0x10] sm:$0xff] }
 0x2e8   : > { %v916_v33 = vmul.f32 %v911_v30, %v911_v30  ;;  %vm1080_vm3 = vcmp.lt.s32.totalorder %v880_v31, 0 }
 0x2ea   : > { %v929_v34 = vsel %vm7972_vm1, %v916_v33, 0.0  ;;  %v878_v33 = vld [vmem:[#allocation6] sm:$0xff] }
 0x2eb   : > { %927 = vadd.xlane.f32.xlu0 %v926_v32  ;;  %930 = vadd.xlane.f32.xlu1 %v929_v34  ;;  %vm1078_vm4 = vcmp.lt.s32.totalorder %v878_v33, 0  ;;  %v882_v34 = vld [vmem:[#allocation6 + $0x20] sm:$0x1] }
 0x2ec   : > { %vm1082_vm7 = vcmp.lt.s32.totalorder %v882_v34, 0 }
 0x370   : > { %v919_v38 = vpop.xlane.xlu1 %918 }
 0x371   : > { %v932_v39 = vmul.f32 0.03125, %v919_v38  ;;  %v881_v38 = vld [vmem:[#allocation6 + $0x18] sm:$0xff] }
 0x372   : > { %vm1081_vm6 = vcmp.lt.s32.totalorder %v881_v38, 0 }
 0x373   : > { %v937_v40 = vadd.f32 1e-05, %v932_v39 }
 0x374   : > { %v925_v41 = vpop.xlane.xlu1 %924  ;;  %v922_v42 = vpop.xlane.xlu0 %921 }
 0x375   : > { %5034 = vrsqrt.f32 %v937_v40  ;;  %v934_v43 = vmul.f32 0.03125, %v925_v41  ;;  %v933_v44 = vmul.f32 0.03125, %v922_v42 }
 0x377   : > { %v938_v45 = vadd.f32 1e-05, %v933_v44  ;;  %v939_v46 = vadd.f32 1e-05, %v934_v43 }
 0x378   : > { %v931_v47 = vpop.xlane.xlu1 %930  ;;  %v928_v48 = vpop.xlane.xlu0 %927 }
 0x379   : > { %v935_v49 = vmul.f32 0.03125, %v928_v48  ;;  %5036 = vrsqrt.f32 %v938_v45  ;;  %v936_v50 = vmul.f32 0.03125, %v931_v47 }
 0x37a   : > { %5038 = vrsqrt.f32 %v939_v46 }
 0x37b   : > { %v940_v51 = vadd.f32 1e-05, %v935_v49  ;;  %v941_v52 = vadd.f32 1e-05, %v936_v50 }
 0x37d   : > { %5040 = vrsqrt.f32 %v940_v51 }
 0x37e   : > { %5042 = vrsqrt.f32 %v941_v52 }
 0x37f   : > { %v5035_v53 = vpop.eup %5034 }
 0x380   : > { %v947_v54 = vmul.f32 %v5035_v53, %v907_v14  ;;  %v5902_v14 = vmov 0  }
 0x381   : > { %5019 = vset.pattern.permute.xlu0 %v5902_v14  ;;  %5018 = vset.pattern.permute.xlu1 %v5902_v14  ;;  %v1085_v32 = vsel %vm1080_vm3, 1, %v5902_v14  ;;  %v1083_v35 = vsel %vm1078_vm4, 1, %v5902_v14  ;;  %v1086_v39 = vsel %vm1081_vm6, 1, %v5902_v14  ;;  %v1087_v40 = vsel %vm1082_vm7, 1, %v5902_v14 }
 0x382   : > { %v958_v58 = vmul.f32 %v4154_v55, %v947_v54  ;;  %vm1217_vm6 = vcmask 269312  }
 0x383   : > { %v5037_v56 = vpop.eup %5036 }
 0x384   : > { %v948_v57 = vmul.f32 %v5037_v56, %v908_v22  ;;  %v5039_v59 = vpop.eup %5038  ;;  %v969_v63 = vadd.f32 %v4155_v60, %v958_v58 }
 0x385   : > { %v949_v1 = vmul.f32 %v5039_v59, %v6624_v15 }
 0x386   : > { %v959_v61 = vmul.f32 %v4154_v55, %v948_v57 }
 0x387   : > { %v5041_v62 = vpop.eup %5040  ;;  %v960_v6 = vmul.f32 %v4154_v55, %v949_v1 }
 0x388   : > { %v970_v0 = vadd.f32 %v4155_v60, %v959_v61  ;;  %v950_v2 = vmul.f32 %v5041_v62, %v910_v23  ;;  %v5043_v5 = vpop.eup %5042 }
 0x389   : > { %v951_v8 = vmul.f32 %v5043_v5, %v911_v30  ;;  %v971_v9 = vadd.f32 %v4155_v60, %v960_v6  ;;  %v879_v30 = vld [vmem:[#allocation6 + $0x8] sm:$0xff] }
 0x38a   : > { %v974_v3 = vpack.c.bf16 %v970_v0, %v969_v63  ;;  %v961_v4 = vmul.f32 %v4154_v55, %v950_v2  ;;  %vm1079_vm5 = vcmp.lt.s32.totalorder %v879_v30, 0 }
 0x38b   : > { %v962_v11 = vmul.f32 %v4154_v55, %v951_v8  ;;  %v1084_v37 = vsel %vm1079_vm5, 1, %v5902_v14 }
 0x38c   : > { %4378 = vmatmul.mubr.msk.bf16.vlgmr.msra.gmra.mrb[0].mxu0 %vm7975_vm0, %v974_v3  ;;  %v972_v7 = vadd.f32 %v4155_v60, %v961_v4 }
 0x38d   : > { %4381 = vmatprep.mubr.msk.bf16.mxu0 %vm5901_vm2, %v5900_v36  ;;  %v973_v12 = vadd.f32 %v4155_v60, %v962_v11 }
 0x38e   : > { %v975_v10 = vpack.c.bf16 %v972_v7, %v971_v9 }
 0x38f   : > { %v976_v13 = vpack.c.bf16 %v973_v12, %v973_v12 }
 0x394   : > { %4382 = vmatmul.mubr.msk.bf16.gmra.mrb[4].mxu0 %vm7975_vm0, %v975_v10 }
 0x395   : > { %4385 = vmatprep.mubr.msk.bf16.mxu0 %vm5901_vm2, %v5900_v36 }
 0x39c   : > { %4386 = vmatmul.mubr.msk.bf16.gmra.mrb[8].mxu0 %vm7975_vm0, %v976_v13 }
 0x39d   : > { %4413 = vmatprep.mubr.msk.bf16.mxu0 %vm5901_vm2, %v5900_v36 }
 0x45f   : > { %v1032_v15 = vpop.f32.mrb[0].mxu0 }
 0x460   : > { %v4379_v16 = vpop.f32.mrb[1].mxu0 }
 0x461   : > { %v1035_v17 = vpop.f32.mrb[2].mxu0 }
 0x462   : > { %v6653_v18 = vpack.c.bf16 %v1035_v17, %v1032_v15  ;;  %v4380_v19 = vpop.f32.mrb[3].mxu0 }
 0x464   : > { %1131 = vrot.lane.b32.xlu0 %v6653_v18, %s5903_s1 }
 0x467   : > { %v1040_v20 = vpop.f32.mrb[4].mxu0 }
 0x468   : > { %v4383_v21 = vpop.f32.mrb[5].mxu0 }
 0x469   : > { %v1043_v22 = vpop.f32.mrb[6].mxu0 }
 0x46a   : > { %v6657_v23 = vpack.c.bf16 %v1043_v22, %v1040_v20  ;;  %v4384_v24 = vpop.f32.mrb[7].mxu0 }
 0x46c   : > { %1370 = vrot.lane.b32.xlu0 %v6657_v23, %s5904_s14  ;;  %1133 = vrot.lane.b32.xlu1 %v6657_v23, %s5903_s1 }
 0x46f   : > { %v1048_v25 = vpop.f32.mrb[8].mxu0 }
 0x470   : > { %v6663_v26 = vpack.c.bf16 %v1048_v25, %v1048_v25  ;;  %1362 = vrot.lane.b32.xlu0 %v6653_v18, %s5905_s25  ;;  %v4387_v27 = vpop.f32.mrb[9].mxu0 }
 0x471   : > { %v1051_v28 = vpop.f32.mrb[10].mxu0  ;;  %v6779_v27 = vsel %vm1294_vm9, 65535, %v5902_v14 }
 0x472   : > { %1135 = vrot.lane.b32.xlu1 %v6663_v26, %s5903_s1  ;;  %v4388_v29 = vpop.f32.mrb[11].mxu0 }
 0x474   : > { %1364 = vrot.lane.b32.xlu0 %v6657_v23, %s5905_s25 }
 0x476   : > { %1368 = vrot.lane.b32.xlu1 %v6653_v18, %s5904_s14 }
 0x478   : > { %1366 = vrot.lane.b32.xlu0 %v6663_v26, %s5905_s25 }
 0x47a   : > { %1372 = vrot.lane.b32.xlu1 %v6663_v26, %s5904_s14 }
 0x47c   : > { %1614 = vrot.lane.b32.xlu0 %v6653_v18, %s5906_s3 }
 0x47e   : > { %1620 = vrot.lane.b32.xlu1 %v6653_v18, %s5907_s6 }
 0x480   : > { %1616 = vrot.lane.b32.xlu0 %v6657_v23, %s5906_s3 }
 0x482   : > { %1622 = vrot.lane.b32.xlu1 %v6657_v23, %s5907_s6 }
 0x484   : > { %1618 = vrot.lane.b32.xlu0 %v6663_v26, %s5906_s3 }
 0x486   : > { %1624 = vrot.lane.b32.xlu1 %v6663_v26, %s5907_s6 }
 0x488   : > { %1866 = vrot.lane.b32.xlu0 %v6653_v18, %s5908_s5 }
 0x48a   : > { %1872 = vrot.lane.b32.xlu1 %v6653_v18, %s5909_s7 }
 0x48c   : > { %1870 = vrot.lane.b32.xlu0 %v6663_v26, %s5908_s5 }
 0x48e   : > { %1874 = vrot.lane.b32.xlu1 %v6657_v23, %s5909_s7 }
 0x490   : > { %1058 = vperm.xlu0 %5019, %v879_v30   ;;  %v1069_v30 = vlaneseq }
 0x492   : > { %1876 = vrot.lane.b32.xlu1 %v6663_v26, %s5909_s7 }
 0x494   : > { %1061 = vperm.xlu0 %5019, %v880_v31   ;;  %v1070_v31 = vshrl.u32 %v1069_v30, 7 }
 0x496   : > { %1868 = vrot.lane.b32.xlu1 %v6657_v23, %s5908_s5 }
 0x498   : > { %1095 = vperm.xlu0 %5019, %v1085_v32   ;;  %v883_v32 = vld [vmem:[#allocation8] sm:$0x1] }
 0x499   : > { %vm1113_vm10 = vcmp.lt.s32.totalorder %v883_v32, 0 }
 0x49a   : > { %1055 = vperm.xlu1 %5018, %v878_v33   ;;  %v6792_v33 = vsub.s32 0, %v1070_v31 }
 0x49c   : > { %1067 = vperm.xlu0 %5019, %v882_v34   ;;  %v1072_v34 = vrot.slane %v883_v32, %v6792_v33 }
 0x49e   : > { %1089 = vperm.xlu1 %5018, %v1083_v35   ;;  %v1114_v35 = vsel %vm1113_vm10, 1, %v5902_v14 }
 0x4a0   : > { %1279 = vrot.lane.b32.xlu0 %v6657_v23, %s5910_s2 }
 0x4a2   : > { %1092 = vperm.xlu1 %5018, %v1084_v37   ;;  %v1118_v37 = vrot.slane %v1114_v35, %v6792_v33 }
 0x4a4   : > { %vm6797_vm15 = vcmp.eq.s32.totalorder %v1118_v37, 1 }
 0x4a6   : > { %1064 = vperm.xlu1 %5018, %v881_v38  }
 0x4aa   : > { %1098 = vperm.xlu1 %5018, %v1086_v39  }
 0x4ae   : > { %1101 = vperm.xlu1 %5018, %v1087_v40  }
 0x4b2   : > { %1277 = vrot.lane.b32.xlu1 %v6653_v18, %s5910_s2 }
 0x4b6   : > { %1511 = vrot.lane.b32.xlu1 %v6653_v18, %s7970_s0 }
 0x4ba   : > { %1281 = vrot.lane.b32.xlu1 %v6663_v26, %s5910_s2 }
 0x4d6   : > { %v1132_v41 = vpop.permute.xlu0 %1131 }
 0x4d7   : > { %v1148_v42 = vsel %vm1137_vm8, %v1132_v41, 0 }
 0x4d8   : > { %4390 = vmatpush3.bf16.xpose.msra.mxu1 %v1148_v42 }
 0x4d9   : > { %4391 = vmatprep.subr.bf16.mxu1 %v5900_v36 }
 0x4de   : > { %v1134_v43 = vpop.permute.xlu1 %1133  ;;  %v1371_v48 = vpop.permute.xlu0 %1370 }
 0x4df   : > { %v1151_v44 = vsel %vm1137_vm8, %v1134_v43, 0  ;;  %v1387_v54 = vsel %vm1137_vm8, %v1371_v48, 0 }
 0x4e0   : > { %4392 = vmatpush3.bf16.xpose.msra.mxu1 %v1151_v44 }
 0x4e1   : > { %4393 = vmatprep.subr.bf16.mxu1 %v5900_v36 }
 0x4e2   : > { %v1363_v50 = vpop.permute.xlu0 %1362 }
 0x4e4   : > { %v1136_v45 = vpop.permute.xlu1 %1135 }
 0x4e5   : > { %v1154_v46 = vsel %vm1137_vm8, %v1136_v45, 0 }
 0x4e6   : > { %v1365_v53 = vpop.permute.xlu0 %1364 }
 0x4e8   : > { %v1369_v47 = vpop.permute.xlu1 %1368  ;;  %4394 = vmatpush3.bf16.xpose.msra.mxu1 %v1154_v46 }
 0x4e9   : > { %4425 = vmatprep.subr.bf16.mxu1 %v5900_v36  ;;  %v1384_v51 = vsel %vm1137_vm8, %v1369_v47, 0 }
 0x4ea   : > { %v1367_v56 = vpop.permute.xlu0 %1366 }
 0x4ec   : > { %v1373_v49 = vpop.permute.xlu1 %1372 }
 0x4ed   : > { %v1390_v58 = vsel %vm1137_vm8, %v1373_v49, 0 }
 0x4ee   : > { %v1615_v59 = vpop.permute.xlu0 %1614 }
 0x4ef   : > { %4396 = vmatmul.mubr.msk.bf16.vlgmr.msra.gmra.mrb[0].mxu1 %vm1137_vm8, %v6653_v18 }
 0x4f0   : > { %4426 = vmatpush3.bf16.xpose.msra.mxu1 %v1384_v51  ;;  %4399 = vmatprep.mubr.msk.bf16.mxu1 %vm5901_vm2, %v5900_v36  ;;  %v1621_v52 = vpop.permute.xlu1 %1620 }
 0x4f1   : > { %4427 = vmatprep.subr.bf16.mxu1 %v5900_v36  ;;  %v1636_v61 = vsel %vm1137_vm8, %v1621_v52, 0 }
 0x4f2   : > { %v1617_v62 = vpop.permute.xlu0 %1616 }
 0x4f4   : > { %v1623_v55 = vpop.permute.xlu1 %1622 }
 0x4f5   : > { %v1639_v1 = vsel %vm1137_vm8, %v1623_v55, 0 }
 0x4f6   : > { %v1619_v0 = vpop.permute.xlu0 %1618 }
 0x4f7   : > { %4400 = vmatmul.mubr.msk.bf16.gmra.mrb[4].mxu1 %vm1137_vm8, %v6657_v23 }
 0x4f8   : > { %4428 = vmatpush3.bf16.xpose.msra.mxu1 %v1387_v54  ;;  %4403 = vmatprep.mubr.msk.bf16.mxu1 %vm5901_vm2, %v5900_v36  ;;  %v1625_v57 = vpop.permute.xlu1 %1624 }
 0x4f9   : > { %4429 = vmatprep.subr.bf16.mxu1 %v5900_v36  ;;  %v1642_v5 = vsel %vm1137_vm8, %v1625_v57, 0 }
 0x4fa   : > { %v1867_v3 = vpop.permute.xlu0 %1866 }
 0x4fc   : > { %v1873_v60 = vpop.permute.xlu1 %1872 }
 0x4fd   : > { %v1888_v10 = vsel %vm1137_vm8, %v1873_v60, 0 }
 0x4fe   : > { %v1871_v6 = vpop.permute.xlu0 %1870 }
 0x4ff   : > { %4404 = vmatmul.mubr.msk.bf16.gmra.mrb[8].mxu1 %vm1137_vm8, %v6663_v26 }
 0x500   : > { %4430 = vmatpush3.bf16.xpose.msra.mxu1 %v1390_v58  ;;  %4431 = vmatprep.mubr.msk.bf16.mxu1 %vm5901_vm2, %v5900_v36  ;;  %v1875_v63 = vpop.permute.xlu1 %1874 }
 0x501   : > { %4461 = vmatprep.subr.bf16.mxu1 %v5900_v36  ;;  %v1891_v15 = vsel %vm1137_vm8, %v1875_v63, 0 }
 0x504   : > { %v1877_v2 = vpop.permute.xlu1 %1876 }
 0x505   : > { %v1894_v20 = vsel %vm1137_vm8, %v1877_v2, 0 }
 0x507   : > { %4432 = vmatmul.mubr.msk.bf16.vlgmr.msra.gmra.mrb[12].mxu1 %vm1137_vm8, %v1363_v50 }
 0x508   : > { %4462 = vmatpush3.bf16.xpose.msra.mxu1 %v1636_v61  ;;  %4435 = vmatprep.mubr.msk.bf16.mxu1 %vm5901_vm2, %v5900_v36  ;;  %v1869_v4 = vpop.permute.xlu1 %1868 }
 0x509   : > { %4463 = vmatprep.subr.bf16.mxu1 %v5900_v36 }
 0x50f   : > { %4436 = vmatmul.mubr.msk.bf16.gmra.mrb[16].mxu1 %vm1137_vm8, %v1365_v53  ;;  %v1059_v8 = vpop.permute.xlu0 %1058 }
 0x510   : > { %4464 = vmatpush3.bf16.xpose.msra.mxu1 %v1639_v1  ;;  %4439 = vmatprep.mubr.msk.bf16.mxu1 %vm5901_vm2, %v5900_v36  ;;  %vm1074_vm13 = vcmp.eq.s32.totalorder %v1059_v8, %v1072_v34 }
 0x511   : > { %4465 = vmatprep.subr.bf16.mxu1 %v5900_v36 }
 0x513   : > { %v1062_v12 = vpop.permute.xlu0 %1061 }
 0x514   : > { %vm1075_vm7 = vcmp.eq.s32.totalorder %v1062_v12, %v1072_v34 }
 0x517   : > { %4440 = vmatmul.mubr.msk.bf16.gmra.mrb[20].mxu1 %vm1137_vm8, %v1367_v56  ;;  %v1096_v16 = vpop.permute.xlu0 %1095 }
 0x518   : > { %4466 = vmatpush3.bf16.xpose.msra.mxu1 %v1642_v5  ;;  %4467 = vmatprep.mubr.msk.bf16.mxu1 %vm5901_vm2, %v5900_v36  ;;  %vm1105_vm9 = vcmp.eq.s32.totalorder %v1096_v16, 1 }
 0x519   : > { %v1056_v7 = vpop.permute.xlu1 %1055  ;;  %4497 = vmatprep.subr.bf16.mxu1 %v5900_v36 }
 0x51a   : > { %vm1073_vm11 = vcmp.eq.s32.totalorder %v1056_v7, %v1072_v34 }
 0x51b   : > { %v6768_v21 = vpop.permute.xlu0 %1067 }
 0x51d   : > { %v1090_v9 = vpop.permute.xlu1 %1089 }
 0x51e   : > { %vm1103_vm12 = vcmp.eq.s32.totalorder %v1090_v9, 1 }
 0x51f   : > { %4468 = vmatmul.mubr.msk.bf16.vlgmr.msra.gmra.mrb[24].mxu1 %vm1137_vm8, %v1615_v59  ;;  %v1280_v24 = vpop.permute.xlu0 %1279  ;;  %vm1108_vm3 = vmor %vm1073_vm11, %vm1103_vm12 }
 0x520   : > { %4498 = vmatpush3.bf16.xpose.msra.mxu1 %v1888_v10  ;;  %4471 = vmatprep.mubr.msk.bf16.mxu1 %vm5901_vm2, %v5900_v36  ;;  %vm6803_vm5 = vmor %vm1108_vm3, %vm6797_vm15 }
 0x521   : > { %v1093_v11 = vpop.permute.xlu1 %1092  ;;  %4499 = vmatprep.subr.bf16.mxu1 %v5900_v36 }
 0x522   : > { %vm1104_vm14 = vcmp.eq.s32.totalorder %v1093_v11, 1 }
 0x523   : > { %vm1109_vm4 = vmor %vm1074_vm13, %vm1104_vm14 }
 0x524   : > { %vm6809_vm10 = vmor %vm1109_vm4, %vm6797_vm15 }
 0x525   : > { %v6758_v13 = vpop.permute.xlu1 %1064  ;;  %vm1110_vm13 = vmor %vm1075_vm7, %vm1105_vm9  ;;  %vm1077_vm7 = vcmp.eq.s32.totalorder %v6768_v21, %v1072_v34 }
 0x526   : > { %vm1076_vm11 = vcmp.eq.s32.totalorder %v6758_v13, %v1072_v34  ;;  %vm6828_vm3 = vmor %vm1110_vm13, %vm6797_vm15 }
 0x527   : > { %4472 = vmatmul.mubr.msk.bf16.gmra.mrb[28].mxu1 %vm1137_vm8, %v1617_v62 }
 0x528   : > { %4500 = vmatpush3.bf16.xpose.msra.mxu1 %v1891_v15  ;;  %4475 = vmatprep.mubr.msk.bf16.mxu1 %vm5901_vm2, %v5900_v36 }
 0x529   : > { %v1099_v17 = vpop.permute.xlu1 %1098  ;;  %4501 = vmatprep.subr.bf16.mxu1 %v5900_v36 }
 0x52a   : > { %vm1106_vm12 = vcmp.eq.s32.totalorder %v1099_v17, 1 }
 0x52b   : > { %vm1111_vm14 = vmor %vm1076_vm11, %vm1106_vm12  ;;  %vm1230_vm12 = vcmask 262144  }
 0x52c   : > { %vm6834_vm4 = vmor %vm1111_vm14, %vm6797_vm15  ;;  %vm7977_vm14 = vcmask 261312  }
 0x52d   : > { %v6765_v19 = vpop.permute.xlu1 %1101 }
 0x52e   : > { %vm1107_vm9 = vcmp.eq.s32.totalorder %v6765_v19, 1 }
 0x52f   : > { %4476 = vmatmul.mubr.msk.bf16.gmra.mrb[32].mxu1 %vm1137_vm8, %v1619_v0  ;;  %vm1112_vm11 = vmor %vm1077_vm7, %vm1107_vm9  ;;  %vm7973_vm7 = vcmask 254144  }
 0x530   : > { %4502 = vmatpush3.bf16.xpose.msra.mxu1 %v1894_v20  ;;  %4503 = vmatprep.mubr.msk.bf16.mxu1 %vm5901_vm2, %v5900_v36  ;;  %vm6854_vm13 = vmor %vm1112_vm11, %vm6797_vm15  ;;  %vm1360_vm15 = vcmask 57344  }
 0x531   : > { %v1278_v22 = vpop.permute.xlu1 %1277  ;;  %4533 = vmatprep.subr.bf16.mxu1 %v5900_v36 }
 0x532   : > { %4408 = vmatpush3.bf16.msra.mxu0 %v1278_v22 }
 0x533   : > { %4409 = vmatprep.subr.bf16.mxu0 %v5900_v36 }
 0x535   : > { %v6775_v25 = vpop.permute.xlu1 %1511 }
 0x536   : > { %4410 = vmatpush3.bf16.msra.mxu0 %v1280_v24 }
 0x537   : > { %4504 = vmatmul.mubr.msk.bf16.vlgmr.msra.gmra.mrb[36].mxu1 %vm1137_vm8, %v1867_v3  ;;  %4411 = vmatprep.subr.bf16.mxu0 %v5900_v36 }
 0x538   : > { %4507 = vmatprep.mubr.msk.bf16.mxu1 %vm5901_vm2, %v5900_v36 }
 0x539   : > { %v1282_v28 = vpop.permute.xlu1 %1281 }
 0x53a   : > { %v1298_v29 = vand.u32 %v6779_v27, %v1282_v28 }
 0x53c   : > { %4412 = vmatpush3.bf16.msra.mxu0 %v1298_v29 }
 0x53d   : > { %4443 = vmatprep.subr.bf16.mxu0 %v5900_v36 }
 0x53f   : > { %4508 = vmatmul.mubr.msk.bf16.gmra.mrb[40].mxu1 %vm1137_vm8, %v1869_v4 }
 0x540   : > { %4511 = vmatprep.mubr.msk.bf16.mxu1 %vm5901_vm2, %v5900_v36 }
 0x547   : > { %4512 = vmatmul.mubr.msk.bf16.gmra.mrb[44].mxu1 %vm1137_vm8, %v1871_v6 }
 0x548   : > { %4537 = vmatprep.mubr.msk.bf16.mxu1 %vm5901_vm2, %v5900_v36 }
 0x5c2   : > { %v1190_v41 = vpop.f32.mrb[0].mxu1 }
 0x5c3   : > { %v6815_v42 = vsel %vm6803_vm5, %v1190_v41, -1e+30  ;;  %v4397_v43 = vpop.f32.mrb[1].mxu1 }
 0x5c4   : > { %v1193_v44 = vpop.f32.mrb[2].mxu1  ;;  %v1218_v45 = vsel %vm1217_vm6, %v6815_v42, -inf }
 0x5c5   : > { %v6822_v46 = vsel %vm6809_vm10, %v1193_v44, -1e+30  ;;  %1219 = vmax.xlane.f32.xlu0 %v1218_v45  ;;  %v4398_v47 = vpop.f32.mrb[3].mxu1 }
 0x5c6   : > { %v1221_v48 = vsel %vm1217_vm6, %v6822_v46, -inf }
 0x5c7   : > { %1222 = vmax.xlane.f32.xlu1 %v1221_v48 }
 0x5ca   : > { %v1198_v51 = vpop.f32.mrb[4].mxu1 }
 0x5cb   : > { %v6840_v52 = vsel %vm6828_vm3, %v1198_v51, -1e+30  ;;  %v4401_v53 = vpop.f32.mrb[5].mxu1 }
 0x5cc   : > { %v1201_v54 = vpop.f32.mrb[6].mxu1  ;;  %v1224_v55 = vsel %vm1217_vm6, %v6840_v52, -inf }
 0x5cd   : > { %v6848_v56 = vsel %vm6834_vm4, %v1201_v54, -1e+30  ;;  %v4402_v57 = vpop.f32.mrb[7].mxu1  ;;  %1225 = vmax.xlane.f32.xlu0 %v1224_v55 }
 0x5ce   : > { %v1227_v58 = vsel %vm1217_vm6, %v6848_v56, -inf }
 0x5d1   : > { %1228 = vmax.xlane.f32.xlu0 %v1227_v58 }
 0x5d2   : > { %v1206_v60 = vpop.f32.mrb[8].mxu1 }
 0x5d3   : > { %v6860_v61 = vsel %vm6854_vm13, %v1206_v60, -1e+30  ;;  %v4405_v62 = vpop.f32.mrb[9].mxu1 }
 0x5d4   : > { %v1209_v63 = vpop.f32.mrb[10].mxu1  ;;  %v1231_v0 = vsel %vm1230_vm12, %v6860_v61, -inf }
 0x5d5   : > { %v4406_v1 = vpop.f32.mrb[11].mxu1  ;;  %1232 = vmax.xlane.f32.xlu0 %v1231_v0 }
 0x5da   : > { %v1426_v2 = vpop.f32.mrb[12].mxu1 }
 0x5db   : > { %v6866_v3 = vsel %vm6803_vm5, %v1426_v2, -1e+30  ;;  %v4433_v4 = vpop.f32.mrb[13].mxu1 }
 0x5dc   : > { %v1429_v5 = vpop.f32.mrb[14].mxu1  ;;  %v1453_v6 = vsel %vm1217_vm6, %v6866_v3, -inf }
 0x5dd   : > { %v6872_v7 = vsel %vm6809_vm10, %v1429_v5, -1e+30  ;;  %v4434_v8 = vpop.f32.mrb[15].mxu1  ;;  %1454 = vmax.xlane.f32.xlu1 %v1453_v6 }
 0x5de   : > { %v1456_v9 = vsel %vm1217_vm6, %v6872_v7, -inf }
 0x5df   : > { %1457 = vmax.xlane.f32.xlu0 %v1456_v9 }
 0x5e2   : > { %v1434_v10 = vpop.f32.mrb[16].mxu1 }
 0x5e3   : > { %v6878_v11 = vsel %vm6828_vm3, %v1434_v10, -1e+30  ;;  %v4437_v12 = vpop.f32.mrb[17].mxu1 }
 0x5e4   : > { %v1437_v13 = vpop.f32.mrb[18].mxu1  ;;  %v1459_v15 = vsel %vm1217_vm6, %v6878_v11, -inf }
 0x5e5   : > { %v6884_v16 = vsel %vm6834_vm4, %v1437_v13, -1e+30  ;;  %v4438_v17 = vpop.f32.mrb[19].mxu1  ;;  %1460 = vmax.xlane.f32.xlu1 %v1459_v15 }
 0x5e6   : > { %v1462_v19 = vsel %vm1217_vm6, %v6884_v16, -inf }
 0x5e7   : > { %1463 = vmax.xlane.f32.xlu0 %v1462_v19 }
 0x5ea   : > { %v1442_v20 = vpop.f32.mrb[20].mxu1 }
 0x5eb   : > { %v4441_v21 = vpop.f32.mrb[21].mxu1  ;;  %v6900_v60 = vsel %vm6854_vm13, %v1442_v20, -1e+30 }
 0x5ec   : > { %v1445_v22 = vpop.f32.mrb[22].mxu1  ;;  %v1465_v5 = vsel %vm1230_vm12, %v6900_v60, -inf }
 0x5ed   : > { %v4442_v24 = vpop.f32.mrb[23].mxu1 }
 0x5f2   : > { %v1678_v28 = vpop.f32.mrb[24].mxu1 }
 0x5f3   : > { %v4469_v29 = vpop.f32.mrb[25].mxu1  ;;  %v6896_v58 = vsel %vm6803_vm5, %v1678_v28, -1e+30 }
 0x5f4   : > { %v1681_v30 = vpop.f32.mrb[26].mxu1  ;;  %v1705_v0 = vsel %vm1217_vm6, %v6896_v58, -inf }
 0x5f5   : > { %v4470_v31 = vpop.f32.mrb[27].mxu1  ;;  %v6912_v6 = vsel %vm6809_vm10, %v1681_v30, -1e+30 }
 0x5f6   : > { %1515 = vrot.lane.b32.xlu1 %v6663_v26, %s7970_s0  ;;  %v1708_v10 = vsel %vm1217_vm6, %v6912_v6, -inf }
 0x5fa   : > { %v1686_v32 = vpop.f32.mrb[28].mxu1  ;;  %1763 = vrot.lane.b32.xlu1 %v6653_v18, %s7968_s24 }
 0x5fb   : > { %v4473_v34 = vpop.f32.mrb[29].mxu1  ;;  %v6906_v1 = vsel %vm6828_vm3, %v1686_v32, -1e+30 }
 0x5fc   : > { %v1689_v35 = vpop.f32.mrb[30].mxu1  ;;  %v1711_v8 = vsel %vm1217_vm6, %v6906_v1, -inf }
 0x5fd   : > { %v4474_v37 = vpop.f32.mrb[31].mxu1  ;;  %1513 = vrot.lane.b32.xlu0 %v6657_v23, %s7970_s0  ;;  %v6924_v12 = vsel %vm6834_vm4, %v1689_v35, -1e+30  ;;  %s5916_s0 = smov 24  }
 0x5fe   : > { %v1714_v17 = vsel %vm1217_vm6, %v6924_v12, -inf }
 0x602   : > { %v1694_v38 = vpop.f32.mrb[32].mxu1 }
 0x603   : > { %v4477_v41 = vpop.f32.mrb[33].mxu1  ;;  %v6918_v9 = vsel %vm6854_vm13, %v1694_v38, -1e+30 }
 0x604   : > { %v1697_v43 = vpop.f32.mrb[34].mxu1  ;;  %v1717_v13 = vsel %vm1230_vm12, %v6918_v9, -inf }
 0x605   : > { %v4478_v44 = vpop.f32.mrb[35].mxu1 }
 0x60a   : > { %v1930_v45 = vpop.f32.mrb[36].mxu1 }
 0x60b   : > { %v4505_v47 = vpop.f32.mrb[37].mxu1  ;;  %v6936_v19 = vsel %vm6803_vm5, %v1930_v45, -1e+30  ;;  %vm1607_vm5 = vcmask 130112  }
 0x60c   : > { %v1933_v48 = vpop.f32.mrb[38].mxu1  ;;  %v1957_v40 = vsel %vm1217_vm6, %v6936_v19, -inf }
 0x60d   : > { %v4506_v51 = vpop.f32.mrb[39].mxu1  ;;  %v6930_v15 = vsel %vm6809_vm10, %v1933_v48, -1e+30  ;;  %vm1859_vm10 = vcmask 195712  }
 0x60e   : > { %v1960_v20 = vsel %vm1217_vm6, %v6930_v15, -inf }
 0x612   : > { %v1938_v53 = vpop.f32.mrb[40].mxu1 }
 0x613   : > { %v4509_v54 = vpop.f32.mrb[41].mxu1  ;;  %v6948_v22 = vsel %vm6828_vm3, %v1938_v53, -1e+30  ;;  %vm7976_vm3 = vcmask 122944  }
 0x614   : > { %v1941_v55 = vpop.f32.mrb[42].mxu1  ;;  %v1963_v24 = vsel %vm1217_vm6, %v6948_v22, -inf }
 0x615   : > { %v4510_v57 = vpop.f32.mrb[43].mxu1  ;;  %v6942_v21 = vsel %vm6834_vm4, %v1941_v55, -1e+30  ;;  %vm7974_vm4 = vcmask 188544  }
 0x616   : > { %v1966_v39 = vsel %vm1217_vm6, %v6942_v21, -inf }
 0x61a   : > { %v1946_v62 = vpop.f32.mrb[44].mxu1 }
 0x61b   : > { %v4513_v63 = vpop.f32.mrb[45].mxu1  ;;  %v6956_v50 = vsel %vm6854_vm13, %v1946_v62, -1e+30 }
 0x61c   : > { %v1949_v2 = vpop.f32.mrb[46].mxu1  ;;  %1706 = vmax.xlane.f32.xlu0 %v1705_v0  ;;  %v1969_v28 = vsel %vm1230_vm12, %v6956_v50, -inf }
 0x61d   : > { %v4514_v4 = vpop.f32.mrb[47].mxu1 }
 0x61e   : > { %1466 = vmax.xlane.f32.xlu1 %v1465_v5 }
 0x620   : > { %1712 = vmax.xlane.f32.xlu0 %v1711_v8 }
 0x622   : > { %1709 = vmax.xlane.f32.xlu1 %v1708_v10 }
 0x624   : > { %1718 = vmax.xlane.f32.xlu0 %v1717_v13 }
 0x626   : > { %1715 = vmax.xlane.f32.xlu1 %v1714_v17 }
 0x628   : > { %1961 = vmax.xlane.f32.xlu0 %v1960_v20 }
 0x62a   : > { %1958 = vmax.xlane.f32.xlu1 %v1957_v40 }
 0x62c   : > { %1967 = vmax.xlane.f32.xlu0 %v1966_v39 }
 0x62e   : > { %1964 = vmax.xlane.f32.xlu1 %v1963_v24 }
 0x632   : > { %1970 = vmax.xlane.f32.xlu1 %v1969_v28 }
 0x652   : > { %v1220_v49 = vpop.xlane.xlu0 %1219 }
 0x653   : > { %v1234_v29 = vsub.f32 %v6815_v42, %v1220_v49 }
 0x654   : > { %v1223_v30 = vpop.xlane.xlu1 %1222 }
 0x655   : > { %v1239_v31 = vmul.f32 1.442695, %v1234_v29  ;;  %v1235_v32 = vsub.f32 %v6822_v46, %v1223_v30 }
 0x657   : > { %5044 = vpow2.f32 %v1239_v31  ;;  %v1241_v34 = vmul.f32 1.442695, %v1235_v32 }
 0x659   : > { %5046 = vpow2.f32 %v1241_v34 }
 0x65a   : > { %v1226_v35 = vpop.xlane.xlu0 %1225 }
 0x65b   : > { %v1236_v59 = vsub.f32 %v6840_v52, %v1226_v35 }
 0x65d   : > { %v1243_v37 = vmul.f32 1.442695, %v1236_v59 }
 0x65e   : > { %v1229_v38 = vpop.xlane.xlu0 %1228 }
 0x65f   : > { %5048 = vpow2.f32 %v1243_v37  ;;  %v1237_v41 = vsub.f32 %v6848_v56, %v1229_v38 }
 0x661   : > { %v6964_v43 = vpop.eup %5044  ;;  %v1245_v44 = vmul.f32 1.442695, %v1237_v41 }
 0x662   : > { %v1233_v45 = vpop.xlane.xlu0 %1232  ;;  %v1249_v42 = vsel %vm1217_vm6, %v6964_v43, 0.0 }
 0x663   : > { %v6968_v47 = vpop.eup %5046  ;;  %5050 = vpow2.f32 %v1245_v44  ;;  %v1238_v46 = vsub.f32 %v6860_v61, %v1233_v45  ;;  %1250 = vadd.xlane.f32.xlu1 %v1249_v42 }
 0x664   : > { %v1252_v52 = vsel %vm1217_vm6, %v6968_v47, 0.0 }
 0x665   : > { %v1247_v48 = vmul.f32 1.442695, %v1238_v46  ;;  %1253 = vadd.xlane.f32.xlu0 %v1252_v52 }
 0x667   : > { %5052 = vpow2.f32 %v1247_v48 }
 0x669   : > { %v6973_v56 = vpop.eup %5048 }
 0x66a   : > { %v1455_v51 = vpop.xlane.xlu1 %1454  ;;  %v1255_v53 = vsel %vm1217_vm6, %v6973_v56, 0.0 }
 0x66b   : > { %v1468_v54 = vsub.f32 %v6866_v3, %v1455_v51  ;;  %1256 = vadd.xlane.f32.xlu0 %v1255_v53 }
 0x66c   : > { %v1458_v55 = vpop.xlane.xlu0 %1457 }
 0x66d   : > { %v6978_v57 = vpop.eup %5050  ;;  %v1473_v61 = vmul.f32 1.442695, %v1468_v54  ;;  %v1469_v62 = vsub.f32 %v6872_v7, %v1458_v55 }
 0x66e   : > { %v1258_v63 = vsel %vm1217_vm6, %v6978_v57, 0.0 }
 0x66f   : > { %5054 = vpow2.f32 %v1473_v61  ;;  %v1475_v0 = vmul.f32 1.442695, %v1469_v62  ;;  %1259 = vadd.xlane.f32.xlu1 %v1258_v63 }
 0x671   : > { %v6983_v2 = vpop.eup %5052  ;;  %5056 = vpow2.f32 %v1475_v0 }
 0x672   : > { %v1461_v4 = vpop.xlane.xlu1 %1460  ;;  %v1261_v3 = vsel %vm1230_vm12, %v6983_v2, 0.0 }
 0x673   : > { %v1470_v5 = vsub.f32 %v6878_v11, %v1461_v4  ;;  %1262 = vadd.xlane.f32.xlu0 %v1261_v3 }
 0x674   : > { %v1464_v40 = vpop.xlane.xlu0 %1463 }
 0x675   : > { %v1477_v8 = vmul.f32 1.442695, %v1470_v5  ;;  %v1471_v39 = vsub.f32 %v6884_v16, %v1464_v40 }
 0x676   : > { %v7005_v28 = vpop.permute.xlu1 %1515 }
 0x677   : > { %5058 = vpow2.f32 %v1477_v8  ;;  %v1479_v24 = vmul.f32 1.442695, %v1471_v39 }
 0x678   : > { %v7007_v49 = vpop.permute.xlu0 %1513 }
 0x679   : > { %v6988_v10 = vpop.eup %5054  ;;  %5060 = vpow2.f32 %v1479_v24 }
 0x67a   : > { %v1483_v7 = vsel %vm1217_vm6, %v6988_v10, 0.0  ;;  %v7009_v29 = vpop.permute.xlu1 %1763 }
 0x67b   : > { %v6992_v13 = vpop.eup %5056  ;;  %1484 = vadd.xlane.f32.xlu1 %v1483_v7 }
 0x67c   : > { %v1486_v17 = vsel %vm1217_vm6, %v6992_v13, 0.0 }
 0x67d   : > { %1487 = vadd.xlane.f32.xlu0 %v1486_v17 }
 0x681   : > { %v6996_v20 = vpop.eup %5058 }
 0x682   : > { %v1489_v11 = vsel %vm1217_vm6, %v6996_v20, 0.0 }
 0x683   : > { %1490 = vadd.xlane.f32.xlu0 %v1489_v11  ;;  %v7012_v34 = vpop.eup %5060 }
 0x684   : > { %v1492_v44 = vsel %vm1217_vm6, %v7012_v34, 0.0 }
 0x68c   : > { %1767 = vrot.lane.b32.xlu1 %v6663_v26, %s7968_s24 }
 0x699   : > { %1765 = vrot.lane.b32.xlu0 %v6657_v23, %s7968_s24  ;;  %s5915_s24 = smov 16  }
 0x6a9   : > { %v1707_v30 = vpop.xlane.xlu0 %1706 }
 0x6aa   : > { %v1720_v31 = vsub.f32 %v6896_v58, %v1707_v30 }
 0x6ab   : > { %v1467_v32 = vpop.xlane.xlu1 %1466 }
 0x6ac   : > { %v1725_v35 = vmul.f32 1.442695, %v1720_v31  ;;  %v1472_v59 = vsub.f32 %v6900_v60, %v1467_v32 }
 0x6ad   : > { %v1713_v37 = vpop.xlane.xlu0 %1712 }
 0x6ae   : > { %5062 = vpow2.f32 %v1725_v35  ;;  %v1481_v16 = vmul.f32 1.442695, %v1472_v59  ;;  %v1722_v38 = vsub.f32 %v6906_v1, %v1713_v37 }
 0x6af   : > { %v1710_v41 = vpop.xlane.xlu1 %1709 }
 0x6b0   : > { %5064 = vpow2.f32 %v1481_v16  ;;  %v1721_v45 = vsub.f32 %v6912_v6, %v1710_v41  ;;  %1493 = vadd.xlane.f32.xlu1 %v1492_v44  ;;  %v1729_v42 = vmul.f32 1.442695, %v1722_v38 }
 0x6b1   : > { %v1719_v58 = vpop.xlane.xlu0 %1718 }
 0x6b2   : > { %v1727_v46 = vmul.f32 1.442695, %v1721_v45  ;;  %v1724_v52 = vsub.f32 %v6918_v9, %v1719_v58 }
 0x6b3   : > { %v1716_v48 = vpop.xlane.xlu1 %1715 }
 0x6b4   : > { %5066 = vpow2.f32 %v1727_v46  ;;  %v1723_v60 = vsub.f32 %v6924_v12, %v1716_v48  ;;  %v1733_v1 = vmul.f32 1.442695, %v1724_v52 }
 0x6b5   : > { %v1962_v51 = vpop.xlane.xlu0 %1961  ;;  %5068 = vpow2.f32 %v1729_v42 }
 0x6b6   : > { %v1731_v53 = vmul.f32 1.442695, %v1723_v60  ;;  %v1973_v54 = vsub.f32 %v6930_v15, %v1962_v51 }
 0x6b7   : > { %v1959_v55 = vpop.xlane.xlu1 %1958 }
 0x6b8   : > { %v7022_v61 = vpop.eup %5062  ;;  %5070 = vpow2.f32 %v1731_v53  ;;  %v1972_v6 = vsub.f32 %v6936_v19, %v1959_v55  ;;  %v1979_v63 = vmul.f32 1.442695, %v1973_v54 }
 0x6b9   : > { %v1735_v62 = vsel %vm1217_vm6, %v7022_v61, 0.0  ;;  %5072 = vpow2.f32 %v1733_v1  ;;  %v1968_v59 = vpop.xlane.xlu0 %1967 }
 0x6ba   : > { %v7027_v9 = vpop.eup %5064  ;;  %v1977_v12 = vmul.f32 1.442695, %v1972_v6  ;;  %1736 = vadd.xlane.f32.xlu1 %v1735_v62  ;;  %v1975_v37 = vsub.f32 %v6942_v21, %v1968_v59  ;;  %v1529_v62 = vand.u32 %v7005_v28, %v6779_v27 }
 0x6bb   : > { %v1965_v0 = vpop.xlane.xlu1 %1964  ;;  %v1495_v4 = vsel %vm1230_vm12, %v7027_v9, 0.0 }
 0x6bc   : > { %5074 = vpow2.f32 %v1977_v12  ;;  %v1974_v15 = vsub.f32 %v6948_v22, %v1965_v0  ;;  %1496 = vadd.xlane.f32.xlu0 %v1495_v4  ;;  %v1983_v41 = vmul.f32 1.442695, %v1975_v37 }
 0x6bd   : > { %5076 = vpow2.f32 %v1979_v63 }
 0x6be   : > { %v7032_v3 = vpop.eup %5066  ;;  %v1981_v19 = vmul.f32 1.442695, %v1974_v15 }
 0x6bf   : > { %v1738_v5 = vsel %vm1217_vm6, %v7032_v3, 0.0  ;;  %v7036_v8 = vpop.eup %5068  ;;  %v1971_v16 = vpop.xlane.xlu1 %1970 }
 0x6c0   : > { %1739 = vadd.xlane.f32.xlu0 %v1738_v5  ;;  %5078 = vpow2.f32 %v1981_v19  ;;  %v1741_v22 = vsel %vm1217_vm6, %v7036_v8, 0.0  ;;  %v1976_v38 = vsub.f32 %v6956_v50, %v1971_v16 }
 0x6c1   : > { %5080 = vpow2.f32 %v1983_v41 }
 0x6c2   : > { %v7038_v7 = vpop.eup %5070  ;;  %v1985_v44 = vmul.f32 1.442695, %v1976_v38 }
 0x6c3   : > { %v1744_v17 = vsel %vm1217_vm6, %v7038_v7, 0.0  ;;  %v7044_v11 = vpop.eup %5072 }
 0x6c4   : > { %1745 = vadd.xlane.f32.xlu1 %v1744_v17  ;;  %1742 = vadd.xlane.f32.xlu0 %v1741_v22  ;;  %v1747_v24 = vsel %vm1230_vm12, %v7044_v11, 0.0 }
 0x6c6   : > { %v7046_v40 = vpop.eup %5074 }
 0x6c7   : > { %v1987_v39 = vsel %vm1217_vm6, %v7046_v40, 0.0  ;;  %v7052_v30 = vpop.eup %5076 }
 0x6c8   : > { %1988 = vadd.xlane.f32.xlu1 %v1987_v39  ;;  %1748 = vadd.xlane.f32.xlu0 %v1747_v24  ;;  %v1990_v31 = vsel %vm1217_vm6, %v7052_v30, 0.0 }
 0x6ca   : > { %v7056_v32 = vpop.eup %5078 }
 0x6cb   : > { %v1993_v35 = vsel %vm1217_vm6, %v7056_v32, 0.0  ;;  %v7066_v46 = vpop.eup %5080 }
 0x6cc   : > { %1991 = vadd.xlane.f32.xlu0 %v1990_v31  ;;  %v1996_v21 = vsel %vm1217_vm6, %v7066_v46, 0.0 }
 0x6d0   : > { %1994 = vadd.xlane.f32.xlu0 %v1993_v35 }
 0x6d9   : > { %2017 = vrot.lane.b32.xlu1 %v6657_v23, %s7966_s26 }
 0x6e6   : > { %2015 = vrot.lane.b32.xlu0 %v6653_v18, %s7966_s26 }
 0x6f0   : > { %v1251_v45 = vpop.xlane.xlu1 %1250 }
 0x6f1   : > { %5082 = vrcp.f32 %v1251_v45 }
 0x6f2   : > { %5084 = vpow2.f32 %v1985_v44  ;;  %v1254_v58 = vpop.xlane.xlu0 %1253 }
 0x6f3   : > { %5086 = vrcp.f32 %v1254_v58 }
 0x6f8   : > { %v1257_v42 = vpop.xlane.xlu0 %1256 }
 0x6f9   : > { %5088 = vrcp.f32 %v1257_v42 }
 0x6fb   : > { %v5083_v23 = vpop.eup %5082 }
 0x6fc   : > { %v7068_v52 = vpop.eup %5084  ;;  %v1260_v18 = vpop.xlane.xlu1 %1259  ;;  %v1269_v48 = vmul.f32 %v5083_v23, %v6964_v43 }
 0x6fd   : > { %v5087_v50 = vpop.eup %5086  ;;  %5090 = vrcp.f32 %v1260_v18  ;;  %1997 = vadd.xlane.f32.xlu1 %v1996_v21  ;;  %v1999_v53 = vsel %vm1230_vm12, %v7068_v52, 0.0 }
 0x6fe   : > { %v1270_v60 = vmul.f32 %v5087_v50, %v6968_v47 }
 0x700   : > { %v1274_v51 = vpack.c.bf16 %v1270_v60, %v1269_v48  ;;  %v1263_v1 = vpop.xlane.xlu0 %1262 }
 0x701   : > { %5092 = vrcp.f32 %v1263_v1  ;;  %2000 = vadd.xlane.f32.xlu1 %v1999_v53 }
 0x702   : > { %4414 = vmatmul.mubr.msk.bf16.vlgmr.msra.gmra.mrb[12].mxu0 %vm1217_vm6, %v1274_v51 }
 0x703   : > { %4444 = vmatpush3.bf16.msra.mxu0 %v6775_v25  ;;  %4417 = vmatprep.mubr.msk.bf16.mxu0 %vm5901_vm2, %v5900_v36  ;;  %v5089_v54 = vpop.eup %5088 }
 0x704   : > { %4445 = vmatprep.subr.bf16.mxu0 %v5900_v36  ;;  %v1271_v55 = vmul.f32 %v5089_v54, %v6973_v56 }
 0x707   : > { %v5091_v43 = vpop.eup %5090  ;;  %4446 = vmatpush3.bf16.msra.mxu0 %v7007_v49 }
 0x708   : > { %v1485_v47 = vpop.xlane.xlu1 %1484  ;;  %4447 = vmatprep.subr.bf16.mxu0 %v5900_v36  ;;  %v1272_v6 = vmul.f32 %v5091_v43, %v6978_v57 }
 0x709   : > { %5094 = vrcp.f32 %v1485_v47 }
 0x70a   : > { %v1488_v25 = vpop.xlane.xlu0 %1487  ;;  %v1275_v63 = vpack.c.bf16 %v1272_v6, %v1271_v55 }
 0x70b   : > { %v5093_v12 = vpop.eup %5092  ;;  %4448 = vmatpush3.bf16.msra.mxu0 %v1529_v62  ;;  %5096 = vrcp.f32 %v1488_v25 }
 0x70c   : > { %4418 = vmatmul.mubr.msk.bf16.gmra.mrb[16].mxu0 %vm1217_vm6, %v1275_v63  ;;  %4479 = vmatprep.subr.bf16.mxu0 %v5900_v36  ;;  %v1273_v56 = vmul.f32 %v5093_v12, %v6983_v2 }
 0x70d   : > { %4421 = vmatprep.mubr.msk.bf16.mxu0 %vm5901_vm2, %v5900_v36 }
 0x70e   : > { %v1276_v57 = vpack.c.bf16 %v1273_v56, %v1273_v56 }
 0x710   : > { %v1491_v19 = vpop.xlane.xlu0 %1490 }
 0x711   : > { %5098 = vrcp.f32 %v1491_v19 }
 0x712   : > { %2019 = vrot.lane.b32.xlu1 %v6663_v26, %s7966_s26  ;;  %v1768_v26 = vpop.permute.xlu1 %1767  ;;  %s7978_s26 = smov 8  }
 0x713   : > { %v5095_v28 = vpop.eup %5094 }
 0x714   : > { %4422 = vmatmul.mubr.msk.bf16.gmra.mrb[20].mxu0 %vm1217_vm6, %v1276_v57  ;;  %v1503_v4 = vmul.f32 %v5095_v28, %v6988_v10  ;;  %v1766_v2 = vpop.permute.xlu0 %1765 }
 0x715   : > { %v5097_v49 = vpop.eup %5096  ;;  %4449 = vmatprep.mubr.msk.bf16.mxu0 %vm5901_vm2, %v5900_v36 }
 0x716   : > { %v1504_v0 = vmul.f32 %v5097_v49, %v6992_v13  ;;  %v1781_v13 = vand.u32 %v1768_v26, %v6779_v27 }
 0x718   : > { %v1508_v15 = vpack.c.bf16 %v1504_v0, %v1503_v4 }
 0x71b   : > { %v5099_v5 = vpop.eup %5098 }
 0x71c   : > { %4450 = vmatmul.mubr.msk.bf16.vlgmr.msra.gmra.mrb[24].mxu0 %vm1217_vm6, %v1508_v15  ;;  %v1505_v22 = vmul.f32 %v5099_v5, %v6996_v20 }
 0x71d   : > { %4480 = vmatpush3.bf16.msra.mxu0 %v7009_v29  ;;  %4453 = vmatprep.mubr.msk.bf16.mxu0 %vm5901_vm2, %v5900_v36 }
 0x71e   : > { %4481 = vmatprep.subr.bf16.mxu0 %v5900_v36 }
 0x721   : > { %4482 = vmatpush3.bf16.msra.mxu0 %v1766_v2 }
 0x722   : > { %4483 = vmatprep.subr.bf16.mxu0 %v5900_v36 }
 0x725   : > { %4484 = vmatpush3.bf16.msra.mxu0 %v1781_v13 }
 0x726   : > { %4515 = vmatprep.subr.bf16.mxu0 %v5900_v36 }
 0x73d   : > { %v1494_v10 = vpop.xlane.xlu1 %1493 }
 0x73e   : > { %5100 = vrcp.f32 %v1494_v10 }
 0x747   : > { %v1737_v31 = vpop.xlane.xlu1 %1736 }
 0x748   : > { %v5101_v29 = vpop.eup %5100 }
 0x749   : > { %v1497_v17 = vpop.xlane.xlu0 %1496  ;;  %v1506_v39 = vmul.f32 %v5101_v29, %v7012_v34 }
 0x74a   : > { %5102 = vrcp.f32 %v1497_v17 }
 0x74b   : > { %v1509_v24 = vpack.c.bf16 %v1506_v39, %v1505_v22 }
 0x74d   : > { %4454 = vmatmul.mubr.msk.bf16.gmra.mrb[28].mxu0 %vm1217_vm6, %v1509_v24  ;;  %v1740_v35 = vpop.xlane.xlu0 %1739 }
 0x74e   : > { %5104 = vrcp.f32 %v1740_v35  ;;  %4457 = vmatprep.mubr.msk.bf16.mxu0 %vm5901_vm2, %v5900_v36 }
 0x74f   : > { %5106 = vrcp.f32 %v1737_v31 }
 0x751   : > { %v1743_v59 = vpop.xlane.xlu0 %1742  ;;  %v1746_v37 = vpop.xlane.xlu1 %1745 }
 0x752   : > { %5108 = vrcp.f32 %v1746_v37  ;;  %v5022_v37 = vld [vmem:[#allocation17] sm:$0xff]  }
 0x753   : > { %5110 = vrcp.f32 %v1743_v59  ;;  %4534 = vmatpush3.bf16.msra.mxu1 %v5022_v37 }
 0x754   : > { %v5103_v16 = vpop.eup %5102  ;;  %4535 = vmatprep.subr.bf16.mxu1 %v5900_v36 }
 0x755   : > { %v1749_v38 = vpop.xlane.xlu0 %1748  ;;  %v1507_v20 = vmul.f32 %v5103_v16, %v7027_v9  ;;  %v1989_v50 = vpop.xlane.xlu1 %1988 }
 0x756   : > { %5112 = vrcp.f32 %v1749_v38 }
 0x757   : > { %v1510_v34 = vpack.c.bf16 %v1507_v20, %v1507_v20 }
 0x758   : > { %v5105_v41 = vpop.eup %5104 }
 0x759   : > { %4458 = vmatmul.mubr.msk.bf16.gmra.mrb[32].mxu0 %vm1217_vm6, %v1510_v34  ;;  %v1992_v44 = vpop.xlane.xlu0 %1991  ;;  %v5107_v45 = vpop.eup %5106  ;;  %v1756_v58 = vmul.f32 %v5105_v41, %v7032_v3 }
 0x75a   : > { %4485 = vmatprep.mubr.msk.bf16.mxu0 %vm5901_vm2, %v5900_v36  ;;  %v1755_v42 = vmul.f32 %v5107_v45, %v7022_v61  ;;  %v2018_v61 = vpop.permute.xlu1 %2017  ;;  %5114 = vrcp.f32 %v1992_v44 }
 0x75b   : > { %5116 = vrcp.f32 %v1989_v50 }
 0x75c   : > { %v5109_v18 = vpop.eup %5108  ;;  %v1760_v21 = vpack.c.bf16 %v1756_v58, %v1755_v42 }
 0x75d   : > { %v1995_v23 = vpop.xlane.xlu0 %1994  ;;  %v5111_v9 = vpop.eup %5110  ;;  %v1758_v3 = vmul.f32 %v5109_v18, %v7038_v7 }
 0x75e   : > { %v1757_v60 = vmul.f32 %v5111_v9, %v7036_v8 }
 0x760   : > { %v1761_v51 = vpack.c.bf16 %v1758_v3, %v1757_v60  ;;  %v5113_v1 = vpop.eup %5112 }
 0x761   : > { %4486 = vmatmul.mubr.msk.bf16.vlgmr.msra.gmra.mrb[36].mxu0 %vm1217_vm6, %v1760_v21  ;;  %v2016_v48 = vpop.permute.xlu0 %2015  ;;  %v1759_v53 = vmul.f32 %v5113_v1, %v7044_v11 }
 0x762   : > { %4516 = vmatpush3.bf16.msra.mxu0 %v2016_v48  ;;  %4489 = vmatprep.mubr.msk.bf16.mxu0 %vm5901_vm2, %v5900_v36 }
 0x763   : > { %4517 = vmatprep.subr.bf16.mxu0 %v5900_v36  ;;  %v1762_v54 = vpack.c.bf16 %v1759_v53, %v1759_v53 }
 0x764   : > { %v5115_v43 = vpop.eup %5114 }
 0x765   : > { %v5117_v47 = vpop.eup %5116  ;;  %v2008_v55 = vmul.f32 %v5115_v43, %v7052_v30 }
 0x766   : > { %4518 = vmatpush3.bf16.msra.mxu0 %v2018_v61  ;;  %v2007_v11 = vmul.f32 %v5117_v47, %v7046_v40  ;;  %v5023_v61 = vld [vmem:[#allocation17 + $0x8] sm:$0xff]  }
 0x767   : > { %4519 = vmatprep.subr.bf16.mxu0 %v5900_v36  ;;  %4536 = vmatpush3.bf16.msra.mxu1 %v5023_v61 }
 0x768   : > { %v2012_v25 = vpack.c.bf16 %v2008_v55, %v2007_v11  ;;  %4565 = vmatprep.subr.bf16.mxu1 %v5900_v36 }
 0x769   : > { %4490 = vmatmul.mubr.msk.bf16.gmra.mrb[40].mxu0 %vm1217_vm6, %v1761_v51 }
 0x76a   : > { %4493 = vmatprep.mubr.msk.bf16.mxu0 %vm5901_vm2, %v5900_v36 }
 0x771   : > { %4494 = vmatmul.mubr.msk.bf16.gmra.mrb[44].mxu0 %vm1217_vm6, %v1762_v54 }
 0x772   : > { %4521 = vmatprep.mubr.msk.bf16.mxu0 %vm5901_vm2, %v5900_v36 }
 0x78a   : > { %v1998_v8 = vpop.xlane.xlu1 %1997 }
 0x78b   : > { %5118 = vrcp.f32 %v1998_v8 }
 0x78c   : > { %5120 = vrcp.f32 %v1995_v23 }
 0x78e   : > { %v2001_v7 = vpop.xlane.xlu1 %2000 }
 0x78f   : > { %5122 = vrcp.f32 %v2001_v7 }
 0x792   : > { %v2020_v6 = vpop.permute.xlu1 %2019 }
 0x793   : > { %v2033_v62 = vand.u32 %v2020_v6, %v6779_v27 }
 0x795   : > { %4520 = vmatpush3.bf16.msra.mxu0 %v2033_v62  ;;  %v5119_v63 = vpop.eup %5118 }
 0x796   : > { %4549 = vmatprep.subr.bf16.mxu0 %v5900_v36  ;;  %v5121_v12 = vpop.eup %5120  ;;  %v2010_v56 = vmul.f32 %v5119_v63, %v7066_v46 }
 0x797   : > { %v2009_v30 = vmul.f32 %v5121_v12, %v7056_v32 }
 0x798   : > { %4522 = vmatmul.mubr.msk.bf16.vlgmr.msra.gmra.mrb[48].mxu0 %vm1217_vm6, %v2012_v25 }
 0x799   : > { %4525 = vmatprep.mubr.msk.bf16.mxu0 %vm5901_vm2, %v5900_v36  ;;  %v2013_v57 = vpack.c.bf16 %v2010_v56, %v2009_v30  ;;  %v5123_v28 = vpop.eup %5122 }
 0x79a   : > { %v2011_v40 = vmul.f32 %v5123_v28, %v7068_v52 }
 0x79c   : > { %v2014_v49 = vpack.c.bf16 %v2011_v40, %v2011_v40 }
 0x7a0   : > { %4526 = vmatmul.mubr.msk.bf16.gmra.mrb[52].mxu0 %vm1217_vm6, %v2013_v57 }
 0x7a1   : > { %4529 = vmatprep.mubr.msk.bf16.mxu0 %vm5901_vm2, %v5900_v36 }
 0x7a8   : > { %4530 = vmatmul.mubr.msk.bf16.gmra.mrb[56].mxu0 %vm1217_vm6, %v2014_v49 }
 0x7a9   : > { %4553 = vmatprep.mubr.msk.bf16.mxu0 %vm5901_vm2, %v5900_v36 }
 0x7d5   : > { %v1334_v0 = vpop.f32.mrb[12].mxu0 }
 0x7d6   : > { %1356 = vst.msk [vmem:[#allocation2] sm:$0xff] %vm1137_vm8, %v1334_v0  ;;  %v4415_v46 = vpop.f32.mrb[13].mxu0 }
 0x7d7   : > { %v1337_v32 = vpop.f32.mrb[14].mxu0 }
 0x7d8   : > { %1357 = vst.msk [vmem:[#allocation2 + $0x8] sm:$0xff] %vm1137_vm8, %v1337_v32  ;;  %v4416_v4 = vpop.f32.mrb[15].mxu0 }
 0x7df   : > { %v1342_v15 = vpop.f32.mrb[16].mxu0 }
 0x7e0   : > { %1358 = vst.msk [vmem:[#allocation2 + $0x10] sm:$0xff] %vm1137_vm8, %v1342_v15  ;;  %v4419_v19 = vpop.f32.mrb[17].mxu0 }
 0x7e1   : > { %v1345_v26 = vpop.f32.mrb[18].mxu0 }
 0x7e2   : > { %1359 = vst.msk [vmem:[#allocation2 + $0x18] sm:$0xff] %vm1137_vm8, %v1345_v26  ;;  %v4420_v52 = vpop.f32.mrb[19].mxu0 }
 0x7e7   : > { %v1350_v2 = vpop.f32.mrb[20].mxu0 }
 0x7e8   : > { %1361 = vst.msk [vmem:[#allocation2 + $0x20] sm:$0x1] %vm1360_vm15, %v1350_v2  ;;  %v4423_v13 = vpop.f32.mrb[21].mxu0 }
 0x7e9   : > { %v1353_v10 = vpop.f32.mrb[22].mxu0 }
 0x7ea   : > { %v4424_v5 = vpop.f32.mrb[23].mxu0 }
 0x7ef   : > { %v1565_v29 = vpop.f32.mrb[24].mxu0 }
 0x7f0   : > { %1592 = vrot.lane.b32.xlu0 %v1565_v29, %s7978_s26  ;;  %v4451_v17 = vpop.f32.mrb[25].mxu0 }
 0x7f1   : > { %v1568_v22 = vpop.f32.mrb[26].mxu0 }
 0x7f2   : > { %1594 = vrot.lane.b32.xlu1 %v1568_v22, %s7978_s26  ;;  %v4452_v39 = vpop.f32.mrb[27].mxu0  ;;  %v5234_v22 = vld [vmem:[%s6572_s23] sm:$0xff] }
 0x820   : > { %v1573_v24 = vpop.f32.mrb[28].mxu0 }
 0x821   : > { %1596 = vrot.lane.b32.xlu0 %v1573_v24, %s7978_s26  ;;  %v4455_v31 = vpop.f32.mrb[29].mxu0 }
 0x822   : > { %v1576_v35 = vpop.f32.mrb[30].mxu0 }
 0x823   : > { %1598 = vrot.lane.b32.xlu1 %v1576_v35, %s7978_s26  ;;  %v4456_v59 = vpop.f32.mrb[31].mxu0  ;;  %v5235_v35 = vld [vmem:[%s6572_s23 + $0x8] sm:$0xff] }
 0x82c   : > { %v1581_v16 = vpop.f32.mrb[32].mxu0 }
 0x82d   : > { %v4459_v38 = vpop.f32.mrb[33].mxu0 }
 0x82e   : > { %v1584_v20 = vpop.f32.mrb[34].mxu0 }
 0x82f   : > { %v4460_v34 = vpop.f32.mrb[35].mxu0 }
 0x830   : > { %v5236_v34 = vld [vmem:[%s6572_s23 + $0x10] sm:$0xff] }
 0x834   : > { %v1817_v41 = vpop.f32.mrb[36].mxu0 }
 0x835   : > { %1844 = vrot.lane.b32.xlu0 %v1817_v41, %s5915_s24  ;;  %v4487_v44 = vpop.f32.mrb[37].mxu0 }
 0x836   : > { %v1820_v45 = vpop.f32.mrb[38].mxu0 }
 0x837   : > { %1846 = vrot.lane.b32.xlu1 %v1820_v45, %s5915_s24  ;;  %v4488_v58 = vpop.f32.mrb[39].mxu0 }
 0x838   : > { %v5237_v58 = vld [vmem:[%s6572_s23 + $0x18] sm:$0xff] }
 0x83c   : > { %v1825_v42 = vpop.f32.mrb[40].mxu0 }
 0x83d   : > { %v4491_v23 = vpop.f32.mrb[41].mxu0 }
 0x83e   : > { %v1828_v18 = vpop.f32.mrb[42].mxu0 }
 0x83f   : > { %v4492_v21 = vpop.f32.mrb[43].mxu0 }
 0x844   : > { %v1833_v50 = vpop.f32.mrb[44].mxu0 }
 0x845   : > { %v4495_v9 = vpop.f32.mrb[45].mxu0 }
 0x846   : > { %v1836_v48 = vpop.f32.mrb[46].mxu0  ;;  %v5238_v9 = vld [vmem:[%s6572_s23 + $0x20] sm:$0x1]  ;;  %s8059_s23 = smov 56  }
 0x847   : > { %v4496_v60 = vpop.f32.mrb[47].mxu0 }
 0x862   : > { %v1593_v3 = vpop.permute.xlu0 %1592 }
 0x863   : > { %1608 = vst.msk [vmem:[#allocation2] sm:$0xff] %vm1607_vm5, %v1593_v3 }
 0x864   : > { %v1595_v51 = vpop.permute.xlu1 %1594 }
 0x865   : > { %1609 = vst.msk [vmem:[#allocation2 + $0x8] sm:$0xff] %vm1607_vm5, %v1595_v51 }
 0x86b   : > { %v2069_v1 = vpop.f32.mrb[48].mxu0 }
 0x86c   : > { %2096 = vrot.lane.b32.xlu0 %v2069_v1, %s5916_s0  ;;  %v4523_v53 = vpop.f32.mrb[49].mxu0 }
 0x86d   : > { %v2072_v54 = vpop.f32.mrb[50].mxu0 }
 0x86e   : > { %2098 = vrot.lane.b32.xlu1 %v2072_v54, %s5916_s0  ;;  %v4524_v8 = vpop.f32.mrb[51].mxu0 }
 0x870   : > { %1848 = vrot.lane.b32.xlu0 %v1825_v42, %s5915_s24 }
 0x872   : > { %1850 = vrot.lane.b32.xlu1 %v1828_v18, %s5915_s24 }
 0x873   : > { %v2077_v7 = vpop.f32.mrb[52].mxu0 }
 0x874   : > { %2100 = vrot.lane.b32.xlu0 %v2077_v7, %s5916_s0  ;;  %v4527_v43 = vpop.f32.mrb[53].mxu0 }
 0x875   : > { %v2080_v47 = vpop.f32.mrb[54].mxu0 }
 0x876   : > { %2102 = vrot.lane.b32.xlu1 %v2080_v47, %s5916_s0  ;;  %v4528_v55 = vpop.f32.mrb[55].mxu0 }
 0x878   : > { %1600 = vrot.lane.b32.xlu0 %v1581_v16, %s7978_s26 }
 0x87a   : > { %1852 = vrot.lane.b32.xlu1 %v1833_v50, %s5915_s24 }
 0x87b   : > { %v2085_v6 = vpop.f32.mrb[56].mxu0 }
 0x87c   : > { %2104 = vrot.lane.b32.xlu0 %v2085_v6, %s5916_s0  ;;  %v4531_v62 = vpop.f32.mrb[57].mxu0 }
 0x87d   : > { %v2088_v11 = vpop.f32.mrb[58].mxu0 }
 0x87e   : > { %v4532_v25 = vpop.f32.mrb[59].mxu0 }
 0x893   : > { %v1597_v63 = vpop.permute.xlu0 %1596 }
 0x894   : > { %1610 = vst.msk [vmem:[#allocation2 + $0x10] sm:$0xff] %vm1607_vm5, %v1597_v63 }
 0x895   : > { %v1599_v12 = vpop.permute.xlu1 %1598 }
 0x896   : > { %1611 = vst.msk [vmem:[#allocation2 + $0x18] sm:$0xff] %vm1607_vm5, %v1599_v12 }
 0x8a7   : > { %v1845_v56 = vpop.permute.xlu0 %1844 }
 0x8a8   : > { %1860 = vst.msk [vmem:[#allocation2] sm:$0xff] %vm1859_vm10, %v1845_v56 }
 0x8a9   : > { %v1847_v30 = vpop.permute.xlu1 %1846 }
 0x8aa   : > { %1861 = vst.msk [vmem:[#allocation2 + $0x8] sm:$0xff] %vm1859_vm10, %v1847_v30 }
 0x8de   : > { %v2097_v57 = vpop.permute.xlu0 %2096 }
 0x8df   : > { %2112 = vst.msk [vmem:[#allocation2] sm:$0xff] %vm7977_vm14, %v2097_v57 }
 0x8e0   : > { %v2099_v28 = vpop.permute.xlu1 %2098 }
 0x8e1   : > { %2113 = vst.msk [vmem:[#allocation2 + $0x8] sm:$0xff] %vm7977_vm14, %v2099_v28 }
 0x8e2   : > { %v1849_v40 = vpop.permute.xlu0 %1848 }
 0x8e3   : > { %1862 = vst.msk [vmem:[#allocation2 + $0x10] sm:$0xff] %vm1859_vm10, %v1849_v40 }
 0x8e4   : > { %v1851_v49 = vpop.permute.xlu1 %1850 }
 0x8e5   : > { %1863 = vst.msk [vmem:[#allocation2 + $0x18] sm:$0xff] %vm1859_vm10, %v1851_v49 }
 0x8e6   : > { %v2101_v0 = vpop.permute.xlu0 %2100  ;;  %v2118_v32 = vld [vmem:[#allocation2] sm:$0xff] }
 0x8e7   : > { %2114 = vst.msk [vmem:[#allocation2 + $0x10] sm:$0xff] %vm7977_vm14, %v2101_v0 }
 0x8e8   : > { %v2103_v46 = vpop.permute.xlu1 %2102  ;;  %v2119_v4 = vld [vmem:[#allocation2 + $0x8] sm:$0xff] }
 0x8e9   : > { %2115 = vst.msk [vmem:[#allocation2 + $0x18] sm:$0xff] %vm7977_vm14, %v2103_v46  ;;  %v2123_v15 = vpack.c.bf16 %v2119_v4, %v2118_v32 }
 0x8ea   : > { %v1601_v19 = vpop.permute.xlu0 %1600 }
 0x8eb   : > { %1613 = vst.msk [vmem:[#allocation2 + $0x20] sm:$0x1] %vm7976_vm3, %v1601_v19  ;;  %4538 = vmatmul.mubr.msk.bf16.vlgmr.msra.gmra.mrb[48].mxu1 %vm7975_vm0, %v2123_v15  ;;  %v5024_v19 = vld [vmem:[#allocation21] sm:$0xff]  }
 0x8ec   : > { %v1853_v26 = vpop.permute.xlu1 %1852  ;;  %4541 = vmatprep.mubr.msk.bf16.mxu1 %vm5901_vm2, %v5900_v36  ;;  %4550 = vmatpush3.bf16.msra.mxu0 %v5024_v19 }
 0x8ed   : > { %1865 = vst.msk [vmem:[#allocation2 + $0x20] sm:$0x1] %vm7974_vm4, %v1853_v26  ;;  %4551 = vmatprep.subr.bf16.mxu0 %v5900_v36  ;;  %v5025_v26 = vld [vmem:[#allocation21 + $0x8] sm:$0xff]  }
 0x8ee   : > { %v2105_v52 = vpop.permute.xlu0 %2104  ;;  %v2120_v2 = vld [vmem:[#allocation2 + $0x10] sm:$0xff] }
 0x8ef   : > { %2117 = vst.msk [vmem:[#allocation2 + $0x20] sm:$0x1] %vm7973_vm7, %v2105_v52 }
 0x8f0   : > { %v2121_v13 = vld [vmem:[#allocation2 + $0x18] sm:$0xff]  ;;  %4552 = vmatpush3.bf16.msra.mxu0 %v5025_v26 }
 0x8f1   : > { %v2124_v10 = vpack.c.bf16 %v2121_v13, %v2120_v2  ;;  %4583 = vmatprep.subr.bf16.mxu0 %v5900_v36 }
 0x8f3   : > { %4542 = vmatmul.mubr.msk.bf16.gmra.mrb[52].mxu1 %vm7975_vm0, %v2124_v10 }
 0x8f4   : > { %4545 = vmatprep.mubr.msk.bf16.mxu1 %vm5901_vm2, %v5900_v36 }
 0x8f6   : > { %v2122_v5 = vld [vmem:[#allocation2 + $0x20] sm:$0x1] }
 0x8f7   : > { %v2125_v29 = vpack.c.bf16 %v2122_v5, %v2122_v5 }
 0x8fb   : > { %4546 = vmatmul.mubr.msk.bf16.gmra.mrb[56].mxu1 %vm7975_vm0, %v2125_v29 }
 0x8fc   : > { %4571 = vmatprep.mubr.msk.bf16.mxu1 %vm5901_vm2, %v5900_v36 }
 0x9be   : > { %v2181_v17 = vpop.f32.mrb[48].mxu1 }
 0x9bf   : > { %v7195_v39 = vadd.f32 %v5234_v22, %v2181_v17  ;;  %v4539_v24 = vpop.f32.mrb[49].mxu1 }
 0x9c0   : > { %v2184_v31 = vpop.f32.mrb[50].mxu1 }
 0x9c1   : > { %v7198_v59 = vadd.f32 %v5235_v35, %v2184_v31  ;;  %v4540_v37 = vpop.f32.mrb[51].mxu1  ;;  %v2224_v16 = vsel %vm7975_vm0, %v7195_v39, 0.0 }
 0x9c2   : > { %2225 = vadd.xlane.f32.xlu1 %v2224_v16  ;;  %v4190_v16 = vld [vmem:[#allocation18] ss:$0 sm:$0xff] }
 0x9c3   : > { %v2227_v38 = vsel %vm7975_vm0, %v7198_v59, 0.0 }
 0x9c4   : > { %2228 = vadd.xlane.f32.xlu0 %v2227_v38 }
 0x9c6   : > { %v2189_v20 = vpop.f32.mrb[52].mxu1 }
 0x9c7   : > { %v7205_v41 = vadd.f32 %v5236_v34, %v2189_v20  ;;  %v4543_v44 = vpop.f32.mrb[53].mxu1 }
 0x9c8   : > { %v2192_v45 = vpop.f32.mrb[54].mxu1 }
 0x9c9   : > { %v7208_v42 = vadd.f32 %v5237_v58, %v2192_v45  ;;  %v4544_v23 = vpop.f32.mrb[55].mxu1  ;;  %v2230_v18 = vsel %vm7975_vm0, %v7205_v41, 0.0 }
 0x9ca   : > { %2231 = vadd.xlane.f32.xlu0 %v2230_v18  ;;  %v4191_v18 = vld [vmem:[#allocation20] ss:$0 sm:$0xff] }
 0x9cb   : > { %v2233_v21 = vsel %vm7975_vm0, %v7208_v42, 0.0 }
 0x9ce   : > { %2234 = vadd.xlane.f32.xlu0 %v2233_v21  ;;  %v2197_v50 = vpop.f32.mrb[56].mxu1 }
 0x9cf   : > { %v7215_v48 = vadd.f32 %v5238_v9, %v2197_v50  ;;  %v4547_v60 = vpop.f32.mrb[57].mxu1 }
 0x9d0   : > { %v2200_v3 = vpop.f32.mrb[58].mxu1 }
 0x9d1   : > { %v4548_v61 = vpop.f32.mrb[59].mxu1  ;;  %v2236_v51 = vsel %vm7972_vm1, %v7215_v48, 0.0 }
 0x9d2   : > { %2237 = vadd.xlane.f32.xlu1 %v2236_v51 }
 0xa4f   : > { %v2226_v1 = vpop.xlane.xlu1 %2225 }
 0xa50   : > { %v2239_v53 = vmul.f32 0.03125, %v2226_v1 }
 0xa51   : > { %v2229_v54 = vpop.xlane.xlu0 %2228 }
 0xa52   : > { %v2244_v8 = vsub.f32 %v7195_v39, %v2239_v53  ;;  %v2240_v7 = vmul.f32 0.03125, %v2229_v54 }
 0xa54   : > { %v2245_v43 = vsub.f32 %v7198_v59, %v2240_v7  ;;  %v2249_v47 = vmul.f32 %v2244_v8, %v2244_v8 }
 0xa56   : > { %v2254_v55 = vsel %vm7975_vm0, %v2249_v47, 0.0  ;;  %v2250_v6 = vmul.f32 %v2245_v43, %v2245_v43 }
 0xa57   : > { %2255 = vadd.xlane.f32.xlu0 %v2254_v55  ;;  %v2232_v62 = vpop.xlane.xlu0 %2231 }
 0xa58   : > { %v2241_v11 = vmul.f32 0.03125, %v2232_v62  ;;  %v2257_v25 = vsel %vm7975_vm0, %v2250_v6, 0.0 }
 0xa59   : > { %2258 = vadd.xlane.f32.xlu1 %v2257_v25 }
 0xa5a   : > { %v2246_v63 = vsub.f32 %v7205_v41, %v2241_v11 }
 0xa5b   : > { %v2235_v12 = vpop.xlane.xlu0 %2234 }
 0xa5c   : > { %v2242_v56 = vmul.f32 0.03125, %v2235_v12  ;;  %v2251_v30 = vmul.f32 %v2246_v63, %v2246_v63 }
 0xa5e   : > { %v2247_v57 = vsub.f32 %v7208_v42, %v2242_v56  ;;  %v2260_v28 = vsel %vm7975_vm0, %v2251_v30, 0.0 }
 0xa5f   : > { %v2238_v40 = vpop.xlane.xlu1 %2237  ;;  %2261 = vadd.xlane.f32.xlu0 %v2260_v28 }
 0xa60   : > { %v2243_v49 = vmul.f32 0.03125, %v2238_v40  ;;  %v2252_v0 = vmul.f32 %v2247_v57, %v2247_v57 }
 0xa62   : > { %v2248_v46 = vsub.f32 %v7215_v48, %v2243_v49  ;;  %v2263_v32 = vsel %vm7975_vm0, %v2252_v0, 0.0 }
 0xa63   : > { %2264 = vadd.xlane.f32.xlu1 %v2263_v32 }
 0xa64   : > { %v2253_v4 = vmul.f32 %v2248_v46, %v2248_v46 }
 0xa66   : > { %v2266_v15 = vsel %vm7972_vm1, %v2253_v4, 0.0 }
 0xa67   : > { %2267 = vadd.xlane.f32.xlu0 %v2266_v15 }
 0xae4   : > { %v2256_v52 = vpop.xlane.xlu0 %2255 }
 0xae5   : > { %v2269_v2 = vmul.f32 0.03125, %v2256_v52  ;;  %v2218_v52 = vld [vmem:[#allocation9] sm:$0xff] }
 0xae6   : > { %v2259_v13 = vpop.xlane.xlu1 %2258  ;;  %vm2415_vm9 = vcmp.lt.s32.totalorder %v2218_v52, 0 }
 0xae7   : > { %v2274_v10 = vadd.f32 1e-05, %v2269_v2  ;;  %v2270_v5 = vmul.f32 0.03125, %v2259_v13  ;;  %v2420_v2 = vsel %vm2415_vm9, 1, %v5902_v14  ;;  %v2220_v13 = vld [vmem:[#allocation9 + $0x10] sm:$0xff] }
 0xae8   : > { %vm2417_vm11 = vcmp.lt.s32.totalorder %v2220_v13, 0 }
 0xae9   : > { %5124 = vrsqrt.f32 %v2274_v10  ;;  %v2275_v29 = vadd.f32 1e-05, %v2270_v5  ;;  %v2422_v10 = vsel %vm2417_vm11, 1, %v5902_v14  ;;  %v2219_v5 = vld [vmem:[#allocation9 + $0x8] sm:$0xff] }
 0xaea   : > { %vm2416_vm13 = vcmp.lt.s32.totalorder %v2219_v5, 0 }
 0xaeb   : > { %5126 = vrsqrt.f32 %v2275_v29  ;;  %v2222_v29 = vld [vmem:[#allocation9 + $0x20] sm:$0x1] }
 0xaec   : > { %v2262_v17 = vpop.xlane.xlu0 %2261  ;;  %vm2419_vm1 = vcmp.lt.s32.totalorder %v2222_v29, 0 }
 0xaed   : > { %v2271_v22 = vmul.f32 0.03125, %v2262_v17  ;;  %v2421_v17 = vsel %vm2416_vm13, 1, %v5902_v14 }
 0xaef   : > { %v2276_v24 = vadd.f32 1e-05, %v2271_v22  ;;  %v2221_v22 = vld [vmem:[#allocation9 + $0x18] sm:$0xff] }
 0xaf0   : > { %v2265_v31 = vpop.xlane.xlu1 %2264  ;;  %vm2418_vm9 = vcmp.lt.s32.totalorder %v2221_v22, 0 }
 0xaf1   : > { %5128 = vrsqrt.f32 %v2276_v24  ;;  %v2272_v35 = vmul.f32 0.03125, %v2265_v31  ;;  %v2423_v24 = vsel %vm2418_vm9, 1, %v5902_v14  ;;  %v2424_v31 = vsel %vm2419_vm1, 1, %v5902_v14 }
 0xaf3   : > { %v5125_v37 = vpop.eup %5124  ;;  %v2277_v38 = vadd.f32 1e-05, %v2272_v35 }
 0xaf4   : > { %v2284_v20 = vmul.f32 %v5125_v37, %v2244_v8  ;;  %v2268_v34 = vpop.xlane.xlu0 %2267 }
 0xaf5   : > { %v5127_v44 = vpop.eup %5126  ;;  %5130 = vrsqrt.f32 %v2277_v38  ;;  %v2273_v45 = vmul.f32 0.03125, %v2268_v34 }
 0xaf6   : > { %v2295_v58 = vmul.f32 %v4190_v16, %v2284_v20  ;;  %v2285_v23 = vmul.f32 %v5127_v44, %v2245_v43 }
 0xaf7   : > { %v2278_v21 = vadd.f32 1e-05, %v2273_v45 }
 0xaf8   : > { %v2296_v50 = vmul.f32 %v4190_v16, %v2285_v23  ;;  %v2306_v9 = vadd.f32 %v4191_v18, %v2295_v58 }
 0xaf9   : > { %5132 = vrsqrt.f32 %v2278_v21 }
 0xafa   : > { %v2307_v60 = vadd.f32 %v4191_v18, %v2296_v50 }
 0xafb   : > { %v5129_v3 = vpop.eup %5128 }
 0xafc   : > { %v2311_v61 = vpack.c.bf16 %v2307_v60, %v2306_v9  ;;  %v2286_v51 = vmul.f32 %v5129_v3, %v2246_v63 }
 0xafe   : > { %4554 = vmatmul.mubr.msk.bf16.vlgmr.msra.gmra.mrb[60].mxu0 %vm7975_vm0, %v2311_v61  ;;  %v2297_v54 = vmul.f32 %v4190_v16, %v2286_v51 }
 0xaff   : > { %v5131_v1 = vpop.eup %5130  ;;  %4557 = vmatprep.mubr.msk.bf16.mxu0 %vm5901_vm2, %v5900_v36 }
 0xb00   : > { %v2287_v53 = vmul.f32 %v5131_v1, %v2247_v57  ;;  %v2308_v43 = vadd.f32 %v4191_v18, %v2297_v54 }
 0xb02   : > { %v2298_v8 = vmul.f32 %v4190_v16, %v2287_v53 }
 0xb03   : > { %v5133_v7 = vpop.eup %5132 }
 0xb04   : > { %v2309_v47 = vadd.f32 %v4191_v18, %v2298_v8  ;;  %v2288_v55 = vmul.f32 %v5133_v7, %v2248_v46 }
 0xb06   : > { %v2312_v6 = vpack.c.bf16 %v2309_v47, %v2308_v43  ;;  %v2299_v62 = vmul.f32 %v4190_v16, %v2288_v55 }
 0xb08   : > { %4558 = vmatmul.mubr.msk.bf16.gmra.mrb[64].mxu0 %vm7975_vm0, %v2312_v6  ;;  %v2310_v11 = vadd.f32 %v4191_v18, %v2299_v62  ;;  %v7334_v62 = vld [vmem:[#allocation11] sm:$0x1] }
 0xb09   : > { %4561 = vmatprep.mubr.msk.bf16.mxu0 %vm5901_vm2, %v5900_v36 }
 0xb0a   : > { %v2313_v25 = vpack.c.bf16 %v2310_v11, %v2310_v11 }
 0xb10   : > { %4562 = vmatmul.mubr.msk.bf16.gmra.mrb[68].mxu0 %vm7975_vm0, %v2313_v25  ;;  %v2409_v25 = vrot.slane %v7334_v62, %v6792_v33 }
 0xb11   : > { %4589 = vmatprep.mubr.msk.bf16.mxu0 %vm5901_vm2, %v5900_v36 }
 0xbd1   : > { %v2369_v63 = vpop.f32.mrb[60].mxu0 }
 0xbd2   : > { %v4555_v12 = vpop.f32.mrb[61].mxu0 }
 0xbd3   : > { %v2372_v56 = vpop.f32.mrb[62].mxu0 }
 0xbd4   : > { %v7240_v30 = vpack.c.bf16 %v2372_v56, %v2369_v63  ;;  %v4556_v57 = vpop.f32.mrb[63].mxu0 }
 0xbd6   : > { %2468 = vrot.lane.b32.xlu1 %v7240_v30, %s5903_s1 }
 0xbdb   : > { %v2377_v28 = vpop.f32.mrb[64].mxu0 }
 0xbdc   : > { %v4559_v40 = vpop.f32.mrb[65].mxu0 }
 0xbdd   : > { %v2380_v49 = vpop.f32.mrb[66].mxu0 }
 0xbde   : > { %v7244_v0 = vpack.c.bf16 %v2380_v49, %v2377_v28  ;;  %v4560_v46 = vpop.f32.mrb[67].mxu0 }
 0xbe0   : > { %2470 = vrot.lane.b32.xlu0 %v7244_v0, %s5903_s1 }
 0xbe3   : > { %v2385_v32 = vpop.f32.mrb[68].mxu0 }
 0xbe4   : > { %v7248_v4 = vpack.c.bf16 %v2385_v32, %v2385_v32  ;;  %v4563_v15 = vpop.f32.mrb[69].mxu0 }
 0xbe5   : > { %v2388_v19 = vpop.f32.mrb[70].mxu0 }
 0xbe6   : > { %2702 = vrot.lane.b32.xlu0 %v7248_v4, %s5904_s14  ;;  %2472 = vrot.lane.b32.xlu1 %v7248_v4, %s5903_s1  ;;  %v4564_v26 = vpop.f32.mrb[71].mxu0  ;;  %s8082_s1 = smov 48  }
 0xbea   : > { %2948 = vrot.lane.b32.xlu0 %v7240_v30, %s5907_s6  ;;  %2698 = vrot.lane.b32.xlu1 %v7240_v30, %s5904_s14 }
 0xbee   : > { %2950 = vrot.lane.b32.xlu0 %v7244_v0, %s5907_s6  ;;  %2700 = vrot.lane.b32.xlu1 %v7244_v0, %s5904_s14  ;;  %s8083_s14 = smov 40  }
 0xbf2   : > { %2952 = vrot.lane.b32.xlu0 %v7248_v4, %s5907_s6  ;;  %2692 = vrot.lane.b32.xlu1 %v7240_v30, %s5905_s25 }
 0xbf6   : > { %3198 = vrot.lane.b32.xlu0 %v7240_v30, %s5909_s7  ;;  %2694 = vrot.lane.b32.xlu1 %v7244_v0, %s5905_s25 }
 0xbfa   : > { %3200 = vrot.lane.b32.xlu0 %v7244_v0, %s5909_s7  ;;  %2696 = vrot.lane.b32.xlu1 %v7248_v4, %s5905_s25  ;;  %s8107_s25 = smul.u32 40, %s6566_s30 }
 0xbfe   : > { %3202 = vrot.lane.b32.xlu0 %v7248_v4, %s5909_s7  ;;  %2942 = vrot.lane.b32.xlu1 %v7240_v30, %s5906_s3 }
 0xc02   : > { %3194 = vrot.lane.b32.xlu0 %v7244_v0, %s5908_s5  ;;  %2944 = vrot.lane.b32.xlu1 %v7244_v0, %s5906_s3 }
 0xc06   : > { %2392 = vperm.xlu0 %5019, %v2218_v52   ;;  %2946 = vrot.lane.b32.xlu1 %v7248_v4, %s5906_s3  ;;  %s861_s3 = scalar_lea.vmem [#allocation33], %s8107_s25 }
 0xc07   : > { %s3869_s6 = sshll.u32 %s861_s3, 4  ;;  %s7870_s6 = int_to_ptr.vmem [resolvable:$true] %s3869_s6 }
 0xc0a   : > { %2426 = vperm.xlu0 %5019, %v2420_v2   ;;  %3192 = vrot.lane.b32.xlu1 %v7240_v30, %s5908_s5 }
 0xc0e   : > { %2398 = vperm.xlu0 %5019, %v2220_v13   ;;  %3196 = vrot.lane.b32.xlu1 %v7248_v4, %s5908_s5  ;;  %s4768_s5 = smul.u32 640, %s8028_s4  ;;  %s3856_s4 = scalar_lea.sflag [#allocation5], %s6566_s30 }
 0xc12   : > { %2432 = vperm.xlu0 %5019, %v2422_v10   ;;  %2395 = vperm.xlu1 %5018, %v2219_v5  }
 0xc16   : > { %2404 = vperm.xlu0 %5019, %v2222_v29   ;;  %2429 = vperm.xlu1 %5018, %v2421_v17  }
 0xc1a   : > { %2613 = vrot.lane.b32.xlu0 %v7244_v0, %s5910_s2  ;;  %2401 = vperm.xlu1 %5018, %v2221_v22  }
 0xc1e   : > { %2435 = vperm.xlu1 %5018, %v2423_v24  }
 0xc22   : > { %2438 = vperm.xlu1 %5018, %v2424_v31  }
 0xc26   : > { %2611 = vrot.lane.b32.xlu1 %v7240_v30, %s5910_s2 }
 0xc2a   : > { %2841 = vrot.lane.b32.xlu1 %v7240_v30, %s8059_s23 }
 0xc2e   : > { %2615 = vrot.lane.b32.xlu1 %v7248_v4, %s5910_s2 }
 0xc48   : > { %v2469_v35 = vpop.permute.xlu1 %2468 }
 0xc49   : > { %v2484_v37 = vsel %vm1137_vm8, %v2469_v35, 0 }
 0xc4a   : > { %4566 = vmatpush3.bf16.xpose.msra.mxu1 %v2484_v37 }
 0xc4b   : > { %4567 = vmatprep.subr.bf16.mxu1 %v5900_v36 }
 0xc52   : > { %v2471_v16 = vpop.permute.xlu0 %2470 }
 0xc53   : > { %v2487_v38 = vsel %vm1137_vm8, %v2471_v16, 0 }
 0xc54   : > { %4568 = vmatpush3.bf16.xpose.msra.mxu1 %v2487_v38 }
 0xc55   : > { %4569 = vmatprep.subr.bf16.mxu1 %v5900_v36 }
 0xc58   : > { %v2473_v20 = vpop.permute.xlu1 %2472  ;;  %v2703_v34 = vpop.permute.xlu0 %2702 }
 0xc59   : > { %v2490_v44 = vsel %vm1137_vm8, %v2473_v20, 0  ;;  %v2720_v1 = vsel %vm1137_vm8, %v2703_v34, 0 }
 0xc5c   : > { %v2699_v45 = vpop.permute.xlu1 %2698  ;;  %4570 = vmatpush3.bf16.xpose.msra.mxu1 %v2490_v44  ;;  %v2949_v58 = vpop.permute.xlu0 %2948 }
 0xc5d   : > { %4601 = vmatprep.subr.bf16.mxu1 %v5900_v36  ;;  %v2714_v18 = vsel %vm1137_vm8, %v2699_v45, 0  ;;  %v2964_v8 = vsel %vm1137_vm8, %v2949_v58, 0 }
 0xc60   : > { %v2701_v23 = vpop.permute.xlu1 %2700  ;;  %v2951_v21 = vpop.permute.xlu0 %2950 }
 0xc61   : > { %v2717_v3 = vsel %vm1137_vm8, %v2701_v23, 0  ;;  %v2967_v6 = vsel %vm1137_vm8, %v2951_v21, 0 }
 0xc63   : > { %4572 = vmatmul.mubr.msk.bf16.vlgmr.msra.gmra.mrb[60].mxu1 %vm1137_vm8, %v7240_v30 }
 0xc64   : > { %v2693_v50 = vpop.permute.xlu1 %2692  ;;  %4602 = vmatpush3.bf16.xpose.msra.mxu1 %v2714_v18  ;;  %4575 = vmatprep.mubr.msk.bf16.mxu1 %vm5901_vm2, %v5900_v36  ;;  %v2953_v9 = vpop.permute.xlu0 %2952 }
 0xc65   : > { %4603 = vmatprep.subr.bf16.mxu1 %v5900_v36  ;;  %v2970_v56 = vsel %vm1137_vm8, %v2953_v9, 0 }
 0xc68   : > { %v2695_v60 = vpop.permute.xlu1 %2694  ;;  %v3199_v61 = vpop.permute.xlu0 %3198 }
 0xc69   : > { %v3214_v32 = vsel %vm1137_vm8, %v3199_v61, 0 }
 0xc6b   : > { %4576 = vmatmul.mubr.msk.bf16.gmra.mrb[64].mxu1 %vm1137_vm8, %v7244_v0 }
 0xc6c   : > { %4604 = vmatpush3.bf16.xpose.msra.mxu1 %v2717_v3  ;;  %4579 = vmatprep.mubr.msk.bf16.mxu1 %vm5901_vm2, %v5900_v36  ;;  %v2697_v51 = vpop.permute.xlu1 %2696  ;;  %v3201_v53 = vpop.permute.xlu0 %3200 }
 0xc6d   : > { %4605 = vmatprep.subr.bf16.mxu1 %v5900_v36  ;;  %v3217_v2 = vsel %vm1137_vm8, %v3201_v53, 0 }
 0xc70   : > { %v2943_v54 = vpop.permute.xlu1 %2942  ;;  %v3203_v7 = vpop.permute.xlu0 %3202 }
 0xc71   : > { %v3220_v17 = vsel %vm1137_vm8, %v3203_v7, 0 }
 0xc73   : > { %4580 = vmatmul.mubr.msk.bf16.gmra.mrb[68].mxu1 %vm1137_vm8, %v7248_v4 }
 0xc74   : > { %4606 = vmatpush3.bf16.xpose.msra.mxu1 %v2720_v1  ;;  %4607 = vmatprep.mubr.msk.bf16.mxu1 %vm5901_vm2, %v5900_v36  ;;  %v2945_v43 = vpop.permute.xlu1 %2944  ;;  %v7330_v47 = vpop.permute.xlu0 %3194 }
 0xc75   : > { %4637 = vmatprep.subr.bf16.mxu1 %v5900_v36 }
 0xc78   : > { %v2947_v55 = vpop.permute.xlu1 %2946 }
 0xc7b   : > { %4608 = vmatmul.mubr.msk.bf16.vlgmr.msra.gmra.mrb[72].mxu1 %vm1137_vm8, %v2693_v50 }
 0xc7c   : > { %4638 = vmatpush3.bf16.xpose.msra.mxu1 %v2964_v8  ;;  %4611 = vmatprep.mubr.msk.bf16.mxu1 %vm5901_vm2, %v5900_v36  ;;  %v3193_v63 = vpop.permute.xlu1 %3192 }
 0xc7d   : > { %4639 = vmatprep.subr.bf16.mxu1 %v5900_v36 }
 0xc80   : > { %v3197_v28 = vpop.permute.xlu1 %3196 }
 0xc83   : > { %4612 = vmatmul.mubr.msk.bf16.gmra.mrb[76].mxu1 %vm1137_vm8, %v2695_v60 }
 0xc84   : > { %4640 = vmatpush3.bf16.xpose.msra.mxu1 %v2967_v6  ;;  %4615 = vmatprep.mubr.msk.bf16.mxu1 %vm5901_vm2, %v5900_v36 }
 0xc85   : > { %v2393_v11 = vpop.permute.xlu0 %2392  ;;  %4641 = vmatprep.subr.bf16.mxu1 %v5900_v36 }
 0xc86   : > { %vm2410_vm1 = vcmp.eq.s32.totalorder %v2393_v11, %v2409_v25 }
 0xc89   : > { %v2427_v12 = vpop.permute.xlu0 %2426 }
 0xc8a   : > { %vm2440_vm11 = vcmp.eq.s32.totalorder %v2427_v12, 1 }
 0xc8b   : > { %vm7342_vm13 = vmor %vm2410_vm1, %vm2440_vm11  ;;  %4616 = vmatmul.mubr.msk.bf16.gmra.mrb[80].mxu1 %vm1137_vm8, %v2697_v51 }
 0xc8c   : > { %4642 = vmatpush3.bf16.xpose.msra.mxu1 %v2970_v56  ;;  %4643 = vmatprep.mubr.msk.bf16.mxu1 %vm5901_vm2, %v5900_v36 }
 0xc8d   : > { %v2399_v40 = vpop.permute.xlu0 %2398  ;;  %4673 = vmatprep.subr.bf16.mxu1 %v5900_v36 }
 0xc8e   : > { %vm2412_vm9 = vcmp.eq.s32.totalorder %v2399_v40, %v2409_v25 }
 0xc91   : > { %v2396_v49 = vpop.permute.xlu1 %2395  ;;  %v2433_v46 = vpop.permute.xlu0 %2432 }
 0xc92   : > { %vm2442_vm7 = vcmp.eq.s32.totalorder %v2433_v46, 1  ;;  %vm2411_vm11 = vcmp.eq.s32.totalorder %v2396_v49, %v2409_v25 }
 0xc93   : > { %vm7351_vm1 = vmor %vm2412_vm9, %vm2442_vm7  ;;  %4644 = vmatmul.mubr.msk.bf16.vlgmr.msra.gmra.mrb[84].mxu1 %vm1137_vm8, %v2943_v54 }
 0xc94   : > { %4674 = vmatpush3.bf16.xpose.msra.mxu1 %v3214_v32  ;;  %4647 = vmatprep.mubr.msk.bf16.mxu1 %vm5901_vm2, %v5900_v36 }
 0xc95   : > { %v2430_v19 = vpop.permute.xlu1 %2429  ;;  %4675 = vmatprep.subr.bf16.mxu1 %v5900_v36  ;;  %v2405_v10 = vpop.permute.xlu0 %2404 }
 0xc96   : > { %vm2441_vm4 = vcmp.eq.s32.totalorder %v2430_v19, 1 }
 0xc97   : > { %vm7359_vm0 = vmor %vm2411_vm11, %vm2441_vm4  ;;  %vm2414_vm4 = vcmp.eq.s32.totalorder %v2405_v10, %v2409_v25 }
 0xc99   : > { %v2402_v52 = vpop.permute.xlu1 %2401  ;;  %v2614_v31 = vpop.permute.xlu0 %2613 }
 0xc9a   : > { %vm2413_vm7 = vcmp.eq.s32.totalorder %v2402_v52, %v2409_v25 }
 0xc9b   : > { %4648 = vmatmul.mubr.msk.bf16.gmra.mrb[88].mxu1 %vm1137_vm8, %v2945_v43 }
 0xc9c   : > { %4676 = vmatpush3.bf16.xpose.msra.mxu1 %v3217_v2  ;;  %4651 = vmatprep.mubr.msk.bf16.mxu1 %vm5901_vm2, %v5900_v36 }
 0xc9d   : > { %v2436_v13 = vpop.permute.xlu1 %2435  ;;  %4677 = vmatprep.subr.bf16.mxu1 %v5900_v36 }
 0xc9e   : > { %vm2443_vm9 = vcmp.eq.s32.totalorder %v2436_v13, 1 }
 0xc9f   : > { %vm7368_vm3 = vmor %vm2413_vm7, %vm2443_vm9  ;;  %vm2450_vm7 = vcmp.lt.s32.totalorder %v7334_v62, 0 }
 0xca0   : > { %v2451_v38 = vsel %vm2450_vm7, 1, %v5902_v14 }
 0xca1   : > { %v2439_v29 = vpop.permute.xlu1 %2438  ;;  %v2455_v20 = vrot.slane %v2451_v38, %v6792_v33 }
 0xca2   : > { %vm2444_vm11 = vcmp.eq.s32.totalorder %v2439_v29, 1 }
 0xca3   : > { %vm7373_vm14 = vmor %vm2414_vm4, %vm2444_vm11  ;;  %4652 = vmatmul.mubr.msk.bf16.gmra.mrb[92].mxu1 %vm1137_vm8, %v2947_v55  ;;  %vm7400_vm9 = vcmp.eq.s32.totalorder %v2455_v20, 1 }
 0xca4   : > { %4678 = vmatpush3.bf16.xpose.msra.mxu1 %v3220_v17  ;;  %4679 = vmatprep.mubr.msk.bf16.mxu1 %vm5901_vm2, %v5900_v36  ;;  %vm7408_vm4 = vmor %vm7342_vm13, %vm7400_vm9 }
 0xca5   : > { %v2612_v24 = vpop.permute.xlu1 %2611  ;;  %4761 = vmatprep.subr.bf16.mxu1 %v5900_v36  ;;  %vm7420_vm11 = vmor %vm7359_vm0, %vm7400_vm9 }
 0xca6   : > { %4584 = vmatpush3.bf16.msra.mxu0 %v2612_v24  ;;  %vm7436_vm0 = vmor %vm7351_vm1, %vm7400_vm9  ;;  %vm8090_vm1 = vcmask 188544  }
 0xca7   : > { %4585 = vmatprep.subr.bf16.mxu0 %v5900_v36  ;;  %vm7448_vm13 = vmor %vm7368_vm3, %vm7400_vm9 }
 0xca8   : > { %vm7464_vm3 = vmor %vm7373_vm14, %vm7400_vm9  ;;  %vm8089_vm14 = vcmask 261120  }
 0xca9   : > { %v7382_v35 = vpop.permute.xlu1 %2841  ;;  %vm8092_vm7 = vmmov %vm8089_vm14 }
 0xcaa   : > { %4586 = vmatpush3.bf16.msra.mxu0 %v2614_v31  ;;  %vm8093_vm9 = vmmov %vm8092_vm7 }
 0xcab   : > { %4680 = vmatmul.mubr.msk.bf16.vlgmr.msra.gmra.mrb[96].mxu1 %vm1137_vm8, %v3193_v63  ;;  %4587 = vmatprep.subr.bf16.mxu0 %v5900_v36 }
 0xcac   : > { %4683 = vmatprep.mubr.msk.bf16.mxu1 %vm5901_vm2, %v5900_v36 }
 0xcad   : > { %v2616_v37 = vpop.permute.xlu1 %2615 }
 0xcae   : > { %v2629_v16 = vand.u32 %v2616_v37, %v6779_v27 }
 0xcb0   : > { %4588 = vmatpush3.bf16.msra.mxu0 %v2629_v16 }
 0xcb1   : > { %4619 = vmatprep.subr.bf16.mxu0 %v5900_v36 }
 0xcb3   : > { %4684 = vmatmul.mubr.msk.bf16.gmra.mrb[100].mxu1 %vm1137_vm8, %v7330_v47 }
 0xcb4   : > { %4687 = vmatprep.mubr.msk.bf16.mxu1 %vm5901_vm2, %v5900_v36 }
 0xcbb   : > { %4688 = vmatmul.mubr.msk.bf16.gmra.mrb[104].mxu1 %vm1137_vm8, %v3197_v28 }
 0xcbc   : > { %4717 = vmatprep.mubr.msk.bf16.mxu1 %vm5901_vm2, %v5900_v36 }
 0xd36   : > { %v2526_v45 = vpop.f32.mrb[60].mxu1 }
 0xd37   : > { %v7414_v58 = vsel %vm7408_vm4, %v2526_v45, -1e+30  ;;  %v4573_v14 = vpop.f32.mrb[61].mxu1 }
 0xd38   : > { %v2553_v23 = vsel %vm1217_vm6, %v7414_v58, -inf  ;;  %v2529_v18 = vpop.f32.mrb[62].mxu1 }
 0xd39   : > { %v7428_v21 = vsel %vm7420_vm11, %v2529_v18, -1e+30  ;;  %v4574_v50 = vpop.f32.mrb[63].mxu1  ;;  %2554 = vmax.xlane.f32.xlu0 %v2553_v23 }
 0xd3a   : > { %v2556_v9 = vsel %vm1217_vm6, %v7428_v21, -inf }
 0xd3b   : > { %2557 = vmax.xlane.f32.xlu1 %v2556_v9 }
 0xd3e   : > { %v2534_v3 = vpop.f32.mrb[64].mxu1 }
 0xd3f   : > { %v7442_v61 = vsel %vm7436_vm0, %v2534_v3, -1e+30  ;;  %v4577_v51 = vpop.f32.mrb[65].mxu1 }
 0xd40   : > { %v2559_v53 = vsel %vm1217_vm6, %v7442_v61, -inf  ;;  %v2537_v54 = vpop.f32.mrb[66].mxu1 }
 0xd41   : > { %v7456_v8 = vsel %vm7448_vm13, %v2537_v54, -1e+30  ;;  %v4578_v7 = vpop.f32.mrb[67].mxu1  ;;  %2560 = vmax.xlane.f32.xlu0 %v2559_v53 }
 0xd42   : > { %v2562_v43 = vsel %vm1217_vm6, %v7456_v8, -inf }
 0xd45   : > { %2563 = vmax.xlane.f32.xlu0 %v2562_v43 }
 0xd46   : > { %v2542_v55 = vpop.f32.mrb[68].mxu1 }
 0xd47   : > { %v7470_v6 = vsel %vm7464_vm3, %v2542_v55, -1e+30  ;;  %v4581_v62 = vpop.f32.mrb[69].mxu1 }
 0xd48   : > { %v2565_v11 = vsel %vm1230_vm12, %v7470_v6, -inf  ;;  %v2545_v25 = vpop.f32.mrb[70].mxu1 }
 0xd49   : > { %v4582_v63 = vpop.f32.mrb[71].mxu1  ;;  %2566 = vmax.xlane.f32.xlu0 %v2565_v11 }
 0xd4e   : > { %v2756_v12 = vpop.f32.mrb[72].mxu1 }
 0xd4f   : > { %v7476_v56 = vsel %vm7408_vm4, %v2756_v12, -1e+30  ;;  %v4609_v57 = vpop.f32.mrb[73].mxu1 }
 0xd50   : > { %v2783_v28 = vsel %vm1217_vm6, %v7476_v56, -inf  ;;  %v2759_v40 = vpop.f32.mrb[74].mxu1 }
 0xd51   : > { %v7482_v49 = vsel %vm7420_vm11, %v2759_v40, -1e+30  ;;  %v4610_v46 = vpop.f32.mrb[75].mxu1  ;;  %2784 = vmax.xlane.f32.xlu1 %v2783_v28 }
 0xd52   : > { %v2786_v32 = vsel %vm1217_vm6, %v7482_v49, -inf }
 0xd53   : > { %2787 = vmax.xlane.f32.xlu0 %v2786_v32 }
 0xd56   : > { %v2764_v15 = vpop.f32.mrb[76].mxu1 }
 0xd57   : > { %v7488_v19 = vsel %vm7436_vm0, %v2764_v15, -1e+30  ;;  %v4613_v26 = vpop.f32.mrb[77].mxu1 }
 0xd58   : > { %v2789_v52 = vsel %vm1217_vm6, %v7488_v19, -inf  ;;  %v2767_v2 = vpop.f32.mrb[78].mxu1 }
 0xd59   : > { %v7494_v13 = vsel %vm7448_vm13, %v2767_v2, -1e+30  ;;  %v4614_v10 = vpop.f32.mrb[79].mxu1  ;;  %2790 = vmax.xlane.f32.xlu1 %v2789_v52 }
 0xd5a   : > { %v2792_v5 = vsel %vm1217_vm6, %v7494_v13, -inf }
 0xd5b   : > { %2793 = vmax.xlane.f32.xlu0 %v2792_v5 }
 0xd5e   : > { %v2772_v29 = vpop.f32.mrb[80].mxu1 }
 0xd5f   : > { %v4617_v17 = vpop.f32.mrb[81].mxu1  ;;  %v7510_v25 = vsel %vm7464_vm3, %v2772_v29, -1e+30 }
 0xd60   : > { %v2775_v22 = vpop.f32.mrb[82].mxu1  ;;  %v2795_v46 = vsel %vm1230_vm12, %v7510_v25, -inf }
 0xd61   : > { %v4618_v24 = vpop.f32.mrb[83].mxu1 }
 0xd66   : > { %v3006_v31 = vpop.f32.mrb[84].mxu1 }
 0xd67   : > { %v4645_v37 = vpop.f32.mrb[85].mxu1  ;;  %v7506_v11 = vsel %vm7408_vm4, %v3006_v31, -1e+30 }
 0xd68   : > { %v3009_v16 = vpop.f32.mrb[86].mxu1  ;;  %v3033_v12 = vsel %vm1217_vm6, %v7506_v11, -inf }
 0xd69   : > { %v4646_v38 = vpop.f32.mrb[87].mxu1  ;;  %v7522_v15 = vsel %vm7420_vm11, %v3009_v16, -1e+30 }
 0xd6a   : > { %2845 = vrot.lane.b32.xlu1 %v7248_v4, %s8059_s23  ;;  %v3036_v2 = vsel %vm1217_vm6, %v7522_v15, -inf }
 0xd6e   : > { %v3014_v20 = vpop.f32.mrb[88].mxu1  ;;  %3091 = vrot.lane.b32.xlu1 %v7240_v30, %s8082_s1 }
 0xd6f   : > { %v4649_v34 = vpop.f32.mrb[89].mxu1  ;;  %v7516_v28 = vsel %vm7436_vm0, %v3014_v20, -1e+30 }
 0xd70   : > { %v3017_v45 = vpop.f32.mrb[90].mxu1  ;;  %v3039_v26 = vsel %vm1217_vm6, %v7516_v28, -inf }
 0xd71   : > { %v4650_v14 = vpop.f32.mrb[91].mxu1  ;;  %2843 = vrot.lane.b32.xlu0 %v7244_v0, %s8059_s23  ;;  %v7534_v10 = vsel %vm7448_vm13, %v3017_v45, -1e+30 }
 0xd72   : > { %v3042_v17 = vsel %vm1217_vm6, %v7534_v10, -inf }
 0xd76   : > { %v3022_v23 = vpop.f32.mrb[92].mxu1 }
 0xd77   : > { %v4653_v18 = vpop.f32.mrb[93].mxu1  ;;  %v7528_v52 = vsel %vm7464_vm3, %v3022_v23, -1e+30 }
 0xd78   : > { %v3025_v50 = vpop.f32.mrb[94].mxu1  ;;  %v3045_v5 = vsel %vm1230_vm12, %v7528_v52, -inf }
 0xd79   : > { %v4654_v9 = vpop.f32.mrb[95].mxu1 }
 0xd7e   : > { %v3256_v3 = vpop.f32.mrb[96].mxu1 }
 0xd7f   : > { %v4681_v51 = vpop.f32.mrb[97].mxu1  ;;  %v7546_v22 = vsel %vm7408_vm4, %v3256_v3, -1e+30  ;;  %vm8094_vm4 = vmmov %vm8092_vm7 }
 0xd80   : > { %v3259_v53 = vpop.f32.mrb[98].mxu1  ;;  %v3283_v33 = vsel %vm1217_vm6, %v7546_v22, -inf }
 0xd81   : > { %v4682_v54 = vpop.f32.mrb[99].mxu1  ;;  %v7540_v29 = vsel %vm7420_vm11, %v3259_v53, -1e+30  ;;  %vm8095_vm11 = vmmov %vm8094_vm4 }
 0xd82   : > { %v3286_v24 = vsel %vm1217_vm6, %v7540_v29, -inf }
 0xd86   : > { %v3264_v7 = vpop.f32.mrb[100].mxu1 }
 0xd87   : > { %v4685_v43 = vpop.f32.mrb[101].mxu1  ;;  %v7558_v37 = vsel %vm7436_vm0, %v3264_v7, -1e+30  ;;  %vm8096_vm0 = vmmov %vm8094_vm4 }
 0xd88   : > { %v3267_v55 = vpop.f32.mrb[102].mxu1  ;;  %v3289_v16 = vsel %vm1217_vm6, %v7558_v37, -inf }
 0xd89   : > { %v4686_v62 = vpop.f32.mrb[103].mxu1  ;;  %v7552_v31 = vsel %vm7448_vm13, %v3267_v55, -1e+30  ;;  %vm8097_vm13 = vmmov %vm8096_vm0 }
 0xd8a   : > { %v3292_v44 = vsel %vm1217_vm6, %v7552_v31, -inf }
 0xd8e   : > { %v3272_v63 = vpop.f32.mrb[104].mxu1 }
 0xd8f   : > { %v4689_v57 = vpop.f32.mrb[105].mxu1  ;;  %v7566_v1 = vsel %vm7464_vm3, %v3272_v63, -1e+30  ;;  %vm8098_vm3 = vcmask 253952  }
 0xd90   : > { %v3275_v40 = vpop.f32.mrb[106].mxu1  ;;  %3034 = vmax.xlane.f32.xlu0 %v3033_v12  ;;  %v3295_v38 = vsel %vm1230_vm12, %v7566_v1, -inf }
 0xd91   : > { %v4690_v32 = vpop.f32.mrb[107].mxu1 }
 0xd92   : > { %2796 = vmax.xlane.f32.xlu1 %v2795_v46 }
 0xd94   : > { %3040 = vmax.xlane.f32.xlu0 %v3039_v26 }
 0xd96   : > { %3037 = vmax.xlane.f32.xlu1 %v3036_v2 }
 0xd98   : > { %3046 = vmax.xlane.f32.xlu0 %v3045_v5 }
 0xd9a   : > { %3043 = vmax.xlane.f32.xlu1 %v3042_v17 }
 0xd9c   : > { %3287 = vmax.xlane.f32.xlu0 %v3286_v24 }
 0xd9e   : > { %3284 = vmax.xlane.f32.xlu1 %v3283_v33 }
 0xda0   : > { %3293 = vmax.xlane.f32.xlu0 %v3292_v44 }
 0xda2   : > { %3290 = vmax.xlane.f32.xlu1 %v3289_v16 }
 0xda6   : > { %3296 = vmax.xlane.f32.xlu1 %v3295_v38 }
 0xdc6   : > { %v2555_v60 = vpop.xlane.xlu0 %2554 }
 0xdc7   : > { %v2568_v20 = vsub.f32 %v7414_v58, %v2555_v60 }
 0xdc8   : > { %v2558_v34 = vpop.xlane.xlu1 %2557 }
 0xdc9   : > { %v2573_v45 = vmul.f32 1.442695, %v2568_v20  ;;  %v2569_v14 = vsub.f32 %v7428_v21, %v2558_v34 }
 0xdcb   : > { %5134 = vpow2.f32 %v2573_v45  ;;  %v2575_v23 = vmul.f32 1.442695, %v2569_v14 }
 0xdcd   : > { %5136 = vpow2.f32 %v2575_v23 }
 0xdce   : > { %v2561_v18 = vpop.xlane.xlu0 %2560 }
 0xdcf   : > { %v2570_v47 = vsub.f32 %v7442_v61, %v2561_v18 }
 0xdd1   : > { %v2577_v50 = vmul.f32 1.442695, %v2570_v47 }
 0xdd2   : > { %v2564_v9 = vpop.xlane.xlu0 %2563 }
 0xdd3   : > { %5138 = vpow2.f32 %v2577_v50  ;;  %v2571_v3 = vsub.f32 %v7456_v8, %v2564_v9 }
 0xdd5   : > { %v7574_v51 = vpop.eup %5134  ;;  %v2579_v53 = vmul.f32 1.442695, %v2571_v3 }
 0xdd6   : > { %v2567_v54 = vpop.xlane.xlu0 %2566  ;;  %v2583_v58 = vsel %vm1217_vm6, %v7574_v51, 0.0 }
 0xdd7   : > { %v7578_v7 = vpop.eup %5136  ;;  %5140 = vpow2.f32 %v2579_v53  ;;  %v2572_v21 = vsub.f32 %v7470_v6, %v2567_v54  ;;  %2584 = vadd.xlane.f32.xlu1 %v2583_v58 }
 0xdd8   : > { %v2586_v61 = vsel %vm1217_vm6, %v7578_v7, 0.0 }
 0xdd9   : > { %v2581_v43 = vmul.f32 1.442695, %v2572_v21  ;;  %2587 = vadd.xlane.f32.xlu0 %v2586_v61 }
 0xddb   : > { %5142 = vpow2.f32 %v2581_v43 }
 0xddd   : > { %v7583_v8 = vpop.eup %5138 }
 0xdde   : > { %v2785_v55 = vpop.xlane.xlu1 %2784  ;;  %v2589_v62 = vsel %vm1217_vm6, %v7583_v8, 0.0 }
 0xddf   : > { %v2798_v63 = vsub.f32 %v7476_v56, %v2785_v55  ;;  %2590 = vadd.xlane.f32.xlu0 %v2589_v62 }
 0xde0   : > { %v2788_v12 = vpop.xlane.xlu0 %2787 }
 0xde1   : > { %v7588_v57 = vpop.eup %5140  ;;  %v2803_v6 = vmul.f32 1.442695, %v2798_v63  ;;  %v2799_v40 = vsub.f32 %v7482_v49, %v2788_v12 }
 0xde2   : > { %v2592_v46 = vsel %vm1217_vm6, %v7588_v57, 0.0 }
 0xde3   : > { %5144 = vpow2.f32 %v2803_v6  ;;  %v2805_v32 = vmul.f32 1.442695, %v2799_v40  ;;  %2593 = vadd.xlane.f32.xlu1 %v2592_v46 }
 0xde5   : > { %v7593_v26 = vpop.eup %5142  ;;  %5146 = vpow2.f32 %v2805_v32 }
 0xde6   : > { %v2791_v2 = vpop.xlane.xlu1 %2790  ;;  %v2595_v56 = vsel %vm1230_vm12, %v7593_v26, 0.0 }
 0xde7   : > { %v2800_v5 = vsub.f32 %v7488_v19, %v2791_v2  ;;  %2596 = vadd.xlane.f32.xlu0 %v2595_v56 }
 0xde8   : > { %v2794_v38 = vpop.xlane.xlu0 %2793 }
 0xde9   : > { %v2807_v17 = vmul.f32 1.442695, %v2800_v5  ;;  %v2801_v60 = vsub.f32 %v7494_v13, %v2794_v38 }
 0xdea   : > { %v7615_v34 = vpop.permute.xlu1 %2845 }
 0xdeb   : > { %5148 = vpow2.f32 %v2807_v17  ;;  %v2809_v20 = vmul.f32 1.442695, %v2801_v60 }
 0xdec   : > { %v7617_v45 = vpop.permute.xlu0 %2843 }
 0xded   : > { %v7598_v24 = vpop.eup %5144  ;;  %5150 = vpow2.f32 %v2809_v20 }
 0xdee   : > { %v2813_v49 = vsel %vm1217_vm6, %v7598_v24, 0.0  ;;  %v7619_v14 = vpop.permute.xlu1 %3091 }
 0xdef   : > { %v7602_v33 = vpop.eup %5146  ;;  %2814 = vadd.xlane.f32.xlu1 %v2813_v49 }
 0xdf0   : > { %v2816_v44 = vsel %vm1217_vm6, %v7602_v33, 0.0 }
 0xdf1   : > { %2817 = vadd.xlane.f32.xlu0 %v2816_v44 }
 0xdf5   : > { %v7606_v16 = vpop.eup %5148 }
 0xdf6   : > { %v2819_v19 = vsel %vm1217_vm6, %v7606_v16, 0.0 }
 0xdf7   : > { %2820 = vadd.xlane.f32.xlu0 %v2819_v19  ;;  %v7622_v50 = vpop.eup %5150 }
 0xdf8   : > { %v2822_v21 = vsel %vm1217_vm6, %v7622_v50, 0.0 }
 0xe00   : > { %3095 = vrot.lane.b32.xlu1 %v7248_v4, %s8082_s1 }
 0xe0d   : > { %3093 = vrot.lane.b32.xlu0 %v7244_v0, %s8082_s1  ;;  %s5773_s1 = scalar_lea.vmem %s7870_s6, 640 }
 0xe0e   : > { %p5774_p6 = scmp.ne.s32.totalorder %s7870_s6, %s5773_s1 }
 0xe10   : > { %p5775_p5 = pnand %p5774_p6, %p8115_p7 }
 0xe12   : > { %p5776_p9 = pneg %p5775_p5 }
 0xe1d   : > { %v3035_v23 = vpop.xlane.xlu0 %3034 }
 0xe1e   : > { %v3048_v18 = vsub.f32 %v7506_v11, %v3035_v23 }
 0xe1f   : > { %v2797_v47 = vpop.xlane.xlu1 %2796 }
 0xe20   : > { %v3053_v9 = vmul.f32 1.442695, %v3048_v18  ;;  %v2802_v3 = vsub.f32 %v7510_v25, %v2797_v47 }
 0xe21   : > { %v3041_v53 = vpop.xlane.xlu0 %3040 }
 0xe22   : > { %5152 = vpow2.f32 %v3053_v9  ;;  %v2811_v13 = vmul.f32 1.442695, %v2802_v3  ;;  %v3050_v54 = vsub.f32 %v7516_v28, %v3041_v53 }
 0xe23   : > { %v3038_v58 = vpop.xlane.xlu1 %3037 }
 0xe24   : > { %5154 = vpow2.f32 %v2811_v13  ;;  %v3049_v61 = vsub.f32 %v7522_v15, %v3038_v58  ;;  %2823 = vadd.xlane.f32.xlu1 %v2822_v21  ;;  %v3057_v43 = vmul.f32 1.442695, %v3050_v54 }
 0xe25   : > { %v3047_v11 = vpop.xlane.xlu0 %3046 }
 0xe26   : > { %v3055_v55 = vmul.f32 1.442695, %v3049_v61  ;;  %v3052_v62 = vsub.f32 %v7528_v52, %v3047_v11 }
 0xe27   : > { %v3044_v63 = vpop.xlane.xlu1 %3043 }
 0xe28   : > { %5156 = vpow2.f32 %v3055_v55  ;;  %v3051_v25 = vsub.f32 %v7534_v10, %v3044_v63  ;;  %v3061_v28 = vmul.f32 1.442695, %v3052_v62 }
 0xe29   : > { %v3288_v12 = vpop.xlane.xlu0 %3287  ;;  %5158 = vpow2.f32 %v3057_v43 }
 0xe2a   : > { %v3059_v6 = vmul.f32 1.442695, %v3051_v25  ;;  %v3299_v40 = vsub.f32 %v7540_v29, %v3288_v12 }
 0xe2b   : > { %v3285_v46 = vpop.xlane.xlu1 %3284 }
 0xe2c   : > { %v7632_v32 = vpop.eup %5152  ;;  %5160 = vpow2.f32 %v3059_v6  ;;  %v3298_v15 = vsub.f32 %v7546_v22, %v3285_v46  ;;  %v3305_v56 = vmul.f32 1.442695, %v3299_v40 }
 0xe2d   : > { %v3063_v2 = vsel %vm1217_vm6, %v7632_v32, 0.0  ;;  %5162 = vpow2.f32 %v3061_v28  ;;  %v3294_v54 = vpop.xlane.xlu0 %3293 }
 0xe2e   : > { %v7637_v52 = vpop.eup %5154  ;;  %v3303_v10 = vmul.f32 1.442695, %v3298_v15  ;;  %3064 = vadd.xlane.f32.xlu1 %v3063_v2  ;;  %v3301_v58 = vsub.f32 %v7552_v31, %v3294_v54 }
 0xe2f   : > { %v3291_v5 = vpop.xlane.xlu1 %3290  ;;  %v2825_v17 = vsel %vm1230_vm12, %v7637_v52, 0.0 }
 0xe30   : > { %5164 = vpow2.f32 %v3303_v10  ;;  %v3300_v29 = vsub.f32 %v7558_v37, %v3291_v5  ;;  %2826 = vadd.xlane.f32.xlu0 %v2825_v17  ;;  %v3309_v11 = vmul.f32 1.442695, %v3301_v58  ;;  %v2859_v5 = vand.u32 %v7615_v34, %v6779_v27 }
 0xe31   : > { %5166 = vpow2.f32 %v3305_v56 }
 0xe32   : > { %v7642_v49 = vpop.eup %5156  ;;  %v3307_v22 = vmul.f32 1.442695, %v3300_v29 }
 0xe33   : > { %v3066_v44 = vsel %vm1217_vm6, %v7642_v49, 0.0  ;;  %v7646_v19 = vpop.eup %5158  ;;  %v3297_v21 = vpop.xlane.xlu1 %3296 }
 0xe34   : > { %3067 = vadd.xlane.f32.xlu0 %v3066_v44  ;;  %5168 = vpow2.f32 %v3307_v22  ;;  %v3069_v37 = vsel %vm1217_vm6, %v7646_v19, 0.0  ;;  %v3302_v61 = vsub.f32 %v7566_v1, %v3297_v21 }
 0xe35   : > { %5170 = vpow2.f32 %v3309_v11 }
 0xe36   : > { %v7648_v38 = vpop.eup %5160  ;;  %v3311_v43 = vmul.f32 1.442695, %v3302_v61 }
 0xe37   : > { %v3072_v60 = vsel %vm1217_vm6, %v7648_v38, 0.0  ;;  %v7654_v20 = vpop.eup %5162 }
 0xe38   : > { %3073 = vadd.xlane.f32.xlu1 %v3072_v60  ;;  %3070 = vadd.xlane.f32.xlu0 %v3069_v37  ;;  %v3075_v47 = vsel %vm1230_vm12, %v7654_v20, 0.0 }
 0xe3a   : > { %v7656_v23 = vpop.eup %5164 }
 0xe3b   : > { %v3313_v18 = vsel %vm1217_vm6, %v7656_v23, 0.0  ;;  %v7662_v9 = vpop.eup %5166 }
 0xe3c   : > { %3314 = vadd.xlane.f32.xlu1 %v3313_v18  ;;  %3076 = vadd.xlane.f32.xlu0 %v3075_v47  ;;  %v3316_v3 = vsel %vm1217_vm6, %v7662_v9, 0.0 }
 0xe3e   : > { %v7666_v53 = vpop.eup %5168 }
 0xe3f   : > { %v3319_v13 = vsel %vm1217_vm6, %v7666_v53, 0.0  ;;  %v7676_v25 = vpop.eup %5170 }
 0xe40   : > { %3317 = vadd.xlane.f32.xlu0 %v3316_v3  ;;  %v3322_v31 = vsel %vm1217_vm6, %v7676_v25, 0.0 }
 0xe44   : > { %3320 = vadd.xlane.f32.xlu0 %v3319_v13 }
 0xe4d   : > { %3343 = vrot.lane.b32.xlu1 %v7244_v0, %s8083_s14 }
 0xe5a   : > { %3341 = vrot.lane.b32.xlu0 %v7240_v30, %s8083_s14 }
 0xe64   : > { %v2585_v55 = vpop.xlane.xlu1 %2584 }
 0xe65   : > { %5172 = vrcp.f32 %v2585_v55 }
 0xe66   : > { %5174 = vpow2.f32 %v3311_v43  ;;  %v2588_v62 = vpop.xlane.xlu0 %2587 }
 0xe67   : > { %5176 = vrcp.f32 %v2588_v62 }
 0xe6c   : > { %v2591_v63 = vpop.xlane.xlu0 %2590 }
 0xe6d   : > { %5178 = vrcp.f32 %v2591_v63 }
 0xe6f   : > { %v5173_v0 = vpop.eup %5172 }
 0xe70   : > { %v7678_v12 = vpop.eup %5174  ;;  %v2594_v30 = vpop.xlane.xlu1 %2593  ;;  %v2603_v28 = vmul.f32 %v5173_v0, %v7574_v51 }
 0xe71   : > { %v5177_v1 = vpop.eup %5176  ;;  %5180 = vrcp.f32 %v2594_v30  ;;  %3323 = vadd.xlane.f32.xlu1 %v3322_v31  ;;  %v3325_v15 = vsel %vm1230_vm12, %v7678_v12, 0.0 }
 0xe72   : > { %v2604_v6 = vmul.f32 %v5177_v1, %v7578_v7 }
 0xe74   : > { %v2608_v40 = vpack.c.bf16 %v2604_v6, %v2603_v28  ;;  %v2597_v46 = vpop.xlane.xlu0 %2596 }
 0xe75   : > { %5182 = vrcp.f32 %v2597_v46  ;;  %3326 = vadd.xlane.f32.xlu1 %v3325_v15 }
 0xe76   : > { %4590 = vmatmul.mubr.msk.bf16.vlgmr.msra.gmra.mrb[72].mxu0 %vm1217_vm6, %v2608_v40 }
 0xe77   : > { %4620 = vmatpush3.bf16.msra.mxu0 %v7382_v35  ;;  %4593 = vmatprep.mubr.msk.bf16.mxu0 %vm5901_vm2, %v5900_v36  ;;  %v5179_v2 = vpop.eup %5178 }
 0xe78   : > { %4621 = vmatprep.subr.bf16.mxu0 %v5900_v36  ;;  %v2605_v56 = vmul.f32 %v5179_v2, %v7583_v8 }
 0xe7b   : > { %v5181_v51 = vpop.eup %5180  ;;  %4622 = vmatpush3.bf16.msra.mxu0 %v7617_v45 }
 0xe7c   : > { %v2815_v7 = vpop.xlane.xlu1 %2814  ;;  %4623 = vmatprep.subr.bf16.mxu0 %v5900_v36  ;;  %v2606_v10 = vmul.f32 %v5181_v51, %v7588_v57 }
 0xe7d   : > { %5184 = vrcp.f32 %v2815_v7 }
 0xe7e   : > { %v2818_v35 = vpop.xlane.xlu0 %2817  ;;  %v2609_v17 = vpack.c.bf16 %v2606_v10, %v2605_v56 }
 0xe7f   : > { %v5183_v29 = vpop.eup %5182  ;;  %4624 = vmatpush3.bf16.msra.mxu0 %v2859_v5  ;;  %5186 = vrcp.f32 %v2818_v35 }
 0xe80   : > { %4594 = vmatmul.mubr.msk.bf16.gmra.mrb[76].mxu0 %vm1217_vm6, %v2609_v17  ;;  %4655 = vmatprep.subr.bf16.mxu0 %v5900_v36  ;;  %v2607_v8 = vmul.f32 %v5183_v29, %v7593_v26 }
 0xe81   : > { %4597 = vmatprep.mubr.msk.bf16.mxu0 %vm5901_vm2, %v5900_v36 }
 0xe82   : > { %v2610_v57 = vpack.c.bf16 %v2607_v8, %v2607_v8 }
 0xe84   : > { %v2821_v37 = vpop.xlane.xlu0 %2820 }
 0xe85   : > { %5188 = vrcp.f32 %v2821_v37 }
 0xe86   : > { %3345 = vrot.lane.b32.xlu1 %v7248_v4, %s8083_s14  ;;  %v3096_v4 = vpop.permute.xlu1 %3095  ;;  %s5917_s14 = smov [#allocation33]  }
 0xe87   : > { %v5185_v34 = vpop.eup %5184  ;;  %s5777_s25 = sshll.u32 %s5917_s14, 4  ;;  %s5778_s25 = int_to_ptr.vmem [resolvable:$false] %s5777_s25 }
 0xe88   : > { %4598 = vmatmul.mubr.msk.bf16.gmra.mrb[80].mxu0 %vm1217_vm6, %v2610_v57  ;;  %v2833_v44 = vmul.f32 %v5185_v34, %v7598_v24  ;;  %v3094_v26 = vpop.permute.xlu0 %3093  ;;  %p5780_p12 = scmp.lt.s32.totalorder %s7870_s6, %s5778_s25 }
 0xe89   : > { %v5187_v45 = vpop.eup %5186  ;;  %4625 = vmatprep.mubr.msk.bf16.mxu0 %vm5901_vm2, %v5900_v36 }
 0xe8a   : > { %v2834_v22 = vmul.f32 %v5187_v45, %v7602_v33  ;;  %v3109_v33 = vand.u32 %v3096_v4, %v6779_v27 }
 0xe8c   : > { %v2838_v60 = vpack.c.bf16 %v2834_v22, %v2833_v44 }
 0xe8f   : > { %v5189_v18 = vpop.eup %5188 }
 0xe90   : > { %4626 = vmatmul.mubr.msk.bf16.vlgmr.msra.gmra.mrb[84].mxu0 %vm1217_vm6, %v2838_v60  ;;  %v2835_v3 = vmul.f32 %v5189_v18, %v7606_v16 }
 0xe91   : > { %4656 = vmatpush3.bf16.msra.mxu0 %v7619_v14  ;;  %4629 = vmatprep.mubr.msk.bf16.mxu0 %vm5901_vm2, %v5900_v36 }
 0xe92   : > { %4657 = vmatprep.subr.bf16.mxu0 %v5900_v36 }
 0xe95   : > { %4658 = vmatpush3.bf16.msra.mxu0 %v3094_v26 }
 0xe96   : > { %4659 = vmatprep.subr.bf16.mxu0 %v5900_v36 }
 0xe99   : > { %4660 = vmatpush3.bf16.msra.mxu0 %v3109_v33 }
 0xe9a   : > { %4691 = vmatprep.subr.bf16.mxu0 %v5900_v36 }
 0xeb1   : > { %v2824_v24 = vpop.xlane.xlu1 %2823 }
 0xeb2   : > { %5190 = vrcp.f32 %v2824_v24 }
 0xebb   : > { %v3065_v58 = vpop.xlane.xlu1 %3064 }
 0xebc   : > { %v5191_v14 = vpop.eup %5190 }
 0xebd   : > { %v2827_v47 = vpop.xlane.xlu0 %2826  ;;  %v2836_v13 = vmul.f32 %v5191_v14, %v7622_v50 }
 0xebe   : > { %5192 = vrcp.f32 %v2827_v47 }
 0xebf   : > { %v2839_v54 = vpack.c.bf16 %v2836_v13, %v2835_v3 }
 0xec1   : > { %4630 = vmatmul.mubr.msk.bf16.gmra.mrb[88].mxu0 %vm1217_vm6, %v2839_v54  ;;  %v3068_v21 = vpop.xlane.xlu0 %3067 }
 0xec2   : > { %5194 = vrcp.f32 %v3068_v21  ;;  %4633 = vmatprep.mubr.msk.bf16.mxu0 %vm5901_vm2, %v5900_v36 }
 0xec3   : > { %5196 = vrcp.f32 %v3065_v58 }
 0xec5   : > { %v3071_v61 = vpop.xlane.xlu0 %3070  ;;  %v3074_v11 = vpop.xlane.xlu1 %3073 }
 0xec6   : > { %5198 = vrcp.f32 %v3074_v11 }
 0xec7   : > { %5200 = vrcp.f32 %v3071_v61 }
 0xec8   : > { %v5193_v43 = vpop.eup %5192 }
 0xec9   : > { %v3077_v55 = vpop.xlane.xlu0 %3076  ;;  %v2837_v16 = vmul.f32 %v5193_v43, %v7637_v52  ;;  %v3315_v40 = vpop.xlane.xlu1 %3314 }
 0xeca   : > { %5202 = vrcp.f32 %v3077_v55  ;;  %v5026_v55 = vld [vmem:[#allocation23] sm:$0xff]  }
 0xecb   : > { %v2840_v50 = vpack.c.bf16 %v2837_v16, %v2837_v16  ;;  %4763 = vmatpush3.bf16.msra.mxu1 %v5026_v55 }
 0xecc   : > { %v5195_v62 = vpop.eup %5194  ;;  %4762 = vmatprep.subr.bf16.mxu1 %v5900_v36 }
 0xecd   : > { %4634 = vmatmul.mubr.msk.bf16.gmra.mrb[92].mxu0 %vm1217_vm6, %v2840_v50  ;;  %v3318_v63 = vpop.xlane.xlu0 %3317  ;;  %v5197_v0 = vpop.eup %5196  ;;  %v3084_v30 = vmul.f32 %v5195_v62, %v7642_v49 }
 0xece   : > { %4661 = vmatprep.mubr.msk.bf16.mxu0 %vm5901_vm2, %v5900_v36  ;;  %v3083_v31 = vmul.f32 %v5197_v0, %v7632_v32  ;;  %v3344_v32 = vpop.permute.xlu1 %3343  ;;  %5204 = vrcp.f32 %v3318_v63 }
 0xecf   : > { %5206 = vrcp.f32 %v3315_v40 }
 0xed0   : > { %v5199_v28 = vpop.eup %5198  ;;  %v3088_v6 = vpack.c.bf16 %v3084_v30, %v3083_v31 }
 0xed1   : > { %v3321_v1 = vpop.xlane.xlu0 %3320  ;;  %v5201_v52 = vpop.eup %5200  ;;  %v3086_v49 = vmul.f32 %v5199_v28, %v7648_v38 }
 0xed2   : > { %v3085_v15 = vmul.f32 %v5201_v52, %v7646_v19 }
 0xed4   : > { %v3089_v2 = vpack.c.bf16 %v3086_v49, %v3085_v15  ;;  %v5203_v51 = vpop.eup %5202 }
 0xed5   : > { %4662 = vmatmul.mubr.msk.bf16.vlgmr.msra.gmra.mrb[96].mxu0 %vm1217_vm6, %v3088_v6  ;;  %v3342_v46 = vpop.permute.xlu0 %3341  ;;  %v3087_v7 = vmul.f32 %v5203_v51, %v7654_v20 }
 0xed6   : > { %4692 = vmatpush3.bf16.msra.mxu0 %v3342_v46  ;;  %4665 = vmatprep.mubr.msk.bf16.mxu0 %vm5901_vm2, %v5900_v36 }
 0xed7   : > { %4693 = vmatprep.subr.bf16.mxu0 %v5900_v36  ;;  %v3090_v56 = vpack.c.bf16 %v3087_v7, %v3087_v7  ;;  %v5027_v7 = vld [vmem:[#allocation23 + $0x8] sm:$0xff]  }
 0xed8   : > { %v5205_v10 = vpop.eup %5204  ;;  %4764 = vmatpush3.bf16.msra.mxu1 %v5027_v7 }
 0xed9   : > { %v5207_v5 = vpop.eup %5206  ;;  %v3334_v35 = vmul.f32 %v5205_v10, %v7662_v9  ;;  %4741 = vmatprep.subr.bf16.mxu1 %v5900_v36 }
 0xeda   : > { %4694 = vmatpush3.bf16.msra.mxu0 %v3344_v32  ;;  %v3333_v20 = vmul.f32 %v5207_v5, %v7656_v23 }
 0xedb   : > { %4695 = vmatprep.subr.bf16.mxu0 %v5900_v36 }
 0xedc   : > { %v3338_v8 = vpack.c.bf16 %v3334_v35, %v3333_v20 }
 0xedd   : > { %4666 = vmatmul.mubr.msk.bf16.gmra.mrb[100].mxu0 %vm1217_vm6, %v3089_v2 }
 0xede   : > { %4669 = vmatprep.mubr.msk.bf16.mxu0 %vm5901_vm2, %v5900_v36 }
 0xee5   : > { %4670 = vmatmul.mubr.msk.bf16.gmra.mrb[104].mxu0 %vm1217_vm6, %v3090_v56 }
 0xee6   : > { %4697 = vmatprep.mubr.msk.bf16.mxu0 %vm5901_vm2, %v5900_v36 }
 0xefe   : > { %v3324_v19 = vpop.xlane.xlu1 %3323 }
 0xeff   : > { %5208 = vrcp.f32 %v3324_v19 }
 0xf00   : > { %5210 = vrcp.f32 %v3321_v1 }
 0xf02   : > { %v3327_v38 = vpop.xlane.xlu1 %3326 }
 0xf03   : > { %5212 = vrcp.f32 %v3327_v38 }
 0xf06   : > { %v3346_v17 = vpop.permute.xlu1 %3345 }
 0xf07   : > { %v3359_v29 = vand.u32 %v3346_v17, %v6779_v27 }
 0xf09   : > { %4696 = vmatpush3.bf16.msra.mxu0 %v3359_v29  ;;  %v5209_v57 = vpop.eup %5208 }
 0xf0a   : > { %4709 = vmatprep.subr.bf16.mxu0 %v5900_v36  ;;  %v5211_v34 = vpop.eup %5210  ;;  %v3336_v45 = vmul.f32 %v5209_v57, %v7676_v25 }
 0xf0b   : > { %v3335_v9 = vmul.f32 %v5211_v34, %v7666_v53 }
 0xf0c   : > { %4698 = vmatmul.mubr.msk.bf16.vlgmr.msra.gmra.mrb[108].mxu0 %vm1217_vm6, %v3338_v8 }
 0xf0d   : > { %4701 = vmatprep.mubr.msk.bf16.mxu0 %vm5901_vm2, %v5900_v36  ;;  %v3339_v22 = vpack.c.bf16 %v3336_v45, %v3335_v9  ;;  %v5213_v27 = vpop.eup %5212  ;;  %4710 = vmatpush3.bf16.msra.mxu0 %v5026_v55 }
 0xf0e   : > { %v3337_v23 = vmul.f32 %v5213_v27, %v7678_v12  ;;  %4711 = vmatprep.subr.bf16.mxu0 %v5900_v36 }
 0xf10   : > { %v3340_v44 = vpack.c.bf16 %v3337_v23, %v3337_v23 }
 0xf11   : > { %4712 = vmatpush3.bf16.msra.mxu0 %v5027_v7 }
 0xf12   : > { %4725 = vmatprep.subr.bf16.mxu0 %v5900_v36 }
 0xf14   : > { %4702 = vmatmul.mubr.msk.bf16.gmra.mrb[112].mxu0 %vm1217_vm6, %v3339_v22 }
 0xf15   : > { %4705 = vmatprep.mubr.msk.bf16.mxu0 %vm5901_vm2, %v5900_v36 }
 0xf1c   : > { %4706 = vmatmul.mubr.msk.bf16.gmra.mrb[116].mxu0 %vm1217_vm6, %v3340_v44 }
 0xf1d   : > { %4713 = vmatprep.mubr.msk.bf16.mxu0 %vm5901_vm2, %v5900_v36 }
 0xf49   : > { %v2665_v60 = vpop.f32.mrb[72].mxu0 }
 0xf4a   : > { %2687 = vst.msk [vmem:[#allocation2] sm:$0xff] %vm1137_vm8, %v2665_v60  ;;  %v4591_v25 = vpop.f32.mrb[73].mxu0 }
 0xf4b   : > { %v2668_v53 = vpop.f32.mrb[74].mxu0 }
 0xf4c   : > { %2688 = vst.msk [vmem:[#allocation2 + $0x8] sm:$0xff] %vm1137_vm8, %v2668_v53  ;;  %v4592_v37 = vpop.f32.mrb[75].mxu0 }
 0xf53   : > { %v2673_v4 = vpop.f32.mrb[76].mxu0 }
 0xf54   : > { %2689 = vst.msk [vmem:[#allocation2 + $0x10] sm:$0xff] %vm1137_vm8, %v2673_v4  ;;  %v4595_v26 = vpop.f32.mrb[77].mxu0 }
 0xf55   : > { %v2676_v33 = vpop.f32.mrb[78].mxu0 }
 0xf56   : > { %2690 = vst.msk [vmem:[#allocation2 + $0x18] sm:$0xff] %vm1137_vm8, %v2676_v33  ;;  %v4596_v12 = vpop.f32.mrb[79].mxu0  ;;  %vm8084_vm8 = vcmask 261312  }
 0xf57   : > { %vm8085_vm6 = vmmov %vm8084_vm8 }
 0xf58   : > { %vm8086_vm12 = vmmov %vm8085_vm6 }
 0xf5b   : > { %v2681_v24 = vpop.f32.mrb[80].mxu0 }
 0xf5c   : > { %2691 = vst.msk [vmem:[#allocation2 + $0x20] sm:$0x1] %vm1360_vm15, %v2681_v24  ;;  %v4599_v18 = vpop.f32.mrb[81].mxu0  ;;  %vm8087_vm15 = vmmov %vm8085_vm6 }
 0xf5d   : > { %v2684_v14 = vpop.f32.mrb[82].mxu0 }
 0xf5e   : > { %v4600_v47 = vpop.f32.mrb[83].mxu0 }
 0xf63   : > { %v2895_v3 = vpop.f32.mrb[84].mxu0 }
 0xf64   : > { %2922 = vrot.lane.b32.xlu0 %v2895_v3, %s7978_s26  ;;  %v4627_v13 = vpop.f32.mrb[85].mxu0 }
 0xf65   : > { %v2898_v54 = vpop.f32.mrb[86].mxu0 }
 0xf66   : > { %2924 = vrot.lane.b32.xlu1 %v2898_v54, %s7978_s26  ;;  %v4628_v58 = vpop.f32.mrb[87].mxu0 }
 0xf94   : > { %v2903_v21 = vpop.f32.mrb[88].mxu0 }
 0xf95   : > { %2926 = vrot.lane.b32.xlu0 %v2903_v21, %s7978_s26  ;;  %v4631_v61 = vpop.f32.mrb[89].mxu0 }
 0xf96   : > { %v2906_v11 = vpop.f32.mrb[90].mxu0 }
 0xf97   : > { %2928 = vrot.lane.b32.xlu1 %v2906_v11, %s7978_s26  ;;  %v4632_v43 = vpop.f32.mrb[91].mxu0 }
 0xfa0   : > { %v2911_v16 = vpop.f32.mrb[92].mxu0 }
 0xfa1   : > { %v4635_v50 = vpop.f32.mrb[93].mxu0 }
 0xfa2   : > { %v2914_v62 = vpop.f32.mrb[94].mxu0 }
 0xfa3   : > { %v4636_v63 = vpop.f32.mrb[95].mxu0 }
 0xfa8   : > { %v3145_v0 = vpop.f32.mrb[96].mxu0 }
 0xfa9   : > { %3172 = vrot.lane.b32.xlu0 %v3145_v0, %s5915_s24  ;;  %v4663_v30 = vpop.f32.mrb[97].mxu0 }
 0xfaa   : > { %v3148_v31 = vpop.f32.mrb[98].mxu0 }
 0xfab   : > { %3174 = vrot.lane.b32.xlu1 %v3148_v31, %s5915_s24  ;;  %v4664_v1 = vpop.f32.mrb[99].mxu0 }
 0xfb0   : > { %v3153_v28 = vpop.f32.mrb[100].mxu0 }
 0xfb1   : > { %v4667_v6 = vpop.f32.mrb[101].mxu0 }
 0xfb2   : > { %v3156_v40 = vpop.f32.mrb[102].mxu0 }
 0xfb3   : > { %v4668_v52 = vpop.f32.mrb[103].mxu0 }
 0xfb8   : > { %v3161_v46 = vpop.f32.mrb[104].mxu0 }
 0xfb9   : > { %v4671_v15 = vpop.f32.mrb[105].mxu0 }
 0xfba   : > { %v3164_v49 = vpop.f32.mrb[106].mxu0 }
 0xfbb   : > { %v4672_v32 = vpop.f32.mrb[107].mxu0 }
 0xfd6   : > { %v2923_v2 = vpop.permute.xlu0 %2922 }
 0xfd7   : > { %2937 = vst.msk [vmem:[#allocation2] sm:$0xff] %vm1607_vm5, %v2923_v2 }
 0xfd8   : > { %v2925_v51 = vpop.permute.xlu1 %2924 }
 0xfd9   : > { %2938 = vst.msk [vmem:[#allocation2 + $0x8] sm:$0xff] %vm1607_vm5, %v2925_v51 }
 0xfdf   : > { %v3395_v56 = vpop.f32.mrb[108].mxu0 }
 0xfe0   : > { %3422 = vrot.lane.b32.xlu0 %v3395_v56, %s5916_s0  ;;  %v4699_v19 = vpop.f32.mrb[109].mxu0 }
 0xfe1   : > { %v3398_v38 = vpop.f32.mrb[110].mxu0 }
 0xfe2   : > { %3424 = vrot.lane.b32.xlu1 %v3398_v38, %s5916_s0  ;;  %v4700_v10 = vpop.f32.mrb[111].mxu0 }
 0xfe4   : > { %3176 = vrot.lane.b32.xlu0 %v3153_v28, %s5915_s24 }
 0xfe6   : > { %3178 = vrot.lane.b32.xlu1 %v3156_v40, %s5915_s24 }
 0xfe7   : > { %v3403_v5 = vpop.f32.mrb[112].mxu0 }
 0xfe8   : > { %3426 = vrot.lane.b32.xlu0 %v3403_v5, %s5916_s0  ;;  %v4703_v35 = vpop.f32.mrb[113].mxu0 }
 0xfe9   : > { %v3406_v17 = vpop.f32.mrb[114].mxu0 }
 0xfea   : > { %3428 = vrot.lane.b32.xlu1 %v3406_v17, %s5916_s0  ;;  %v4704_v29 = vpop.f32.mrb[115].mxu0 }
 0xfec   : > { %2930 = vrot.lane.b32.xlu0 %v2911_v16, %s7978_s26  ;;  %s5779_s26 = scalar_lea.vmem %s5778_s25, 1280 }
 0xfed   : > { %p5781_p1 = scmp.lt.s32.totalorder %s5779_s26, %s5773_s1 }
 0xfee   : > { %3180 = vrot.lane.b32.xlu1 %v3161_v46, %s5915_s24 }
 0xfef   : > { %v3411_v20 = vpop.f32.mrb[116].mxu0  ;;  %p5782_p13 = por %p5781_p1, %p5780_p12 }
 0xff0   : > { %3430 = vrot.lane.b32.xlu0 %v3411_v20, %s5916_s0  ;;  %v4707_v8 = vpop.f32.mrb[117].mxu0  ;;  %s8112_s0 = sld [smem:[#allocation62_spill]] }
 0xff1   : > { %v3414_v57 = vpop.f32.mrb[118].mxu0  ;;  %p5783_p0 = pnand %p5782_p13, %p5776_p9 }
 0xff2   : > { %v4708_v34 = vpop.f32.mrb[119].mxu0 }
 0xff6   : > { %s8113_s24 = smov %s8112_s0  ;;  %s7876_s23 = scalar_lea.hbm %s8112_s0, %s4768_s5 }
0x1007   : > { %v2927_v45 = vpop.permute.xlu0 %2926 }
0x1008   : > { %2939 = vst.msk [vmem:[#allocation2 + $0x10] sm:$0xff] %vm1607_vm5, %v2927_v45 }
0x1009   : > { %v2929_v9 = vpop.permute.xlu1 %2928 }
0x100a   : > { %2940 = vst.msk [vmem:[#allocation2 + $0x18] sm:$0xff] %vm1607_vm5, %v2929_v9  ;;  %vm8088_vm5 = vcmask 122944  }
0x101b   : > { %v3173_v22 = vpop.permute.xlu0 %3172 }
0x101c   : > { %3187 = vst.msk [vmem:[#allocation2] sm:$0xff] %vm1859_vm10, %v3173_v22 }
0x101d   : > { %v3175_v27 = vpop.permute.xlu1 %3174 }
0x101e   : > { %3188 = vst.msk [vmem:[#allocation2 + $0x8] sm:$0xff] %vm1859_vm10, %v3175_v27 }
0x1052   : > { %v3423_v23 = vpop.permute.xlu0 %3422 }
0x1053   : > { %3437 = vst.msk [vmem:[#allocation2] sm:$0xff] %vm8084_vm8, %v3423_v23  ;;  %vm8099_vm8 = vmmov %vm8096_vm0 }
0x1054   : > { %v3425_v44 = vpop.permute.xlu1 %3424 }
0x1055   : > { %3438 = vst.msk [vmem:[#allocation2 + $0x8] sm:$0xff] %vm8085_vm6, %v3425_v44  ;;  %vm8100_vm6 = vmmov %vm8096_vm0  ;;  %v5028_v44 = vld [vmem:[#allocation27] sm:$0xff]  }
0x1056   : > { %v3177_v60 = vpop.permute.xlu0 %3176 }
0x1057   : > { %3189 = vst.msk [vmem:[#allocation2 + $0x10] sm:$0xff] %vm1859_vm10, %v3177_v60  ;;  %v5029_v60 = vld [vmem:[#allocation27 + $0x8] sm:$0xff]  }
0x1058   : > { %v3179_v25 = vpop.permute.xlu1 %3178 }
0x1059   : > { %3190 = vst.msk [vmem:[#allocation2 + $0x18] sm:$0xff] %vm1859_vm10, %v3179_v25  ;;  %vm8091_vm10 = vcmask 254144  }
0x105a   : > { %v3427_v53 = vpop.permute.xlu0 %3426  ;;  %v3442_v4 = vld [vmem:[#allocation2] sm:$0xff] }
0x105b   : > { %3439 = vst.msk [vmem:[#allocation2 + $0x10] sm:$0xff] %vm8086_vm12, %v3427_v53  ;;  %vm8101_vm12 = vmmov %vm8096_vm0 }
0x105c   : > { %v3429_v37 = vpop.permute.xlu1 %3428  ;;  %v3443_v26 = vld [vmem:[#allocation2 + $0x8] sm:$0xff] }
0x105d   : > { %3440 = vst.msk [vmem:[#allocation2 + $0x18] sm:$0xff] %vm8087_vm15, %v3429_v37  ;;  %v3447_v33 = vpack.c.bf16 %v3443_v26, %v3442_v4  ;;  %vm8102_vm15 = vmmov %vm8096_vm0 }
0x105e   : > { %v2931_v12 = vpop.permute.xlu0 %2930 }
0x105f   : > { %2941 = vst.msk [vmem:[#allocation2 + $0x20] sm:$0x1] %vm8088_vm5, %v2931_v12  ;;  %4714 = vmatmul.mubr.msk.bf16.vlgmr.msra.gmra.mrb[120].mxu0 %vm8089_vm14, %v3447_v33  ;;  %vm8103_vm5 = vmmov %vm8098_vm3 }
0x1060   : > { %v3181_v24 = vpop.permute.xlu1 %3180  ;;  %4729 = vmatprep.mubr.msk.bf16.mxu0 %vm5901_vm2, %v5900_v36  ;;  %4726 = vmatpush3.bf16.msra.mxu0 %v5028_v44  ;;  %vm8104_vm14 = vmmov %vm8096_vm0 }
0x1061   : > { %3191 = vst.msk [vmem:[#allocation2 + $0x20] sm:$0x1] %vm8090_vm1, %v3181_v24  ;;  %4727 = vmatprep.subr.bf16.mxu0 %v5900_v36  ;;  %vm8105_vm1 = vmmov %vm8096_vm0 }
0x1062   : > { %v3431_v18 = vpop.permute.xlu0 %3430  ;;  %v3444_v14 = vld [vmem:[#allocation2 + $0x10] sm:$0xff] }
0x1063   : > { %3441 = vst.msk [vmem:[#allocation2 + $0x20] sm:$0x1] %vm8091_vm10, %v3431_v18  ;;  %vm8106_vm10 = vmmov %vm8096_vm0 }
0x1064   : > { %v3445_v47 = vld [vmem:[#allocation2 + $0x18] sm:$0xff]  ;;  %4728 = vmatpush3.bf16.msra.mxu0 %v5029_v60 }
0x1065   : > { %v3448_v3 = vpack.c.bf16 %v3445_v47, %v3444_v14 }
0x1067   : > { %4718 = vmatmul.mubr.msk.bf16.vlgmr.msra.gmra.mrb[108].mxu1 %vm8092_vm7, %v3448_v3  ;;  %vm3779_vm7 = vcmask 523264  }
0x1068   : > { %4721 = vmatprep.mubr.msk.bf16.mxu1 %vm5901_vm2, %v5900_v36 }
0x106a   : > { %v3446_v13 = vld [vmem:[#allocation2 + $0x20] sm:$0x1] }
0x106b   : > { %v3449_v54 = vpack.c.bf16 %v3446_v13, %v3446_v13  ;;  %v4226_v13 = vld [vmem:[#allocation24] ss:$0 sm:$0xff] }
0x106f   : > { %4722 = vmatmul.mubr.msk.bf16.gmra.mrb[112].mxu1 %vm8093_vm9, %v3449_v54  ;;  %vm8108_vm9 = vmmov %vm8096_vm0 }
0x1070   : > { %4749 = vmatprep.mubr.msk.bf16.mxu1 %vm5901_vm2, %v5900_v36 }
0x1132   : > { %v3505_v58 = vpop.f32.mrb[120].mxu0 }
0x1133   : > { %v7807_v21 = vadd.f32 %v3505_v58, %v7195_v39  ;;  %v4715_v61 = vpop.f32.mrb[121].mxu0 }
0x1134   : > { %v3508_v11 = vpop.f32.mrb[122].mxu0 }
0x1135   : > { %v7810_v43 = vadd.f32 %v3508_v11, %v7198_v59  ;;  %v4716_v55 = vpop.f32.mrb[123].mxu0  ;;  %v3548_v16 = vsel %vm8094_vm4, %v7807_v21, 0.0  ;;  %vm8110_vm4 = vmmov %vm8096_vm0 }
0x1136   : > { %3549 = vadd.xlane.f32.xlu1 %v3548_v16 }
0x1137   : > { %v3551_v50 = vsel %vm8095_vm11, %v7810_v43, 0.0  ;;  %vm8111_vm11 = vmmov %vm8096_vm0 }
0x1138   : > { %3552 = vadd.xlane.f32.xlu0 %v3551_v50 }
0x113a   : > { %v3513_v62 = vpop.f32.mrb[108].mxu1 }
0x113b   : > { %v7817_v63 = vadd.f32 %v3513_v62, %v7205_v41  ;;  %v4719_v39 = vpop.f32.mrb[109].mxu1 }
0x113c   : > { %v3516_v0 = vpop.f32.mrb[110].mxu1  ;;  %v4227_v39 = vld [vmem:[#allocation26] ss:$0 sm:$0xff] }
0x113d   : > { %v7820_v30 = vadd.f32 %v3516_v0, %v7208_v42  ;;  %v4720_v59 = vpop.f32.mrb[111].mxu1  ;;  %v3554_v31 = vsel %vm8096_vm0, %v7817_v63, 0.0 }
0x113e   : > { %3555 = vadd.xlane.f32.xlu0 %v3554_v31 }
0x113f   : > { %v3557_v1 = vsel %vm8097_vm13, %v7820_v30, 0.0 }
0x1142   : > { %3558 = vadd.xlane.f32.xlu0 %v3557_v1  ;;  %v3521_v28 = vpop.f32.mrb[112].mxu1 }
0x1143   : > { %v7827_v6 = vadd.f32 %v3521_v28, %v7215_v48  ;;  %v4723_v41 = vpop.f32.mrb[113].mxu1 }
0x1144   : > { %v3524_v40 = vpop.f32.mrb[114].mxu1 }
0x1145   : > { %v4724_v52 = vpop.f32.mrb[115].mxu1  ;;  %v3560_v42 = vsel %vm8098_vm3, %v7827_v6, 0.0 }
0x1146   : > { %3561 = vadd.xlane.f32.xlu1 %v3560_v42 }
0x11c3   : > { %v3550_v46 = vpop.xlane.xlu1 %3549 }
0x11c4   : > { %v3563_v15 = vmul.f32 0.03125, %v3550_v46 }
0x11c5   : > { %v3553_v49 = vpop.xlane.xlu0 %3552 }
0x11c6   : > { %v3568_v32 = vsub.f32 %v7807_v21, %v3563_v15  ;;  %v3564_v2 = vmul.f32 0.03125, %v3553_v49 }
0x11c8   : > { %v3569_v51 = vsub.f32 %v7810_v43, %v3564_v2  ;;  %v3573_v7 = vmul.f32 %v3568_v32, %v3568_v32 }
0x11ca   : > { %v3578_v56 = vsel %vm8099_vm8, %v3573_v7, 0.0  ;;  %v3574_v48 = vmul.f32 %v3569_v51, %v3569_v51 }
0x11cb   : > { %3579 = vadd.xlane.f32.xlu0 %v3578_v56  ;;  %v3556_v19 = vpop.xlane.xlu0 %3555 }
0x11cc   : > { %v3565_v38 = vmul.f32 0.03125, %v3556_v19  ;;  %v3581_v10 = vsel %vm8100_vm6, %v3574_v48, 0.0  ;;  %v5030_v19 = vld [vmem:[#allocation30] sm:$0xff]  }
0x11cd   : > { %3582 = vadd.xlane.f32.xlu1 %v3581_v10  ;;  %4742 = vmatpush3.bf16.msra.mxu1 %v5030_v19  ;;  %v5032_v10 = vld [vmem:[#allocation30 + $0x10] sm:$0xff]  }
0x11ce   : > { %v3570_v5 = vsub.f32 %v7817_v63, %v3565_v38  ;;  %4743 = vmatprep.subr.bf16.mxu1 %v5900_v36  ;;  %v5031_v38 = vld [vmem:[#allocation30 + $0x8] sm:$0xff]  }
0x11cf   : > { %v3559_v35 = vpop.xlane.xlu0 %3558 }
0x11d0   : > { %v3566_v17 = vmul.f32 0.03125, %v3559_v35  ;;  %v3575_v29 = vmul.f32 %v3570_v5, %v3570_v5  ;;  %v4228_v35 = vld [vmem:[#allocation29] ss:$0 sm:$0xff] }
0x11d1   : > { %4744 = vmatpush3.bf16.msra.mxu1 %v5031_v38 }
0x11d2   : > { %v3571_v20 = vsub.f32 %v7820_v30, %v3566_v17  ;;  %v3584_v8 = vsel %vm8101_vm12, %v3575_v29, 0.0  ;;  %4745 = vmatprep.subr.bf16.mxu1 %v5900_v36 }
0x11d3   : > { %v3562_v57 = vpop.xlane.xlu1 %3561  ;;  %3585 = vadd.xlane.f32.xlu0 %v3584_v8 }
0x11d4   : > { %v3567_v34 = vmul.f32 0.03125, %v3562_v57  ;;  %v3576_v45 = vmul.f32 %v3571_v20, %v3571_v20 }
0x11d5   : > { %4746 = vmatpush3.bf16.msra.mxu1 %v5032_v10 }
0x11d6   : > { %v3572_v9 = vsub.f32 %v7827_v6, %v3567_v34  ;;  %v3587_v22 = vsel %vm8102_vm15, %v3576_v45, 0.0  ;;  %4747 = vmatprep.subr.bf16.mxu1 %v5900_v36 }
0x11d7   : > { %3588 = vadd.xlane.f32.xlu1 %v3587_v22 }
0x11d8   : > { %v3577_v27 = vmul.f32 %v3572_v9, %v3572_v9 }
0x11da   : > { %v3590_v23 = vsel %vm8103_vm5, %v3577_v27, 0.0 }
0x11db   : > { %3591 = vadd.xlane.f32.xlu0 %v3590_v23 }
0x1258   : > { %v3580_v25 = vpop.xlane.xlu0 %3579 }
0x1259   : > { %v3593_v53 = vmul.f32 0.03125, %v3580_v25 }
0x125a   : > { %v3583_v37 = vpop.xlane.xlu1 %3582 }
0x125b   : > { %v3598_v4 = vadd.f32 1e-05, %v3593_v53  ;;  %v3594_v26 = vmul.f32 0.03125, %v3583_v37 }
0x125d   : > { %5214 = vrsqrt.f32 %v3598_v4  ;;  %v3599_v33 = vadd.f32 1e-05, %v3594_v26 }
0x125f   : > { %5216 = vrsqrt.f32 %v3599_v33 }
0x1260   : > { %v3586_v12 = vpop.xlane.xlu0 %3585 }
0x1261   : > { %v3595_v24 = vmul.f32 0.03125, %v3586_v12 }
0x1263   : > { %v3600_v18 = vadd.f32 1e-05, %v3595_v24 }
0x1264   : > { %v3589_v14 = vpop.xlane.xlu1 %3588 }
0x1265   : > { %5218 = vrsqrt.f32 %v3600_v18  ;;  %v3596_v47 = vmul.f32 0.03125, %v3589_v14 }
0x1267   : > { %v5215_v3 = vpop.eup %5214  ;;  %v3601_v54 = vadd.f32 1e-05, %v3596_v47 }
0x1268   : > { %v3608_v58 = vmul.f32 %v5215_v3, %v3568_v32  ;;  %v3592_v61 = vpop.xlane.xlu0 %3591 }
0x1269   : > { %v5217_v11 = vpop.eup %5216  ;;  %5220 = vrsqrt.f32 %v3601_v54  ;;  %v3597_v55 = vmul.f32 0.03125, %v3592_v61 }
0x126a   : > { %v3619_v16 = vmul.f32 %v4226_v13, %v3608_v58  ;;  %v3609_v50 = vmul.f32 %v5217_v11, %v3569_v51 }
0x126b   : > { %v3602_v62 = vadd.f32 1e-05, %v3597_v55 }
0x126c   : > { %v3620_v0 = vmul.f32 %v4226_v13, %v3609_v50  ;;  %v3630_v59 = vadd.f32 %v4227_v39, %v3619_v16 }
0x126d   : > { %5222 = vrsqrt.f32 %v3602_v62 }
0x126e   : > { %v3631_v31 = vadd.f32 %v4227_v39, %v3620_v0 }
0x126f   : > { %v5219_v1 = vpop.eup %5218 }
0x1270   : > { %v3610_v28 = vmul.f32 %v5219_v1, %v3570_v5  ;;  %v3635_v41 = vpack.c.bf16 %v3631_v31, %v3630_v59  ;;  %v5033_v5 = vld [vmem:[#allocation30 + $0x18] sm:$0xff]  }
0x1271   : > { %4748 = vmatpush3.bf16.msra.mxu1 %v5033_v5 }
0x1272   : > { %4730 = vmatmul.mubr.msk.bf16.vlgmr.msra.gmra.mrb[124].mxu0 %vm8104_vm14, %v3635_v41  ;;  %v3621_v42 = vmul.f32 %v4226_v13, %v3610_v28 }
0x1273   : > { %v5221_v40 = vpop.eup %5220  ;;  %4733 = vmatprep.mubr.msk.bf16.mxu0 %vm5901_vm2, %v5900_v36 }
0x1274   : > { %v3611_v52 = vmul.f32 %v5221_v40, %v3571_v20  ;;  %v3632_v32 = vadd.f32 %v4227_v39, %v3621_v42 }
0x1276   : > { %v3622_v46 = vmul.f32 %v4226_v13, %v3611_v52 }
0x1277   : > { %v5223_v15 = vpop.eup %5222 }
0x1278   : > { %v3612_v49 = vmul.f32 %v5223_v15, %v3572_v9  ;;  %v3633_v2 = vadd.f32 %v4227_v39, %v3622_v46  ;;  %v4234_v15 = vld [vmem:[#allocation32] ss:$0 sm:$0xff] }
0x127a   : > { %v3636_v51 = vpack.c.bf16 %v3633_v2, %v3632_v32  ;;  %v3623_v7 = vmul.f32 %v4226_v13, %v3612_v49 }
0x127c   : > { %4734 = vmatmul.mubr.msk.bf16.gmra.mrb[128].mxu0 %vm8105_vm1, %v3636_v51  ;;  %v3634_v56 = vadd.f32 %v4227_v39, %v3623_v7 }
0x127d   : > { %4737 = vmatprep.mubr.msk.bf16.mxu0 %vm5901_vm2, %v5900_v36 }
0x127e   : > { %v3637_v48 = vpack.c.bf16 %v3634_v56, %v3634_v56 }
0x1284   : > { %4738 = vmatmul.mubr.msk.bf16.gmra.mrb[132].mxu0 %vm8106_vm10, %v3637_v48 }
0x1345   : > { %v3699_v17 = vpop.f32.mrb[124].mxu0 }
0x1346   : > { %v3700_v29 = vadd.f32 %v4228_v35, %v3699_v17  ;;  %v4731_v20 = vpop.f32.mrb[125].mxu0 }
0x1347   : > { %v3702_v8 = vpop.f32.mrb[126].mxu0 }
0x1348   : > { %v3726_v57 = vmul.f32 0.70710677, %v3700_v29  ;;  %v3703_v34 = vadd.f32 %v4228_v35, %v3702_v8  ;;  %v4732_v45 = vpop.f32.mrb[127].mxu0  ;;  %v3721_v12 = vmul.f32 0.5, %v3700_v29 }
0x134a   : > { %5224 = verf.f32 %v3726_v57  ;;  %v3727_v9 = vmul.f32 0.70710677, %v3703_v34  ;;  %v3722_v24 = vmul.f32 0.5, %v3703_v34 }
0x134c   : > { %5226 = verf.f32 %v3727_v9 }
0x134f   : > { %v3707_v22 = vpop.f32.mrb[128].mxu0 }
0x1350   : > { %v3708_v27 = vadd.f32 %v4228_v35, %v3707_v22  ;;  %v4735_v23 = vpop.f32.mrb[129].mxu0 }
0x1351   : > { %v3710_v44 = vpop.f32.mrb[130].mxu0 }
0x1352   : > { %v3728_v60 = vmul.f32 0.70710677, %v3708_v27  ;;  %v3711_v25 = vadd.f32 %v4228_v35, %v3710_v44  ;;  %v4736_v53 = vpop.f32.mrb[131].mxu0  ;;  %v3723_v39 = vmul.f32 0.5, %v3708_v27 }
0x1354   : > { %v5225_v37 = vpop.eup %5224  ;;  %5228 = verf.f32 %v3728_v60  ;;  %v3729_v4 = vmul.f32 0.70710677, %v3711_v25  ;;  %v3724_v0 = vmul.f32 0.5, %v3711_v25 }
0x1355   : > { %v3736_v26 = vadd.f32 1.0, %v5225_v37 }
0x1356   : > { %v5227_v33 = vpop.eup %5226  ;;  %5230 = verf.f32 %v3729_v4 }
0x1357   : > { %v3737_v18 = vadd.f32 1.0, %v5227_v33  ;;  %v3715_v14 = vpop.f32.mrb[132].mxu0  ;;  %v3741_v13 = vmul.f32 %v3736_v26, %v3721_v12 }
0x1358   : > { %v3716_v47 = vadd.f32 %v4228_v35, %v3715_v14  ;;  %v4739_v3 = vpop.f32.mrb[133].mxu0 }
0x1359   : > { %v3742_v54 = vmul.f32 %v3737_v18, %v3722_v24  ;;  %v3718_v58 = vpop.f32.mrb[134].mxu0 }
0x135a   : > { %v3730_v61 = vmul.f32 0.70710677, %v3716_v47  ;;  %v4740_v11 = vpop.f32.mrb[135].mxu0  ;;  %v3725_v40 = vmul.f32 0.5, %v3716_v47 }
0x135b   : > { %v3746_v55 = vpack.c.bf16 %v3742_v54, %v3741_v13 }
0x135c   : > { %5232 = verf.f32 %v3730_v61 }
0x135d   : > { %4750 = vmatmul.mubr.msk.bf16.vlgmr.msra.gmra.mrb[116].mxu1 %vm3779_vm7, %v3746_v55 }
0x135e   : > { %v5229_v16 = vpop.eup %5228  ;;  %4753 = vmatprep.mubr.msk.bf16.mxu1 %vm5901_vm2, %v5900_v36 }
0x135f   : > { %v3738_v50 = vadd.f32 1.0, %v5229_v16 }
0x1360   : > { %v5231_v62 = vpop.eup %5230 }
0x1361   : > { %v3739_v59 = vadd.f32 1.0, %v5231_v62  ;;  %v3743_v31 = vmul.f32 %v3738_v50, %v3723_v39 }
0x1363   : > { %v3744_v1 = vmul.f32 %v3739_v59, %v3724_v0 }
0x1365   : > { %v3747_v28 = vpack.c.bf16 %v3744_v1, %v3743_v31 }
0x1366   : > { %v5233_v41 = vpop.eup %5232 }
0x1367   : > { %v3740_v52 = vadd.f32 1.0, %v5233_v41  ;;  %4754 = vmatmul.mubr.msk.bf16.gmra.mrb[120].mxu1 %vm3779_vm7, %v3747_v28 }
0x1368   : > { %4757 = vmatprep.mubr.msk.bf16.mxu1 %vm5901_vm2, %v5900_v36  ;;  %vm8109_vm2 = vmmov %vm8096_vm0 }
0x1369   : > { %v3745_v42 = vmul.f32 %v3740_v52, %v3725_v40  ;;  %vm8114_vm0 = vmmov %vm8098_vm3 }
0x136b   : > { %v3748_v46 = vpack.c.bf16 %v3745_v42, %v3745_v42 }
0x136f   : > { %4758 = vmatmul.mubr.msk.bf16.gmra.mrb[124].mxu1 %vm3779_vm7, %v3748_v46 }
0x1430   : > { %v3823_v49 = vpop.f32.mrb[116].mxu1 }
0x1431   : > { %v3824_v32 = vadd.f32 %v4234_v15, %v3823_v49  ;;  %v4751_v2 = vpop.f32.mrb[117].mxu1 }
0x1432   : > { %v3826_v51 = vpop.f32.mrb[118].mxu1 }
0x1433   : > { %v3845_v7 = vadd.f32 %v3824_v32, %v7807_v21  ;;  %v3827_v56 = vadd.f32 %v4234_v15, %v3826_v51  ;;  %v4752_v48 = vpop.f32.mrb[119].mxu1 }
0x1435   : > { %3850 = vst.msk [vmem:[%s861_s3] sm:$0xff] %vm8108_vm9, %v3845_v7  ;;  %v3846_v36 = vadd.f32 %v3827_v56, %v7810_v43 }
0x1437   : > { %3851 = vst.msk [vmem:[%s861_s3 + $0x8] sm:$0xff] %vm8109_vm2, %v3846_v36 }
0x143a   : > { %v3831_v19 = vpop.f32.mrb[120].mxu1 }
0x143b   : > { %v3832_v38 = vadd.f32 %v4234_v15, %v3831_v19  ;;  %v4755_v10 = vpop.f32.mrb[121].mxu1 }
0x143c   : > { %v3834_v5 = vpop.f32.mrb[122].mxu1 }
0x143d   : > { %v3847_v35 = vadd.f32 %v3832_v38, %v7817_v63  ;;  %v3835_v17 = vadd.f32 %v4234_v15, %v3834_v5  ;;  %v4756_v21 = vpop.f32.mrb[123].mxu1 }
0x143f   : > { %3852 = vst.msk [vmem:[%s861_s3 + $0x10] sm:$0xff] %vm8110_vm4, %v3847_v35  ;;  %v3848_v29 = vadd.f32 %v3835_v17, %v7820_v30 }
0x1441   : > { %3853 = vst.msk [vmem:[%s861_s3 + $0x18] sm:$0xff] %vm8111_vm11, %v3848_v29 }
0x1442   : > { %v3839_v43 = vpop.f32.mrb[124].mxu1 }
0x1443   : > { %v3840_v20 = vadd.f32 %v4234_v15, %v3839_v43  ;;  %v4759_v8 = vpop.f32.mrb[125].mxu1 }
0x1444   : > { %v3842_v63 = vpop.f32.mrb[126].mxu1 }
0x1445   : > { %v3849_v57 = vadd.f32 %v3840_v20, %v7827_v6  ;;  %v4760_v34 = vpop.f32.mrb[127].mxu1 }
0x1447   : > { %3854 = vst.msk [vmem:[%s861_s3 + $0x20] sm:$0x1] %vm8114_vm0, %v3849_v57 }
0x1448   : > { %5786 = shalt.err (!%p5783_p0)
}
0x1449   : > { %s5787_s3 = scalar_lea.hbm %s7876_s23, 640  ;;  %s5791_s2 = scalar_lea.hbm %s8113_s24, 1280 }
0x144a   : > { %p5788_p2 = scmp.ne.s32.totalorder %s7876_s23, %s5787_s3  ;;  %p5792_p10 = scmp.lt.u32.totalorder %s7876_s23, %s8113_s24 }
0x144b   : > { %p5793_p11 = scmp.lt.u32.totalorder %s5791_s2, %s5787_s3  ;;  %p5795_p6 = scmp.lt.u32.totalorder %s5787_s3, %s7876_s23 }
0x144c   : > { %p5789_p8 = pnand %p5788_p2, %p8115_p7 }
0x144d   : > { %p5794_p3 = por %p5793_p11, %p5792_p10 }
0x144e   : > { %p5790_p4 = pneg %p5789_p8 }
0x144f   : > { %p5796_p5 = por %p5795_p6, %p5794_p3 }
0x1451   : > { %p5797_p9 = pnand %p5796_p5, %p5790_p4 }
0x1453   : > { %5800 = shalt.err (!%p5797_p9)
}
0x1454   : > { %s5918_s26 = smov 128   ;;  %s8116_s1 = smov 8  }
0x1455   : > { %4843 = dma.vmem_to_hbm [thread:$0]  (%p8115_p7), %s7870_s6, 640, %s7876_s23, %s3856_s4, %s5918_s26, %s5918_s26, %s8116_s1  }
0x1456 PF: > { %s8117_s25 = sld [smem:[#allocation45_spill]]  ;;  %s8118_s5 = sld [smem:[#allocation48_spill]] }
0x1457   : > { %p8119_p12 = scmp.ne.s32.totalorder %s8020_s29, 0 }
0x145c   : > { %s3884_s7 = sand.u32 1, %s8117_s25   ;;  %p8120_p1 = scmp.ge.s32.totalorder %s8118_s5, 2 }
0x145d   : > { %s3885_s3 = scalar_lea.sflag [#allocation5], %s3884_s7 }
0x145e   : > { %p4905_p13 = pnand %p8120_p1, %p8119_p12 }
0x1460   : > { %5858 = dma.done.wait (!%p4905_p13), %s3885_s3, 640  }
0x1461   : > { %5860 = vsyncadd (!%p4905_p13), %s3885_s3, 4294966656  ;;  %s8121_s0 = sld [smem:[#allocation46_spill]]  ;;  %s8122_s30 = sld [smem:[#allocation47_spill]] }
0x1462   : > { %p41_p0 = scmp.ge.s32.totalorder %s6490_s21, 4  }
0x1464   :  { %43 = sbr.rel (!%p41_p0) target bundleno = 27 (0x1b), region = 213 }
0x146b   :  { %3890 = vsyncpa [#allocation4], 1 }
0x146c   :  { %3892 = vsyncpa [#allocation4 + $0x1], 1 }
0x146d   :  { %3893 = vsyncpa [#allocation7], 1 }
0x146e   :  { %3894 = vsyncpa [#allocation10], 1 }
0x146f   :  { %3895 = vsyncpa [#allocation13], 1 }
0x1470   :  { %3896 = vsyncpa [#allocation16], 1 }
0x1471   :  { %3897 = vsyncpa [#allocation19], 1 }
0x1472   :  { %3898 = vsyncpa [#allocation22], 1 }
0x1473   :  { %3899 = vsyncpa [#allocation25], 1 }
0x1474   :  { %3900 = vsyncpa [#allocation28], 1 }
0x1475   :  { %3901 = vsyncpa [#allocation31], 1 }
0x1476   :  { %3902 = vsyncpa [#allocation5], 1 }
0x1477   :  { %3904 = vsyncpa [#allocation5 + $0x1], 1 }

// kernel: tpu_custom_call.1
= control target key start
LH: loop header
LB: loop body
LE: loop exit
PB: predicated region body
PF: predicated region fallthrough
CT: control target
= control target key end

     0   :  { %s7922_s0 = inlined_call_operand.hbm [shape: f32[2,33,32], index: 0, kind: input, shape index: {}]   ;;  %s7923_s1 = inlined_call_operand.hbm [shape: s32[33,1], index: 1, kind: input, shape index: {}]   ;;  %s7924_s2 = inlined_call_operand.hbm [shape: s32[1,33], index: 2, kind: input, shape index: {}]   ;;  %s7925_s3 = inlined_call_operand.hbm [shape: s32[33,1], index: 3, kind: input, shape index: {}]   ;;  %s7926_s4 = inlined_call_operand.hbm [shape: s32[1,33], index: 4, kind: input, shape index: {}]   ;;  %s7927_s5 = inlined_call_operand.hbm [shape: f32[1,32], index: 5, kind: input, shape index: {}]   ;;  %s7928_s6 = inlined_call_operand.hbm [shape: f32[1,32], index: 6, kind: input, shape index: {}]   ;;  %s7929_s7 = inlined_call_operand.hbm [shape: bf16[32,96], index: 7, kind: input, shape index: {}]   ;;  %s7930_s8 = inlined_call_operand.hbm [shape: bf16[32,32], index: 8, kind: input, shape index: {}]   ;;  %s7931_s9 = inlined_call_operand.hbm [shape: f32[1,32], index: 9, kind: input, shape index: {}]   ;;  %s7932_s10 = inlined_call_operand.hbm [shape: f32[1,32], index: 10, kind: input, shape index: {}]   ;;  %s7933_s11 = inlined_call_operand.hbm [shape: bf16[32,96], index: 11, kind: input, shape index: {}]   ;;  %s7934_s12 = inlined_call_operand.hbm [shape: bf16[32,32], index: 12, kind: input, shape index: {}]   ;;  %s7935_s13 = inlined_call_operand.hbm [shape: f32[1,32], index: 13, kind: input, shape index: {}]   ;;  %s7936_s14 = inlined_call_operand.hbm [shape: f32[1,32], index: 14, kind: input, shape index: {}]   ;;  %s7937_s15 = inlined_call_operand.hbm [shape: bf16[32,64], index: 15, kind: input, shape index: {}]   ;;  %s7938_s16 = inlined_call_operand.hbm [shape: f32[1,64], index: 16, kind: input, shape index: {}]   ;;  %s7939_s17 = inlined_call_operand.hbm [shape: bf16[64,32], index: 17, kind: input, shape index: {}]   ;;  %s7940_s18 = inlined_call_operand.hbm [shape: f32[1,32], index: 18, kind: input, shape index: {}]   ;;  %s7941_s19 = inlined_call_operand.hbm [shape: f32[2,33,32], index: 19, kind: output, shape index: {}]  }
   0x1   :  { %7979 = sst [smem:[#allocation51_spill]] %s7922_s0 }
   0x2   :  { %7980 = sst [smem:[#allocation52_spill]] %s7923_s1 }
   0x3   :  { %7981 = sst [smem:[#allocation53_spill]] %s7924_s2 }
   0x4   :  { %7982 = sst [smem:[#allocation54_spill]] %s7925_s3 }
   0x5   :  { %7983 = sst [smem:[#allocation55_spill]] %s7926_s4 }
   0x6   :  { %7984 = sst [smem:[#allocation56_spill]] %s7927_s5 }
   0x7   :  { %7985 = sst [smem:[#allocation57_spill]] %s7928_s6 }
   0x8   :  { %7986 = sst [smem:[#allocation58_spill]] %s7929_s7 }
   0x9   :  { %7987 = sst [smem:[#allocation59_spill]] %s7936_s14 }
   0xa   :  { %7988 = sst [smem:[#allocation60_spill]] %s7938_s16 }
   0xb   :  { %7989 = sst [smem:[#allocation61_spill]] %s7940_s18 }
   0xc   :  { %7990 = sst [smem:[#allocation62_spill]] %s7941_s19 }
   0xd   :  { %24 = vsyncpa [#allocation4], 0 }
   0xe   :  { %26 = vsyncpa [#allocation4 + $0x1], 0 }
   0xf   :  { %27 = vsyncpa [#allocation7], 0 }
  0x10   :  { %28 = vsyncpa [#allocation10], 0 }
  0x11   :  { %29 = vsyncpa [#allocation13], 0 }
  0x12   :  { %30 = vsyncpa [#allocation16], 0 }
  0x13   :  { %31 = vsyncpa [#allocation19], 0 }
  0x14   :  { %32 = vsyncpa [#allocation22], 0 }
  0x15   :  { %33 = vsyncpa [#allocation25], 0 }
  0x16   :  { %34 = vsyncpa [#allocation28], 0 }
  0x17   :  { %35 = vsyncpa [#allocation31], 0 }
  0x18   :  { %36 = vsyncpa [#allocation5], 0 }
  0x19   :  { %38 = vsyncpa [#allocation5 + $0x1], 0  ;;  %s6019_s0 = smov 0   ;;  %s6021_s30 = smov 0  }
  0x1a   :  { %s6023_s20 = smov 0   ;;  %s6025_s21 = smov 0  }
  0x1b LB: > { %7991 = sst [smem:[#allocation45_spill]] %s5863_s0  ;;  %s5877_s1 = smov [#allocation6]   ;;  %s5875_s21 = sphi %s6025_s21, %s6490_s21   ;;  %s5871_s20 = sphi %s6023_s20, %s6501_s20   ;;  %s5867_s30 = sphi %s6021_s30, %s8122_s30   ;;  %s5863_s0 = sphi %s6019_s0, %s8121_s0  }
  0x1c   : > { %7992 = sst [smem:[#allocation46_spill]] %s5867_s30  ;;  %s491_s22 = sshll.u32 %s5877_s1, 4  ;;  %s6045_s22 = int_to_ptr.vmem [resolvable:$true] %s491_s22 }
  0x1d   : > { %7993 = sst [smem:[#allocation47_spill]] %s5871_s20  ;;  %s6040_s2 = sadd.s32 4294967295, %s5875_s21  }
  0x1e   : > { %7994 = sst [smem:[#allocation48_spill]] %s5875_s21  ;;  %p4114_p0 = scmp.ge.s32.totalorder %s5875_s21, 1 }
  0x1f   : > { %7995 = sst [smem:[#allocation49_spill]] %s6040_s2  ;;  %p7958_p1 = scmp.eq.s32.totalorder %s6040_s2, 0 }
  0x20   : > { %p479_p2 = scmp.lt.s32.totalorder %s5875_s21, 3  ;;  %s5878_s24 = smov [#allocation9]  }
  0x21   : > { %s515_s25 = sshll.u32 %s5878_s24, 4  ;;  %s5879_s26 = smov [#allocation12]   ;;  %s6060_s25 = int_to_ptr.vmem [resolvable:$true] %s515_s25 }
  0x22   : > { %p6047_p3 = pnand %p4114_p0, %p479_p2  ;;  %s540_s27 = sshll.u32 %s5879_s26, 4  ;;  %s6062_s27 = int_to_ptr.vmem [resolvable:$true] %s540_s27 }
  0x23   : > { %s7999_s1 = sld [smem:[#allocation52_spill]] }
  0x24   : > { %s7996_s23 = scalar_select %p6047_p3, 1, 0 }
  0x25   : > { %p4845_p5 = pneg %p6047_p3 }
  0x26   : > { %7997 = sst [smem:[#allocation50_spill]] %s7996_s23 }
  0x27   : > { %p6056_p6 = pnand %p4845_p5, %p7958_p1 }
  0x29   : > { %s5239_s19 = scalar_lea.hbm %s7999_s1, 640  ;;  %p6072_p8 = pneg %p6056_p6 }
  0x2a   : > { %p5240_p7 = scmp.ne.s32.totalorder %s7999_s1, %s5239_s19  ;;  %p5246_p11 = scmp.lt.u32.totalorder %s5239_s19, %s7999_s1 }
  0x2c   : > { %p5242_p9 = pnand %p6072_p8, %p5240_p7 }
  0x2e   : > { %p5243_p10 = pneg %p5242_p9 }
  0x30   : > { %p5248_p12 = pnand %p5246_p11, %p5243_p10 }
  0x32   : > { %5251 = shalt.err (!%p5248_p12)
}
  0x33   : > { %s5252_s0 = scalar_lea.vmem %s6045_s22, 640  ;;  %p5260_p5 = scmp.lt.s32.totalorder %s6045_s22, %s6045_s22 }
  0x34   : > { %p5253_p13 = scmp.ne.s32.totalorder %s6045_s22, %s5252_s0  ;;  %p5261_p4 = scmp.lt.s32.totalorder %s5252_s0, %s5252_s0 }
  0x36   : > { %p5255_p0 = pnand %p5253_p13, %p6072_p8  ;;  %p5262_p7 = por %p5261_p4, %p5260_p5 }
  0x38   : > { %p5256_p2 = pneg %p5255_p0 }
  0x3a   : > { %p5263_p9 = pnand %p5262_p7, %p5256_p2 }
  0x3c   : > { %5266 = shalt.err (!%p5263_p9)
}
  0x3d   : > { %s7960_s23 = smov 128   ;;  %s7961_s19 = smov 8  }
  0x3e   : > { %4848 = dma.hbm_to_vmem [thread:$0]  (!%p6056_p6), %s7999_s1, 640, %s6045_s22, [#allocation7], %s7960_s23, %s7960_s23, %s7961_s19  }
  0x3f   : > { %s8001_s30 = sld [smem:[#allocation54_spill]] }
  0x45   : > { %s8002_s18 = smov %s8001_s30  ;;  %s5267_s0 = scalar_lea.hbm %s8001_s30, 640 }
  0x46   : > { %p5268_p4 = scmp.ne.s32.totalorder %s8002_s18, %s5267_s0  ;;  %p5274_p12 = scmp.lt.u32.totalorder %s5267_s0, %s8002_s18 }
  0x48   : > { %p5270_p10 = pnand %p5268_p4, %p6072_p8 }
  0x4a   : > { %p5271_p11 = pneg %p5270_p10 }
  0x4c   : > { %p5276_p13 = pnand %p5274_p12, %p5271_p11 }
  0x4e   : > { %5279 = shalt.err (!%p5276_p13)
}
  0x4f   : > { %s5280_s22 = scalar_lea.vmem %s6060_s25, 640  ;;  %p5288_p7 = scmp.lt.s32.totalorder %s6060_s25, %s6060_s25 }
  0x50   : > { %p5281_p0 = scmp.ne.s32.totalorder %s6060_s25, %s5280_s22  ;;  %p5289_p9 = scmp.lt.s32.totalorder %s5280_s22, %s5280_s22 }
  0x52   : > { %p5283_p2 = pnand %p5281_p0, %p6072_p8  ;;  %p5290_p4 = por %p5289_p9, %p5288_p7 }
  0x54   : > { %p5284_p5 = pneg %p5283_p2 }
  0x56   : > { %p5291_p10 = pnand %p5290_p4, %p5284_p5 }
  0x58   : > { %5294 = shalt.err (!%p5291_p10)
}
  0x59   : > { %4854 = dma.hbm_to_vmem [thread:$0]  (!%p6056_p6), %s8002_s18, 640, %s6060_s25, [#allocation10], %s7960_s23, %s7960_s23, %s7961_s19  }
  0x5a   : > { %s8003_s5 = sld [smem:[#allocation56_spill]] }
  0x60   : > { %s5295_s21 = scalar_lea.hbm %s8003_s5, 16 }
  0x61   : > { %p5296_p11 = scmp.ne.s32.totalorder %s8003_s5, %s5295_s21  ;;  %p5302_p0 = scmp.lt.u32.totalorder %s5295_s21, %s8003_s5 }
  0x63   : > { %p5298_p12 = pnand %p5296_p11, %p6072_p8 }
  0x65   : > { %p5299_p13 = pneg %p5298_p12 }
  0x67   : > { %p5304_p2 = pnand %p5302_p0, %p5299_p13 }
  0x69   : > { %5307 = shalt.err (!%p5304_p2)
}
  0x6a   : > { %s5308_s25 = scalar_lea.vmem %s6062_s27, 16  ;;  %s5315_s0 = scalar_lea.vmem %s6062_s27, 32 }
  0x6b   : > { %p5309_p5 = scmp.ne.s32.totalorder %s6062_s27, %s5308_s25  ;;  %p5316_p4 = scmp.lt.s32.totalorder %s6062_s27, %s6062_s27 }
  0x6c   : > { %p5317_p10 = scmp.lt.s32.totalorder %s5315_s0, %s5308_s25 }
  0x6d   : > { %p5311_p7 = pnand %p5309_p5, %p6072_p8 }
  0x6e   : > { %p5318_p11 = por %p5317_p10, %p5316_p4 }
  0x6f   : > { %p5312_p9 = pneg %p5311_p7 }
  0x71   : > { %p5319_p12 = pnand %p5318_p11, %p5312_p9 }
  0x73   : > { %5322 = shalt.err (!%p5319_p12)
}
  0x74   : > { %4860 = dma.hbm_to_vmem [thread:$0]  (!%p6056_p6), %s8003_s5, 16, %s6062_s27, [#allocation13]  }
  0x75   : > { %s5882_s16 = smov [#allocation15]   ;;  %s8004_s7 = sld [smem:[#allocation58_spill]] }
  0x76   : > { %s561_s30 = sshll.u32 %s5882_s16, 4  ;;  %s562_s30 = int_to_ptr.vmem [resolvable:$true] %s561_s30 }
  0x7b   : > { %s5323_s2 = scalar_lea.hbm %s8004_s7, 256 }
  0x7c   : > { %p5324_p13 = scmp.ne.s32.totalorder %s8004_s7, %s5323_s2  ;;  %p5330_p5 = scmp.lt.u32.totalorder %s5323_s2, %s8004_s7 }
  0x7e   : > { %p5326_p0 = pnand %p5324_p13, %p6072_p8 }
  0x80   : > { %p5327_p2 = pneg %p5326_p0 }
  0x82   : > { %p5332_p7 = pnand %p5330_p5, %p5327_p2 }
  0x84   : > { %5335 = shalt.err (!%p5332_p7)
}
  0x85   : > { %s5336_s27 = scalar_lea.vmem %s562_s30, 256  ;;  %p5344_p11 = scmp.lt.s32.totalorder %s562_s30, %s562_s30 }
  0x86   : > { %p5337_p9 = scmp.ne.s32.totalorder %s562_s30, %s5336_s27  ;;  %p5345_p12 = scmp.lt.s32.totalorder %s5336_s27, %s5336_s27 }
  0x88   : > { %p5339_p4 = pnand %p5337_p9, %p6072_p8  ;;  %p5346_p1 = por %p5345_p12, %p5344_p11 }
  0x8a   : > { %p5340_p10 = pneg %p5339_p4 }
  0x8c   : > { %p5347_p3 = pnand %p5346_p1, %p5340_p10 }
  0x8e   : > { %5350 = shalt.err (!%p5347_p3)
}
  0x8f   : > { %s5883_s0 = smov 64   ;;  %s5884_s22 = smov 4  }
  0x90   : > { %4866 = dma.hbm_to_vmem [thread:$0]  (!%p6056_p6), %s8004_s7, 256, %s562_s30, [#allocation16], %s5883_s0, %s5883_s0, %s5884_s22  }
  0x91   : > { %s5885_s20 = smov [#allocation18]   ;;  %s5886_s2 = smov [#allocation21]  }
  0x92   : > { %s588_s21 = sshll.u32 %s5885_s20, 4  ;;  %s609_s28 = sshll.u32 %s5886_s2, 4  ;;  %s589_s21 = int_to_ptr.vmem [resolvable:$true] %s588_s21  ;;  %s6167_s28 = int_to_ptr.vmem [resolvable:$true] %s609_s28 }
  0x93   : > { %s5351_s25 = scalar_lea.hbm %s7931_s9, 16 }
  0x94   : > { %p5352_p1 = scmp.ne.s32.totalorder %s7931_s9, %s5351_s25  ;;  %p5358_p0 = scmp.lt.u32.totalorder %s5351_s25, %s7931_s9 }
  0x96   : > { %p5354_p3 = pnand %p5352_p1, %p6072_p8 }
  0x98   : > { %p5355_p13 = pneg %p5354_p3 }
  0x9a   : > { %p5360_p2 = pnand %p5358_p0, %p5355_p13 }
  0x9c   : > { %5363 = shalt.err (!%p5360_p2)
}
  0x9d   : > { %s5364_s16 = scalar_lea.vmem %s589_s21, 16  ;;  %s5371_s20 = scalar_lea.vmem %s589_s21, 32 }
  0x9e   : > { %p5365_p5 = scmp.ne.s32.totalorder %s589_s21, %s5364_s16  ;;  %p5372_p4 = scmp.lt.s32.totalorder %s589_s21, %s589_s21 }
  0x9f   : > { %p5373_p10 = scmp.lt.s32.totalorder %s5371_s20, %s5364_s16 }
  0xa0   : > { %p5367_p7 = pnand %p5365_p5, %p6072_p8 }
  0xa1   : > { %p5374_p11 = por %p5373_p10, %p5372_p4 }
  0xa2   : > { %p5368_p9 = pneg %p5367_p7 }
  0xa4   : > { %p5375_p12 = pnand %p5374_p11, %p5368_p9 }
  0xa6   : > { %5378 = shalt.err (!%p5375_p12)
}
  0xa7   : > { %4872 = dma.hbm_to_vmem [thread:$0]  (!%p6056_p6), %s7931_s9, 16, %s589_s21, [#allocation19]  }
  0xa8   : > { %s5379_s25 = scalar_lea.hbm %s7933_s11, 256 }
  0xa9   : > { %p5380_p1 = scmp.ne.s32.totalorder %s7933_s11, %s5379_s25  ;;  %p5386_p0 = scmp.lt.u32.totalorder %s5379_s25, %s7933_s11 }
  0xab   : > { %p5382_p3 = pnand %p5380_p1, %p6072_p8 }
  0xad   : > { %p5383_p13 = pneg %p5382_p3 }
  0xaf   : > { %p5388_p2 = pnand %p5386_p0, %p5383_p13 }
  0xb1   : > { %5391 = shalt.err (!%p5388_p2)
}
  0xb2   : > { %s5392_s21 = scalar_lea.vmem %s6167_s28, 256  ;;  %p5400_p4 = scmp.lt.s32.totalorder %s6167_s28, %s6167_s28 }
  0xb3   : > { %p5393_p5 = scmp.ne.s32.totalorder %s6167_s28, %s5392_s21  ;;  %p5401_p10 = scmp.lt.s32.totalorder %s5392_s21, %s5392_s21 }
  0xb5   : > { %p5395_p7 = pnand %p5393_p5, %p6072_p8  ;;  %p5402_p11 = por %p5401_p10, %p5400_p4 }
  0xb7   : > { %p5396_p9 = pneg %p5395_p7 }
  0xb9   : > { %p5403_p12 = pnand %p5402_p11, %p5396_p9 }
  0xbb   : > { %5406 = shalt.err (!%p5403_p12)
}
  0xbc   : > { %4878 = dma.hbm_to_vmem [thread:$0]  (!%p6056_p6), %s7933_s11, 256, %s6167_s28, [#allocation22], %s5883_s0, %s5883_s0, %s5884_s22  }
  0xbd   : > { %s5887_s2 = smov [#allocation24]   ;;  %s5888_s26 = smov [#allocation27]  }
  0xbe   : > { %s636_s29 = sshll.u32 %s5887_s2, 4  ;;  %s657_s25 = sshll.u32 %s5888_s26, 4  ;;  %s637_s29 = int_to_ptr.vmem [resolvable:$true] %s636_s29  ;;  %s6213_s25 = int_to_ptr.vmem [resolvable:$true] %s657_s25 }
  0xbf   : > { %s5407_s30 = scalar_lea.hbm %s7935_s13, 16 }
  0xc0   : > { %p5408_p1 = scmp.ne.s32.totalorder %s7935_s13, %s5407_s30  ;;  %p5414_p0 = scmp.lt.u32.totalorder %s5407_s30, %s7935_s13 }
  0xc2   : > { %p5410_p3 = pnand %p5408_p1, %p6072_p8 }
  0xc4   : > { %p5411_p13 = pneg %p5410_p3 }
  0xc6   : > { %p5416_p2 = pnand %p5414_p0, %p5411_p13 }
  0xc8   : > { %5419 = shalt.err (!%p5416_p2)
}
  0xc9   : > { %s5420_s23 = scalar_lea.vmem %s637_s29, 16  ;;  %s5427_s2 = scalar_lea.vmem %s637_s29, 32 }
  0xca   : > { %p5421_p5 = scmp.ne.s32.totalorder %s637_s29, %s5420_s23  ;;  %p5428_p4 = scmp.lt.s32.totalorder %s637_s29, %s637_s29 }
  0xcb   : > { %p5429_p10 = scmp.lt.s32.totalorder %s5427_s2, %s5420_s23 }
  0xcc   : > { %p5423_p7 = pnand %p5421_p5, %p6072_p8 }
  0xcd   : > { %p5430_p11 = por %p5429_p10, %p5428_p4 }
  0xce   : > { %p5424_p9 = pneg %p5423_p7 }
  0xd0   : > { %p5431_p12 = pnand %p5430_p11, %p5424_p9 }
  0xd2   : > { %5434 = shalt.err (!%p5431_p12)
}
  0xd3   : > { %4884 = dma.hbm_to_vmem [thread:$0]  (!%p6056_p6), %s7935_s13, 16, %s637_s29, [#allocation25]  }
  0xd4   : > { %s5435_s16 = scalar_lea.hbm %s7937_s15, 256 }
  0xd5   : > { %p5436_p1 = scmp.ne.s32.totalorder %s7937_s15, %s5435_s16  ;;  %p5442_p0 = scmp.lt.u32.totalorder %s5435_s16, %s7937_s15 }
  0xd7   : > { %p5438_p3 = pnand %p5436_p1, %p6072_p8 }
  0xd9   : > { %p5439_p13 = pneg %p5438_p3 }
  0xdb   : > { %p5444_p2 = pnand %p5442_p0, %p5439_p13 }
  0xdd   : > { %5447 = shalt.err (!%p5444_p2)
}
  0xde   : > { %s5448_s29 = scalar_lea.vmem %s6213_s25, 256  ;;  %p5456_p4 = scmp.lt.s32.totalorder %s6213_s25, %s6213_s25 }
  0xdf   : > { %p5449_p5 = scmp.ne.s32.totalorder %s6213_s25, %s5448_s29  ;;  %p5457_p10 = scmp.lt.s32.totalorder %s5448_s29, %s5448_s29 }
  0xe1   : > { %p5451_p7 = pnand %p5449_p5, %p6072_p8  ;;  %p5458_p11 = por %p5457_p10, %p5456_p4 }
  0xe3   : > { %p5452_p9 = pneg %p5451_p7 }
  0xe5   : > { %p5459_p12 = pnand %p5458_p11, %p5452_p9 }
  0xe7   : > { %5462 = shalt.err (!%p5459_p12)
}
  0xe8   : > { %4890 = dma.hbm_to_vmem [thread:$0]  (!%p6056_p6), %s7937_s15, 256, %s6213_s25, [#allocation28], %s5883_s0, %s5883_s0, %s5884_s22  }
  0xe9   : > { %s5889_s27 = smov [#allocation30]   ;;  %s5890_s30 = smov [#allocation8]  }
  0xea   : > { %s681_s14 = sshll.u32 %s5889_s27, 4  ;;  %s505_s16 = sshll.u32 %s5890_s30, 4  ;;  %s682_s14 = int_to_ptr.vmem [resolvable:$true] %s681_s14  ;;  %s6259_s16 = int_to_ptr.vmem [resolvable:$true] %s505_s16 }
  0xeb   : > { %s5463_s28 = scalar_lea.hbm %s7939_s17, 512 }
  0xec   : > { %p5464_p1 = scmp.ne.s32.totalorder %s7939_s17, %s5463_s28  ;;  %p5470_p0 = scmp.lt.u32.totalorder %s5463_s28, %s7939_s17 }
  0xee   : > { %p5466_p3 = pnand %p5464_p1, %p6072_p8 }
  0xf0   : > { %p5467_p13 = pneg %p5466_p3 }
  0xf2   : > { %p5472_p2 = pnand %p5470_p0, %p5467_p13 }
  0xf4   : > { %5475 = shalt.err (!%p5472_p2)
}
  0xf5   : > { %s5476_s26 = scalar_lea.vmem %s682_s14, 512  ;;  %p5484_p4 = scmp.lt.s32.totalorder %s682_s14, %s682_s14 }
  0xf6   : > { %p5477_p5 = scmp.ne.s32.totalorder %s682_s14, %s5476_s26  ;;  %p5485_p10 = scmp.lt.s32.totalorder %s5476_s26, %s5476_s26 }
  0xf8   : > { %p5479_p7 = pnand %p5477_p5, %p6072_p8  ;;  %p5486_p11 = por %p5485_p10, %p5484_p4 }
  0xfa   : > { %p5480_p9 = pneg %p5479_p7 }
  0xfc   : > { %p5487_p12 = pnand %p5486_p11, %p5480_p9 }
  0xfe   : > { %5490 = shalt.err (!%p5487_p12)
}
  0xff   : > { %4896 = dma.hbm_to_vmem [thread:$0]  (!%p6056_p6), %s7939_s17, 512, %s682_s14, [#allocation31], %s5883_s0, %s5883_s0, %s5884_s22  }
 0x100   : > { %s8005_s28 = sld [smem:[#allocation53_spill]] }
 0x106   : > { %s5491_s23 = scalar_lea.hbm %s8005_s28, 16 }
 0x107   : > { %p5492_p1 = scmp.ne.s32.totalorder %s8005_s28, %s5491_s23  ;;  %p5498_p0 = scmp.lt.u32.totalorder %s5491_s23, %s8005_s28 }
 0x109   : > { %p5494_p3 = pnand %p5492_p1, %p6072_p8 }
 0x10b   : > { %p5495_p13 = pneg %p5494_p3 }
 0x10d   : > { %p5500_p2 = pnand %p5498_p0, %p5495_p13 }
 0x10f   : > { %5503 = shalt.err (!%p5500_p2)
}
 0x110   : > { %s5504_s14 = scalar_lea.vmem %s6259_s16, 16  ;;  %s5511_s27 = scalar_lea.vmem %s6259_s16, 32 }
 0x111   : > { %p5505_p5 = scmp.ne.s32.totalorder %s6259_s16, %s5504_s14  ;;  %p5512_p4 = scmp.lt.s32.totalorder %s6259_s16, %s6259_s16 }
 0x112   : > { %p5513_p10 = scmp.lt.s32.totalorder %s5511_s27, %s5504_s14 }
 0x113   : > { %p5507_p7 = pnand %p5505_p5, %p6072_p8 }
 0x114   : > { %p5514_p11 = por %p5513_p10, %p5512_p4 }
 0x115   : > { %p5508_p9 = pneg %p5507_p7 }
 0x117   : > { %p5515_p12 = pnand %p5514_p11, %p5508_p9 }
 0x119   : > { %5518 = shalt.err (!%p5515_p12)
}
 0x11a   : > { %4851 = dma.hbm_to_vmem [thread:$0]  (!%p6056_p6), %s8005_s28, 16, %s6259_s16, [#allocation7]  }
 0x11b   : > { %s5891_s20 = smov [#allocation11]   ;;  %s5892_s29 = smov [#allocation14]  }
 0x11c   : > { %s529_s23 = sshll.u32 %s5891_s20, 4  ;;  %s551_s2 = sshll.u32 %s5892_s29, 4  ;;  %s530_s23 = int_to_ptr.vmem [resolvable:$true] %s529_s23  ;;  %s6306_s2 = int_to_ptr.vmem [resolvable:$true] %s551_s2 }
 0x11d   : > { %s8006_s4 = sld [smem:[#allocation55_spill]] }
 0x123   : > { %s5519_s14 = scalar_lea.hbm %s8006_s4, 16 }
 0x124   : > { %p5520_p1 = scmp.ne.s32.totalorder %s8006_s4, %s5519_s14  ;;  %p5526_p0 = scmp.lt.u32.totalorder %s5519_s14, %s8006_s4 }
 0x126   : > { %p5522_p3 = pnand %p5520_p1, %p6072_p8 }
 0x128   : > { %p5523_p13 = pneg %p5522_p3 }
 0x12a   : > { %p5528_p2 = pnand %p5526_p0, %p5523_p13 }
 0x12c   : > { %5531 = shalt.err (!%p5528_p2)
}
 0x12d   : > { %s5532_s21 = scalar_lea.vmem %s530_s23, 16  ;;  %s5539_s20 = scalar_lea.vmem %s530_s23, 32 }
 0x12e   : > { %p5533_p5 = scmp.ne.s32.totalorder %s530_s23, %s5532_s21  ;;  %p5540_p4 = scmp.lt.s32.totalorder %s530_s23, %s530_s23 }
 0x12f   : > { %p5541_p10 = scmp.lt.s32.totalorder %s5539_s20, %s5532_s21 }
 0x130   : > { %p5535_p7 = pnand %p5533_p5, %p6072_p8 }
 0x131   : > { %p5542_p11 = por %p5541_p10, %p5540_p4 }
 0x132   : > { %p5536_p9 = pneg %p5535_p7 }
 0x134   : > { %p5543_p12 = pnand %p5542_p11, %p5536_p9 }
 0x136   : > { %5546 = shalt.err (!%p5543_p12)
}
 0x137   : > { %4857 = dma.hbm_to_vmem [thread:$0]  (!%p6056_p6), %s8006_s4, 16, %s530_s23, [#allocation10]  }
 0x138   : > { %s8007_s6 = sld [smem:[#allocation57_spill]] }
 0x13e   : > { %s5547_s14 = scalar_lea.hbm %s8007_s6, 16 }
 0x13f   : > { %p5548_p1 = scmp.ne.s32.totalorder %s8007_s6, %s5547_s14  ;;  %p5554_p0 = scmp.lt.u32.totalorder %s5547_s14, %s8007_s6 }
 0x141   : > { %p5550_p3 = pnand %p5548_p1, %p6072_p8 }
 0x143   : > { %p5551_p13 = pneg %p5550_p3 }
 0x145   : > { %p5556_p2 = pnand %p5554_p0, %p5551_p13 }
 0x147   : > { %5559 = shalt.err (!%p5556_p2)
}
 0x148   : > { %s5560_s23 = scalar_lea.vmem %s6306_s2, 16  ;;  %s5567_s20 = scalar_lea.vmem %s6306_s2, 32 }
 0x149   : > { %p5561_p5 = scmp.ne.s32.totalorder %s6306_s2, %s5560_s23  ;;  %p5568_p4 = scmp.lt.s32.totalorder %s6306_s2, %s6306_s2 }
 0x14a   : > { %p5569_p10 = scmp.lt.s32.totalorder %s5567_s20, %s5560_s23 }
 0x14b   : > { %p5563_p7 = pnand %p5561_p5, %p6072_p8 }
 0x14c   : > { %p5570_p11 = por %p5569_p10, %p5568_p4 }
 0x14d   : > { %p5564_p9 = pneg %p5563_p7 }
 0x14f   : > { %p5571_p12 = pnand %p5570_p11, %p5564_p9 }
 0x151   : > { %5574 = shalt.err (!%p5571_p12)
}
 0x152   : > { %4863 = dma.hbm_to_vmem [thread:$0]  (!%p6056_p6), %s8007_s6, 16, %s6306_s2, [#allocation13]  }
 0x153   : > { %s5893_s25 = smov [#allocation17]   ;;  %s5894_s14 = smov [#allocation20]  }
 0x154   : > { %s574_s26 = sshll.u32 %s5893_s25, 4  ;;  %s599_s27 = sshll.u32 %s5894_s14, 4  ;;  %s575_s26 = int_to_ptr.vmem [resolvable:$true] %s574_s26  ;;  %s6350_s27 = int_to_ptr.vmem [resolvable:$true] %s599_s27 }
 0x155   : > { %s5575_s21 = scalar_lea.hbm %s7930_s8, 256 }
 0x156   : > { %p5576_p1 = scmp.ne.s32.totalorder %s7930_s8, %s5575_s21  ;;  %p5582_p0 = scmp.lt.u32.totalorder %s5575_s21, %s7930_s8 }
 0x158   : > { %p5578_p3 = pnand %p5576_p1, %p6072_p8 }
 0x15a   : > { %p5579_p13 = pneg %p5578_p3 }
 0x15c   : > { %p5584_p2 = pnand %p5582_p0, %p5579_p13 }
 0x15e   : > { %5587 = shalt.err (!%p5584_p2)
}
 0x15f   : > { %s5588_s29 = scalar_lea.vmem %s575_s26, 256  ;;  %p5596_p4 = scmp.lt.s32.totalorder %s575_s26, %s575_s26 }
 0x160   : > { %p5589_p5 = scmp.ne.s32.totalorder %s575_s26, %s5588_s29  ;;  %p5597_p10 = scmp.lt.s32.totalorder %s5588_s29, %s5588_s29 }
 0x162   : > { %p5591_p7 = pnand %p5589_p5, %p6072_p8  ;;  %p5598_p11 = por %p5597_p10, %p5596_p4 }
 0x164   : > { %p5592_p9 = pneg %p5591_p7 }
 0x166   : > { %p5599_p12 = pnand %p5598_p11, %p5592_p9 }
 0x168   : > { %5602 = shalt.err (!%p5599_p12)
}
 0x169   : > { %4869 = dma.hbm_to_vmem [thread:$0]  (!%p6056_p6), %s7930_s8, 256, %s575_s26, [#allocation16], %s5883_s0, %s5883_s0, %s5884_s22  }
 0x16a   : > { %s5603_s21 = scalar_lea.hbm %s7932_s10, 16 }
 0x16b   : > { %p5604_p1 = scmp.ne.s32.totalorder %s7932_s10, %s5603_s21  ;;  %p5610_p0 = scmp.lt.u32.totalorder %s5603_s21, %s7932_s10 }
 0x16d   : > { %p5606_p3 = pnand %p5604_p1, %p6072_p8 }
 0x16f   : > { %p5607_p13 = pneg %p5606_p3 }
 0x171   : > { %p5612_p2 = pnand %p5610_p0, %p5607_p13 }
 0x173   : > { %5615 = shalt.err (!%p5612_p2)
}
 0x174   : > { %s5616_s26 = scalar_lea.vmem %s6350_s27, 16  ;;  %s5623_s29 = scalar_lea.vmem %s6350_s27, 32 }
 0x175   : > { %p5617_p5 = scmp.ne.s32.totalorder %s6350_s27, %s5616_s26  ;;  %p5624_p4 = scmp.lt.s32.totalorder %s6350_s27, %s6350_s27 }
 0x176   : > { %p5625_p10 = scmp.lt.s32.totalorder %s5623_s29, %s5616_s26 }
 0x177   : > { %p5619_p7 = pnand %p5617_p5, %p6072_p8 }
 0x178   : > { %p5626_p11 = por %p5625_p10, %p5624_p4 }
 0x179   : > { %p5620_p9 = pneg %p5619_p7 }
 0x17b   : > { %p5627_p12 = pnand %p5626_p11, %p5620_p9 }
 0x17d   : > { %5630 = shalt.err (!%p5627_p12)
}
 0x17e   : > { %4875 = dma.hbm_to_vmem [thread:$0]  (!%p6056_p6), %s7932_s10, 16, %s6350_s27, [#allocation19]  }
 0x17f   : > { %s5895_s30 = smov [#allocation23]   ;;  %s5896_s21 = smov [#allocation26]  }
 0x180   : > { %s622_s16 = sshll.u32 %s5895_s30, 4  ;;  %s647_s23 = sshll.u32 %s5896_s21, 4  ;;  %s623_s16 = int_to_ptr.vmem [resolvable:$true] %s622_s16  ;;  %s6397_s23 = int_to_ptr.vmem [resolvable:$true] %s647_s23 }
 0x181   : > { %s5631_s2 = scalar_lea.hbm %s7934_s12, 256 }
 0x182   : > { %p5632_p1 = scmp.ne.s32.totalorder %s7934_s12, %s5631_s2  ;;  %p5638_p0 = scmp.lt.u32.totalorder %s5631_s2, %s7934_s12 }
 0x184   : > { %p5634_p3 = pnand %p5632_p1, %p6072_p8 }
 0x186   : > { %p5635_p13 = pneg %p5634_p3 }
 0x188   : > { %p5640_p2 = pnand %p5638_p0, %p5635_p13 }
 0x18a   : > { %5643 = shalt.err (!%p5640_p2)
}
 0x18b   : > { %s5644_s14 = scalar_lea.vmem %s623_s16, 256  ;;  %p5652_p4 = scmp.lt.s32.totalorder %s623_s16, %s623_s16 }
 0x18c   : > { %p5645_p5 = scmp.ne.s32.totalorder %s623_s16, %s5644_s14  ;;  %p5653_p10 = scmp.lt.s32.totalorder %s5644_s14, %s5644_s14 }
 0x18e   : > { %p5647_p7 = pnand %p5645_p5, %p6072_p8  ;;  %p5654_p11 = por %p5653_p10, %p5652_p4 }
 0x190   : > { %p5648_p9 = pneg %p5647_p7 }
 0x192   : > { %p5655_p12 = pnand %p5654_p11, %p5648_p9 }
 0x194   : > { %5658 = shalt.err (!%p5655_p12)
}
 0x195   : > { %4881 = dma.hbm_to_vmem [thread:$0]  (!%p6056_p6), %s7934_s12, 256, %s623_s16, [#allocation22], %s5883_s0, %s5883_s0, %s5884_s22  }
 0x196   : > { %s8008_s2 = sld [smem:[#allocation59_spill]] }
 0x19c   : > { %s5659_s26 = scalar_lea.hbm %s8008_s2, 16 }
 0x19d   : > { %p5660_p1 = scmp.ne.s32.totalorder %s8008_s2, %s5659_s26  ;;  %p5666_p0 = scmp.lt.u32.totalorder %s5659_s26, %s8008_s2 }
 0x19f   : > { %p5662_p3 = pnand %p5660_p1, %p6072_p8 }
 0x1a1   : > { %p5663_p13 = pneg %p5662_p3 }
 0x1a3   : > { %p5668_p2 = pnand %p5666_p0, %p5663_p13 }
 0x1a5   : > { %5671 = shalt.err (!%p5668_p2)
}
 0x1a6   : > { %s5672_s0 = scalar_lea.vmem %s6397_s23, 16  ;;  %s5679_s22 = scalar_lea.vmem %s6397_s23, 32 }
 0x1a7   : > { %p5673_p5 = scmp.ne.s32.totalorder %s6397_s23, %s5672_s0  ;;  %p5680_p4 = scmp.lt.s32.totalorder %s6397_s23, %s6397_s23 }
 0x1a8   : > { %p5681_p10 = scmp.lt.s32.totalorder %s5679_s22, %s5672_s0 }
 0x1a9   : > { %p5675_p7 = pnand %p5673_p5, %p6072_p8 }
 0x1aa   : > { %p5682_p11 = por %p5681_p10, %p5680_p4 }
 0x1ab   : > { %p5676_p9 = pneg %p5675_p7 }
 0x1ad   : > { %p5683_p12 = pnand %p5682_p11, %p5676_p9 }
 0x1af   : > { %5686 = shalt.err (!%p5683_p12)
}
 0x1b0   : > { %4887 = dma.hbm_to_vmem [thread:$0]  (!%p6056_p6), %s8008_s2, 16, %s6397_s23, [#allocation25]  }
 0x1b1   : > { %s5897_s21 = smov [#allocation29]   ;;  %s5898_s19 = smov [#allocation32]  }
 0x1b2   : > { %s671_s20 = sshll.u32 %s5897_s21, 4  ;;  %s695_s26 = sshll.u32 %s5898_s19, 4  ;;  %s672_s20 = int_to_ptr.vmem [resolvable:$true] %s671_s20  ;;  %s6444_s26 = int_to_ptr.vmem [resolvable:$true] %s695_s26 }
 0x1b3   : > { %s8009_s27 = sld [smem:[#allocation60_spill]] }
 0x1b9   : > { %s5687_s14 = scalar_lea.hbm %s8009_s27, 16 }
 0x1ba   : > { %p5688_p1 = scmp.ne.s32.totalorder %s8009_s27, %s5687_s14  ;;  %p5694_p0 = scmp.lt.u32.totalorder %s5687_s14, %s8009_s27 }
 0x1bc   : > { %p5690_p3 = pnand %p5688_p1, %p6072_p8 }
 0x1be   : > { %p5691_p13 = pneg %p5690_p3 }
 0x1c0   : > { %p5696_p2 = pnand %p5694_p0, %p5691_p13 }
 0x1c2   : > { %5699 = shalt.err (!%p5696_p2)
}
 0x1c3   : > { %s5700_s30 = scalar_lea.vmem %s672_s20, 16  ;;  %s5707_s21 = scalar_lea.vmem %s672_s20, 32 }
 0x1c4   : > { %p5701_p5 = scmp.ne.s32.totalorder %s672_s20, %s5700_s30  ;;  %p5708_p4 = scmp.lt.s32.totalorder %s672_s20, %s672_s20 }
 0x1c5   : > { %p5709_p10 = scmp.lt.s32.totalorder %s5707_s21, %s5700_s30 }
 0x1c6   : > { %p5703_p7 = pnand %p5701_p5, %p6072_p8 }
 0x1c7   : > { %p5710_p11 = por %p5709_p10, %p5708_p4 }
 0x1c8   : > { %p5704_p9 = pneg %p5703_p7 }
 0x1ca   : > { %p5711_p12 = pnand %p5710_p11, %p5704_p9 }
 0x1cc   : > { %5714 = shalt.err (!%p5711_p12)
}
 0x1cd   : > { %4893 = dma.hbm_to_vmem [thread:$0]  (!%p6056_p6), %s8009_s27, 16, %s672_s20, [#allocation28]  }
 0x1ce   : > { %s8010_s0 = sld [smem:[#allocation61_spill]] }
 0x1d4   : > { %s8011_s22 = smov %s8010_s0  ;;  %s5715_s16 = scalar_lea.hbm %s8010_s0, 16 }
 0x1d5   : > { %p5716_p1 = scmp.ne.s32.totalorder %s8011_s22, %s5715_s16  ;;  %p5722_p0 = scmp.lt.u32.totalorder %s5715_s16, %s8011_s22 }
 0x1d7   : > { %p5718_p3 = pnand %p5716_p1, %p6072_p8 }
 0x1d9   : > { %p5719_p13 = pneg %p5718_p3 }
 0x1db   : > { %p5724_p2 = pnand %p5722_p0, %p5719_p13 }
 0x1dd   : > { %5727 = shalt.err (!%p5724_p2)
}
 0x1de   : > { %s5728_s20 = scalar_lea.vmem %s6444_s26, 16  ;;  %s5735_s1 = scalar_lea.vmem %s6444_s26, 32 }
 0x1df   : > { %p5729_p5 = scmp.ne.s32.totalorder %s6444_s26, %s5728_s20  ;;  %p5736_p4 = scmp.lt.s32.totalorder %s6444_s26, %s6444_s26 }
 0x1e0   : > { %p5737_p10 = scmp.lt.s32.totalorder %s5735_s1, %s5728_s20 }
 0x1e1   : > { %p5731_p7 = pnand %p5729_p5, %p6072_p8 }
 0x1e2   : > { %p5738_p11 = por %p5737_p10, %p5736_p4 }
 0x1e3   : > { %p5732_p9 = pneg %p5731_p7 }
 0x1e5   : > { %p5739_p12 = pnand %p5738_p11, %p5732_p9 }
 0x1e7   : > { %5742 = shalt.err (!%p5739_p12)
}
 0x1e8   : > { %s8012_s25 = sld [smem:[#allocation48_spill]]  ;;  %s8013_s14 = sld [smem:[#allocation47_spill]] }
 0x1e9   : > { %s8014_s24 = sld [smem:[#allocation46_spill]]  ;;  %s8015_s0 = sld [smem:[#allocation45_spill]] }
 0x1ea   : > { %s8016_s16 = sld [smem:[#allocation49_spill]] }
 0x1eb   : > { %4899 = dma.hbm_to_vmem [thread:$0]  (!%p6056_p6), %s8011_s22, 16, %s6444_s26, [#allocation31]  }
 0x1ee   : > { %s4113_s3 = sadd.s32 4294967294, %s8012_s25   ;;  %s6490_s21 = sadd.s32 1, %s8012_s25  }
 0x1ef   : > { %s48_s23 = ssub.s32 %s8012_s25, %s6490_s21  ;;  %s51_s30 = sadd.s32 1, %s8013_s14 }
 0x1f0   : > { %p49_p8 = scmp.eq.s32.totalorder %s48_s23, 0  ;;  %p58_p1 = scmp.ne.s32.totalorder %s8013_s14, %s8014_s24 }
 0x1f1   : > { %p59_p3 = scmp.eq.s32.totalorder %s8012_s25, 0  ;;  %p64_p13 = scmp.ne.s32.totalorder %s8014_s24, %s8015_s0 }
 0x1f2   : > { %s6501_s20 = scalar_select %p49_p8, %s8013_s14, %s51_s30  }
 0x1f3   : > { %p60_p0 = por %p59_p3, %p58_p1  ;;  %p8017_p2 = scmp.eq.s32.totalorder %s8016_s16, 0 }
 0x1f4   : > { %p466_p6 = scmp.eq.s32.totalorder %s8016_s16, 1  ;;  %p472_p7 = scmp.eq.s32.totalorder %s4113_s3, 1 }
 0x1f5   : > { %p6505_p5 = por %p8017_p2, %p64_p13  ;;  %p4926_p9 = scmp.lt.s32.totalorder %s8012_s25, 2 }
 0x1f6   : > { %s706_s26 = sand.u32 1, %s8013_s14   ;;  %p6512_p4 = por %p466_p6, %p58_p1 }
 0x1f7   : > { %p6516_p10 = por %p472_p7, %p64_p13  ;;  %s4765_s24 = smul.u32 40, %s706_s26 }
 0x1f8   : > { %s8019_s19 = scalar_select %p6512_p4, 1, 0 }
 0x1f9   : > { %s8020_s29 = scalar_select %p6516_p10, 1, 0 }
 0x1fa   : > { %s4766_s0 = smul.u32 640, %s8012_s25  ;;  %p6521_p11 = pnand %p4926_p9, %p60_p0 }
 0x1fb   : > { %s8022_s16 = sld [smem:[#allocation51_spill]]  ;;  %s710_s3 = scalar_lea.vmem [#allocation3], %s4765_s24 }
 0x1fc   : > { %s717_s4 = sshll.u32 %s710_s3, 4  ;;  %s6532_s25 = scalar_lea.sflag [#allocation4], %s706_s26  ;;  %s6530_s4 = int_to_ptr.vmem [resolvable:$true] %s717_s4 }
 0x1fd   : > { %p5745_p8 = pneg %p6521_p11 }
 0x201   : > { %s6528_s14 = scalar_lea.hbm %s8022_s16, %s4766_s0  ;;  %s5748_s30 = scalar_lea.hbm %s8022_s16, 1280 }
 0x202   : > { %s5743_s5 = scalar_lea.hbm %s6528_s14, 640  ;;  %p5749_p13 = scmp.lt.u32.totalorder %s6528_s14, %s8022_s16 }
 0x203   : > { %p5744_p12 = scmp.ne.s32.totalorder %s6528_s14, %s5743_s5  ;;  %p5750_p0 = scmp.lt.u32.totalorder %s5748_s30, %s5743_s5 }
 0x204   : > { %p5752_p6 = scmp.lt.u32.totalorder %s5743_s5, %s6528_s14 }
 0x205   : > { %p5746_p1 = pnand %p5745_p8, %p5744_p12  ;;  %p5751_p2 = por %p5750_p0, %p5749_p13 }
 0x207   : > { %p5747_p3 = pneg %p5746_p1  ;;  %p5753_p7 = por %p5752_p6, %p5751_p2 }
 0x209   : > { %p5754_p9 = pnand %p5753_p7, %p5747_p3 }
 0x20b   : > { %5757 = shalt.err (!%p5754_p9)
}
 0x20c   : > { %s5758_s26 = scalar_lea.vmem %s6530_s4, 640  ;;  %s5899_s24 = smov [#allocation3]  }
 0x20d   : > { %p5759_p12 = scmp.ne.s32.totalorder %s6530_s4, %s5758_s26  ;;  %s5763_s3 = sshll.u32 %s5899_s24, 4  ;;  %s5764_s3 = int_to_ptr.vmem [resolvable:$false] %s5763_s3 }
 0x20e   : > { %s5765_s6 = scalar_lea.vmem %s5764_s3, 1280  ;;  %p5766_p4 = scmp.lt.s32.totalorder %s6530_s4, %s5764_s3 }
 0x20f   : > { %p5761_p1 = pnand %p5759_p12, %p5745_p8  ;;  %p5767_p13 = scmp.lt.s32.totalorder %s5765_s6, %s5758_s26 }
 0x211   : > { %p5762_p10 = pneg %p5761_p1  ;;  %p5768_p0 = por %p5767_p13, %p5766_p4 }
 0x213   : > { %p5769_p2 = pnand %p5768_p0, %p5762_p10 }
 0x215   : > { %5772 = shalt.err (!%p5769_p2)
}
 0x216   : > { %s8023_s5 = smov 8   ;;  %s8024_s7 = smov 128  }
 0x217   : > { %4903 = dma.hbm_to_vmem [thread:$0]  (!%p6521_p11), %s6528_s14, 640, %s6530_s4, %s6532_s25, %s8024_s7, %s8024_s7, %s8023_s5  }
 0x218   : > { %s8025_s2 = sld [smem:[#allocation50_spill]] }
 0x21e   : > { %p8026_p8 = scmp.ne.s32.totalorder %s8025_s2, 0 }
 0x21f   : > { %s8027_s0 = sld [smem:[#allocation46_spill]] (!%p8026_p8) }
 0x220   : > { %729 = sbr.rel (%p8026_p8) target bundleno = 5206 (0x1456), region = 96 }
 0x225   : > { %s6566_s30 = sand.u32 (!%p8026_p8), 1, %s8027_s0  }
 0x226   : > { %s7965_s26 = smul.u32 (!%p8026_p8), 40, %s6566_s30  ;;  %s732_s24 = scalar_lea.sflag (!%p8026_p8), [#allocation4], %s6566_s30 }
 0x228   : > { %s6572_s23 = scalar_lea.vmem [#allocation3], %s7965_s26 }
 0x229   : > { %5818 = dma.done.wait (%p6505_p5), %s732_s24, 640  }
 0x22a   : > { %5820 = vsyncadd (%p6505_p5), %s732_s24, 4294966656  ;;  %s8028_s4 = sld [smem:[#allocation49_spill]] }
 0x230   : > { %p8029_p4 = scmp.eq.s32.totalorder %s8028_s4, 0 }
 0x232   : > { %5822 = dma.done.wait (%p8029_p4), [#allocation7], 656   ;;  %p8030_p10 = pmov %p8029_p4 }
 0x233   : > { %p8031_p11 = pmov %p8029_p4 }
 0x234   : > { %5824 = vsyncadd (%p8030_p10), [#allocation7], 4294966640 }
 0x235   : > { %5826 = dma.done.wait (%p8031_p11), [#allocation10], 656   ;;  %p8032_p3 = pmov %p8029_p4 }
 0x237   : > { %5828 = vsyncadd (%p8032_p3), [#allocation10], 4294966640  ;;  %p8033_p6 = pmov %p8032_p3 }
 0x238   : > { %p8034_p7 = pmov %p8032_p3 }
 0x239   : > { %5830 = dma.done.wait (%p8033_p6), [#allocation13], 32  }
 0x23a   : > { %5832 = vsyncadd (%p8034_p7), [#allocation13], 4294967264  ;;  %p8035_p5 = pmov %p8032_p3 }
 0x23b   : > { %p8036_p9 = pmov %p8032_p3 }
 0x23c   : > { %5834 = dma.done.wait (%p8035_p5), [#allocation16], 512  }
 0x23d   : > { %5836 = vsyncadd (%p8036_p9), [#allocation16], 4294966784  ;;  %p8037_p12 = pmov %p8032_p3 }
 0x23e   : > { %p8038_p1 = pmov %p8032_p3 }
 0x23f   : > { %5838 = dma.done.wait (%p8037_p12), [#allocation19], 32  }
 0x240   : > { %5840 = vsyncadd (%p8038_p1), [#allocation19], 4294967264  ;;  %p8039_p13 = pmov %p8038_p1 }
 0x241   : > { %p8040_p0 = pmov %p8038_p1 }
 0x242   : > { %5842 = dma.done.wait (%p8039_p13), [#allocation22], 512  }
 0x243   : > { %5844 = vsyncadd (%p8040_p0), [#allocation22], 4294966784  ;;  %p8041_p2 = pmov %p8040_p0 }
 0x244   : > { %p8042_p8 = pmov %p8040_p0 }
 0x245   : > { %5846 = dma.done.wait (%p8041_p2), [#allocation25], 32  }
 0x246   : > { %5848 = vsyncadd (%p8042_p8), [#allocation25], 4294967264  ;;  %p8043_p4 = pmov %p8040_p0 }
 0x247   : > { %p8044_p10 = pmov %p8040_p0 }
 0x248   : > { %5850 = dma.done.wait (%p8043_p4), [#allocation28], 272  }
 0x249   : > { %5852 = vsyncadd (%p8044_p10), [#allocation28], 4294967024  ;;  %p8045_p11 = pmov %p8040_p0 }
 0x24a   : > { %p8046_p3 = pmov %p8040_p0 }
 0x24b   : > { %5854 = dma.done.wait (%p8045_p11), [#allocation31], 528  }
 0x24c   : > { %5856 = vsyncadd (%p8046_p3), [#allocation31], 4294966768  ;;  %vm7975_vm0 = vcmask 261120   ;;  %vm7972_vm1 = vcmask 253952   ;;  %v863_v0 = vld [vmem:[%s6572_s23] sm:$0xff]  ;;  %v865_v1 = vld [vmem:[%s6572_s23 + $0x10] sm:$0xff] }
 0x24d   : > { %v864_v2 = vld [vmem:[%s6572_s23 + $0x8] sm:$0xff]  ;;  %v885_v3 = vsel %vm7975_vm0, %v863_v0, 0.0  ;;  %v891_v4 = vsel %vm7975_vm0, %v865_v1, 0.0  ;;  %v866_v6 = vld [vmem:[%s6572_s23 + $0x18] sm:$0xff]  ;;  %v867_v7 = vld [vmem:[%s6572_s23 + $0x20] sm:$0x1] }
 0x24e   : > { %v888_v5 = vsel %vm7975_vm0, %v864_v2, 0.0  ;;  %886 = vadd.xlane.f32.xlu0 %v885_v3  ;;  %892 = vadd.xlane.f32.xlu1 %v891_v4  ;;  %v894_v8 = vsel %vm7975_vm0, %v866_v6, 0.0  ;;  %v898_v9 = vsel %vm7972_vm1, %v867_v7, 0.0  ;;  %v5020_v35 = vld [vmem:[#allocation15] sm:$0xff]   ;;  %v5900_v36 = vmov 0.0   ;;  %v5021_v37 = vld [vmem:[#allocation15 + $0x8] sm:$0xff]  }
 0x24f   : > { %4373 = vmatprep.subr.bf16.mxu0 %v5900_v36  ;;  %vm5901_vm2 = vmmov 0   ;;  %4389 = vmatprep.subr.bf16.mxu1 %v5900_v36  ;;  %v4154_v55 = vld [vmem:[#allocation12] ss:$0 sm:$0xff]  ;;  %v4155_v60 = vld [vmem:[#allocation14] ss:$0 sm:$0xff]  ;;  %s5903_s1 = smov 96  }
 0x250   : > { %4377 = vmatprep.mubr.msk.bf16.mxu0 %vm5901_vm2, %v5900_v36  ;;  %4374 = vmatpush3.bf16.msra.mxu0 %v5020_v35  ;;  %s5904_s14 = smov 88   ;;  %s5905_s25 = smov 120   ;;  %vm1137_vm8 = vcmask 64512   ;;  %vm1294_vm9 = vcmask 1040384  }
 0x251   : > { %4375 = vmatprep.subr.bf16.mxu0 %v5900_v36  ;;  %4395 = vmatprep.mubr.msk.bf16.mxu1 %vm5901_vm2, %v5900_v36  ;;  %s5906_s3 = smov 112   ;;  %s5907_s6 = smov 80  }
 0x252   : > { %889 = vadd.xlane.f32.xlu0 %v888_v5  ;;  %895 = vadd.xlane.f32.xlu1 %v894_v8  ;;  %s5908_s5 = smov 104   ;;  %s5909_s7 = smov 72  }
 0x253   : > { %s5910_s2 = smov 64   ;;  %s7970_s0 = smov 56  }
 0x254   : > { %4376 = vmatpush3.bf16.msra.mxu0 %v5021_v37  ;;  %s7968_s24 = smov 48   ;;  %s7966_s26 = smov 40  }
 0x255   : > { %4407 = vmatprep.subr.bf16.mxu0 %v5900_v36  ;;  %p8115_p7 = scmp.ne.s32.totalorder %s8019_s19, 0 }
 0x256   : > { %899 = vadd.xlane.f32.xlu0 %v898_v9 }
 0x2db   : > { %v887_v10 = vpop.xlane.xlu0 %886  ;;  %v893_v11 = vpop.xlane.xlu1 %892 }
 0x2dc   : > { %v902_v12 = vmul.f32 0.03125, %v887_v10  ;;  %v904_v13 = vmul.f32 0.03125, %v893_v11 }
 0x2de   : > { %v907_v14 = vsub.f32 %v863_v0, %v902_v12  ;;  %v6624_v15 = vsub.f32 %v865_v1, %v904_v13 }
 0x2df   : > { %v890_v16 = vpop.xlane.xlu0 %889  ;;  %v896_v17 = vpop.xlane.xlu1 %895 }
 0x2e0   : > { %v903_v18 = vmul.f32 0.03125, %v890_v16  ;;  %v905_v19 = vmul.f32 0.03125, %v896_v17  ;;  %v912_v20 = vmul.f32 %v907_v14, %v907_v14  ;;  %v914_v21 = vmul.f32 %v6624_v15, %v6624_v15 }
 0x2e2   : > { %v908_v22 = vsub.f32 %v864_v2, %v903_v18  ;;  %v910_v23 = vsub.f32 %v866_v6, %v905_v19  ;;  %v917_v24 = vsel %vm7975_vm0, %v912_v20, 0.0  ;;  %v923_v27 = vsel %vm7975_vm0, %v914_v21, 0.0 }
 0x2e3   : > { %918 = vadd.xlane.f32.xlu1 %v917_v24  ;;  %v900_v25 = vpop.xlane.xlu0 %899 }
 0x2e4   : > { %v906_v26 = vmul.f32 0.03125, %v900_v25  ;;  %v913_v28 = vmul.f32 %v908_v22, %v908_v22  ;;  %v915_v29 = vmul.f32 %v910_v23, %v910_v23 }
 0x2e6   : > { %v911_v30 = vsub.f32 %v867_v7, %v906_v26  ;;  %v920_v31 = vsel %vm7975_vm0, %v913_v28, 0.0  ;;  %v926_v32 = vsel %vm7975_vm0, %v915_v29, 0.0 }
 0x2e7   : > { %924 = vadd.xlane.f32.xlu1 %v923_v27  ;;  %921 = vadd.xlane.f32.xlu0 %v920_v31  ;;  %v880_v31 = vld [vmem:[#allocation6 + $0x10] sm:$0xff] }
 0x2e8   : > { %v916_v33 = vmul.f32 %v911_v30, %v911_v30  ;;  %vm1080_vm3 = vcmp.lt.s32.totalorder %v880_v31, 0 }
 0x2ea   : > { %v929_v34 = vsel %vm7972_vm1, %v916_v33, 0.0  ;;  %v878_v33 = vld [vmem:[#allocation6] sm:$0xff] }
 0x2eb   : > { %927 = vadd.xlane.f32.xlu0 %v926_v32  ;;  %930 = vadd.xlane.f32.xlu1 %v929_v34  ;;  %vm1078_vm4 = vcmp.lt.s32.totalorder %v878_v33, 0  ;;  %v882_v34 = vld [vmem:[#allocation6 + $0x20] sm:$0x1] }
 0x2ec   : > { %vm1082_vm7 = vcmp.lt.s32.totalorder %v882_v34, 0 }
 0x370   : > { %v919_v38 = vpop.xlane.xlu1 %918 }
 0x371   : > { %v932_v39 = vmul.f32 0.03125, %v919_v38  ;;  %v881_v38 = vld [vmem:[#allocation6 + $0x18] sm:$0xff] }
 0x372   : > { %vm1081_vm6 = vcmp.lt.s32.totalorder %v881_v38, 0 }
 0x373   : > { %v937_v40 = vadd.f32 1e-05, %v932_v39 }
 0x374   : > { %v925_v41 = vpop.xlane.xlu1 %924  ;;  %v922_v42 = vpop.xlane.xlu0 %921 }
 0x375   : > { %5034 = vrsqrt.f32 %v937_v40  ;;  %v934_v43 = vmul.f32 0.03125, %v925_v41  ;;  %v933_v44 = vmul.f32 0.03125, %v922_v42 }
 0x377   : > { %v938_v45 = vadd.f32 1e-05, %v933_v44  ;;  %v939_v46 = vadd.f32 1e-05, %v934_v43 }
 0x378   : > { %v931_v47 = vpop.xlane.xlu1 %930  ;;  %v928_v48 = vpop.xlane.xlu0 %927 }
 0x379   : > { %v935_v49 = vmul.f32 0.03125, %v928_v48  ;;  %5036 = vrsqrt.f32 %v938_v45  ;;  %v936_v50 = vmul.f32 0.03125, %v931_v47 }
 0x37a   : > { %5038 = vrsqrt.f32 %v939_v46 }
 0x37b   : > { %v940_v51 = vadd.f32 1e-05, %v935_v49  ;;  %v941_v52 = vadd.f32 1e-05, %v936_v50 }
 0x37d   : > { %5040 = vrsqrt.f32 %v940_v51 }
 0x37e   : > { %5042 = vrsqrt.f32 %v941_v52 }
 0x37f   : > { %v5035_v53 = vpop.eup %5034 }
 0x380   : > { %v947_v54 = vmul.f32 %v5035_v53, %v907_v14  ;;  %v5902_v14 = vmov 0  }
 0x381   : > { %5019 = vset.pattern.permute.xlu0 %v5902_v14  ;;  %5018 = vset.pattern.permute.xlu1 %v5902_v14  ;;  %v1085_v32 = vsel %vm1080_vm3, 1, %v5902_v14  ;;  %v1083_v35 = vsel %vm1078_vm4, 1, %v5902_v14  ;;  %v1086_v39 = vsel %vm1081_vm6, 1, %v5902_v14  ;;  %v1087_v40 = vsel %vm1082_vm7, 1, %v5902_v14 }
 0x382   : > { %v958_v58 = vmul.f32 %v4154_v55, %v947_v54  ;;  %vm1217_vm6 = vcmask 269312  }
 0x383   : > { %v5037_v56 = vpop.eup %5036 }
 0x384   : > { %v948_v57 = vmul.f32 %v5037_v56, %v908_v22  ;;  %v5039_v59 = vpop.eup %5038  ;;  %v969_v63 = vadd.f32 %v4155_v60, %v958_v58 }
 0x385   : > { %v949_v1 = vmul.f32 %v5039_v59, %v6624_v15 }
 0x386   : > { %v959_v61 = vmul.f32 %v4154_v55, %v948_v57 }
 0x387   : > { %v5041_v62 = vpop.eup %5040  ;;  %v960_v6 = vmul.f32 %v4154_v55, %v949_v1 }
 0x388   : > { %v970_v0 = vadd.f32 %v4155_v60, %v959_v61  ;;  %v950_v2 = vmul.f32 %v5041_v62, %v910_v23  ;;  %v5043_v5 = vpop.eup %5042 }
 0x389   : > { %v951_v8 = vmul.f32 %v5043_v5, %v911_v30  ;;  %v971_v9 = vadd.f32 %v4155_v60, %v960_v6  ;;  %v879_v30 = vld [vmem:[#allocation6 + $0x8] sm:$0xff] }
 0x38a   : > { %v974_v3 = vpack.c.bf16 %v970_v0, %v969_v63  ;;  %v961_v4 = vmul.f32 %v4154_v55, %v950_v2  ;;  %vm1079_vm5 = vcmp.lt.s32.totalorder %v879_v30, 0 }
 0x38b   : > { %v962_v11 = vmul.f32 %v4154_v55, %v951_v8  ;;  %v1084_v37 = vsel %vm1079_vm5, 1, %v5902_v14 }
 0x38c   : > { %4378 = vmatmul.mubr.msk.bf16.vlgmr.msra.gmra.mrb[0].mxu0 %vm7975_vm0, %v974_v3  ;;  %v972_v7 = vadd.f32 %v4155_v60, %v961_v4 }
 0x38d   : > { %4381 = vmatprep.mubr.msk.bf16.mxu0 %vm5901_vm2, %v5900_v36  ;;  %v973_v12 = vadd.f32 %v4155_v60, %v962_v11 }
 0x38e   : > { %v975_v10 = vpack.c.bf16 %v972_v7, %v971_v9 }
 0x38f   : > { %v976_v13 = vpack.c.bf16 %v973_v12, %v973_v12 }
 0x394   : > { %4382 = vmatmul.mubr.msk.bf16.gmra.mrb[4].mxu0 %vm7975_vm0, %v975_v10 }
 0x395   : > { %4385 = vmatprep.mubr.msk.bf16.mxu0 %vm5901_vm2, %v5900_v36 }
 0x39c   : > { %4386 = vmatmul.mubr.msk.bf16.gmra.mrb[8].mxu0 %vm7975_vm0, %v976_v13 }
 0x39d   : > { %4413 = vmatprep.mubr.msk.bf16.mxu0 %vm5901_vm2, %v5900_v36 }
 0x45f   : > { %v1032_v15 = vpop.f32.mrb[0].mxu0 }
 0x460   : > { %v4379_v16 = vpop.f32.mrb[1].mxu0 }
 0x461   : > { %v1035_v17 = vpop.f32.mrb[2].mxu0 }
 0x462   : > { %v6653_v18 = vpack.c.bf16 %v1035_v17, %v1032_v15  ;;  %v4380_v19 = vpop.f32.mrb[3].mxu0 }
 0x464   : > { %1131 = vrot.lane.b32.xlu0 %v6653_v18, %s5903_s1 }
 0x467   : > { %v1040_v20 = vpop.f32.mrb[4].mxu0 }
 0x468   : > { %v4383_v21 = vpop.f32.mrb[5].mxu0 }
 0x469   : > { %v1043_v22 = vpop.f32.mrb[6].mxu0 }
 0x46a   : > { %v6657_v23 = vpack.c.bf16 %v1043_v22, %v1040_v20  ;;  %v4384_v24 = vpop.f32.mrb[7].mxu0 }
 0x46c   : > { %1370 = vrot.lane.b32.xlu0 %v6657_v23, %s5904_s14  ;;  %1133 = vrot.lane.b32.xlu1 %v6657_v23, %s5903_s1 }
 0x46f   : > { %v1048_v25 = vpop.f32.mrb[8].mxu0 }
 0x470   : > { %v6663_v26 = vpack.c.bf16 %v1048_v25, %v1048_v25  ;;  %1362 = vrot.lane.b32.xlu0 %v6653_v18, %s5905_s25  ;;  %v4387_v27 = vpop.f32.mrb[9].mxu0 }
 0x471   : > { %v1051_v28 = vpop.f32.mrb[10].mxu0  ;;  %v6779_v27 = vsel %vm1294_vm9, 65535, %v5902_v14 }
 0x472   : > { %1135 = vrot.lane.b32.xlu1 %v6663_v26, %s5903_s1  ;;  %v4388_v29 = vpop.f32.mrb[11].mxu0 }
 0x474   : > { %1364 = vrot.lane.b32.xlu0 %v6657_v23, %s5905_s25 }
 0x476   : > { %1368 = vrot.lane.b32.xlu1 %v6653_v18, %s5904_s14 }
 0x478   : > { %1366 = vrot.lane.b32.xlu0 %v6663_v26, %s5905_s25 }
 0x47a   : > { %1372 = vrot.lane.b32.xlu1 %v6663_v26, %s5904_s14 }
 0x47c   : > { %1614 = vrot.lane.b32.xlu0 %v6653_v18, %s5906_s3 }
 0x47e   : > { %1620 = vrot.lane.b32.xlu1 %v6653_v18, %s5907_s6 }
 0x480   : > { %1616 = vrot.lane.b32.xlu0 %v6657_v23, %s5906_s3 }
 0x482   : > { %1622 = vrot.lane.b32.xlu1 %v6657_v23, %s5907_s6 }
 0x484   : > { %1618 = vrot.lane.b32.xlu0 %v6663_v26, %s5906_s3 }
 0x486   : > { %1624 = vrot.lane.b32.xlu1 %v6663_v26, %s5907_s6 }
 0x488   : > { %1866 = vrot.lane.b32.xlu0 %v6653_v18, %s5908_s5 }
 0x48a   : > { %1872 = vrot.lane.b32.xlu1 %v6653_v18, %s5909_s7 }
 0x48c   : > { %1870 = vrot.lane.b32.xlu0 %v6663_v26, %s5908_s5 }
 0x48e   : > { %1874 = vrot.lane.b32.xlu1 %v6657_v23, %s5909_s7 }
 0x490   : > { %1058 = vperm.xlu0 %5019, %v879_v30   ;;  %v1069_v30 = vlaneseq }
 0x492   : > { %1876 = vrot.lane.b32.xlu1 %v6663_v26, %s5909_s7 }
 0x494   : > { %1061 = vperm.xlu0 %5019, %v880_v31   ;;  %v1070_v31 = vshrl.u32 %v1069_v30, 7 }
 0x496   : > { %1868 = vrot.lane.b32.xlu1 %v6657_v23, %s5908_s5 }
 0x498   : > { %1095 = vperm.xlu0 %5019, %v1085_v32   ;;  %v883_v32 = vld [vmem:[#allocation8] sm:$0x1] }
 0x499   : > { %vm1113_vm10 = vcmp.lt.s32.totalorder %v883_v32, 0 }
 0x49a   : > { %1055 = vperm.xlu1 %5018, %v878_v33   ;;  %v6792_v33 = vsub.s32 0, %v1070_v31 }
 0x49c   : > { %1067 = vperm.xlu0 %5019, %v882_v34   ;;  %v1072_v34 = vrot.slane %v883_v32, %v6792_v33 }
 0x49e   : > { %1089 = vperm.xlu1 %5018, %v1083_v35   ;;  %v1114_v35 = vsel %vm1113_vm10, 1, %v5902_v14 }
 0x4a0   : > { %1279 = vrot.lane.b32.xlu0 %v6657_v23, %s5910_s2 }
 0x4a2   : > { %1092 = vperm.xlu1 %5018, %v1084_v37   ;;  %v1118_v37 = vrot.slane %v1114_v35, %v6792_v33 }
 0x4a4   : > { %vm6797_vm15 = vcmp.eq.s32.totalorder %v1118_v37, 1 }
 0x4a6   : > { %1064 = vperm.xlu1 %5018, %v881_v38  }
 0x4aa   : > { %1098 = vperm.xlu1 %5018, %v1086_v39  }
 0x4ae   : > { %1101 = vperm.xlu1 %5018, %v1087_v40  }
 0x4b2   : > { %1277 = vrot.lane.b32.xlu1 %v6653_v18, %s5910_s2 }
 0x4b6   : > { %1511 = vrot.lane.b32.xlu1 %v6653_v18, %s7970_s0 }
 0x4ba   : > { %1281 = vrot.lane.b32.xlu1 %v6663_v26, %s5910_s2 }
 0x4d6   : > { %v1132_v41 = vpop.permute.xlu0 %1131 }
 0x4d7   : > { %v1148_v42 = vsel %vm1137_vm8, %v1132_v41, 0 }
 0x4d8   : > { %4390 = vmatpush3.bf16.xpose.msra.mxu1 %v1148_v42 }
 0x4d9   : > { %4391 = vmatprep.subr.bf16.mxu1 %v5900_v36 }
 0x4de   : > { %v1134_v43 = vpop.permute.xlu1 %1133  ;;  %v1371_v48 = vpop.permute.xlu0 %1370 }
 0x4df   : > { %v1151_v44 = vsel %vm1137_vm8, %v1134_v43, 0  ;;  %v1387_v54 = vsel %vm1137_vm8, %v1371_v48, 0 }
 0x4e0   : > { %4392 = vmatpush3.bf16.xpose.msra.mxu1 %v1151_v44 }
 0x4e1   : > { %4393 = vmatprep.subr.bf16.mxu1 %v5900_v36 }
 0x4e2   : > { %v1363_v50 = vpop.permute.xlu0 %1362 }
 0x4e4   : > { %v1136_v45 = vpop.permute.xlu1 %1135 }
 0x4e5   : > { %v1154_v46 = vsel %vm1137_vm8, %v1136_v45, 0 }
 0x4e6   : > { %v1365_v53 = vpop.permute.xlu0 %1364 }
 0x4e8   : > { %v1369_v47 = vpop.permute.xlu1 %1368  ;;  %4394 = vmatpush3.bf16.xpose.msra.mxu1 %v1154_v46 }
 0x4e9   : > { %4425 = vmatprep.subr.bf16.mxu1 %v5900_v36  ;;  %v1384_v51 = vsel %vm1137_vm8, %v1369_v47, 0 }
 0x4ea   : > { %v1367_v56 = vpop.permute.xlu0 %1366 }
 0x4ec   : > { %v1373_v49 = vpop.permute.xlu1 %1372 }
 0x4ed   : > { %v1390_v58 = vsel %vm1137_vm8, %v1373_v49, 0 }
 0x4ee   : > { %v1615_v59 = vpop.permute.xlu0 %1614 }
 0x4ef   : > { %4396 = vmatmul.mubr.msk.bf16.vlgmr.msra.gmra.mrb[0].mxu1 %vm1137_vm8, %v6653_v18 }
 0x4f0   : > { %4426 = vmatpush3.bf16.xpose.msra.mxu1 %v1384_v51  ;;  %4399 = vmatprep.mubr.msk.bf16.mxu1 %vm5901_vm2, %v5900_v36  ;;  %v1621_v52 = vpop.permute.xlu1 %1620 }
 0x4f1   : > { %4427 = vmatprep.subr.bf16.mxu1 %v5900_v36  ;;  %v1636_v61 = vsel %vm1137_vm8, %v1621_v52, 0 }
 0x4f2   : > { %v1617_v62 = vpop.permute.xlu0 %1616 }
 0x4f4   : > { %v1623_v55 = vpop.permute.xlu1 %1622 }
 0x4f5   : > { %v1639_v1 = vsel %vm1137_vm8, %v1623_v55, 0 }
 0x4f6   : > { %v1619_v0 = vpop.permute.xlu0 %1618 }
 0x4f7   : > { %4400 = vmatmul.mubr.msk.bf16.gmra.mrb[4].mxu1 %vm1137_vm8, %v6657_v23 }
 0x4f8   : > { %4428 = vmatpush3.bf16.xpose.msra.mxu1 %v1387_v54  ;;  %4403 = vmatprep.mubr.msk.bf16.mxu1 %vm5901_vm2, %v5900_v36  ;;  %v1625_v57 = vpop.permute.xlu1 %1624 }
 0x4f9   : > { %4429 = vmatprep.subr.bf16.mxu1 %v5900_v36  ;;  %v1642_v5 = vsel %vm1137_vm8, %v1625_v57, 0 }
 0x4fa   : > { %v1867_v3 = vpop.permute.xlu0 %1866 }
 0x4fc   : > { %v1873_v60 = vpop.permute.xlu1 %1872 }
 0x4fd   : > { %v1888_v10 = vsel %vm1137_vm8, %v1873_v60, 0 }
 0x4fe   : > { %v1871_v6 = vpop.permute.xlu0 %1870 }
 0x4ff   : > { %4404 = vmatmul.mubr.msk.bf16.gmra.mrb[8].mxu1 %vm1137_vm8, %v6663_v26 }
 0x500   : > { %4430 = vmatpush3.bf16.xpose.msra.mxu1 %v1390_v58  ;;  %4431 = vmatprep.mubr.msk.bf16.mxu1 %vm5901_vm2, %v5900_v36  ;;  %v1875_v63 = vpop.permute.xlu1 %1874 }
 0x501   : > { %4461 = vmatprep.subr.bf16.mxu1 %v5900_v36  ;;  %v1891_v15 = vsel %vm1137_vm8, %v1875_v63, 0 }
 0x504   : > { %v1877_v2 = vpop.permute.xlu1 %1876 }
 0x505   : > { %v1894_v20 = vsel %vm1137_vm8, %v1877_v2, 0 }
 0x507   : > { %4432 = vmatmul.mubr.msk.bf16.vlgmr.msra.gmra.mrb[12].mxu1 %vm1137_vm8, %v1363_v50 }
 0x508   : > { %4462 = vmatpush3.bf16.xpose.msra.mxu1 %v1636_v61  ;;  %4435 = vmatprep.mubr.msk.bf16.mxu1 %vm5901_vm2, %v5900_v36  ;;  %v1869_v4 = vpop.permute.xlu1 %1868 }
 0x509   : > { %4463 = vmatprep.subr.bf16.mxu1 %v5900_v36 }
 0x50f   : > { %4436 = vmatmul.mubr.msk.bf16.gmra.mrb[16].mxu1 %vm1137_vm8, %v1365_v53  ;;  %v1059_v8 = vpop.permute.xlu0 %1058 }
 0x510   : > { %4464 = vmatpush3.bf16.xpose.msra.mxu1 %v1639_v1  ;;  %4439 = vmatprep.mubr.msk.bf16.mxu1 %vm5901_vm2, %v5900_v36  ;;  %vm1074_vm13 = vcmp.eq.s32.totalorder %v1059_v8, %v1072_v34 }
 0x511   : > { %4465 = vmatprep.subr.bf16.mxu1 %v5900_v36 }
 0x513   : > { %v1062_v12 = vpop.permute.xlu0 %1061 }
 0x514   : > { %vm1075_vm7 = vcmp.eq.s32.totalorder %v1062_v12, %v1072_v34 }
 0x517   : > { %4440 = vmatmul.mubr.msk.bf16.gmra.mrb[20].mxu1 %vm1137_vm8, %v1367_v56  ;;  %v1096_v16 = vpop.permute.xlu0 %1095 }
 0x518   : > { %4466 = vmatpush3.bf16.xpose.msra.mxu1 %v1642_v5  ;;  %4467 = vmatprep.mubr.msk.bf16.mxu1 %vm5901_vm2, %v5900_v36  ;;  %vm1105_vm9 = vcmp.eq.s32.totalorder %v1096_v16, 1 }
 0x519   : > { %v1056_v7 = vpop.permute.xlu1 %1055  ;;  %4497 = vmatprep.subr.bf16.mxu1 %v5900_v36 }
 0x51a   : > { %vm1073_vm11 = vcmp.eq.s32.totalorder %v1056_v7, %v1072_v34 }
 0x51b   : > { %v6768_v21 = vpop.permute.xlu0 %1067 }
 0x51d   : > { %v1090_v9 = vpop.permute.xlu1 %1089 }
 0x51e   : > { %vm1103_vm12 = vcmp.eq.s32.totalorder %v1090_v9, 1 }
 0x51f   : > { %4468 = vmatmul.mubr.msk.bf16.vlgmr.msra.gmra.mrb[24].mxu1 %vm1137_vm8, %v1615_v59  ;;  %v1280_v24 = vpop.permute.xlu0 %1279  ;;  %vm1108_vm3 = vmor %vm1073_vm11, %vm1103_vm12 }
 0x520   : > { %4498 = vmatpush3.bf16.xpose.msra.mxu1 %v1888_v10  ;;  %4471 = vmatprep.mubr.msk.bf16.mxu1 %vm5901_vm2, %v5900_v36  ;;  %vm6803_vm5 = vmor %vm1108_vm3, %vm6797_vm15 }
 0x521   : > { %v1093_v11 = vpop.permute.xlu1 %1092  ;;  %4499 = vmatprep.subr.bf16.mxu1 %v5900_v36 }
 0x522   : > { %vm1104_vm14 = vcmp.eq.s32.totalorder %v1093_v11, 1 }
 0x523   : > { %vm1109_vm4 = vmor %vm1074_vm13, %vm1104_vm14 }
 0x524   : > { %vm6809_vm10 = vmor %vm1109_vm4, %vm6797_vm15 }
 0x525   : > { %v6758_v13 = vpop.permute.xlu1 %1064  ;;  %vm1110_vm13 = vmor %vm1075_vm7, %vm1105_vm9  ;;  %vm1077_vm7 = vcmp.eq.s32.totalorder %v6768_v21, %v1072_v34 }
 0x526   : > { %vm1076_vm11 = vcmp.eq.s32.totalorder %v6758_v13, %v1072_v34  ;;  %vm6828_vm3 = vmor %vm1110_vm13, %vm6797_vm15 }
 0x527   : > { %4472 = vmatmul.mubr.msk.bf16.gmra.mrb[28].mxu1 %vm1137_vm8, %v1617_v62 }
 0x528   : > { %4500 = vmatpush3.bf16.xpose.msra.mxu1 %v1891_v15  ;;  %4475 = vmatprep.mubr.msk.bf16.mxu1 %vm5901_vm2, %v5900_v36 }
 0x529   : > { %v1099_v17 = vpop.permute.xlu1 %1098  ;;  %4501 = vmatprep.subr.bf16.mxu1 %v5900_v36 }
 0x52a   : > { %vm1106_vm12 = vcmp.eq.s32.totalorder %v1099_v17, 1 }
 0x52b   : > { %vm1111_vm14 = vmor %vm1076_vm11, %vm1106_vm12  ;;  %vm1230_vm12 = vcmask 262144  }
 0x52c   : > { %vm6834_vm4 = vmor %vm1111_vm14, %vm6797_vm15  ;;  %vm7977_vm14 = vcmask 261312  }
 0x52d   : > { %v6765_v19 = vpop.permute.xlu1 %1101 }
 0x52e   : > { %vm1107_vm9 = vcmp.eq.s32.totalorder %v6765_v19, 1 }
 0x52f   : > { %4476 = vmatmul.mubr.msk.bf16.gmra.mrb[32].mxu1 %vm1137_vm8, %v1619_v0  ;;  %vm1112_vm11 = vmor %vm1077_vm7, %vm1107_vm9  ;;  %vm7973_vm7 = vcmask 254144  }
 0x530   : > { %4502 = vmatpush3.bf16.xpose.msra.mxu1 %v1894_v20  ;;  %4503 = vmatprep.mubr.msk.bf16.mxu1 %vm5901_vm2, %v5900_v36  ;;  %vm6854_vm13 = vmor %vm1112_vm11, %vm6797_vm15  ;;  %vm1360_vm15 = vcmask 57344  }
 0x531   : > { %v1278_v22 = vpop.permute.xlu1 %1277  ;;  %4533 = vmatprep.subr.bf16.mxu1 %v5900_v36 }
 0x532   : > { %4408 = vmatpush3.bf16.msra.mxu0 %v1278_v22 }
 0x533   : > { %4409 = vmatprep.subr.bf16.mxu0 %v5900_v36 }
 0x535   : > { %v6775_v25 = vpop.permute.xlu1 %1511 }
 0x536   : > { %4410 = vmatpush3.bf16.msra.mxu0 %v1280_v24 }
 0x537   : > { %4504 = vmatmul.mubr.msk.bf16.vlgmr.msra.gmra.mrb[36].mxu1 %vm1137_vm8, %v1867_v3  ;;  %4411 = vmatprep.subr.bf16.mxu0 %v5900_v36 }
 0x538   : > { %4507 = vmatprep.mubr.msk.bf16.mxu1 %vm5901_vm2, %v5900_v36 }
 0x539   : > { %v1282_v28 = vpop.permute.xlu1 %1281 }
 0x53a   : > { %v1298_v29 = vand.u32 %v6779_v27, %v1282_v28 }
 0x53c   : > { %4412 = vmatpush3.bf16.msra.mxu0 %v1298_v29 }
 0x53d   : > { %4443 = vmatprep.subr.bf16.mxu0 %v5900_v36 }
 0x53f   : > { %4508 = vmatmul.mubr.msk.bf16.gmra.mrb[40].mxu1 %vm1137_vm8, %v1869_v4 }
 0x540   : > { %4511 = vmatprep.mubr.msk.bf16.mxu1 %vm5901_vm2, %v5900_v36 }
 0x547   : > { %4512 = vmatmul.mubr.msk.bf16.gmra.mrb[44].mxu1 %vm1137_vm8, %v1871_v6 }
 0x548   : > { %4537 = vmatprep.mubr.msk.bf16.mxu1 %vm5901_vm2, %v5900_v36 }
 0x5c2   : > { %v1190_v41 = vpop.f32.mrb[0].mxu1 }
 0x5c3   : > { %v6815_v42 = vsel %vm6803_vm5, %v1190_v41, -1e+30  ;;  %v4397_v43 = vpop.f32.mrb[1].mxu1 }
 0x5c4   : > { %v1193_v44 = vpop.f32.mrb[2].mxu1  ;;  %v1218_v45 = vsel %vm1217_vm6, %v6815_v42, -inf }
 0x5c5   : > { %v6822_v46 = vsel %vm6809_vm10, %v1193_v44, -1e+30  ;;  %1219 = vmax.xlane.f32.xlu0 %v1218_v45  ;;  %v4398_v47 = vpop.f32.mrb[3].mxu1 }
 0x5c6   : > { %v1221_v48 = vsel %vm1217_vm6, %v6822_v46, -inf }
 0x5c7   : > { %1222 = vmax.xlane.f32.xlu1 %v1221_v48 }
 0x5ca   : > { %v1198_v51 = vpop.f32.mrb[4].mxu1 }
 0x5cb   : > { %v6840_v52 = vsel %vm6828_vm3, %v1198_v51, -1e+30  ;;  %v4401_v53 = vpop.f32.mrb[5].mxu1 }
 0x5cc   : > { %v1201_v54 = vpop.f32.mrb[6].mxu1  ;;  %v1224_v55 = vsel %vm1217_vm6, %v6840_v52, -inf }
 0x5cd   : > { %v6848_v56 = vsel %vm6834_vm4, %v1201_v54, -1e+30  ;;  %v4402_v57 = vpop.f32.mrb[7].mxu1  ;;  %1225 = vmax.xlane.f32.xlu0 %v1224_v55 }
 0x5ce   : > { %v1227_v58 = vsel %vm1217_vm6, %v6848_v56, -inf }
 0x5d1   : > { %1228 = vmax.xlane.f32.xlu0 %v1227_v58 }
 0x5d2   : > { %v1206_v60 = vpop.f32.mrb[8].mxu1 }
 0x5d3   : > { %v6860_v61 = vsel %vm6854_vm13, %v1206_v60, -1e+30  ;;  %v4405_v62 = vpop.f32.mrb[9].mxu1 }
 0x5d4   : > { %v1209_v63 = vpop.f32.mrb[10].mxu1  ;;  %v1231_v0 = vsel %vm1230_vm12, %v6860_v61, -inf }
 0x5d5   : > { %v4406_v1 = vpop.f32.mrb[11].mxu1  ;;  %1232 = vmax.xlane.f32.xlu0 %v1231_v0 }
 0x5da   : > { %v1426_v2 = vpop.f32.mrb[12].mxu1 }
 0x5db   : > { %v6866_v3 = vsel %vm6803_vm5, %v1426_v2, -1e+30  ;;  %v4433_v4 = vpop.f32.mrb[13].mxu1 }
 0x5dc   : > { %v1429_v5 = vpop.f32.mrb[14].mxu1  ;;  %v1453_v6 = vsel %vm1217_vm6, %v6866_v3, -inf }
 0x5dd   : > { %v6872_v7 = vsel %vm6809_vm10, %v1429_v5, -1e+30  ;;  %v4434_v8 = vpop.f32.mrb[15].mxu1  ;;  %1454 = vmax.xlane.f32.xlu1 %v1453_v6 }
 0x5de   : > { %v1456_v9 = vsel %vm1217_vm6, %v6872_v7, -inf }
 0x5df   : > { %1457 = vmax.xlane.f32.xlu0 %v1456_v9 }
 0x5e2   : > { %v1434_v10 = vpop.f32.mrb[16].mxu1 }
 0x5e3   : > { %v6878_v11 = vsel %vm6828_vm3, %v1434_v10, -1e+30  ;;  %v4437_v12 = vpop.f32.mrb[17].mxu1 }
 0x5e4   : > { %v1437_v13 = vpop.f32.mrb[18].mxu1  ;;  %v1459_v15 = vsel %vm1217_vm6, %v6878_v11, -inf }
 0x5e5   : > { %v6884_v16 = vsel %vm6834_vm4, %v1437_v13, -1e+30  ;;  %v4438_v17 = vpop.f32.mrb[19].mxu1  ;;  %1460 = vmax.xlane.f32.xlu1 %v1459_v15 }
 0x5e6   : > { %v1462_v19 = vsel %vm1217_vm6, %v6884_v16, -inf }
 0x5e7   : > { %1463 = vmax.xlane.f32.xlu0 %v1462_v19 }
 0x5ea   : > { %v1442_v20 = vpop.f32.mrb[20].mxu1 }
 0x5eb   : > { %v4441_v21 = vpop.f32.mrb[21].mxu1  ;;  %v6900_v60 = vsel %vm6854_vm13, %v1442_v20, -1e+30 }
 0x5ec   : > { %v1445_v22 = vpop.f32.mrb[22].mxu1  ;;  %v1465_v5 = vsel %vm1230_vm12, %v6900_v60, -inf }
 0x5ed   : > { %v4442_v24 = vpop.f32.mrb[23].mxu1 }
 0x5f2   : > { %v1678_v28 = vpop.f32.mrb[24].mxu1 }
 0x5f3   : > { %v4469_v29 = vpop.f32.mrb[25].mxu1  ;;  %v6896_v58 = vsel %vm6803_vm5, %v1678_v28, -1e+30 }
 0x5f4   : > { %v1681_v30 = vpop.f32.mrb[26].mxu1  ;;  %v1705_v0 = vsel %vm1217_vm6, %v6896_v58, -inf }
 0x5f5   : > { %v4470_v31 = vpop.f32.mrb[27].mxu1  ;;  %v6912_v6 = vsel %vm6809_vm10, %v1681_v30, -1e+30 }
 0x5f6   : > { %1515 = vrot.lane.b32.xlu1 %v6663_v26, %s7970_s0  ;;  %v1708_v10 = vsel %vm1217_vm6, %v6912_v6, -inf }
 0x5fa   : > { %v1686_v32 = vpop.f32.mrb[28].mxu1  ;;  %1763 = vrot.lane.b32.xlu1 %v6653_v18, %s7968_s24 }
 0x5fb   : > { %v4473_v34 = vpop.f32.mrb[29].mxu1  ;;  %v6906_v1 = vsel %vm6828_vm3, %v1686_v32, -1e+30 }
 0x5fc   : > { %v1689_v35 = vpop.f32.mrb[30].mxu1  ;;  %v1711_v8 = vsel %vm1217_vm6, %v6906_v1, -inf }
 0x5fd   : > { %v4474_v37 = vpop.f32.mrb[31].mxu1  ;;  %1513 = vrot.lane.b32.xlu0 %v6657_v23, %s7970_s0  ;;  %v6924_v12 = vsel %vm6834_vm4, %v1689_v35, -1e+30  ;;  %s5916_s0 = smov 24  }
 0x5fe   : > { %v1714_v17 = vsel %vm1217_vm6, %v6924_v12, -inf }
 0x602   : > { %v1694_v38 = vpop.f32.mrb[32].mxu1 }
 0x603   : > { %v4477_v41 = vpop.f32.mrb[33].mxu1  ;;  %v6918_v9 = vsel %vm6854_vm13, %v1694_v38, -1e+30 }
 0x604   : > { %v1697_v43 = vpop.f32.mrb[34].mxu1  ;;  %v1717_v13 = vsel %vm1230_vm12, %v6918_v9, -inf }
 0x605   : > { %v4478_v44 = vpop.f32.mrb[35].mxu1 }
 0x60a   : > { %v1930_v45 = vpop.f32.mrb[36].mxu1 }
 0x60b   : > { %v4505_v47 = vpop.f32.mrb[37].mxu1  ;;  %v6936_v19 = vsel %vm6803_vm5, %v1930_v45, -1e+30  ;;  %vm1607_vm5 = vcmask 130112  }
 0x60c   : > { %v1933_v48 = vpop.f32.mrb[38].mxu1  ;;  %v1957_v40 = vsel %vm1217_vm6, %v6936_v19, -inf }
 0x60d   : > { %v4506_v51 = vpop.f32.mrb[39].mxu1  ;;  %v6930_v15 = vsel %vm6809_vm10, %v1933_v48, -1e+30  ;;  %vm1859_vm10 = vcmask 195712  }
 0x60e   : > { %v1960_v20 = vsel %vm1217_vm6, %v6930_v15, -inf }
 0x612   : > { %v1938_v53 = vpop.f32.mrb[40].mxu1 }
 0x613   : > { %v4509_v54 = vpop.f32.mrb[41].mxu1  ;;  %v6948_v22 = vsel %vm6828_vm3, %v1938_v53, -1e+30  ;;  %vm7976_vm3 = vcmask 122944  }
 0x614   : > { %v1941_v55 = vpop.f32.mrb[42].mxu1  ;;  %v1963_v24 = vsel %vm1217_vm6, %v6948_v22, -inf }
 0x615   : > { %v4510_v57 = vpop.f32.mrb[43].mxu1  ;;  %v6942_v21 = vsel %vm6834_vm4, %v1941_v55, -1e+30  ;;  %vm7974_vm4 = vcmask 188544  }
 0x616   : > { %v1966_v39 = vsel %vm1217_vm6, %v6942_v21, -inf }
 0x61a   : > { %v1946_v62 = vpop.f32.mrb[44].mxu1 }
 0x61b   : > { %v4513_v63 = vpop.f32.mrb[45].mxu1  ;;  %v6956_v50 = vsel %vm6854_vm13, %v1946_v62, -1e+30 }
 0x61c   : > { %v1949_v2 = vpop.f32.mrb[46].mxu1  ;;  %1706 = vmax.xlane.f32.xlu0 %v1705_v0  ;;  %v1969_v28 = vsel %vm1230_vm12, %v6956_v50, -inf }
 0x61d   : > { %v4514_v4 = vpop.f32.mrb[47].mxu1 }
 0x61e   : > { %1466 = vmax.xlane.f32.xlu1 %v1465_v5 }
 0x620   : > { %1712 = vmax.xlane.f32.xlu0 %v1711_v8 }
 0x622   : > { %1709 = vmax.xlane.f32.xlu1 %v1708_v10 }
 0x624   : > { %1718 = vmax.xlane.f32.xlu0 %v1717_v13 }
 0x626   : > { %1715 = vmax.xlane.f32.xlu1 %v1714_v17 }
 0x628   : > { %1961 = vmax.xlane.f32.xlu0 %v1960_v20 }
 0x62a   : > { %1958 = vmax.xlane.f32.xlu1 %v1957_v40 }
 0x62c   : > { %1967 = vmax.xlane.f32.xlu0 %v1966_v39 }
 0x62e   : > { %1964 = vmax.xlane.f32.xlu1 %v1963_v24 }
 0x632   : > { %1970 = vmax.xlane.f32.xlu1 %v1969_v28 }
 0x652   : > { %v1220_v49 = vpop.xlane.xlu0 %1219 }
 0x653   : > { %v1234_v29 = vsub.f32 %v6815_v42, %v1220_v49 }
 0x654   : > { %v1223_v30 = vpop.xlane.xlu1 %1222 }
 0x655   : > { %v1239_v31 = vmul.f32 1.442695, %v1234_v29  ;;  %v1235_v32 = vsub.f32 %v6822_v46, %v1223_v30 }
 0x657   : > { %5044 = vpow2.f32 %v1239_v31  ;;  %v1241_v34 = vmul.f32 1.442695, %v1235_v32 }
 0x659   : > { %5046 = vpow2.f32 %v1241_v34 }
 0x65a   : > { %v1226_v35 = vpop.xlane.xlu0 %1225 }
 0x65b   : > { %v1236_v59 = vsub.f32 %v6840_v52, %v1226_v35 }
 0x65d   : > { %v1243_v37 = vmul.f32 1.442695, %v1236_v59 }
 0x65e   : > { %v1229_v38 = vpop.xlane.xlu0 %1228 }
 0x65f   : > { %5048 = vpow2.f32 %v1243_v37  ;;  %v1237_v41 = vsub.f32 %v6848_v56, %v1229_v38 }
 0x661   : > { %v6964_v43 = vpop.eup %5044  ;;  %v1245_v44 = vmul.f32 1.442695, %v1237_v41 }
 0x662   : > { %v1233_v45 = vpop.xlane.xlu0 %1232  ;;  %v1249_v42 = vsel %vm1217_vm6, %v6964_v43, 0.0 }
 0x663   : > { %v6968_v47 = vpop.eup %5046  ;;  %5050 = vpow2.f32 %v1245_v44  ;;  %v1238_v46 = vsub.f32 %v6860_v61, %v1233_v45  ;;  %1250 = vadd.xlane.f32.xlu1 %v1249_v42 }
 0x664   : > { %v1252_v52 = vsel %vm1217_vm6, %v6968_v47, 0.0 }
 0x665   : > { %v1247_v48 = vmul.f32 1.442695, %v1238_v46  ;;  %1253 = vadd.xlane.f32.xlu0 %v1252_v52 }
 0x667   : > { %5052 = vpow2.f32 %v1247_v48 }
 0x669   : > { %v6973_v56 = vpop.eup %5048 }
 0x66a   : > { %v1455_v51 = vpop.xlane.xlu1 %1454  ;;  %v1255_v53 = vsel %vm1217_vm6, %v6973_v56, 0.0 }
 0x66b   : > { %v1468_v54 = vsub.f32 %v6866_v3, %v1455_v51  ;;  %1256 = vadd.xlane.f32.xlu0 %v1255_v53 }
 0x66c   : > { %v1458_v55 = vpop.xlane.xlu0 %1457 }
 0x66d   : > { %v6978_v57 = vpop.eup %5050  ;;  %v1473_v61 = vmul.f32 1.442695, %v1468_v54  ;;  %v1469_v62 = vsub.f32 %v6872_v7, %v1458_v55 }
 0x66e   : > { %v1258_v63 = vsel %vm1217_vm6, %v6978_v57, 0.0 }
 0x66f   : > { %5054 = vpow2.f32 %v1473_v61  ;;  %v1475_v0 = vmul.f32 1.442695, %v1469_v62  ;;  %1259 = vadd.xlane.f32.xlu1 %v1258_v63 }
 0x671   : > { %v6983_v2 = vpop.eup %5052  ;;  %5056 = vpow2.f32 %v1475_v0 }
 0x672   : > { %v1461_v4 = vpop.xlane.xlu1 %1460  ;;  %v1261_v3 = vsel %vm1230_vm12, %v6983_v2, 0.0 }
 0x673   : > { %v1470_v5 = vsub.f32 %v6878_v11, %v1461_v4  ;;  %1262 = vadd.xlane.f32.xlu0 %v1261_v3 }
 0x674   : > { %v1464_v40 = vpop.xlane.xlu0 %1463 }
 0x675   : > { %v1477_v8 = vmul.f32 1.442695, %v1470_v5  ;;  %v1471_v39 = vsub.f32 %v6884_v16, %v1464_v40 }
 0x676   : > { %v7005_v28 = vpop.permute.xlu1 %1515 }
 0x677   : > { %5058 = vpow2.f32 %v1477_v8  ;;  %v1479_v24 = vmul.f32 1.442695, %v1471_v39 }
 0x678   : > { %v7007_v49 = vpop.permute.xlu0 %1513 }
 0x679   : > { %v6988_v10 = vpop.eup %5054  ;;  %5060 = vpow2.f32 %v1479_v24 }
 0x67a   : > { %v1483_v7 = vsel %vm1217_vm6, %v6988_v10, 0.0  ;;  %v7009_v29 = vpop.permute.xlu1 %1763 }
 0x67b   : > { %v6992_v13 = vpop.eup %5056  ;;  %1484 = vadd.xlane.f32.xlu1 %v1483_v7 }
 0x67c   : > { %v1486_v17 = vsel %vm1217_vm6, %v6992_v13, 0.0 }
 0x67d   : > { %1487 = vadd.xlane.f32.xlu0 %v1486_v17 }
 0x681   : > { %v6996_v20 = vpop.eup %5058 }
 0x682   : > { %v1489_v11 = vsel %vm1217_vm6, %v6996_v20, 0.0 }
 0x683   : > { %1490 = vadd.xlane.f32.xlu0 %v1489_v11  ;;  %v7012_v34 = vpop.eup %5060 }
 0x684   : > { %v1492_v44 = vsel %vm1217_vm6, %v7012_v34, 0.0 }
 0x68c   : > { %1767 = vrot.lane.b32.xlu1 %v6663_v26, %s7968_s24 }
 0x699   : > { %1765 = vrot.lane.b32.xlu0 %v6657_v23, %s7968_s24  ;;  %s5915_s24 = smov 16  }
 0x6a9   : > { %v1707_v30 = vpop.xlane.xlu0 %1706 }
 0x6aa   : > { %v1720_v31 = vsub.f32 %v6896_v58, %v1707_v30 }
 0x6ab   : > { %v1467_v32 = vpop.xlane.xlu1 %1466 }
 0x6ac   : > { %v1725_v35 = vmul.f32 1.442695, %v1720_v31  ;;  %v1472_v59 = vsub.f32 %v6900_v60, %v1467_v32 }
 0x6ad   : > { %v1713_v37 = vpop.xlane.xlu0 %1712 }
 0x6ae   : > { %5062 = vpow2.f32 %v1725_v35  ;;  %v1481_v16 = vmul.f32 1.442695, %v1472_v59  ;;  %v1722_v38 = vsub.f32 %v6906_v1, %v1713_v37 }
 0x6af   : > { %v1710_v41 = vpop.xlane.xlu1 %1709 }
 0x6b0   : > { %5064 = vpow2.f32 %v1481_v16  ;;  %v1721_v45 = vsub.f32 %v6912_v6, %v1710_v41  ;;  %1493 = vadd.xlane.f32.xlu1 %v1492_v44  ;;  %v1729_v42 = vmul.f32 1.442695, %v1722_v38 }
 0x6b1   : > { %v1719_v58 = vpop.xlane.xlu0 %1718 }
 0x6b2   : > { %v1727_v46 = vmul.f32 1.442695, %v1721_v45  ;;  %v1724_v52 = vsub.f32 %v6918_v9, %v1719_v58 }
 0x6b3   : > { %v1716_v48 = vpop.xlane.xlu1 %1715 }
 0x6b4   : > { %5066 = vpow2.f32 %v1727_v46  ;;  %v1723_v60 = vsub.f32 %v6924_v12, %v1716_v48  ;;  %v1733_v1 = vmul.f32 1.442695, %v1724_v52 }
 0x6b5   : > { %v1962_v51 = vpop.xlane.xlu0 %1961  ;;  %5068 = vpow2.f32 %v1729_v42 }
 0x6b6   : > { %v1731_v53 = vmul.f32 1.442695, %v1723_v60  ;;  %v1973_v54 = vsub.f32 %v6930_v15, %v1962_v51 }
 0x6b7   : > { %v1959_v55 = vpop.xlane.xlu1 %1958 }
 0x6b8   : > { %v7022_v61 = vpop.eup %5062  ;;  %5070 = vpow2.f32 %v1731_v53  ;;  %v1972_v6 = vsub.f32 %v6936_v19, %v1959_v55  ;;  %v1979_v63 = vmul.f32 1.442695, %v1973_v54 }
 0x6b9   : > { %v1735_v62 = vsel %vm1217_vm6, %v7022_v61, 0.0  ;;  %5072 = vpow2.f32 %v1733_v1  ;;  %v1968_v59 = vpop.xlane.xlu0 %1967 }
 0x6ba   : > { %v7027_v9 = vpop.eup %5064  ;;  %v1977_v12 = vmul.f32 1.442695, %v1972_v6  ;;  %1736 = vadd.xlane.f32.xlu1 %v1735_v62  ;;  %v1975_v37 = vsub.f32 %v6942_v21, %v1968_v59  ;;  %v1529_v62 = vand.u32 %v7005_v28, %v6779_v27 }
 0x6bb   : > { %v1965_v0 = vpop.xlane.xlu1 %1964  ;;  %v1495_v4 = vsel %vm1230_vm12, %v7027_v9, 0.0 }
 0x6bc   : > { %5074 = vpow2.f32 %v1977_v12  ;;  %v1974_v15 = vsub.f32 %v6948_v22, %v1965_v0  ;;  %1496 = vadd.xlane.f32.xlu0 %v1495_v4  ;;  %v1983_v41 = vmul.f32 1.442695, %v1975_v37 }
 0x6bd   : > { %5076 = vpow2.f32 %v1979_v63 }
 0x6be   : > { %v7032_v3 = vpop.eup %5066  ;;  %v1981_v19 = vmul.f32 1.442695, %v1974_v15 }
 0x6bf   : > { %v1738_v5 = vsel %vm1217_vm6, %v7032_v3, 0.0  ;;  %v7036_v8 = vpop.eup %5068  ;;  %v1971_v16 = vpop.xlane.xlu1 %1970 }
 0x6c0   : > { %1739 = vadd.xlane.f32.xlu0 %v1738_v5  ;;  %5078 = vpow2.f32 %v1981_v19  ;;  %v1741_v22 = vsel %vm1217_vm6, %v7036_v8, 0.0  ;;  %v1976_v38 = vsub.f32 %v6956_v50, %v1971_v16 }
 0x6c1   : > { %5080 = vpow2.f32 %v1983_v41 }
 0x6c2   : > { %v7038_v7 = vpop.eup %5070  ;;  %v1985_v44 = vmul.f32 1.442695, %v1976_v38 }
 0x6c3   : > { %v1744_v17 = vsel %vm1217_vm6, %v7038_v7, 0.0  ;;  %v7044_v11 = vpop.eup %5072 }
 0x6c4   : > { %1745 = vadd.xlane.f32.xlu1 %v1744_v17  ;;  %1742 = vadd.xlane.f32.xlu0 %v1741_v22  ;;  %v1747_v24 = vsel %vm1230_vm12, %v7044_v11, 0.0 }
 0x6c6   : > { %v7046_v40 = vpop.eup %5074 }
 0x6c7   : > { %v1987_v39 = vsel %vm1217_vm6, %v7046_v40, 0.0  ;;  %v7052_v30 = vpop.eup %5076 }
 0x6c8   : > { %1988 = vadd.xlane.f32.xlu1 %v1987_v39  ;;  %1748 = vadd.xlane.f32.xlu0 %v1747_v24  ;;  %v1990_v31 = vsel %vm1217_vm6, %v7052_v30, 0.0 }
 0x6ca   : > { %v7056_v32 = vpop.eup %5078 }
 0x6cb   : > { %v1993_v35 = vsel %vm1217_vm6, %v7056_v32, 0.0  ;;  %v7066_v46 = vpop.eup %5080 }
 0x6cc   : > { %1991 = vadd.xlane.f32.xlu0 %v1990_v31  ;;  %v1996_v21 = vsel %vm1217_vm6, %v7066_v46, 0.0 }
 0x6d0   : > { %1994 = vadd.xlane.f32.xlu0 %v1993_v35 }
 0x6d9   : > { %2017 = vrot.lane.b32.xlu1 %v6657_v23, %s7966_s26 }
 0x6e6   : > { %2015 = vrot.lane.b32.xlu0 %v6653_v18, %s7966_s26 }
 0x6f0   : > { %v1251_v45 = vpop.xlane.xlu1 %1250 }
 0x6f1   : > { %5082 = vrcp.f32 %v1251_v45 }
 0x6f2   : > { %5084 = vpow2.f32 %v1985_v44  ;;  %v1254_v58 = vpop.xlane.xlu0 %1253 }
 0x6f3   : > { %5086 = vrcp.f32 %v1254_v58 }
 0x6f8   : > { %v1257_v42 = vpop.xlane.xlu0 %1256 }
 0x6f9   : > { %5088 = vrcp.f32 %v1257_v42 }
 0x6fb   : > { %v5083_v23 = vpop.eup %5082 }
 0x6fc   : > { %v7068_v52 = vpop.eup %5084  ;;  %v1260_v18 = vpop.xlane.xlu1 %1259  ;;  %v1269_v48 = vmul.f32 %v5083_v23, %v6964_v43 }
 0x6fd   : > { %v5087_v50 = vpop.eup %5086  ;;  %5090 = vrcp.f32 %v1260_v18  ;;  %1997 = vadd.xlane.f32.xlu1 %v1996_v21  ;;  %v1999_v53 = vsel %vm1230_vm12, %v7068_v52, 0.0 }
 0x6fe   : > { %v1270_v60 = vmul.f32 %v5087_v50, %v6968_v47 }
 0x700   : > { %v1274_v51 = vpack.c.bf16 %v1270_v60, %v1269_v48  ;;  %v1263_v1 = vpop.xlane.xlu0 %1262 }
 0x701   : > { %5092 = vrcp.f32 %v1263_v1  ;;  %2000 = vadd.xlane.f32.xlu1 %v1999_v53 }
 0x702   : > { %4414 = vmatmul.mubr.msk.bf16.vlgmr.msra.gmra.mrb[12].mxu0 %vm1217_vm6, %v1274_v51 }
 0x703   : > { %4444 = vmatpush3.bf16.msra.mxu0 %v6775_v25  ;;  %4417 = vmatprep.mubr.msk.bf16.mxu0 %vm5901_vm2, %v5900_v36  ;;  %v5089_v54 = vpop.eup %5088 }
 0x704   : > { %4445 = vmatprep.subr.bf16.mxu0 %v5900_v36  ;;  %v1271_v55 = vmul.f32 %v5089_v54, %v6973_v56 }
 0x707   : > { %v5091_v43 = vpop.eup %5090  ;;  %4446 = vmatpush3.bf16.msra.mxu0 %v7007_v49 }
 0x708   : > { %v1485_v47 = vpop.xlane.xlu1 %1484  ;;  %4447 = vmatprep.subr.bf16.mxu0 %v5900_v36  ;;  %v1272_v6 = vmul.f32 %v5091_v43, %v6978_v57 }
 0x709   : > { %5094 = vrcp.f32 %v1485_v47 }
 0x70a   : > { %v1488_v25 = vpop.xlane.xlu0 %1487  ;;  %v1275_v63 = vpack.c.bf16 %v1272_v6, %v1271_v55 }
 0x70b   : > { %v5093_v12 = vpop.eup %5092  ;;  %4448 = vmatpush3.bf16.msra.mxu0 %v1529_v62  ;;  %5096 = vrcp.f32 %v1488_v25 }
 0x70c   : > { %4418 = vmatmul.mubr.msk.bf16.gmra.mrb[16].mxu0 %vm1217_vm6, %v1275_v63  ;;  %4479 = vmatprep.subr.bf16.mxu0 %v5900_v36  ;;  %v1273_v56 = vmul.f32 %v5093_v12, %v6983_v2 }
 0x70d   : > { %4421 = vmatprep.mubr.msk.bf16.mxu0 %vm5901_vm2, %v5900_v36 }
 0x70e   : > { %v1276_v57 = vpack.c.bf16 %v1273_v56, %v1273_v56 }
 0x710   : > { %v1491_v19 = vpop.xlane.xlu0 %1490 }
 0x711   : > { %5098 = vrcp.f32 %v1491_v19 }
 0x712   : > { %2019 = vrot.lane.b32.xlu1 %v6663_v26, %s7966_s26  ;;  %v1768_v26 = vpop.permute.xlu1 %1767  ;;  %s7978_s26 = smov 8  }
 0x713   : > { %v5095_v28 = vpop.eup %5094 }
 0x714   : > { %4422 = vmatmul.mubr.msk.bf16.gmra.mrb[20].mxu0 %vm1217_vm6, %v1276_v57  ;;  %v1503_v4 = vmul.f32 %v5095_v28, %v6988_v10  ;;  %v1766_v2 = vpop.permute.xlu0 %1765 }
 0x715   : > { %v5097_v49 = vpop.eup %5096  ;;  %4449 = vmatprep.mubr.msk.bf16.mxu0 %vm5901_vm2, %v5900_v36 }
 0x716   : > { %v1504_v0 = vmul.f32 %v5097_v49, %v6992_v13  ;;  %v1781_v13 = vand.u32 %v1768_v26, %v6779_v27 }
 0x718   : > { %v1508_v15 = vpack.c.bf16 %v1504_v0, %v1503_v4 }
 0x71b   : > { %v5099_v5 = vpop.eup %5098 }
 0x71c   : > { %4450 = vmatmul.mubr.msk.bf16.vlgmr.msra.gmra.mrb[24].mxu0 %vm1217_vm6, %v1508_v15  ;;  %v1505_v22 = vmul.f32 %v5099_v5, %v6996_v20 }
 0x71d   : > { %4480 = vmatpush3.bf16.msra.mxu0 %v7009_v29  ;;  %4453 = vmatprep.mubr.msk.bf16.mxu0 %vm5901_vm2, %v5900_v36 }
 0x71e   : > { %4481 = vmatprep.subr.bf16.mxu0 %v5900_v36 }
 0x721   : > { %4482 = vmatpush3.bf16.msra.mxu0 %v1766_v2 }
 0x722   : > { %4483 = vmatprep.subr.bf16.mxu0 %v5900_v36 }
 0x725   : > { %4484 = vmatpush3.bf16.msra.mxu0 %v1781_v13 }
 0x726   : > { %4515 = vmatprep.subr.bf16.mxu0 %v5900_v36 }
 0x73d   : > { %v1494_v10 = vpop.xlane.xlu1 %1493 }
 0x73e   : > { %5100 = vrcp.f32 %v1494_v10 }
 0x747   : > { %v1737_v31 = vpop.xlane.xlu1 %1736 }
 0x748   : > { %v5101_v29 = vpop.eup %5100 }
 0x749   : > { %v1497_v17 = vpop.xlane.xlu0 %1496  ;;  %v1506_v39 = vmul.f32 %v5101_v29, %v7012_v34 }
 0x74a   : > { %5102 = vrcp.f32 %v1497_v17 }
 0x74b   : > { %v1509_v24 = vpack.c.bf16 %v1506_v39, %v1505_v22 }
 0x74d   : > { %4454 = vmatmul.mubr.msk.bf16.gmra.mrb[28].mxu0 %vm1217_vm6, %v1509_v24  ;;  %v1740_v35 = vpop.xlane.xlu0 %1739 }
 0x74e   : > { %5104 = vrcp.f32 %v1740_v35  ;;  %4457 = vmatprep.mubr.msk.bf16.mxu0 %vm5901_vm2, %v5900_v36 }
 0x74f   : > { %5106 = vrcp.f32 %v1737_v31 }
 0x751   : > { %v1743_v59 = vpop.xlane.xlu0 %1742  ;;  %v1746_v37 = vpop.xlane.xlu1 %1745 }
 0x752   : > { %5108 = vrcp.f32 %v1746_v37  ;;  %v5022_v37 = vld [vmem:[#allocation17] sm:$0xff]  }
 0x753   : > { %5110 = vrcp.f32 %v1743_v59  ;;  %4534 = vmatpush3.bf16.msra.mxu1 %v5022_v37 }
 0x754   : > { %v5103_v16 = vpop.eup %5102  ;;  %4535 = vmatprep.subr.bf16.mxu1 %v5900_v36 }
 0x755   : > { %v1749_v38 = vpop.xlane.xlu0 %1748  ;;  %v1507_v20 = vmul.f32 %v5103_v16, %v7027_v9  ;;  %v1989_v50 = vpop.xlane.xlu1 %1988 }
 0x756   : > { %5112 = vrcp.f32 %v1749_v38 }
 0x757   : > { %v1510_v34 = vpack.c.bf16 %v1507_v20, %v1507_v20 }
 0x758   : > { %v5105_v41 = vpop.eup %5104 }
 0x759   : > { %4458 = vmatmul.mubr.msk.bf16.gmra.mrb[32].mxu0 %vm1217_vm6, %v1510_v34  ;;  %v1992_v44 = vpop.xlane.xlu0 %1991  ;;  %v5107_v45 = vpop.eup %5106  ;;  %v1756_v58 = vmul.f32 %v5105_v41, %v7032_v3 }
 0x75a   : > { %4485 = vmatprep.mubr.msk.bf16.mxu0 %vm5901_vm2, %v5900_v36  ;;  %v1755_v42 = vmul.f32 %v5107_v45, %v7022_v61  ;;  %v2018_v61 = vpop.permute.xlu1 %2017  ;;  %5114 = vrcp.f32 %v1992_v44 }
 0x75b   : > { %5116 = vrcp.f32 %v1989_v50 }
 0x75c   : > { %v5109_v18 = vpop.eup %5108  ;;  %v1760_v21 = vpack.c.bf16 %v1756_v58, %v1755_v42 }
 0x75d   : > { %v1995_v23 = vpop.xlane.xlu0 %1994  ;;  %v5111_v9 = vpop.eup %5110  ;;  %v1758_v3 = vmul.f32 %v5109_v18, %v7038_v7 }
 0x75e   : > { %v1757_v60 = vmul.f32 %v5111_v9, %v7036_v8 }
 0x760   : > { %v1761_v51 = vpack.c.bf16 %v1758_v3, %v1757_v60  ;;  %v5113_v1 = vpop.eup %5112 }
 0x761   : > { %4486 = vmatmul.mubr.msk.bf16.vlgmr.msra.gmra.mrb[36].mxu0 %vm1217_vm6, %v1760_v21  ;;  %v2016_v48 = vpop.permute.xlu0 %2015  ;;  %v1759_v53 = vmul.f32 %v5113_v1, %v7044_v11 }
 0x762   : > { %4516 = vmatpush3.bf16.msra.mxu0 %v2016_v48  ;;  %4489 = vmatprep.mubr.msk.bf16.mxu0 %vm5901_vm2, %v5900_v36 }
 0x763   : > { %4517 = vmatprep.subr.bf16.mxu0 %v5900_v36  ;;  %v1762_v54 = vpack.c.bf16 %v1759_v53, %v1759_v53 }
 0x764   : > { %v5115_v43 = vpop.eup %5114 }
 0x765   : > { %v5117_v47 = vpop.eup %5116  ;;  %v2008_v55 = vmul.f32 %v5115_v43, %v7052_v30 }
 0x766   : > { %4518 = vmatpush3.bf16.msra.mxu0 %v2018_v61  ;;  %v2007_v11 = vmul.f32 %v5117_v47, %v7046_v40  ;;  %v5023_v61 = vld [vmem:[#allocation17 + $0x8] sm:$0xff]  }
 0x767   : > { %4519 = vmatprep.subr.bf16.mxu0 %v5900_v36  ;;  %4536 = vmatpush3.bf16.msra.mxu1 %v5023_v61 }
 0x768   : > { %v2012_v25 = vpack.c.bf16 %v2008_v55, %v2007_v11  ;;  %4565 = vmatprep.subr.bf16.mxu1 %v5900_v36 }
 0x769   : > { %4490 = vmatmul.mubr.msk.bf16.gmra.mrb[40].mxu0 %vm1217_vm6, %v1761_v51 }
 0x76a   : > { %4493 = vmatprep.mubr.msk.bf16.mxu0 %vm5901_vm2, %v5900_v36 }
 0x771   : > { %4494 = vmatmul.mubr.msk.bf16.gmra.mrb[44].mxu0 %vm1217_vm6, %v1762_v54 }
 0x772   : > { %4521 = vmatprep.mubr.msk.bf16.mxu0 %vm5901_vm2, %v5900_v36 }
 0x78a   : > { %v1998_v8 = vpop.xlane.xlu1 %1997 }
 0x78b   : > { %5118 = vrcp.f32 %v1998_v8 }
 0x78c   : > { %5120 = vrcp.f32 %v1995_v23 }
 0x78e   : > { %v2001_v7 = vpop.xlane.xlu1 %2000 }
 0x78f   : > { %5122 = vrcp.f32 %v2001_v7 }
 0x792   : > { %v2020_v6 = vpop.permute.xlu1 %2019 }
 0x793   : > { %v2033_v62 = vand.u32 %v2020_v6, %v6779_v27 }
 0x795   : > { %4520 = vmatpush3.bf16.msra.mxu0 %v2033_v62  ;;  %v5119_v63 = vpop.eup %5118 }
 0x796   : > { %4549 = vmatprep.subr.bf16.mxu0 %v5900_v36  ;;  %v5121_v12 = vpop.eup %5120  ;;  %v2010_v56 = vmul.f32 %v5119_v63, %v7066_v46 }
 0x797   : > { %v2009_v30 = vmul.f32 %v5121_v12, %v7056_v32 }
 0x798   : > { %4522 = vmatmul.mubr.msk.bf16.vlgmr.msra.gmra.mrb[48].mxu0 %vm1217_vm6, %v2012_v25 }
 0x799   : > { %4525 = vmatprep.mubr.msk.bf16.mxu0 %vm5901_vm2, %v5900_v36  ;;  %v2013_v57 = vpack.c.bf16 %v2010_v56, %v2009_v30  ;;  %v5123_v28 = vpop.eup %5122 }
 0x79a   : > { %v2011_v40 = vmul.f32 %v5123_v28, %v7068_v52 }
 0x79c   : > { %v2014_v49 = vpack.c.bf16 %v2011_v40, %v2011_v40 }
 0x7a0   : > { %4526 = vmatmul.mubr.msk.bf16.gmra.mrb[52].mxu0 %vm1217_vm6, %v2013_v57 }
 0x7a1   : > { %4529 = vmatprep.mubr.msk.bf16.mxu0 %vm5901_vm2, %v5900_v36 }
 0x7a8   : > { %4530 = vmatmul.mubr.msk.bf16.gmra.mrb[56].mxu0 %vm1217_vm6, %v2014_v49 }
 0x7a9   : > { %4553 = vmatprep.mubr.msk.bf16.mxu0 %vm5901_vm2, %v5900_v36 }
 0x7d5   : > { %v1334_v0 = vpop.f32.mrb[12].mxu0 }
 0x7d6   : > { %1356 = vst.msk [vmem:[#allocation2] sm:$0xff] %vm1137_vm8, %v1334_v0  ;;  %v4415_v46 = vpop.f32.mrb[13].mxu0 }
 0x7d7   : > { %v1337_v32 = vpop.f32.mrb[14].mxu0 }
 0x7d8   : > { %1357 = vst.msk [vmem:[#allocation2 + $0x8] sm:$0xff] %vm1137_vm8, %v1337_v32  ;;  %v4416_v4 = vpop.f32.mrb[15].mxu0 }
 0x7df   : > { %v1342_v15 = vpop.f32.mrb[16].mxu0 }
 0x7e0   : > { %1358 = vst.msk [vmem:[#allocation2 + $0x10] sm:$0xff] %vm1137_vm8, %v1342_v15  ;;  %v4419_v19 = vpop.f32.mrb[17].mxu0 }
 0x7e1   : > { %v1345_v26 = vpop.f32.mrb[18].mxu0 }
 0x7e2   : > { %1359 = vst.msk [vmem:[#allocation2 + $0x18] sm:$0xff] %vm1137_vm8, %v1345_v26  ;;  %v4420_v52 = vpop.f32.mrb[19].mxu0 }
 0x7e7   : > { %v1350_v2 = vpop.f32.mrb[20].mxu0 }
 0x7e8   : > { %1361 = vst.msk [vmem:[#allocation2 + $0x20] sm:$0x1] %vm1360_vm15, %v1350_v2  ;;  %v4423_v13 = vpop.f32.mrb[21].mxu0 }
 0x7e9   : > { %v1353_v10 = vpop.f32.mrb[22].mxu0 }
 0x7ea   : > { %v4424_v5 = vpop.f32.mrb[23].mxu0 }
 0x7ef   : > { %v1565_v29 = vpop.f32.mrb[24].mxu0 }
 0x7f0   : > { %1592 = vrot.lane.b32.xlu0 %v1565_v29, %s7978_s26  ;;  %v4451_v17 = vpop.f32.mrb[25].mxu0 }
 0x7f1   : > { %v1568_v22 = vpop.f32.mrb[26].mxu0 }
 0x7f2   : > { %1594 = vrot.lane.b32.xlu1 %v1568_v22, %s7978_s26  ;;  %v4452_v39 = vpop.f32.mrb[27].mxu0  ;;  %v5234_v22 = vld [vmem:[%s6572_s23] sm:$0xff] }
 0x820   : > { %v1573_v24 = vpop.f32.mrb[28].mxu0 }
 0x821   : > { %1596 = vrot.lane.b32.xlu0 %v1573_v24, %s7978_s26  ;;  %v4455_v31 = vpop.f32.mrb[29].mxu0 }
 0x822   : > { %v1576_v35 = vpop.f32.mrb[30].mxu0 }
 0x823   : > { %1598 = vrot.lane.b32.xlu1 %v1576_v35, %s7978_s26  ;;  %v4456_v59 = vpop.f32.mrb[31].mxu0  ;;  %v5235_v35 = vld [vmem:[%s6572_s23 + $0x8] sm:$0xff] }
 0x82c   : > { %v1581_v16 = vpop.f32.mrb[32].mxu0 }
 0x82d   : > { %v4459_v38 = vpop.f32.mrb[33].mxu0 }
 0x82e   : > { %v1584_v20 = vpop.f32.mrb[34].mxu0 }
 0x82f   : > { %v4460_v34 = vpop.f32.mrb[35].mxu0 }
 0x830   : > { %v5236_v34 = vld [vmem:[%s6572_s23 + $0x10] sm:$0xff] }
 0x834   : > { %v1817_v41 = vpop.f32.mrb[36].mxu0 }
 0x835   : > { %1844 = vrot.lane.b32.xlu0 %v1817_v41, %s5915_s24  ;;  %v4487_v44 = vpop.f32.mrb[37].mxu0 }
 0x836   : > { %v1820_v45 = vpop.f32.mrb[38].mxu0 }
 0x837   : > { %1846 = vrot.lane.b32.xlu1 %v1820_v45, %s5915_s24  ;;  %v4488_v58 = vpop.f32.mrb[39].mxu0 }
 0x838   : > { %v5237_v58 = vld [vmem:[%s6572_s23 + $0x18] sm:$0xff] }
 0x83c   : > { %v1825_v42 = vpop.f32.mrb[40].mxu0 }
 0x83d   : > { %v4491_v23 = vpop.f32.mrb[41].mxu0 }
 0x83e   : > { %v1828_v18 = vpop.f32.mrb[42].mxu0 }
 0x83f   : > { %v4492_v21 = vpop.f32.mrb[43].mxu0 }
 0x844   : > { %v1833_v50 = vpop.f32.mrb[44].mxu0 }
 0x845   : > { %v4495_v9 = vpop.f32.mrb[45].mxu0 }
 0x846   : > { %v1836_v48 = vpop.f32.mrb[46].mxu0  ;;  %v5238_v9 = vld [vmem:[%s6572_s23 + $0x20] sm:$0x1]  ;;  %s8059_s23 = smov 56  }
 0x847   : > { %v4496_v60 = vpop.f32.mrb[47].mxu0 }
 0x862   : > { %v1593_v3 = vpop.permute.xlu0 %1592 }
 0x863   : > { %1608 = vst.msk [vmem:[#allocation2] sm:$0xff] %vm1607_vm5, %v1593_v3 }
 0x864   : > { %v1595_v51 = vpop.permute.xlu1 %1594 }
 0x865   : > { %1609 = vst.msk [vmem:[#allocation2 + $0x8] sm:$0xff] %vm1607_vm5, %v1595_v51 }
 0x86b   : > { %v2069_v1 = vpop.f32.mrb[48].mxu0 }
 0x86c   : > { %2096 = vrot.lane.b32.xlu0 %v2069_v1, %s5916_s0  ;;  %v4523_v53 = vpop.f32.mrb[49].mxu0 }
 0x86d   : > { %v2072_v54 = vpop.f32.mrb[50].mxu0 }
 0x86e   : > { %2098 = vrot.lane.b32.xlu1 %v2072_v54, %s5916_s0  ;;  %v4524_v8 = vpop.f32.mrb[51].mxu0 }
 0x870   : > { %1848 = vrot.lane.b32.xlu0 %v1825_v42, %s5915_s24 }
 0x872   : > { %1850 = vrot.lane.b32.xlu1 %v1828_v18, %s5915_s24 }
 0x873   : > { %v2077_v7 = vpop.f32.mrb[52].mxu0 }
 0x874   : > { %2100 = vrot.lane.b32.xlu0 %v2077_v7, %s5916_s0  ;;  %v4527_v43 = vpop.f32.mrb[53].mxu0 }
 0x875   : > { %v2080_v47 = vpop.f32.mrb[54].mxu0 }
 0x876   : > { %2102 = vrot.lane.b32.xlu1 %v2080_v47, %s5916_s0  ;;  %v4528_v55 = vpop.f32.mrb[55].mxu0 }
 0x878   : > { %1600 = vrot.lane.b32.xlu0 %v1581_v16, %s7978_s26 }
 0x87a   : > { %1852 = vrot.lane.b32.xlu1 %v1833_v50, %s5915_s24 }
 0x87b   : > { %v2085_v6 = vpop.f32.mrb[56].mxu0 }
 0x87c   : > { %2104 = vrot.lane.b32.xlu0 %v2085_v6, %s5916_s0  ;;  %v4531_v62 = vpop.f32.mrb[57].mxu0 }
 0x87d   : > { %v2088_v11 = vpop.f32.mrb[58].mxu0 }
 0x87e   : > { %v4532_v25 = vpop.f32.mrb[59].mxu0 }
 0x893   : > { %v1597_v63 = vpop.permute.xlu0 %1596 }
 0x894   : > { %1610 = vst.msk [vmem:[#allocation2 + $0x10] sm:$0xff] %vm1607_vm5, %v1597_v63 }
 0x895   : > { %v1599_v12 = vpop.permute.xlu1 %1598 }
 0x896   : > { %1611 = vst.msk [vmem:[#allocation2 + $0x18] sm:$0xff] %vm1607_vm5, %v1599_v12 }
 0x8a7   : > { %v1845_v56 = vpop.permute.xlu0 %1844 }
 0x8a8   : > { %1860 = vst.msk [vmem:[#allocation2] sm:$0xff] %vm1859_vm10, %v1845_v56 }
 0x8a9   : > { %v1847_v30 = vpop.permute.xlu1 %1846 }
 0x8aa   : > { %1861 = vst.msk [vmem:[#allocation2 + $0x8] sm:$0xff] %vm1859_vm10, %v1847_v30 }
 0x8de   : > { %v2097_v57 = vpop.permute.xlu0 %2096 }
 0x8df   : > { %2112 = vst.msk [vmem:[#allocation2] sm:$0xff] %vm7977_vm14, %v2097_v57 }
 0x8e0   : > { %v2099_v28 = vpop.permute.xlu1 %2098 }
 0x8e1   : > { %2113 = vst.msk [vmem:[#allocation2 + $0x8] sm:$0xff] %vm7977_vm14, %v2099_v28 }
 0x8e2   : > { %v1849_v40 = vpop.permute.xlu0 %1848 }
 0x8e3   : > { %1862 = vst.msk [vmem:[#allocation2 + $0x10] sm:$0xff] %vm1859_vm10, %v1849_v40 }
 0x8e4   : > { %v1851_v49 = vpop.permute.xlu1 %1850 }
 0x8e5   : > { %1863 = vst.msk [vmem:[#allocation2 + $0x18] sm:$0xff] %vm1859_vm10, %v1851_v49 }
 0x8e6   : > { %v2101_v0 = vpop.permute.xlu0 %2100  ;;  %v2118_v32 = vld [vmem:[#allocation2] sm:$0xff] }
 0x8e7   : > { %2114 = vst.msk [vmem:[#allocation2 + $0x10] sm:$0xff] %vm7977_vm14, %v2101_v0 }
 0x8e8   : > { %v2103_v46 = vpop.permute.xlu1 %2102  ;;  %v2119_v4 = vld [vmem:[#allocation2 + $0x8] sm:$0xff] }
 0x8e9   : > { %2115 = vst.msk [vmem:[#allocation2 + $0x18] sm:$0xff] %vm7977_vm14, %v2103_v46  ;;  %v2123_v15 = vpack.c.bf16 %v2119_v4, %v2118_v32 }
 0x8ea   : > { %v1601_v19 = vpop.permute.xlu0 %1600 }
 0x8eb   : > { %1613 = vst.msk [vmem:[#allocation2 + $0x20] sm:$0x1] %vm7976_vm3, %v1601_v19  ;;  %4538 = vmatmul.mubr.msk.bf16.vlgmr.msra.gmra.mrb[48].mxu1 %vm7975_vm0, %v2123_v15  ;;  %v5024_v19 = vld [vmem:[#allocation21] sm:$0xff]  }
 0x8ec   : > { %v1853_v26 = vpop.permute.xlu1 %1852  ;;  %4541 = vmatprep.mubr.msk.bf16.mxu1 %vm5901_vm2, %v5900_v36  ;;  %4550 = vmatpush3.bf16.msra.mxu0 %v5024_v19 }
 0x8ed   : > { %1865 = vst.msk [vmem:[#allocation2 + $0x20] sm:$0x1] %vm7974_vm4, %v1853_v26  ;;  %4551 = vmatprep.subr.bf16.mxu0 %v5900_v36  ;;  %v5025_v26 = vld [vmem:[#allocation21 + $0x8] sm:$0xff]  }
 0x8ee   : > { %v2105_v52 = vpop.permute.xlu0 %2104  ;;  %v2120_v2 = vld [vmem:[#allocation2 + $0x10] sm:$0xff] }
 0x8ef   : > { %2117 = vst.msk [vmem:[#allocation2 + $0x20] sm:$0x1] %vm7973_vm7, %v2105_v52 }
 0x8f0   : > { %v2121_v13 = vld [vmem:[#allocation2 + $0x18] sm:$0xff]  ;;  %4552 = vmatpush3.bf16.msra.mxu0 %v5025_v26 }
 0x8f1   : > { %v2124_v10 = vpack.c.bf16 %v2121_v13, %v2120_v2  ;;  %4583 = vmatprep.subr.bf16.mxu0 %v5900_v36 }
 0x8f3   : > { %4542 = vmatmul.mubr.msk.bf16.gmra.mrb[52].mxu1 %vm7975_vm0, %v2124_v10 }
 0x8f4   : > { %4545 = vmatprep.mubr.msk.bf16.mxu1 %vm5901_vm2, %v5900_v36 }
 0x8f6   : > { %v2122_v5 = vld [vmem:[#allocation2 + $0x20] sm:$0x1] }
 0x8f7   : > { %v2125_v29 = vpack.c.bf16 %v2122_v5, %v2122_v5 }
 0x8fb   : > { %4546 = vmatmul.mubr.msk.bf16.gmra.mrb[56].mxu1 %vm7975_vm0, %v2125_v29 }
 0x8fc   : > { %4571 = vmatprep.mubr.msk.bf16.mxu1 %vm5901_vm2, %v5900_v36 }
 0x9be   : > { %v2181_v17 = vpop.f32.mrb[48].mxu1 }
 0x9bf   : > { %v7195_v39 = vadd.f32 %v5234_v22, %v2181_v17  ;;  %v4539_v24 = vpop.f32.mrb[49].mxu1 }
 0x9c0   : > { %v2184_v31 = vpop.f32.mrb[50].mxu1 }
 0x9c1   : > { %v7198_v59 = vadd.f32 %v5235_v35, %v2184_v31  ;;  %v4540_v37 = vpop.f32.mrb[51].mxu1  ;;  %v2224_v16 = vsel %vm7975_vm0, %v7195_v39, 0.0 }
 0x9c2   : > { %2225 = vadd.xlane.f32.xlu1 %v2224_v16  ;;  %v4190_v16 = vld [vmem:[#allocation18] ss:$0 sm:$0xff] }
 0x9c3   : > { %v2227_v38 = vsel %vm7975_vm0, %v7198_v59, 0.0 }
 0x9c4   : > { %2228 = vadd.xlane.f32.xlu0 %v2227_v38 }
 0x9c6   : > { %v2189_v20 = vpop.f32.mrb[52].mxu1 }
 0x9c7   : > { %v7205_v41 = vadd.f32 %v5236_v34, %v2189_v20  ;;  %v4543_v44 = vpop.f32.mrb[53].mxu1 }
 0x9c8   : > { %v2192_v45 = vpop.f32.mrb[54].mxu1 }
 0x9c9   : > { %v7208_v42 = vadd.f32 %v5237_v58, %v2192_v45  ;;  %v4544_v23 = vpop.f32.mrb[55].mxu1  ;;  %v2230_v18 = vsel %vm7975_vm0, %v7205_v41, 0.0 }
 0x9ca   : > { %2231 = vadd.xlane.f32.xlu0 %v2230_v18  ;;  %v4191_v18 = vld [vmem:[#allocation20] ss:$0 sm:$0xff] }
 0x9cb   : > { %v2233_v21 = vsel %vm7975_vm0, %v7208_v42, 0.0 }
 0x9ce   : > { %2234 = vadd.xlane.f32.xlu0 %v2233_v21  ;;  %v2197_v50 = vpop.f32.mrb[56].mxu1 }
 0x9cf   : > { %v7215_v48 = vadd.f32 %v5238_v9, %v2197_v50  ;;  %v4547_v60 = vpop.f32.mrb[57].mxu1 }
 0x9d0   : > { %v2200_v3 = vpop.f32.mrb[58].mxu1 }
 0x9d1   : > { %v4548_v61 = vpop.f32.mrb[59].mxu1  ;;  %v2236_v51 = vsel %vm7972_vm1, %v7215_v48, 0.0 }
 0x9d2   : > { %2237 = vadd.xlane.f32.xlu1 %v2236_v51 }
 0xa4f   : > { %v2226_v1 = vpop.xlane.xlu1 %2225 }
 0xa50   : > { %v2239_v53 = vmul.f32 0.03125, %v2226_v1 }
 0xa51   : > { %v2229_v54 = vpop.xlane.xlu0 %2228 }
 0xa52   : > { %v2244_v8 = vsub.f32 %v7195_v39, %v2239_v53  ;;  %v2240_v7 = vmul.f32 0.03125, %v2229_v54 }
 0xa54   : > { %v2245_v43 = vsub.f32 %v7198_v59, %v2240_v7  ;;  %v2249_v47 = vmul.f32 %v2244_v8, %v2244_v8 }
 0xa56   : > { %v2254_v55 = vsel %vm7975_vm0, %v2249_v47, 0.0  ;;  %v2250_v6 = vmul.f32 %v2245_v43, %v2245_v43 }
 0xa57   : > { %2255 = vadd.xlane.f32.xlu0 %v2254_v55  ;;  %v2232_v62 = vpop.xlane.xlu0 %2231 }
 0xa58   : > { %v2241_v11 = vmul.f32 0.03125, %v2232_v62  ;;  %v2257_v25 = vsel %vm7975_vm0, %v2250_v6, 0.0 }
 0xa59   : > { %2258 = vadd.xlane.f32.xlu1 %v2257_v25 }
 0xa5a   : > { %v2246_v63 = vsub.f32 %v7205_v41, %v2241_v11 }
 0xa5b   : > { %v2235_v12 = vpop.xlane.xlu0 %2234 }
 0xa5c   : > { %v2242_v56 = vmul.f32 0.03125, %v2235_v12  ;;  %v2251_v30 = vmul.f32 %v2246_v63, %v2246_v63 }
 0xa5e   : > { %v2247_v57 = vsub.f32 %v7208_v42, %v2242_v56  ;;  %v2260_v28 = vsel %vm7975_vm0, %v2251_v30, 0.0 }
 0xa5f   : > { %v2238_v40 = vpop.xlane.xlu1 %2237  ;;  %2261 = vadd.xlane.f32.xlu0 %v2260_v28 }
 0xa60   : > { %v2243_v49 = vmul.f32 0.03125, %v2238_v40  ;;  %v2252_v0 = vmul.f32 %v2247_v57, %v2247_v57 }
 0xa62   : > { %v2248_v46 = vsub.f32 %v7215_v48, %v2243_v49  ;;  %v2263_v32 = vsel %vm7975_vm0, %v2252_v0, 0.0 }
 0xa63   : > { %2264 = vadd.xlane.f32.xlu1 %v2263_v32 }
 0xa64   : > { %v2253_v4 = vmul.f32 %v2248_v46, %v2248_v46 }
 0xa66   : > { %v2266_v15 = vsel %vm7972_vm1, %v2253_v4, 0.0 }
 0xa67   : > { %2267 = vadd.xlane.f32.xlu0 %v2266_v15 }
 0xae4   : > { %v2256_v52 = vpop.xlane.xlu0 %2255 }
 0xae5   : > { %v2269_v2 = vmul.f32 0.03125, %v2256_v52  ;;  %v2218_v52 = vld [vmem:[#allocation9] sm:$0xff] }
 0xae6   : > { %v2259_v13 = vpop.xlane.xlu1 %2258  ;;  %vm2415_vm9 = vcmp.lt.s32.totalorder %v2218_v52, 0 }
 0xae7   : > { %v2274_v10 = vadd.f32 1e-05, %v2269_v2  ;;  %v2270_v5 = vmul.f32 0.03125, %v2259_v13  ;;  %v2420_v2 = vsel %vm2415_vm9, 1, %v5902_v14  ;;  %v2220_v13 = vld [vmem:[#allocation9 + $0x10] sm:$0xff] }
 0xae8   : > { %vm2417_vm11 = vcmp.lt.s32.totalorder %v2220_v13, 0 }
 0xae9   : > { %5124 = vrsqrt.f32 %v2274_v10  ;;  %v2275_v29 = vadd.f32 1e-05, %v2270_v5  ;;  %v2422_v10 = vsel %vm2417_vm11, 1, %v5902_v14  ;;  %v2219_v5 = vld [vmem:[#allocation9 + $0x8] sm:$0xff] }
 0xaea   : > { %vm2416_vm13 = vcmp.lt.s32.totalorder %v2219_v5, 0 }
 0xaeb   : > { %5126 = vrsqrt.f32 %v2275_v29  ;;  %v2222_v29 = vld [vmem:[#allocation9 + $0x20] sm:$0x1] }
 0xaec   : > { %v2262_v17 = vpop.xlane.xlu0 %2261  ;;  %vm2419_vm1 = vcmp.lt.s32.totalorder %v2222_v29, 0 }
 0xaed   : > { %v2271_v22 = vmul.f32 0.03125, %v2262_v17  ;;  %v2421_v17 = vsel %vm2416_vm13, 1, %v5902_v14 }
 0xaef   : > { %v2276_v24 = vadd.f32 1e-05, %v2271_v22  ;;  %v2221_v22 = vld [vmem:[#allocation9 + $0x18] sm:$0xff] }
 0xaf0   : > { %v2265_v31 = vpop.xlane.xlu1 %2264  ;;  %vm2418_vm9 = vcmp.lt.s32.totalorder %v2221_v22, 0 }
 0xaf1   : > { %5128 = vrsqrt.f32 %v2276_v24  ;;  %v2272_v35 = vmul.f32 0.03125, %v2265_v31  ;;  %v2423_v24 = vsel %vm2418_vm9, 1, %v5902_v14  ;;  %v2424_v31 = vsel %vm2419_vm1, 1, %v5902_v14 }
 0xaf3   : > { %v5125_v37 = vpop.eup %5124  ;;  %v2277_v38 = vadd.f32 1e-05, %v2272_v35 }
 0xaf4   : > { %v2284_v20 = vmul.f32 %v5125_v37, %v2244_v8  ;;  %v2268_v34 = vpop.xlane.xlu0 %2267 }
 0xaf5   : > { %v5127_v44 = vpop.eup %5126  ;;  %5130 = vrsqrt.f32 %v2277_v38  ;;  %v2273_v45 = vmul.f32 0.03125, %v2268_v34 }
 0xaf6   : > { %v2295_v58 = vmul.f32 %v4190_v16, %v2284_v20  ;;  %v2285_v23 = vmul.f32 %v5127_v44, %v2245_v43 }
 0xaf7   : > { %v2278_v21 = vadd.f32 1e-05, %v2273_v45 }
 0xaf8   : > { %v2296_v50 = vmul.f32 %v4190_v16, %v2285_v23  ;;  %v2306_v9 = vadd.f32 %v4191_v18, %v2295_v58 }
 0xaf9   : > { %5132 = vrsqrt.f32 %v2278_v21 }
 0xafa   : > { %v2307_v60 = vadd.f32 %v4191_v18, %v2296_v50 }
 0xafb   : > { %v5129_v3 = vpop.eup %5128 }
 0xafc   : > { %v2311_v61 = vpack.c.bf16 %v2307_v60, %v2306_v9  ;;  %v2286_v51 = vmul.f32 %v5129_v3, %v2246_v63 }
 0xafe   : > { %4554 = vmatmul.mubr.msk.bf16.vlgmr.msra.gmra.mrb[60].mxu0 %vm7975_vm0, %v2311_v61  ;;  %v2297_v54 = vmul.f32 %v4190_v16, %v2286_v51 }
 0xaff   : > { %v5131_v1 = vpop.eup %5130  ;;  %4557 = vmatprep.mubr.msk.bf16.mxu0 %vm5901_vm2, %v5900_v36 }
 0xb00   : > { %v2287_v53 = vmul.f32 %v5131_v1, %v2247_v57  ;;  %v2308_v43 = vadd.f32 %v4191_v18, %v2297_v54 }
 0xb02   : > { %v2298_v8 = vmul.f32 %v4190_v16, %v2287_v53 }
 0xb03   : > { %v5133_v7 = vpop.eup %5132 }
 0xb04   : > { %v2309_v47 = vadd.f32 %v4191_v18, %v2298_v8  ;;  %v2288_v55 = vmul.f32 %v5133_v7, %v2248_v46 }
 0xb06   : > { %v2312_v6 = vpack.c.bf16 %v2309_v47, %v2308_v43  ;;  %v2299_v62 = vmul.f32 %v4190_v16, %v2288_v55 }
 0xb08   : > { %4558 = vmatmul.mubr.msk.bf16.gmra.mrb[64].mxu0 %vm7975_vm0, %v2312_v6  ;;  %v2310_v11 = vadd.f32 %v4191_v18, %v2299_v62  ;;  %v7334_v62 = vld [vmem:[#allocation11] sm:$0x1] }
 0xb09   : > { %4561 = vmatprep.mubr.msk.bf16.mxu0 %vm5901_vm2, %v5900_v36 }
 0xb0a   : > { %v2313_v25 = vpack.c.bf16 %v2310_v11, %v2310_v11 }
 0xb10   : > { %4562 = vmatmul.mubr.msk.bf16.gmra.mrb[68].mxu0 %vm7975_vm0, %v2313_v25  ;;  %v2409_v25 = vrot.slane %v7334_v62, %v6792_v33 }
 0xb11   : > { %4589 = vmatprep.mubr.msk.bf16.mxu0 %vm5901_vm2, %v5900_v36 }
 0xbd1   : > { %v2369_v63 = vpop.f32.mrb[60].mxu0 }
 0xbd2   : > { %v4555_v12 = vpop.f32.mrb[61].mxu0 }
 0xbd3   : > { %v2372_v56 = vpop.f32.mrb[62].mxu0 }
 0xbd4   : > { %v7240_v30 = vpack.c.bf16 %v2372_v56, %v2369_v63  ;;  %v4556_v57 = vpop.f32.mrb[63].mxu0 }
 0xbd6   : > { %2468 = vrot.lane.b32.xlu1 %v7240_v30, %s5903_s1 }
 0xbdb   : > { %v2377_v28 = vpop.f32.mrb[64].mxu0 }
 0xbdc   : > { %v4559_v40 = vpop.f32.mrb[65].mxu0 }
 0xbdd   : > { %v2380_v49 = vpop.f32.mrb[66].mxu0 }
 0xbde   : > { %v7244_v0 = vpack.c.bf16 %v2380_v49, %v2377_v28  ;;  %v4560_v46 = vpop.f32.mrb[67].mxu0 }
 0xbe0   : > { %2470 = vrot.lane.b32.xlu0 %v7244_v0, %s5903_s1 }
 0xbe3   : > { %v2385_v32 = vpop.f32.mrb[68].mxu0 }
 0xbe4   : > { %v7248_v4 = vpack.c.bf16 %v2385_v32, %v2385_v32  ;;  %v4563_v15 = vpop.f32.mrb[69].mxu0 }
 0xbe5   : > { %v2388_v19 = vpop.f32.mrb[70].mxu0 }
 0xbe6   : > { %2702 = vrot.lane.b32.xlu0 %v7248_v4, %s5904_s14  ;;  %2472 = vrot.lane.b32.xlu1 %v7248_v4, %s5903_s1  ;;  %v4564_v26 = vpop.f32.mrb[71].mxu0  ;;  %s8082_s1 = smov 48  }
 0xbea   : > { %2948 = vrot.lane.b32.xlu0 %v7240_v30, %s5907_s6  ;;  %2698 = vrot.lane.b32.xlu1 %v7240_v30, %s5904_s14 }
 0xbee   : > { %2950 = vrot.lane.b32.xlu0 %v7244_v0, %s5907_s6  ;;  %2700 = vrot.lane.b32.xlu1 %v7244_v0, %s5904_s14  ;;  %s8083_s14 = smov 40  }
 0xbf2   : > { %2952 = vrot.lane.b32.xlu0 %v7248_v4, %s5907_s6  ;;  %2692 = vrot.lane.b32.xlu1 %v7240_v30, %s5905_s25 }
 0xbf6   : > { %3198 = vrot.lane.b32.xlu0 %v7240_v30, %s5909_s7  ;;  %2694 = vrot.lane.b32.xlu1 %v7244_v0, %s5905_s25 }
 0xbfa   : > { %3200 = vrot.lane.b32.xlu0 %v7244_v0, %s5909_s7  ;;  %2696 = vrot.lane.b32.xlu1 %v7248_v4, %s5905_s25  ;;  %s8107_s25 = smul.u32 40, %s6566_s30 }
 0xbfe   : > { %3202 = vrot.lane.b32.xlu0 %v7248_v4, %s5909_s7  ;;  %2942 = vrot.lane.b32.xlu1 %v7240_v30, %s5906_s3 }
 0xc02   : > { %3194 = vrot.lane.b32.xlu0 %v7244_v0, %s5908_s5  ;;  %2944 = vrot.lane.b32.xlu1 %v7244_v0, %s5906_s3 }
 0xc06   : > { %2392 = vperm.xlu0 %5019, %v2218_v52   ;;  %2946 = vrot.lane.b32.xlu1 %v7248_v4, %s5906_s3  ;;  %s861_s3 = scalar_lea.vmem [#allocation33], %s8107_s25 }
 0xc07   : > { %s3869_s6 = sshll.u32 %s861_s3, 4  ;;  %s7870_s6 = int_to_ptr.vmem [resolvable:$true] %s3869_s6 }
 0xc0a   : > { %2426 = vperm.xlu0 %5019, %v2420_v2   ;;  %3192 = vrot.lane.b32.xlu1 %v7240_v30, %s5908_s5 }
 0xc0e   : > { %2398 = vperm.xlu0 %5019, %v2220_v13   ;;  %3196 = vrot.lane.b32.xlu1 %v7248_v4, %s5908_s5  ;;  %s4768_s5 = smul.u32 640, %s8028_s4  ;;  %s3856_s4 = scalar_lea.sflag [#allocation5], %s6566_s30 }
 0xc12   : > { %2432 = vperm.xlu0 %5019, %v2422_v10   ;;  %2395 = vperm.xlu1 %5018, %v2219_v5  }
 0xc16   : > { %2404 = vperm.xlu0 %5019, %v2222_v29   ;;  %2429 = vperm.xlu1 %5018, %v2421_v17  }
 0xc1a   : > { %2613 = vrot.lane.b32.xlu0 %v7244_v0, %s5910_s2  ;;  %2401 = vperm.xlu1 %5018, %v2221_v22  }
 0xc1e   : > { %2435 = vperm.xlu1 %5018, %v2423_v24  }
 0xc22   : > { %2438 = vperm.xlu1 %5018, %v2424_v31  }
 0xc26   : > { %2611 = vrot.lane.b32.xlu1 %v7240_v30, %s5910_s2 }
 0xc2a   : > { %2841 = vrot.lane.b32.xlu1 %v7240_v30, %s8059_s23 }
 0xc2e   : > { %2615 = vrot.lane.b32.xlu1 %v7248_v4, %s5910_s2 }
 0xc48   : > { %v2469_v35 = vpop.permute.xlu1 %2468 }
 0xc49   : > { %v2484_v37 = vsel %vm1137_vm8, %v2469_v35, 0 }
 0xc4a   : > { %4566 = vmatpush3.bf16.xpose.msra.mxu1 %v2484_v37 }
 0xc4b   : > { %4567 = vmatprep.subr.bf16.mxu1 %v5900_v36 }
 0xc52   : > { %v2471_v16 = vpop.permute.xlu0 %2470 }
 0xc53   : > { %v2487_v38 = vsel %vm1137_vm8, %v2471_v16, 0 }
 0xc54   : > { %4568 = vmatpush3.bf16.xpose.msra.mxu1 %v2487_v38 }
 0xc55   : > { %4569 = vmatprep.subr.bf16.mxu1 %v5900_v36 }
 0xc58   : > { %v2473_v20 = vpop.permute.xlu1 %2472  ;;  %v2703_v34 = vpop.permute.xlu0 %2702 }
 0xc59   : > { %v2490_v44 = vsel %vm1137_vm8, %v2473_v20, 0  ;;  %v2720_v1 = vsel %vm1137_vm8, %v2703_v34, 0 }
 0xc5c   : > { %v2699_v45 = vpop.permute.xlu1 %2698  ;;  %4570 = vmatpush3.bf16.xpose.msra.mxu1 %v2490_v44  ;;  %v2949_v58 = vpop.permute.xlu0 %2948 }
 0xc5d   : > { %4601 = vmatprep.subr.bf16.mxu1 %v5900_v36  ;;  %v2714_v18 = vsel %vm1137_vm8, %v2699_v45, 0  ;;  %v2964_v8 = vsel %vm1137_vm8, %v2949_v58, 0 }
 0xc60   : > { %v2701_v23 = vpop.permute.xlu1 %2700  ;;  %v2951_v21 = vpop.permute.xlu0 %2950 }
 0xc61   : > { %v2717_v3 = vsel %vm1137_vm8, %v2701_v23, 0  ;;  %v2967_v6 = vsel %vm1137_vm8, %v2951_v21, 0 }
 0xc63   : > { %4572 = vmatmul.mubr.msk.bf16.vlgmr.msra.gmra.mrb[60].mxu1 %vm1137_vm8, %v7240_v30 }
 0xc64   : > { %v2693_v50 = vpop.permute.xlu1 %2692  ;;  %4602 = vmatpush3.bf16.xpose.msra.mxu1 %v2714_v18  ;;  %4575 = vmatprep.mubr.msk.bf16.mxu1 %vm5901_vm2, %v5900_v36  ;;  %v2953_v9 = vpop.permute.xlu0 %2952 }
 0xc65   : > { %4603 = vmatprep.subr.bf16.mxu1 %v5900_v36  ;;  %v2970_v56 = vsel %vm1137_vm8, %v2953_v9, 0 }
 0xc68   : > { %v2695_v60 = vpop.permute.xlu1 %2694  ;;  %v3199_v61 = vpop.permute.xlu0 %3198 }
 0xc69   : > { %v3214_v32 = vsel %vm1137_vm8, %v3199_v61, 0 }
 0xc6b   : > { %4576 = vmatmul.mubr.msk.bf16.gmra.mrb[64].mxu1 %vm1137_vm8, %v7244_v0 }
 0xc6c   : > { %4604 = vmatpush3.bf16.xpose.msra.mxu1 %v2717_v3  ;;  %4579 = vmatprep.mubr.msk.bf16.mxu1 %vm5901_vm2, %v5900_v36  ;;  %v2697_v51 = vpop.permute.xlu1 %2696  ;;  %v3201_v53 = vpop.permute.xlu0 %3200 }
 0xc6d   : > { %4605 = vmatprep.subr.bf16.mxu1 %v5900_v36  ;;  %v3217_v2 = vsel %vm1137_vm8, %v3201_v53, 0 }
 0xc70   : > { %v2943_v54 = vpop.permute.xlu1 %2942  ;;  %v3203_v7 = vpop.permute.xlu0 %3202 }
 0xc71   : > { %v3220_v17 = vsel %vm1137_vm8, %v3203_v7, 0 }
 0xc73   : > { %4580 = vmatmul.mubr.msk.bf16.gmra.mrb[68].mxu1 %vm1137_vm8, %v7248_v4 }
 0xc74   : > { %4606 = vmatpush3.bf16.xpose.msra.mxu1 %v2720_v1  ;;  %4607 = vmatprep.mubr.msk.bf16.mxu1 %vm5901_vm2, %v5900_v36  ;;  %v2945_v43 = vpop.permute.xlu1 %2944  ;;  %v7330_v47 = vpop.permute.xlu0 %3194 }
 0xc75   : > { %4637 = vmatprep.subr.bf16.mxu1 %v5900_v36 }
 0xc78   : > { %v2947_v55 = vpop.permute.xlu1 %2946 }
 0xc7b   : > { %4608 = vmatmul.mubr.msk.bf16.vlgmr.msra.gmra.mrb[72].mxu1 %vm1137_vm8, %v2693_v50 }
 0xc7c   : > { %4638 = vmatpush3.bf16.xpose.msra.mxu1 %v2964_v8  ;;  %4611 = vmatprep.mubr.msk.bf16.mxu1 %vm5901_vm2, %v5900_v36  ;;  %v3193_v63 = vpop.permute.xlu1 %3192 }
 0xc7d   : > { %4639 = vmatprep.subr.bf16.mxu1 %v5900_v36 }
 0xc80   : > { %v3197_v28 = vpop.permute.xlu1 %3196 }
 0xc83   : > { %4612 = vmatmul.mubr.msk.bf16.gmra.mrb[76].mxu1 %vm1137_vm8, %v2695_v60 }
 0xc84   : > { %4640 = vmatpush3.bf16.xpose.msra.mxu1 %v2967_v6  ;;  %4615 = vmatprep.mubr.msk.bf16.mxu1 %vm5901_vm2, %v5900_v36 }
 0xc85   : > { %v2393_v11 = vpop.permute.xlu0 %2392  ;;  %4641 = vmatprep.subr.bf16.mxu1 %v5900_v36 }
 0xc86   : > { %vm2410_vm1 = vcmp.eq.s32.totalorder %v2393_v11, %v2409_v25 }
 0xc89   : > { %v2427_v12 = vpop.permute.xlu0 %2426 }
 0xc8a   : > { %vm2440_vm11 = vcmp.eq.s32.totalorder %v2427_v12, 1 }
 0xc8b   : > { %vm7342_vm13 = vmor %vm2410_vm1, %vm2440_vm11  ;;  %4616 = vmatmul.mubr.msk.bf16.gmra.mrb[80].mxu1 %vm1137_vm8, %v2697_v51 }
 0xc8c   : > { %4642 = vmatpush3.bf16.xpose.msra.mxu1 %v2970_v56  ;;  %4643 = vmatprep.mubr.msk.bf16.mxu1 %vm5901_vm2, %v5900_v36 }
 0xc8d   : > { %v2399_v40 = vpop.permute.xlu0 %2398  ;;  %4673 = vmatprep.subr.bf16.mxu1 %v5900_v36 }
 0xc8e   : > { %vm2412_vm9 = vcmp.eq.s32.totalorder %v2399_v40, %v2409_v25 }
 0xc91   : > { %v2396_v49 = vpop.permute.xlu1 %2395  ;;  %v2433_v46 = vpop.permute.xlu0 %2432 }
 0xc92   : > { %vm2442_vm7 = vcmp.eq.s32.totalorder %v2433_v46, 1  ;;  %vm2411_vm11 = vcmp.eq.s32.totalorder %v2396_v49, %v2409_v25 }
 0xc93   : > { %vm7351_vm1 = vmor %vm2412_vm9, %vm2442_vm7  ;;  %4644 = vmatmul.mubr.msk.bf16.vlgmr.msra.gmra.mrb[84].mxu1 %vm1137_vm8, %v2943_v54 }
 0xc94   : > { %4674 = vmatpush3.bf16.xpose.msra.mxu1 %v3214_v32  ;;  %4647 = vmatprep.mubr.msk.bf16.mxu1 %vm5901_vm2, %v5900_v36 }
 0xc95   : > { %v2430_v19 = vpop.permute.xlu1 %2429  ;;  %4675 = vmatprep.subr.bf16.mxu1 %v5900_v36  ;;  %v2405_v10 = vpop.permute.xlu0 %2404 }
 0xc96   : > { %vm2441_vm4 = vcmp.eq.s32.totalorder %v2430_v19, 1 }
 0xc97   : > { %vm7359_vm0 = vmor %vm2411_vm11, %vm2441_vm4  ;;  %vm2414_vm4 = vcmp.eq.s32.totalorder %v2405_v10, %v2409_v25 }
 0xc99   : > { %v2402_v52 = vpop.permute.xlu1 %2401  ;;  %v2614_v31 = vpop.permute.xlu0 %2613 }
 0xc9a   : > { %vm2413_vm7 = vcmp.eq.s32.totalorder %v2402_v52, %v2409_v25 }
 0xc9b   : > { %4648 = vmatmul.mubr.msk.bf16.gmra.mrb[88].mxu1 %vm1137_vm8, %v2945_v43 }
 0xc9c   : > { %4676 = vmatpush3.bf16.xpose.msra.mxu1 %v3217_v2  ;;  %4651 = vmatprep.mubr.msk.bf16.mxu1 %vm5901_vm2, %v5900_v36 }
 0xc9d   : > { %v2436_v13 = vpop.permute.xlu1 %2435  ;;  %4677 = vmatprep.subr.bf16.mxu1 %v5900_v36 }
 0xc9e   : > { %vm2443_vm9 = vcmp.eq.s32.totalorder %v2436_v13, 1 }
 0xc9f   : > { %vm7368_vm3 = vmor %vm2413_vm7, %vm2443_vm9  ;;  %vm2450_vm7 = vcmp.lt.s32.totalorder %v7334_v62, 0 }
 0xca0   : > { %v2451_v38 = vsel %vm2450_vm7, 1, %v5902_v14 }
 0xca1   : > { %v2439_v29 = vpop.permute.xlu1 %2438  ;;  %v2455_v20 = vrot.slane %v2451_v38, %v6792_v33 }
 0xca2   : > { %vm2444_vm11 = vcmp.eq.s32.totalorder %v2439_v29, 1 }
 0xca3   : > { %vm7373_vm14 = vmor %vm2414_vm4, %vm2444_vm11  ;;  %4652 = vmatmul.mubr.msk.bf16.gmra.mrb[92].mxu1 %vm1137_vm8, %v2947_v55  ;;  %vm7400_vm9 = vcmp.eq.s32.totalorder %v2455_v20, 1 }
 0xca4   : > { %4678 = vmatpush3.bf16.xpose.msra.mxu1 %v3220_v17  ;;  %4679 = vmatprep.mubr.msk.bf16.mxu1 %vm5901_vm2, %v5900_v36  ;;  %vm7408_vm4 = vmor %vm7342_vm13, %vm7400_vm9 }
 0xca5   : > { %v2612_v24 = vpop.permute.xlu1 %2611  ;;  %4761 = vmatprep.subr.bf16.mxu1 %v5900_v36  ;;  %vm7420_vm11 = vmor %vm7359_vm0, %vm7400_vm9 }
 0xca6   : > { %4584 = vmatpush3.bf16.msra.mxu0 %v2612_v24  ;;  %vm7436_vm0 = vmor %vm7351_vm1, %vm7400_vm9  ;;  %vm8090_vm1 = vcmask 188544  }
 0xca7   : > { %4585 = vmatprep.subr.bf16.mxu0 %v5900_v36  ;;  %vm7448_vm13 = vmor %vm7368_vm3, %vm7400_vm9 }
 0xca8   : > { %vm7464_vm3 = vmor %vm7373_vm14, %vm7400_vm9  ;;  %vm8089_vm14 = vcmask 261120  }
 0xca9   : > { %v7382_v35 = vpop.permute.xlu1 %2841  ;;  %vm8092_vm7 = vmmov %vm8089_vm14 }
 0xcaa   : > { %4586 = vmatpush3.bf16.msra.mxu0 %v2614_v31  ;;  %vm8093_vm9 = vmmov %vm8092_vm7 }
 0xcab   : > { %4680 = vmatmul.mubr.msk.bf16.vlgmr.msra.gmra.mrb[96].mxu1 %vm1137_vm8, %v3193_v63  ;;  %4587 = vmatprep.subr.bf16.mxu0 %v5900_v36 }
 0xcac   : > { %4683 = vmatprep.mubr.msk.bf16.mxu1 %vm5901_vm2, %v5900_v36 }
 0xcad   : > { %v2616_v37 = vpop.permute.xlu1 %2615 }
 0xcae   : > { %v2629_v16 = vand.u32 %v2616_v37, %v6779_v27 }
 0xcb0   : > { %4588 = vmatpush3.bf16.msra.mxu0 %v2629_v16 }
 0xcb1   : > { %4619 = vmatprep.subr.bf16.mxu0 %v5900_v36 }
 0xcb3   : > { %4684 = vmatmul.mubr.msk.bf16.gmra.mrb[100].mxu1 %vm1137_vm8, %v7330_v47 }
 0xcb4   : > { %4687 = vmatprep.mubr.msk.bf16.mxu1 %vm5901_vm2, %v5900_v36 }
 0xcbb   : > { %4688 = vmatmul.mubr.msk.bf16.gmra.mrb[104].mxu1 %vm1137_vm8, %v3197_v28 }
 0xcbc   : > { %4717 = vmatprep.mubr.msk.bf16.mxu1 %vm5901_vm2, %v5900_v36 }
 0xd36   : > { %v2526_v45 = vpop.f32.mrb[60].mxu1 }
 0xd37   : > { %v7414_v58 = vsel %vm7408_vm4, %v2526_v45, -1e+30  ;;  %v4573_v14 = vpop.f32.mrb[61].mxu1 }
 0xd38   : > { %v2553_v23 = vsel %vm1217_vm6, %v7414_v58, -inf  ;;  %v2529_v18 = vpop.f32.mrb[62].mxu1 }
 0xd39   : > { %v7428_v21 = vsel %vm7420_vm11, %v2529_v18, -1e+30  ;;  %v4574_v50 = vpop.f32.mrb[63].mxu1  ;;  %2554 = vmax.xlane.f32.xlu0 %v2553_v23 }
 0xd3a   : > { %v2556_v9 = vsel %vm1217_vm6, %v7428_v21, -inf }
 0xd3b   : > { %2557 = vmax.xlane.f32.xlu1 %v2556_v9 }
 0xd3e   : > { %v2534_v3 = vpop.f32.mrb[64].mxu1 }
 0xd3f   : > { %v7442_v61 = vsel %vm7436_vm0, %v2534_v3, -1e+30  ;;  %v4577_v51 = vpop.f32.mrb[65].mxu1 }
 0xd40   : > { %v2559_v53 = vsel %vm1217_vm6, %v7442_v61, -inf  ;;  %v2537_v54 = vpop.f32.mrb[66].mxu1 }
 0xd41   : > { %v7456_v8 = vsel %vm7448_vm13, %v2537_v54, -1e+30  ;;  %v4578_v7 = vpop.f32.mrb[67].mxu1  ;;  %2560 = vmax.xlane.f32.xlu0 %v2559_v53 }
 0xd42   : > { %v2562_v43 = vsel %vm1217_vm6, %v7456_v8, -inf }
 0xd45   : > { %2563 = vmax.xlane.f32.xlu0 %v2562_v43 }
 0xd46   : > { %v2542_v55 = vpop.f32.mrb[68].mxu1 }
 0xd47   : > { %v7470_v6 = vsel %vm7464_vm3, %v2542_v55, -1e+30  ;;  %v4581_v62 = vpop.f32.mrb[69].mxu1 }
 0xd48   : > { %v2565_v11 = vsel %vm1230_vm12, %v7470_v6, -inf  ;;  %v2545_v25 = vpop.f32.mrb[70].mxu1 }
 0xd49   : > { %v4582_v63 = vpop.f32.mrb[71].mxu1  ;;  %2566 = vmax.xlane.f32.xlu0 %v2565_v11 }
 0xd4e   : > { %v2756_v12 = vpop.f32.mrb[72].mxu1 }
 0xd4f   : > { %v7476_v56 = vsel %vm7408_vm4, %v2756_v12, -1e+30  ;;  %v4609_v57 = vpop.f32.mrb[73].mxu1 }
 0xd50   : > { %v2783_v28 = vsel %vm1217_vm6, %v7476_v56, -inf  ;;  %v2759_v40 = vpop.f32.mrb[74].mxu1 }
 0xd51   : > { %v7482_v49 = vsel %vm7420_vm11, %v2759_v40, -1e+30  ;;  %v4610_v46 = vpop.f32.mrb[75].mxu1  ;;  %2784 = vmax.xlane.f32.xlu1 %v2783_v28 }
 0xd52   : > { %v2786_v32 = vsel %vm1217_vm6, %v7482_v49, -inf }
 0xd53   : > { %2787 = vmax.xlane.f32.xlu0 %v2786_v32 }
 0xd56   : > { %v2764_v15 = vpop.f32.mrb[76].mxu1 }
 0xd57   : > { %v7488_v19 = vsel %vm7436_vm0, %v2764_v15, -1e+30  ;;  %v4613_v26 = vpop.f32.mrb[77].mxu1 }
 0xd58   : > { %v2789_v52 = vsel %vm1217_vm6, %v7488_v19, -inf  ;;  %v2767_v2 = vpop.f32.mrb[78].mxu1 }
 0xd59   : > { %v7494_v13 = vsel %vm7448_vm13, %v2767_v2, -1e+30  ;;  %v4614_v10 = vpop.f32.mrb[79].mxu1  ;;  %2790 = vmax.xlane.f32.xlu1 %v2789_v52 }
 0xd5a   : > { %v2792_v5 = vsel %vm1217_vm6, %v7494_v13, -inf }
 0xd5b   : > { %2793 = vmax.xlane.f32.xlu0 %v2792_v5 }
 0xd5e   : > { %v2772_v29 = vpop.f32.mrb[80].mxu1 }
 0xd5f   : > { %v4617_v17 = vpop.f32.mrb[81].mxu1  ;;  %v7510_v25 = vsel %vm7464_vm3, %v2772_v29, -1e+30 }
 0xd60   : > { %v2775_v22 = vpop.f32.mrb[82].mxu1  ;;  %v2795_v46 = vsel %vm1230_vm12, %v7510_v25, -inf }
 0xd61   : > { %v4618_v24 = vpop.f32.mrb[83].mxu1 }
 0xd66   : > { %v3006_v31 = vpop.f32.mrb[84].mxu1 }
 0xd67   : > { %v4645_v37 = vpop.f32.mrb[85].mxu1  ;;  %v7506_v11 = vsel %vm7408_vm4, %v3006_v31, -1e+30 }
 0xd68   : > { %v3009_v16 = vpop.f32.mrb[86].mxu1  ;;  %v3033_v12 = vsel %vm1217_vm6, %v7506_v11, -inf }
 0xd69   : > { %v4646_v38 = vpop.f32.mrb[87].mxu1  ;;  %v7522_v15 = vsel %vm7420_vm11, %v3009_v16, -1e+30 }
 0xd6a   : > { %2845 = vrot.lane.b32.xlu1 %v7248_v4, %s8059_s23  ;;  %v3036_v2 = vsel %vm1217_vm6, %v7522_v15, -inf }
 0xd6e   : > { %v3014_v20 = vpop.f32.mrb[88].mxu1  ;;  %3091 = vrot.lane.b32.xlu1 %v7240_v30, %s8082_s1 }
 0xd6f   : > { %v4649_v34 = vpop.f32.mrb[89].mxu1  ;;  %v7516_v28 = vsel %vm7436_vm0, %v3014_v20, -1e+30 }
 0xd70   : > { %v3017_v45 = vpop.f32.mrb[90].mxu1  ;;  %v3039_v26 = vsel %vm1217_vm6, %v7516_v28, -inf }
 0xd71   : > { %v4650_v14 = vpop.f32.mrb[91].mxu1  ;;  %2843 = vrot.lane.b32.xlu0 %v7244_v0, %s8059_s23  ;;  %v7534_v10 = vsel %vm7448_vm13, %v3017_v45, -1e+30 }
 0xd72   : > { %v3042_v17 = vsel %vm1217_vm6, %v7534_v10, -inf }
 0xd76   : > { %v3022_v23 = vpop.f32.mrb[92].mxu1 }
 0xd77   : > { %v4653_v18 = vpop.f32.mrb[93].mxu1  ;;  %v7528_v52 = vsel %vm7464_vm3, %v3022_v23, -1e+30 }
 0xd78   : > { %v3025_v50 = vpop.f32.mrb[94].mxu1  ;;  %v3045_v5 = vsel %vm1230_vm12, %v7528_v52, -inf }
 0xd79   : > { %v4654_v9 = vpop.f32.mrb[95].mxu1 }
 0xd7e   : > { %v3256_v3 = vpop.f32.mrb[96].mxu1 }
 0xd7f   : > { %v4681_v51 = vpop.f32.mrb[97].mxu1  ;;  %v7546_v22 = vsel %vm7408_vm4, %v3256_v3, -1e+30  ;;  %vm8094_vm4 = vmmov %vm8092_vm7 }
 0xd80   : > { %v3259_v53 = vpop.f32.mrb[98].mxu1  ;;  %v3283_v33 = vsel %vm1217_vm6, %v7546_v22, -inf }
 0xd81   : > { %v4682_v54 = vpop.f32.mrb[99].mxu1  ;;  %v7540_v29 = vsel %vm7420_vm11, %v3259_v53, -1e+30  ;;  %vm8095_vm11 = vmmov %vm8094_vm4 }
 0xd82   : > { %v3286_v24 = vsel %vm1217_vm6, %v7540_v29, -inf }
 0xd86   : > { %v3264_v7 = vpop.f32.mrb[100].mxu1 }
 0xd87   : > { %v4685_v43 = vpop.f32.mrb[101].mxu1  ;;  %v7558_v37 = vsel %vm7436_vm0, %v3264_v7, -1e+30  ;;  %vm8096_vm0 = vmmov %vm8094_vm4 }
 0xd88   : > { %v3267_v55 = vpop.f32.mrb[102].mxu1  ;;  %v3289_v16 = vsel %vm1217_vm6, %v7558_v37, -inf }
 0xd89   : > { %v4686_v62 = vpop.f32.mrb[103].mxu1  ;;  %v7552_v31 = vsel %vm7448_vm13, %v3267_v55, -1e+30  ;;  %vm8097_vm13 = vmmov %vm8096_vm0 }
 0xd8a   : > { %v3292_v44 = vsel %vm1217_vm6, %v7552_v31, -inf }
 0xd8e   : > { %v3272_v63 = vpop.f32.mrb[104].mxu1 }
 0xd8f   : > { %v4689_v57 = vpop.f32.mrb[105].mxu1  ;;  %v7566_v1 = vsel %vm7464_vm3, %v3272_v63, -1e+30  ;;  %vm8098_vm3 = vcmask 253952  }
 0xd90   : > { %v3275_v40 = vpop.f32.mrb[106].mxu1  ;;  %3034 = vmax.xlane.f32.xlu0 %v3033_v12  ;;  %v3295_v38 = vsel %vm1230_vm12, %v7566_v1, -inf }
 0xd91   : > { %v4690_v32 = vpop.f32.mrb[107].mxu1 }
 0xd92   : > { %2796 = vmax.xlane.f32.xlu1 %v2795_v46 }
 0xd94   : > { %3040 = vmax.xlane.f32.xlu0 %v3039_v26 }
 0xd96   : > { %3037 = vmax.xlane.f32.xlu1 %v3036_v2 }
 0xd98   : > { %3046 = vmax.xlane.f32.xlu0 %v3045_v5 }
 0xd9a   : > { %3043 = vmax.xlane.f32.xlu1 %v3042_v17 }
 0xd9c   : > { %3287 = vmax.xlane.f32.xlu0 %v3286_v24 }
 0xd9e   : > { %3284 = vmax.xlane.f32.xlu1 %v3283_v33 }
 0xda0   : > { %3293 = vmax.xlane.f32.xlu0 %v3292_v44 }
 0xda2   : > { %3290 = vmax.xlane.f32.xlu1 %v3289_v16 }
 0xda6   : > { %3296 = vmax.xlane.f32.xlu1 %v3295_v38 }
 0xdc6   : > { %v2555_v60 = vpop.xlane.xlu0 %2554 }
 0xdc7   : > { %v2568_v20 = vsub.f32 %v7414_v58, %v2555_v60 }
 0xdc8   : > { %v2558_v34 = vpop.xlane.xlu1 %2557 }
 0xdc9   : > { %v2573_v45 = vmul.f32 1.442695, %v2568_v20  ;;  %v2569_v14 = vsub.f32 %v7428_v21, %v2558_v34 }
 0xdcb   : > { %5134 = vpow2.f32 %v2573_v45  ;;  %v2575_v23 = vmul.f32 1.442695, %v2569_v14 }
 0xdcd   : > { %5136 = vpow2.f32 %v2575_v23 }
 0xdce   : > { %v2561_v18 = vpop.xlane.xlu0 %2560 }
 0xdcf   : > { %v2570_v47 = vsub.f32 %v7442_v61, %v2561_v18 }
 0xdd1   : > { %v2577_v50 = vmul.f32 1.442695, %v2570_v47 }
 0xdd2   : > { %v2564_v9 = vpop.xlane.xlu0 %2563 }
 0xdd3   : > { %5138 = vpow2.f32 %v2577_v50  ;;  %v2571_v3 = vsub.f32 %v7456_v8, %v2564_v9 }
 0xdd5   : > { %v7574_v51 = vpop.eup %5134  ;;  %v2579_v53 = vmul.f32 1.442695, %v2571_v3 }
 0xdd6   : > { %v2567_v54 = vpop.xlane.xlu0 %2566  ;;  %v2583_v58 = vsel %vm1217_vm6, %v7574_v51, 0.0 }
 0xdd7   : > { %v7578_v7 = vpop.eup %5136  ;;  %5140 = vpow2.f32 %v2579_v53  ;;  %v2572_v21 = vsub.f32 %v7470_v6, %v2567_v54  ;;  %2584 = vadd.xlane.f32.xlu1 %v2583_v58 }
 0xdd8   : > { %v2586_v61 = vsel %vm1217_vm6, %v7578_v7, 0.0 }
 0xdd9   : > { %v2581_v43 = vmul.f32 1.442695, %v2572_v21  ;;  %2587 = vadd.xlane.f32.xlu0 %v2586_v61 }
 0xddb   : > { %5142 = vpow2.f32 %v2581_v43 }
 0xddd   : > { %v7583_v8 = vpop.eup %5138 }
 0xdde   : > { %v2785_v55 = vpop.xlane.xlu1 %2784  ;;  %v2589_v62 = vsel %vm1217_vm6, %v7583_v8, 0.0 }
 0xddf   : > { %v2798_v63 = vsub.f32 %v7476_v56, %v2785_v55  ;;  %2590 = vadd.xlane.f32.xlu0 %v2589_v62 }
 0xde0   : > { %v2788_v12 = vpop.xlane.xlu0 %2787 }
 0xde1   : > { %v7588_v57 = vpop.eup %5140  ;;  %v2803_v6 = vmul.f32 1.442695, %v2798_v63  ;;  %v2799_v40 = vsub.f32 %v7482_v49, %v2788_v12 }
 0xde2   : > { %v2592_v46 = vsel %vm1217_vm6, %v7588_v57, 0.0 }
 0xde3   : > { %5144 = vpow2.f32 %v2803_v6  ;;  %v2805_v32 = vmul.f32 1.442695, %v2799_v40  ;;  %2593 = vadd.xlane.f32.xlu1 %v2592_v46 }
 0xde5   : > { %v7593_v26 = vpop.eup %5142  ;;  %5146 = vpow2.f32 %v2805_v32 }
 0xde6   : > { %v2791_v2 = vpop.xlane.xlu1 %2790  ;;  %v2595_v56 = vsel %vm1230_vm12, %v7593_v26, 0.0 }
 0xde7   : > { %v2800_v5 = vsub.f32 %v7488_v19, %v2791_v2  ;;  %2596 = vadd.xlane.f32.xlu0 %v2595_v56 }
 0xde8   : > { %v2794_v38 = vpop.xlane.xlu0 %2793 }
 0xde9   : > { %v2807_v17 = vmul.f32 1.442695, %v2800_v5  ;;  %v2801_v60 = vsub.f32 %v7494_v13, %v2794_v38 }
 0xdea   : > { %v7615_v34 = vpop.permute.xlu1 %2845 }
 0xdeb   : > { %5148 = vpow2.f32 %v2807_v17  ;;  %v2809_v20 = vmul.f32 1.442695, %v2801_v60 }
 0xdec   : > { %v7617_v45 = vpop.permute.xlu0 %2843 }
 0xded   : > { %v7598_v24 = vpop.eup %5144  ;;  %5150 = vpow2.f32 %v2809_v20 }
 0xdee   : > { %v2813_v49 = vsel %vm1217_vm6, %v7598_v24, 0.0  ;;  %v7619_v14 = vpop.permute.xlu1 %3091 }
 0xdef   : > { %v7602_v33 = vpop.eup %5146  ;;  %2814 = vadd.xlane.f32.xlu1 %v2813_v49 }
 0xdf0   : > { %v2816_v44 = vsel %vm1217_vm6, %v7602_v33, 0.0 }
 0xdf1   : > { %2817 = vadd.xlane.f32.xlu0 %v2816_v44 }
 0xdf5   : > { %v7606_v16 = vpop.eup %5148 }
 0xdf6   : > { %v2819_v19 = vsel %vm1217_vm6, %v7606_v16, 0.0 }
 0xdf7   : > { %2820 = vadd.xlane.f32.xlu0 %v2819_v19  ;;  %v7622_v50 = vpop.eup %5150 }
 0xdf8   : > { %v2822_v21 = vsel %vm1217_vm6, %v7622_v50, 0.0 }
 0xe00   : > { %3095 = vrot.lane.b32.xlu1 %v7248_v4, %s8082_s1 }
 0xe0d   : > { %3093 = vrot.lane.b32.xlu0 %v7244_v0, %s8082_s1  ;;  %s5773_s1 = scalar_lea.vmem %s7870_s6, 640 }
 0xe0e   : > { %p5774_p6 = scmp.ne.s32.totalorder %s7870_s6, %s5773_s1 }
 0xe10   : > { %p5775_p5 = pnand %p5774_p6, %p8115_p7 }
 0xe12   : > { %p5776_p9 = pneg %p5775_p5 }
 0xe1d   : > { %v3035_v23 = vpop.xlane.xlu0 %3034 }
 0xe1e   : > { %v3048_v18 = vsub.f32 %v7506_v11, %v3035_v23 }
 0xe1f   : > { %v2797_v47 = vpop.xlane.xlu1 %2796 }
 0xe20   : > { %v3053_v9 = vmul.f32 1.442695, %v3048_v18  ;;  %v2802_v3 = vsub.f32 %v7510_v25, %v2797_v47 }
 0xe21   : > { %v3041_v53 = vpop.xlane.xlu0 %3040 }
 0xe22   : > { %5152 = vpow2.f32 %v3053_v9  ;;  %v2811_v13 = vmul.f32 1.442695, %v2802_v3  ;;  %v3050_v54 = vsub.f32 %v7516_v28, %v3041_v53 }
 0xe23   : > { %v3038_v58 = vpop.xlane.xlu1 %3037 }
 0xe24   : > { %5154 = vpow2.f32 %v2811_v13  ;;  %v3049_v61 = vsub.f32 %v7522_v15, %v3038_v58  ;;  %2823 = vadd.xlane.f32.xlu1 %v2822_v21  ;;  %v3057_v43 = vmul.f32 1.442695, %v3050_v54 }
 0xe25   : > { %v3047_v11 = vpop.xlane.xlu0 %3046 }
 0xe26   : > { %v3055_v55 = vmul.f32 1.442695, %v3049_v61  ;;  %v3052_v62 = vsub.f32 %v7528_v52, %v3047_v11 }
 0xe27   : > { %v3044_v63 = vpop.xlane.xlu1 %3043 }
 0xe28   : > { %5156 = vpow2.f32 %v3055_v55  ;;  %v3051_v25 = vsub.f32 %v7534_v10, %v3044_v63  ;;  %v3061_v28 = vmul.f32 1.442695, %v3052_v62 }
 0xe29   : > { %v3288_v12 = vpop.xlane.xlu0 %3287  ;;  %5158 = vpow2.f32 %v3057_v43 }
 0xe2a   : > { %v3059_v6 = vmul.f32 1.442695, %v3051_v25  ;;  %v3299_v40 = vsub.f32 %v7540_v29, %v3288_v12 }
 0xe2b   : > { %v3285_v46 = vpop.xlane.xlu1 %3284 }
 0xe2c   : > { %v7632_v32 = vpop.eup %5152  ;;  %5160 = vpow2.f32 %v3059_v6  ;;  %v3298_v15 = vsub.f32 %v7546_v22, %v3285_v46  ;;  %v3305_v56 = vmul.f32 1.442695, %v3299_v40 }
 0xe2d   : > { %v3063_v2 = vsel %vm1217_vm6, %v7632_v32, 0.0  ;;  %5162 = vpow2.f32 %v3061_v28  ;;  %v3294_v54 = vpop.xlane.xlu0 %3293 }
 0xe2e   : > { %v7637_v52 = vpop.eup %5154  ;;  %v3303_v10 = vmul.f32 1.442695, %v3298_v15  ;;  %3064 = vadd.xlane.f32.xlu1 %v3063_v2  ;;  %v3301_v58 = vsub.f32 %v7552_v31, %v3294_v54 }
 0xe2f   : > { %v3291_v5 = vpop.xlane.xlu1 %3290  ;;  %v2825_v17 = vsel %vm1230_vm12, %v7637_v52, 0.0 }
 0xe30   : > { %5164 = vpow2.f32 %v3303_v10  ;;  %v3300_v29 = vsub.f32 %v7558_v37, %v3291_v5  ;;  %2826 = vadd.xlane.f32.xlu0 %v2825_v17  ;;  %v3309_v11 = vmul.f32 1.442695, %v3301_v58  ;;  %v2859_v5 = vand.u32 %v7615_v34, %v6779_v27 }
 0xe31   : > { %5166 = vpow2.f32 %v3305_v56 }
 0xe32   : > { %v7642_v49 = vpop.eup %5156  ;;  %v3307_v22 = vmul.f32 1.442695, %v3300_v29 }
 0xe33   : > { %v3066_v44 = vsel %vm1217_vm6, %v7642_v49, 0.0  ;;  %v7646_v19 = vpop.eup %5158  ;;  %v3297_v21 = vpop.xlane.xlu1 %3296 }
 0xe34   : > { %3067 = vadd.xlane.f32.xlu0 %v3066_v44  ;;  %5168 = vpow2.f32 %v3307_v22  ;;  %v3069_v37 = vsel %vm1217_vm6, %v7646_v19, 0.0  ;;  %v3302_v61 = vsub.f32 %v7566_v1, %v3297_v21 }
 0xe35   : > { %5170 = vpow2.f32 %v3309_v11 }
 0xe36   : > { %v7648_v38 = vpop.eup %5160  ;;  %v3311_v43 = vmul.f32 1.442695, %v3302_v61 }
 0xe37   : > { %v3072_v60 = vsel %vm1217_vm6, %v7648_v38, 0.0  ;;  %v7654_v20 = vpop.eup %5162 }
 0xe38   : > { %3073 = vadd.xlane.f32.xlu1 %v3072_v60  ;;  %3070 = vadd.xlane.f32.xlu0 %v3069_v37  ;;  %v3075_v47 = vsel %vm1230_vm12, %v7654_v20, 0.0 }
 0xe3a   : > { %v7656_v23 = vpop.eup %5164 }
 0xe3b   : > { %v3313_v18 = vsel %vm1217_vm6, %v7656_v23, 0.0  ;;  %v7662_v9 = vpop.eup %5166 }
 0xe3c   : > { %3314 = vadd.xlane.f32.xlu1 %v3313_v18  ;;  %3076 = vadd.xlane.f32.xlu0 %v3075_v47  ;;  %v3316_v3 = vsel %vm1217_vm6, %v7662_v9, 0.0 }
 0xe3e   : > { %v7666_v53 = vpop.eup %5168 }
 0xe3f   : > { %v3319_v13 = vsel %vm1217_vm6, %v7666_v53, 0.0  ;;  %v7676_v25 = vpop.eup %5170 }
 0xe40   : > { %3317 = vadd.xlane.f32.xlu0 %v3316_v3  ;;  %v3322_v31 = vsel %vm1217_vm6, %v7676_v25, 0.0 }
 0xe44   : > { %3320 = vadd.xlane.f32.xlu0 %v3319_v13 }
 0xe4d   : > { %3343 = vrot.lane.b32.xlu1 %v7244_v0, %s8083_s14 }
 0xe5a   : > { %3341 = vrot.lane.b32.xlu0 %v7240_v30, %s8083_s14 }
 0xe64   : > { %v2585_v55 = vpop.xlane.xlu1 %2584 }
 0xe65   : > { %5172 = vrcp.f32 %v2585_v55 }
 0xe66   : > { %5174 = vpow2.f32 %v3311_v43  ;;  %v2588_v62 = vpop.xlane.xlu0 %2587 }
 0xe67   : > { %5176 = vrcp.f32 %v2588_v62 }
 0xe6c   : > { %v2591_v63 = vpop.xlane.xlu0 %2590 }
 0xe6d   : > { %5178 = vrcp.f32 %v2591_v63 }
 0xe6f   : > { %v5173_v0 = vpop.eup %5172 }
 0xe70   : > { %v7678_v12 = vpop.eup %5174  ;;  %v2594_v30 = vpop.xlane.xlu1 %2593  ;;  %v2603_v28 = vmul.f32 %v5173_v0, %v7574_v51 }
 0xe71   : > { %v5177_v1 = vpop.eup %5176  ;;  %5180 = vrcp.f32 %v2594_v30  ;;  %3323 = vadd.xlane.f32.xlu1 %v3322_v31  ;;  %v3325_v15 = vsel %vm1230_vm12, %v7678_v12, 0.0 }
 0xe72   : > { %v2604_v6 = vmul.f32 %v5177_v1, %v7578_v7 }
 0xe74   : > { %v2608_v40 = vpack.c.bf16 %v2604_v6, %v2603_v28  ;;  %v2597_v46 = vpop.xlane.xlu0 %2596 }
 0xe75   : > { %5182 = vrcp.f32 %v2597_v46  ;;  %3326 = vadd.xlane.f32.xlu1 %v3325_v15 }
 0xe76   : > { %4590 = vmatmul.mubr.msk.bf16.vlgmr.msra.gmra.mrb[72].mxu0 %vm1217_vm6, %v2608_v40 }
 0xe77   : > { %4620 = vmatpush3.bf16.msra.mxu0 %v7382_v35  ;;  %4593 = vmatprep.mubr.msk.bf16.mxu0 %vm5901_vm2, %v5900_v36  ;;  %v5179_v2 = vpop.eup %5178 }
 0xe78   : > { %4621 = vmatprep.subr.bf16.mxu0 %v5900_v36  ;;  %v2605_v56 = vmul.f32 %v5179_v2, %v7583_v8 }
 0xe7b   : > { %v5181_v51 = vpop.eup %5180  ;;  %4622 = vmatpush3.bf16.msra.mxu0 %v7617_v45 }
 0xe7c   : > { %v2815_v7 = vpop.xlane.xlu1 %2814  ;;  %4623 = vmatprep.subr.bf16.mxu0 %v5900_v36  ;;  %v2606_v10 = vmul.f32 %v5181_v51, %v7588_v57 }
 0xe7d   : > { %5184 = vrcp.f32 %v2815_v7 }
 0xe7e   : > { %v2818_v35 = vpop.xlane.xlu0 %2817  ;;  %v2609_v17 = vpack.c.bf16 %v2606_v10, %v2605_v56 }
 0xe7f   : > { %v5183_v29 = vpop.eup %5182  ;;  %4624 = vmatpush3.bf16.msra.mxu0 %v2859_v5  ;;  %5186 = vrcp.f32 %v2818_v35 }
 0xe80   : > { %4594 = vmatmul.mubr.msk.bf16.gmra.mrb[76].mxu0 %vm1217_vm6, %v2609_v17  ;;  %4655 = vmatprep.subr.bf16.mxu0 %v5900_v36  ;;  %v2607_v8 = vmul.f32 %v5183_v29, %v7593_v26 }
 0xe81   : > { %4597 = vmatprep.mubr.msk.bf16.mxu0 %vm5901_vm2, %v5900_v36 }
 0xe82   : > { %v2610_v57 = vpack.c.bf16 %v2607_v8, %v2607_v8 }
 0xe84   : > { %v2821_v37 = vpop.xlane.xlu0 %2820 }
 0xe85   : > { %5188 = vrcp.f32 %v2821_v37 }
 0xe86   : > { %3345 = vrot.lane.b32.xlu1 %v7248_v4, %s8083_s14  ;;  %v3096_v4 = vpop.permute.xlu1 %3095  ;;  %s5917_s14 = smov [#allocation33]  }
 0xe87   : > { %v5185_v34 = vpop.eup %5184  ;;  %s5777_s25 = sshll.u32 %s5917_s14, 4  ;;  %s5778_s25 = int_to_ptr.vmem [resolvable:$false] %s5777_s25 }
 0xe88   : > { %4598 = vmatmul.mubr.msk.bf16.gmra.mrb[80].mxu0 %vm1217_vm6, %v2610_v57  ;;  %v2833_v44 = vmul.f32 %v5185_v34, %v7598_v24  ;;  %v3094_v26 = vpop.permute.xlu0 %3093  ;;  %p5780_p12 = scmp.lt.s32.totalorder %s7870_s6, %s5778_s25 }
 0xe89   : > { %v5187_v45 = vpop.eup %5186  ;;  %4625 = vmatprep.mubr.msk.bf16.mxu0 %vm5901_vm2, %v5900_v36 }
 0xe8a   : > { %v2834_v22 = vmul.f32 %v5187_v45, %v7602_v33  ;;  %v3109_v33 = vand.u32 %v3096_v4, %v6779_v27 }
 0xe8c   : > { %v2838_v60 = vpack.c.bf16 %v2834_v22, %v2833_v44 }
 0xe8f   : > { %v5189_v18 = vpop.eup %5188 }
 0xe90   : > { %4626 = vmatmul.mubr.msk.bf16.vlgmr.msra.gmra.mrb[84].mxu0 %vm1217_vm6, %v2838_v60  ;;  %v2835_v3 = vmul.f32 %v5189_v18, %v7606_v16 }
 0xe91   : > { %4656 = vmatpush3.bf16.msra.mxu0 %v7619_v14  ;;  %4629 = vmatprep.mubr.msk.bf16.mxu0 %vm5901_vm2, %v5900_v36 }
 0xe92   : > { %4657 = vmatprep.subr.bf16.mxu0 %v5900_v36 }
 0xe95   : > { %4658 = vmatpush3.bf16.msra.mxu0 %v3094_v26 }
 0xe96   : > { %4659 = vmatprep.subr.bf16.mxu0 %v5900_v36 }
 0xe99   : > { %4660 = vmatpush3.bf16.msra.mxu0 %v3109_v33 }
 0xe9a   : > { %4691 = vmatprep.subr.bf16.mxu0 %v5900_v36 }
 0xeb1   : > { %v2824_v24 = vpop.xlane.xlu1 %2823 }
 0xeb2   : > { %5190 = vrcp.f32 %v2824_v24 }
 0xebb   : > { %v3065_v58 = vpop.xlane.xlu1 %3064 }
 0xebc   : > { %v5191_v14 = vpop.eup %5190 }
 0xebd   : > { %v2827_v47 = vpop.xlane.xlu0 %2826  ;;  %v2836_v13 = vmul.f32 %v5191_v14, %v7622_v50 }
 0xebe   : > { %5192 = vrcp.f32 %v2827_v47 }
 0xebf   : > { %v2839_v54 = vpack.c.bf16 %v2836_v13, %v2835_v3 }
 0xec1   : > { %4630 = vmatmul.mubr.msk.bf16.gmra.mrb[88].mxu0 %vm1217_vm6, %v2839_v54  ;;  %v3068_v21 = vpop.xlane.xlu0 %3067 }
 0xec2   : > { %5194 = vrcp.f32 %v3068_v21  ;;  %4633 = vmatprep.mubr.msk.bf16.mxu0 %vm5901_vm2, %v5900_v36 }
 0xec3   : > { %5196 = vrcp.f32 %v3065_v58 }
 0xec5   : > { %v3071_v61 = vpop.xlane.xlu0 %3070  ;;  %v3074_v11 = vpop.xlane.xlu1 %3073 }
 0xec6   : > { %5198 = vrcp.f32 %v3074_v11 }
 0xec7   : > { %5200 = vrcp.f32 %v3071_v61 }
 0xec8   : > { %v5193_v43 = vpop.eup %5192 }
 0xec9   : > { %v3077_v55 = vpop.xlane.xlu0 %3076  ;;  %v2837_v16 = vmul.f32 %v5193_v43, %v7637_v52  ;;  %v3315_v40 = vpop.xlane.xlu1 %3314 }
 0xeca   : > { %5202 = vrcp.f32 %v3077_v55  ;;  %v5026_v55 = vld [vmem:[#allocation23] sm:$0xff]  }
 0xecb   : > { %v2840_v50 = vpack.c.bf16 %v2837_v16, %v2837_v16  ;;  %4763 = vmatpush3.bf16.msra.mxu1 %v5026_v55 }
 0xecc   : > { %v5195_v62 = vpop.eup %5194  ;;  %4762 = vmatprep.subr.bf16.mxu1 %v5900_v36 }
 0xecd   : > { %4634 = vmatmul.mubr.msk.bf16.gmra.mrb[92].mxu0 %vm1217_vm6, %v2840_v50  ;;  %v3318_v63 = vpop.xlane.xlu0 %3317  ;;  %v5197_v0 = vpop.eup %5196  ;;  %v3084_v30 = vmul.f32 %v5195_v62, %v7642_v49 }
 0xece   : > { %4661 = vmatprep.mubr.msk.bf16.mxu0 %vm5901_vm2, %v5900_v36  ;;  %v3083_v31 = vmul.f32 %v5197_v0, %v7632_v32  ;;  %v3344_v32 = vpop.permute.xlu1 %3343  ;;  %5204 = vrcp.f32 %v3318_v63 }
 0xecf   : > { %5206 = vrcp.f32 %v3315_v40 }
 0xed0   : > { %v5199_v28 = vpop.eup %5198  ;;  %v3088_v6 = vpack.c.bf16 %v3084_v30, %v3083_v31 }
 0xed1   : > { %v3321_v1 = vpop.xlane.xlu0 %3320  ;;  %v5201_v52 = vpop.eup %5200  ;;  %v3086_v49 = vmul.f32 %v5199_v28, %v7648_v38 }
 0xed2   : > { %v3085_v15 = vmul.f32 %v5201_v52, %v7646_v19 }
 0xed4   : > { %v3089_v2 = vpack.c.bf16 %v3086_v49, %v3085_v15  ;;  %v5203_v51 = vpop.eup %5202 }
 0xed5   : > { %4662 = vmatmul.mubr.msk.bf16.vlgmr.msra.gmra.mrb[96].mxu0 %vm1217_vm6, %v3088_v6  ;;  %v3342_v46 = vpop.permute.xlu0 %3341  ;;  %v3087_v7 = vmul.f32 %v5203_v51, %v7654_v20 }
 0xed6   : > { %4692 = vmatpush3.bf16.msra.mxu0 %v3342_v46  ;;  %4665 = vmatprep.mubr.msk.bf16.mxu0 %vm5901_vm2, %v5900_v36 }
 0xed7   : > { %4693 = vmatprep.subr.bf16.mxu0 %v5900_v36  ;;  %v3090_v56 = vpack.c.bf16 %v3087_v7, %v3087_v7  ;;  %v5027_v7 = vld [vmem:[#allocation23 + $0x8] sm:$0xff]  }
 0xed8   : > { %v5205_v10 = vpop.eup %5204  ;;  %4764 = vmatpush3.bf16.msra.mxu1 %v5027_v7 }
 0xed9   : > { %v5207_v5 = vpop.eup %5206  ;;  %v3334_v35 = vmul.f32 %v5205_v10, %v7662_v9  ;;  %4741 = vmatprep.subr.bf16.mxu1 %v5900_v36 }
 0xeda   : > { %4694 = vmatpush3.bf16.msra.mxu0 %v3344_v32  ;;  %v3333_v20 = vmul.f32 %v5207_v5, %v7656_v23 }
 0xedb   : > { %4695 = vmatprep.subr.bf16.mxu0 %v5900_v36 }
 0xedc   : > { %v3338_v8 = vpack.c.bf16 %v3334_v35, %v3333_v20 }
 0xedd   : > { %4666 = vmatmul.mubr.msk.bf16.gmra.mrb[100].mxu0 %vm1217_vm6, %v3089_v2 }
 0xede   : > { %4669 = vmatprep.mubr.msk.bf16.mxu0 %vm5901_vm2, %v5900_v36 }
 0xee5   : > { %4670 = vmatmul.mubr.msk.bf16.gmra.mrb[104].mxu0 %vm1217_vm6, %v3090_v56 }
 0xee6   : > { %4697 = vmatprep.mubr.msk.bf16.mxu0 %vm5901_vm2, %v5900_v36 }
 0xefe   : > { %v3324_v19 = vpop.xlane.xlu1 %3323 }
 0xeff   : > { %5208 = vrcp.f32 %v3324_v19 }
 0xf00   : > { %5210 = vrcp.f32 %v3321_v1 }
 0xf02   : > { %v3327_v38 = vpop.xlane.xlu1 %3326 }
 0xf03   : > { %5212 = vrcp.f32 %v3327_v38 }
 0xf06   : > { %v3346_v17 = vpop.permute.xlu1 %3345 }
 0xf07   : > { %v3359_v29 = vand.u32 %v3346_v17, %v6779_v27 }
 0xf09   : > { %4696 = vmatpush3.bf16.msra.mxu0 %v3359_v29  ;;  %v5209_v57 = vpop.eup %5208 }
 0xf0a   : > { %4709 = vmatprep.subr.bf16.mxu0 %v5900_v36  ;;  %v5211_v34 = vpop.eup %5210  ;;  %v3336_v45 = vmul.f32 %v5209_v57, %v7676_v25 }
 0xf0b   : > { %v3335_v9 = vmul.f32 %v5211_v34, %v7666_v53 }
 0xf0c   : > { %4698 = vmatmul.mubr.msk.bf16.vlgmr.msra.gmra.mrb[108].mxu0 %vm1217_vm6, %v3338_v8 }
 0xf0d   : > { %4701 = vmatprep.mubr.msk.bf16.mxu0 %vm5901_vm2, %v5900_v36  ;;  %v3339_v22 = vpack.c.bf16 %v3336_v45, %v3335_v9  ;;  %v5213_v27 = vpop.eup %5212  ;;  %4710 = vmatpush3.bf16.msra.mxu0 %v5026_v55 }
 0xf0e   : > { %v3337_v23 = vmul.f32 %v5213_v27, %v7678_v12  ;;  %4711 = vmatprep.subr.bf16.mxu0 %v5900_v36 }
 0xf10   : > { %v3340_v44 = vpack.c.bf16 %v3337_v23, %v3337_v23 }
 0xf11   : > { %4712 = vmatpush3.bf16.msra.mxu0 %v5027_v7 }
 0xf12   : > { %4725 = vmatprep.subr.bf16.mxu0 %v5900_v36 }
 0xf14   : > { %4702 = vmatmul.mubr.msk.bf16.gmra.mrb[112].mxu0 %vm1217_vm6, %v3339_v22 }
 0xf15   : > { %4705 = vmatprep.mubr.msk.bf16.mxu0 %vm5901_vm2, %v5900_v36 }
 0xf1c   : > { %4706 = vmatmul.mubr.msk.bf16.gmra.mrb[116].mxu0 %vm1217_vm6, %v3340_v44 }
 0xf1d   : > { %4713 = vmatprep.mubr.msk.bf16.mxu0 %vm5901_vm2, %v5900_v36 }
 0xf49   : > { %v2665_v60 = vpop.f32.mrb[72].mxu0 }
 0xf4a   : > { %2687 = vst.msk [vmem:[#allocation2] sm:$0xff] %vm1137_vm8, %v2665_v60  ;;  %v4591_v25 = vpop.f32.mrb[73].mxu0 }
 0xf4b   : > { %v2668_v53 = vpop.f32.mrb[74].mxu0 }
 0xf4c   : > { %2688 = vst.msk [vmem:[#allocation2 + $0x8] sm:$0xff] %vm1137_vm8, %v2668_v53  ;;  %v4592_v37 = vpop.f32.mrb[75].mxu0 }
 0xf53   : > { %v2673_v4 = vpop.f32.mrb[76].mxu0 }
 0xf54   : > { %2689 = vst.msk [vmem:[#allocation2 + $0x10] sm:$0xff] %vm1137_vm8, %v2673_v4  ;;  %v4595_v26 = vpop.f32.mrb[77].mxu0 }
 0xf55   : > { %v2676_v33 = vpop.f32.mrb[78].mxu0 }
 0xf56   : > { %2690 = vst.msk [vmem:[#allocation2 + $0x18] sm:$0xff] %vm1137_vm8, %v2676_v33  ;;  %v4596_v12 = vpop.f32.mrb[79].mxu0  ;;  %vm8084_vm8 = vcmask 261312  }
 0xf57   : > { %vm8085_vm6 = vmmov %vm8084_vm8 }
 0xf58   : > { %vm8086_vm12 = vmmov %vm8085_vm6 }
 0xf5b   : > { %v2681_v24 = vpop.f32.mrb[80].mxu0 }
 0xf5c   : > { %2691 = vst.msk [vmem:[#allocation2 + $0x20] sm:$0x1] %vm1360_vm15, %v2681_v24  ;;  %v4599_v18 = vpop.f32.mrb[81].mxu0  ;;  %vm8087_vm15 = vmmov %vm8085_vm6 }
 0xf5d   : > { %v2684_v14 = vpop.f32.mrb[82].mxu0 }
 0xf5e   : > { %v4600_v47 = vpop.f32.mrb[83].mxu0 }
 0xf63   : > { %v2895_v3 = vpop.f32.mrb[84].mxu0 }
 0xf64   : > { %2922 = vrot.lane.b32.xlu0 %v2895_v3, %s7978_s26  ;;  %v4627_v13 = vpop.f32.mrb[85].mxu0 }
 0xf65   : > { %v2898_v54 = vpop.f32.mrb[86].mxu0 }
 0xf66   : > { %2924 = vrot.lane.b32.xlu1 %v2898_v54, %s7978_s26  ;;  %v4628_v58 = vpop.f32.mrb[87].mxu0 }
 0xf94   : > { %v2903_v21 = vpop.f32.mrb[88].mxu0 }
 0xf95   : > { %2926 = vrot.lane.b32.xlu0 %v2903_v21, %s7978_s26  ;;  %v4631_v61 = vpop.f32.mrb[89].mxu0 }
 0xf96   : > { %v2906_v11 = vpop.f32.mrb[90].mxu0 }
 0xf97   : > { %2928 = vrot.lane.b32.xlu1 %v2906_v11, %s7978_s26  ;;  %v4632_v43 = vpop.f32.mrb[91].mxu0 }
 0xfa0   : > { %v2911_v16 = vpop.f32.mrb[92].mxu0 }
 0xfa1   : > { %v4635_v50 = vpop.f32.mrb[93].mxu0 }
 0xfa2   : > { %v2914_v62 = vpop.f32.mrb[94].mxu0 }
 0xfa3   : > { %v4636_v63 = vpop.f32.mrb[95].mxu0 }
 0xfa8   : > { %v3145_v0 = vpop.f32.mrb[96].mxu0 }
 0xfa9   : > { %3172 = vrot.lane.b32.xlu0 %v3145_v0, %s5915_s24  ;;  %v4663_v30 = vpop.f32.mrb[97].mxu0 }
 0xfaa   : > { %v3148_v31 = vpop.f32.mrb[98].mxu0 }
 0xfab   : > { %3174 = vrot.lane.b32.xlu1 %v3148_v31, %s5915_s24  ;;  %v4664_v1 = vpop.f32.mrb[99].mxu0 }
 0xfb0   : > { %v3153_v28 = vpop.f32.mrb[100].mxu0 }
 0xfb1   : > { %v4667_v6 = vpop.f32.mrb[101].mxu0 }
 0xfb2   : > { %v3156_v40 = vpop.f32.mrb[102].mxu0 }
 0xfb3   : > { %v4668_v52 = vpop.f32.mrb[103].mxu0 }
 0xfb8   : > { %v3161_v46 = vpop.f32.mrb[104].mxu0 }
 0xfb9   : > { %v4671_v15 = vpop.f32.mrb[105].mxu0 }
 0xfba   : > { %v3164_v49 = vpop.f32.mrb[106].mxu0 }
 0xfbb   : > { %v4672_v32 = vpop.f32.mrb[107].mxu0 }
 0xfd6   : > { %v2923_v2 = vpop.permute.xlu0 %2922 }
 0xfd7   : > { %2937 = vst.msk [vmem:[#allocation2] sm:$0xff] %vm1607_vm5, %v2923_v2 }
 0xfd8   : > { %v2925_v51 = vpop.permute.xlu1 %2924 }
 0xfd9   : > { %2938 = vst.msk [vmem:[#allocation2 + $0x8] sm:$0xff] %vm1607_vm5, %v2925_v51 }
 0xfdf   : > { %v3395_v56 = vpop.f32.mrb[108].mxu0 }
 0xfe0   : > { %3422 = vrot.lane.b32.xlu0 %v3395_v56, %s5916_s0  ;;  %v4699_v19 = vpop.f32.mrb[109].mxu0 }
 0xfe1   : > { %v3398_v38 = vpop.f32.mrb[110].mxu0 }
 0xfe2   : > { %3424 = vrot.lane.b32.xlu1 %v3398_v38, %s5916_s0  ;;  %v4700_v10 = vpop.f32.mrb[111].mxu0 }
 0xfe4   : > { %3176 = vrot.lane.b32.xlu0 %v3153_v28, %s5915_s24 }
 0xfe6   : > { %3178 = vrot.lane.b32.xlu1 %v3156_v40, %s5915_s24 }
 0xfe7   : > { %v3403_v5 = vpop.f32.mrb[112].mxu0 }
 0xfe8   : > { %3426 = vrot.lane.b32.xlu0 %v3403_v5, %s5916_s0  ;;  %v4703_v35 = vpop.f32.mrb[113].mxu0 }
 0xfe9   : > { %v3406_v17 = vpop.f32.mrb[114].mxu0 }
 0xfea   : > { %3428 = vrot.lane.b32.xlu1 %v3406_v17, %s5916_s0  ;;  %v4704_v29 = vpop.f32.mrb[115].mxu0 }
 0xfec   : > { %2930 = vrot.lane.b32.xlu0 %v2911_v16, %s7978_s26  ;;  %s5779_s26 = scalar_lea.vmem %s5778_s25, 1280 }
 0xfed   : > { %p5781_p1 = scmp.lt.s32.totalorder %s5779_s26, %s5773_s1 }
 0xfee   : > { %3180 = vrot.lane.b32.xlu1 %v3161_v46, %s5915_s24 }
 0xfef   : > { %v3411_v20 = vpop.f32.mrb[116].mxu0  ;;  %p5782_p13 = por %p5781_p1, %p5780_p12 }
 0xff0   : > { %3430 = vrot.lane.b32.xlu0 %v3411_v20, %s5916_s0  ;;  %v4707_v8 = vpop.f32.mrb[117].mxu0  ;;  %s8112_s0 = sld [smem:[#allocation62_spill]] }
 0xff1   : > { %v3414_v57 = vpop.f32.mrb[118].mxu0  ;;  %p5783_p0 = pnand %p5782_p13, %p5776_p9 }
 0xff2   : > { %v4708_v34 = vpop.f32.mrb[119].mxu0 }
 0xff6   : > { %s8113_s24 = smov %s8112_s0  ;;  %s7876_s23 = scalar_lea.hbm %s8112_s0, %s4768_s5 }
0x1007   : > { %v2927_v45 = vpop.permute.xlu0 %2926 }
0x1008   : > { %2939 = vst.msk [vmem:[#allocation2 + $0x10] sm:$0xff] %vm1607_vm5, %v2927_v45 }
0x1009   : > { %v2929_v9 = vpop.permute.xlu1 %2928 }
0x100a   : > { %2940 = vst.msk [vmem:[#allocation2 + $0x18] sm:$0xff] %vm1607_vm5, %v2929_v9  ;;  %vm8088_vm5 = vcmask 122944  }
0x101b   : > { %v3173_v22 = vpop.permute.xlu0 %3172 }
0x101c   : > { %3187 = vst.msk [vmem:[#allocation2] sm:$0xff] %vm1859_vm10, %v3173_v22 }
0x101d   : > { %v3175_v27 = vpop.permute.xlu1 %3174 }
0x101e   : > { %3188 = vst.msk [vmem:[#allocation2 + $0x8] sm:$0xff] %vm1859_vm10, %v3175_v27 }
0x1052   : > { %v3423_v23 = vpop.permute.xlu0 %3422 }
0x1053   : > { %3437 = vst.msk [vmem:[#allocation2] sm:$0xff] %vm8084_vm8, %v3423_v23  ;;  %vm8099_vm8 = vmmov %vm8096_vm0 }
0x1054   : > { %v3425_v44 = vpop.permute.xlu1 %3424 }
0x1055   : > { %3438 = vst.msk [vmem:[#allocation2 + $0x8] sm:$0xff] %vm8085_vm6, %v3425_v44  ;;  %vm8100_vm6 = vmmov %vm8096_vm0  ;;  %v5028_v44 = vld [vmem:[#allocation27] sm:$0xff]  }
0x1056   : > { %v3177_v60 = vpop.permute.xlu0 %3176 }
0x1057   : > { %3189 = vst.msk [vmem:[#allocation2 + $0x10] sm:$0xff] %vm1859_vm10, %v3177_v60  ;;  %v5029_v60 = vld [vmem:[#allocation27 + $0x8] sm:$0xff]  }
0x1058   : > { %v3179_v25 = vpop.permute.xlu1 %3178 }
0x1059   : > { %3190 = vst.msk [vmem:[#allocation2 + $0x18] sm:$0xff] %vm1859_vm10, %v3179_v25  ;;  %vm8091_vm10 = vcmask 254144  }
0x105a   : > { %v3427_v53 = vpop.permute.xlu0 %3426  ;;  %v3442_v4 = vld [vmem:[#allocation2] sm:$0xff] }
0x105b   : > { %3439 = vst.msk [vmem:[#allocation2 + $0x10] sm:$0xff] %vm8086_vm12, %v3427_v53  ;;  %vm8101_vm12 = vmmov %vm8096_vm0 }
0x105c   : > { %v3429_v37 = vpop.permute.xlu1 %3428  ;;  %v3443_v26 = vld [vmem:[#allocation2 + $0x8] sm:$0xff] }
0x105d   : > { %3440 = vst.msk [vmem:[#allocation2 + $0x18] sm:$0xff] %vm8087_vm15, %v3429_v37  ;;  %v3447_v33 = vpack.c.bf16 %v3443_v26, %v3442_v4  ;;  %vm8102_vm15 = vmmov %vm8096_vm0 }
0x105e   : > { %v2931_v12 = vpop.permute.xlu0 %2930 }
0x105f   : > { %2941 = vst.msk [vmem:[#allocation2 + $0x20] sm:$0x1] %vm8088_vm5, %v2931_v12  ;;  %4714 = vmatmul.mubr.msk.bf16.vlgmr.msra.gmra.mrb[120].mxu0 %vm8089_vm14, %v3447_v33  ;;  %vm8103_vm5 = vmmov %vm8098_vm3 }
0x1060   : > { %v3181_v24 = vpop.permute.xlu1 %3180  ;;  %4729 = vmatprep.mubr.msk.bf16.mxu0 %vm5901_vm2, %v5900_v36  ;;  %4726 = vmatpush3.bf16.msra.mxu0 %v5028_v44  ;;  %vm8104_vm14 = vmmov %vm8096_vm0 }
0x1061   : > { %3191 = vst.msk [vmem:[#allocation2 + $0x20] sm:$0x1] %vm8090_vm1, %v3181_v24  ;;  %4727 = vmatprep.subr.bf16.mxu0 %v5900_v36  ;;  %vm8105_vm1 = vmmov %vm8096_vm0 }
0x1062   : > { %v3431_v18 = vpop.permute.xlu0 %3430  ;;  %v3444_v14 = vld [vmem:[#allocation2 + $0x10] sm:$0xff] }
0x1063   : > { %3441 = vst.msk [vmem:[#allocation2 + $0x20] sm:$0x1] %vm8091_vm10, %v3431_v18  ;;  %vm8106_vm10 = vmmov %vm8096_vm0 }
0x1064   : > { %v3445_v47 = vld [vmem:[#allocation2 + $0x18] sm:$0xff]  ;;  %4728 = vmatpush3.bf16.msra.mxu0 %v5029_v60 }
0x1065   : > { %v3448_v3 = vpack.c.bf16 %v3445_v47, %v3444_v14 }
0x1067   : > { %4718 = vmatmul.mubr.msk.bf16.vlgmr.msra.gmra.mrb[108].mxu1 %vm8092_vm7, %v3448_v3  ;;  %vm3779_vm7 = vcmask 523264  }
0x1068   : > { %4721 = vmatprep.mubr.msk.bf16.mxu1 %vm5901_vm2, %v5900_v36 }
0x106a   : > { %v3446_v13 = vld [vmem:[#allocation2 + $0x20] sm:$0x1] }
0x106b   : > { %v3449_v54 = vpack.c.bf16 %v3446_v13, %v3446_v13  ;;  %v4226_v13 = vld [vmem:[#allocation24] ss:$0 sm:$0xff] }
0x106f   : > { %4722 = vmatmul.mubr.msk.bf16.gmra.mrb[112].mxu1 %vm8093_vm9, %v3449_v54  ;;  %vm8108_vm9 = vmmov %vm8096_vm0 }
0x1070   : > { %4749 = vmatprep.mubr.msk.bf16.mxu1 %vm5901_vm2, %v5900_v36 }
0x1132   : > { %v3505_v58 = vpop.f32.mrb[120].mxu0 }
0x1133   : > { %v7807_v21 = vadd.f32 %v3505_v58, %v7195_v39  ;;  %v4715_v61 = vpop.f32.mrb[121].mxu0 }
0x1134   : > { %v3508_v11 = vpop.f32.mrb[122].mxu0 }
0x1135   : > { %v7810_v43 = vadd.f32 %v3508_v11, %v7198_v59  ;;  %v4716_v55 = vpop.f32.mrb[123].mxu0  ;;  %v3548_v16 = vsel %vm8094_vm4, %v7807_v21, 0.0  ;;  %vm8110_vm4 = vmmov %vm8096_vm0 }
0x1136   : > { %3549 = vadd.xlane.f32.xlu1 %v3548_v16 }
0x1137   : > { %v3551_v50 = vsel %vm8095_vm11, %v7810_v43, 0.0  ;;  %vm8111_vm11 = vmmov %vm8096_vm0 }
0x1138   : > { %3552 = vadd.xlane.f32.xlu0 %v3551_v50 }
0x113a   : > { %v3513_v62 = vpop.f32.mrb[108].mxu1 }
0x113b   : > { %v7817_v63 = vadd.f32 %v3513_v62, %v7205_v41  ;;  %v4719_v39 = vpop.f32.mrb[109].mxu1 }
0x113c   : > { %v3516_v0 = vpop.f32.mrb[110].mxu1  ;;  %v4227_v39 = vld [vmem:[#allocation26] ss:$0 sm:$0xff] }
0x113d   : > { %v7820_v30 = vadd.f32 %v3516_v0, %v7208_v42  ;;  %v4720_v59 = vpop.f32.mrb[111].mxu1  ;;  %v3554_v31 = vsel %vm8096_vm0, %v7817_v63, 0.0 }
0x113e   : > { %3555 = vadd.xlane.f32.xlu0 %v3554_v31 }
0x113f   : > { %v3557_v1 = vsel %vm8097_vm13, %v7820_v30, 0.0 }
0x1142   : > { %3558 = vadd.xlane.f32.xlu0 %v3557_v1  ;;  %v3521_v28 = vpop.f32.mrb[112].mxu1 }
0x1143   : > { %v7827_v6 = vadd.f32 %v3521_v28, %v7215_v48  ;;  %v4723_v41 = vpop.f32.mrb[113].mxu1 }
0x1144   : > { %v3524_v40 = vpop.f32.mrb[114].mxu1 }
0x1145   : > { %v4724_v52 = vpop.f32.mrb[115].mxu1  ;;  %v3560_v42 = vsel %vm8098_vm3, %v7827_v6, 0.0 }
0x1146   : > { %3561 = vadd.xlane.f32.xlu1 %v3560_v42 }
0x11c3   : > { %v3550_v46 = vpop.xlane.xlu1 %3549 }
0x11c4   : > { %v3563_v15 = vmul.f32 0.03125, %v3550_v46 }
0x11c5   : > { %v3553_v49 = vpop.xlane.xlu0 %3552 }
0x11c6   : > { %v3568_v32 = vsub.f32 %v7807_v21, %v3563_v15  ;;  %v3564_v2 = vmul.f32 0.03125, %v3553_v49 }
0x11c8   : > { %v3569_v51 = vsub.f32 %v7810_v43, %v3564_v2  ;;  %v3573_v7 = vmul.f32 %v3568_v32, %v3568_v32 }
0x11ca   : > { %v3578_v56 = vsel %vm8099_vm8, %v3573_v7, 0.0  ;;  %v3574_v48 = vmul.f32 %v3569_v51, %v3569_v51 }
0x11cb   : > { %3579 = vadd.xlane.f32.xlu0 %v3578_v56  ;;  %v3556_v19 = vpop.xlane.xlu0 %3555 }
0x11cc   : > { %v3565_v38 = vmul.f32 0.03125, %v3556_v19  ;;  %v3581_v10 = vsel %vm8100_vm6, %v3574_v48, 0.0  ;;  %v5030_v19 = vld [vmem:[#allocation30] sm:$0xff]  }
0x11cd   : > { %3582 = vadd.xlane.f32.xlu1 %v3581_v10  ;;  %4742 = vmatpush3.bf16.msra.mxu1 %v5030_v19  ;;  %v5032_v10 = vld [vmem:[#allocation30 + $0x10] sm:$0xff]  }
0x11ce   : > { %v3570_v5 = vsub.f32 %v7817_v63, %v3565_v38  ;;  %4743 = vmatprep.subr.bf16.mxu1 %v5900_v36  ;;  %v5031_v38 = vld [vmem:[#allocation30 + $0x8] sm:$0xff]  }
0x11cf   : > { %v3559_v35 = vpop.xlane.xlu0 %3558 }
0x11d0   : > { %v3566_v17 = vmul.f32 0.03125, %v3559_v35  ;;  %v3575_v29 = vmul.f32 %v3570_v5, %v3570_v5  ;;  %v4228_v35 = vld [vmem:[#allocation29] ss:$0 sm:$0xff] }
0x11d1   : > { %4744 = vmatpush3.bf16.msra.mxu1 %v5031_v38 }
0x11d2   : > { %v3571_v20 = vsub.f32 %v7820_v30, %v3566_v17  ;;  %v3584_v8 = vsel %vm8101_vm12, %v3575_v29, 0.0  ;;  %4745 = vmatprep.subr.bf16.mxu1 %v5900_v36 }
0x11d3   : > { %v3562_v57 = vpop.xlane.xlu1 %3561  ;;  %3585 = vadd.xlane.f32.xlu0 %v3584_v8 }
0x11d4   : > { %v3567_v34 = vmul.f32 0.03125, %v3562_v57  ;;  %v3576_v45 = vmul.f32 %v3571_v20, %v3571_v20 }
0x11d5   : > { %4746 = vmatpush3.bf16.msra.mxu1 %v5032_v10 }
0x11d6   : > { %v3572_v9 = vsub.f32 %v7827_v6, %v3567_v34  ;;  %v3587_v22 = vsel %vm8102_vm15, %v3576_v45, 0.0  ;;  %4747 = vmatprep.subr.bf16.mxu1 %v5900_v36 }
0x11d7   : > { %3588 = vadd.xlane.f32.xlu1 %v3587_v22 }
0x11d8   : > { %v3577_v27 = vmul.f32 %v3572_v9, %v3572_v9 }
0x11da   : > { %v3590_v23 = vsel %vm8103_vm5, %v3577_v27, 0.0 }
0x11db   : > { %3591 = vadd.xlane.f32.xlu0 %v3590_v23 }
0x1258   : > { %v3580_v25 = vpop.xlane.xlu0 %3579 }
0x1259   : > { %v3593_v53 = vmul.f32 0.03125, %v3580_v25 }
0x125a   : > { %v3583_v37 = vpop.xlane.xlu1 %3582 }
0x125b   : > { %v3598_v4 = vadd.f32 1e-05, %v3593_v53  ;;  %v3594_v26 = vmul.f32 0.03125, %v3583_v37 }
0x125d   : > { %5214 = vrsqrt.f32 %v3598_v4  ;;  %v3599_v33 = vadd.f32 1e-05, %v3594_v26 }
0x125f   : > { %5216 = vrsqrt.f32 %v3599_v33 }
0x1260   : > { %v3586_v12 = vpop.xlane.xlu0 %3585 }
0x1261   : > { %v3595_v24 = vmul.f32 0.03125, %v3586_v12 }
0x1263   : > { %v3600_v18 = vadd.f32 1e-05, %v3595_v24 }
0x1264   : > { %v3589_v14 = vpop.xlane.xlu1 %3588 }
0x1265   : > { %5218 = vrsqrt.f32 %v3600_v18  ;;  %v3596_v47 = vmul.f32 0.03125, %v3589_v14 }
0x1267   : > { %v5215_v3 = vpop.eup %5214  ;;  %v3601_v54 = vadd.f32 1e-05, %v3596_v47 }
0x1268   : > { %v3608_v58 = vmul.f32 %v5215_v3, %v3568_v32  ;;  %v3592_v61 = vpop.xlane.xlu0 %3591 }
0x1269   : > { %v5217_v11 = vpop.eup %5216  ;;  %5220 = vrsqrt.f32 %v3601_v54  ;;  %v3597_v55 = vmul.f32 0.03125, %v3592_v61 }
0x126a   : > { %v3619_v16 = vmul.f32 %v4226_v13, %v3608_v58  ;;  %v3609_v50 = vmul.f32 %v5217_v11, %v3569_v51 }
0x126b   : > { %v3602_v62 = vadd.f32 1e-05, %v3597_v55 }
0x126c   : > { %v3620_v0 = vmul.f32 %v4226_v13, %v3609_v50  ;;  %v3630_v59 = vadd.f32 %v4227_v39, %v3619_v16 }
0x126d   : > { %5222 = vrsqrt.f32 %v3602_v62 }
0x126e   : > { %v3631_v31 = vadd.f32 %v4227_v39, %v3620_v0 }
0x126f   : > { %v5219_v1 = vpop.eup %5218 }
0x1270   : > { %v3610_v28 = vmul.f32 %v5219_v1, %v3570_v5  ;;  %v3635_v41 = vpack.c.bf16 %v3631_v31, %v3630_v59  ;;  %v5033_v5 = vld [vmem:[#allocation30 + $0x18] sm:$0xff]  }
0x1271   : > { %4748 = vmatpush3.bf16.msra.mxu1 %v5033_v5 }
0x1272   : > { %4730 = vmatmul.mubr.msk.bf16.vlgmr.msra.gmra.mrb[124].mxu0 %vm8104_vm14, %v3635_v41  ;;  %v3621_v42 = vmul.f32 %v4226_v13, %v3610_v28 }
0x1273   : > { %v5221_v40 = vpop.eup %5220  ;;  %4733 = vmatprep.mubr.msk.bf16.mxu0 %vm5901_vm2, %v5900_v36 }
0x1274   : > { %v3611_v52 = vmul.f32 %v5221_v40, %v3571_v20  ;;  %v3632_v32 = vadd.f32 %v4227_v39, %v3621_v42 }
0x1276   : > { %v3622_v46 = vmul.f32 %v4226_v13, %v3611_v52 }
0x1277   : > { %v5223_v15 = vpop.eup %5222 }
0x1278   : > { %v3612_v49 = vmul.f32 %v5223_v15, %v3572_v9  ;;  %v3633_v2 = vadd.f32 %v4227_v39, %v3622_v46  ;;  %v4234_v15 = vld [vmem:[#allocation32] ss:$0 sm:$0xff] }
0x127a   : > { %v3636_v51 = vpack.c.bf16 %v3633_v2, %v3632_v32  ;;  %v3623_v7 = vmul.f32 %v4226_v13, %v3612_v49 }
0x127c   : > { %4734 = vmatmul.mubr.msk.bf16.gmra.mrb[128].mxu0 %vm8105_vm1, %v3636_v51  ;;  %v3634_v56 = vadd.f32 %v4227_v39, %v3623_v7 }
0x127d   : > { %4737 = vmatprep.mubr.msk.bf16.mxu0 %vm5901_vm2, %v5900_v36 }
0x127e   : > { %v3637_v48 = vpack.c.bf16 %v3634_v56, %v3634_v56 }
0x1284   : > { %4738 = vmatmul.mubr.msk.bf16.gmra.mrb[132].mxu0 %vm8106_vm10, %v3637_v48 }
0x1345   : > { %v3699_v17 = vpop.f32.mrb[124].mxu0 }
0x1346   : > { %v3700_v29 = vadd.f32 %v4228_v35, %v3699_v17  ;;  %v4731_v20 = vpop.f32.mrb[125].mxu0 }
0x1347   : > { %v3702_v8 = vpop.f32.mrb[126].mxu0 }
0x1348   : > { %v3726_v57 = vmul.f32 0.70710677, %v3700_v29  ;;  %v3703_v34 = vadd.f32 %v4228_v35, %v3702_v8  ;;  %v4732_v45 = vpop.f32.mrb[127].mxu0  ;;  %v3721_v12 = vmul.f32 0.5, %v3700_v29 }
0x134a   : > { %5224 = verf.f32 %v3726_v57  ;;  %v3727_v9 = vmul.f32 0.70710677, %v3703_v34  ;;  %v3722_v24 = vmul.f32 0.5, %v3703_v34 }
0x134c   : > { %5226 = verf.f32 %v3727_v9 }
0x134f   : > { %v3707_v22 = vpop.f32.mrb[128].mxu0 }
0x1350   : > { %v3708_v27 = vadd.f32 %v4228_v35, %v3707_v22  ;;  %v4735_v23 = vpop.f32.mrb[129].mxu0 }
0x1351   : > { %v3710_v44 = vpop.f32.mrb[130].mxu0 }
0x1352   : > { %v3728_v60 = vmul.f32 0.70710677, %v3708_v27  ;;  %v3711_v25 = vadd.f32 %v4228_v35, %v3710_v44  ;;  %v4736_v53 = vpop.f32.mrb[131].mxu0  ;;  %v3723_v39 = vmul.f32 0.5, %v3708_v27 }
0x1354   : > { %v5225_v37 = vpop.eup %5224  ;;  %5228 = verf.f32 %v3728_v60  ;;  %v3729_v4 = vmul.f32 0.70710677, %v3711_v25  ;;  %v3724_v0 = vmul.f32 0.5, %v3711_v25 }
0x1355   : > { %v3736_v26 = vadd.f32 1.0, %v5225_v37 }
0x1356   : > { %v5227_v33 = vpop.eup %5226  ;;  %5230 = verf.f32 %v3729_v4 }
0x1357   : > { %v3737_v18 = vadd.f32 1.0, %v5227_v33  ;;  %v3715_v14 = vpop.f32.mrb[132].mxu0  ;;  %v3741_v13 = vmul.f32 %v3736_v26, %v3721_v12 }
0x1358   : > { %v3716_v47 = vadd.f32 %v4228_v35, %v3715_v14  ;;  %v4739_v3 = vpop.f32.mrb[133].mxu0 }
0x1359   : > { %v3742_v54 = vmul.f32 %v3737_v18, %v3722_v24  ;;  %v3718_v58 = vpop.f32.mrb[134].mxu0 }
0x135a   : > { %v3730_v61 = vmul.f32 0.70710677, %v3716_v47  ;;  %v4740_v11 = vpop.f32.mrb[135].mxu0  ;;  %v3725_v40 = vmul.f32 0.5, %v3716_v47 }
0x135b   : > { %v3746_v55 = vpack.c.bf16 %v3742_v54, %v3741_v13 }
0x135c   : > { %5232 = verf.f32 %v3730_v61 }
0x135d   : > { %4750 = vmatmul.mubr.msk.bf16.vlgmr.msra.gmra.mrb[116].mxu1 %vm3779_vm7, %v3746_v55 }
0x135e   : > { %v5229_v16 = vpop.eup %5228  ;;  %4753 = vmatprep.mubr.msk.bf16.mxu1 %vm5901_vm2, %v5900_v36 }
0x135f   : > { %v3738_v50 = vadd.f32 1.0, %v5229_v16 }
0x1360   : > { %v5231_v62 = vpop.eup %5230 }
0x1361   : > { %v3739_v59 = vadd.f32 1.0, %v5231_v62  ;;  %v3743_v31 = vmul.f32 %v3738_v50, %v3723_v39 }
0x1363   : > { %v3744_v1 = vmul.f32 %v3739_v59, %v3724_v0 }
0x1365   : > { %v3747_v28 = vpack.c.bf16 %v3744_v1, %v3743_v31 }
0x1366   : > { %v5233_v41 = vpop.eup %5232 }
0x1367   : > { %v3740_v52 = vadd.f32 1.0, %v5233_v41  ;;  %4754 = vmatmul.mubr.msk.bf16.gmra.mrb[120].mxu1 %vm3779_vm7, %v3747_v28 }
0x1368   : > { %4757 = vmatprep.mubr.msk.bf16.mxu1 %vm5901_vm2, %v5900_v36  ;;  %vm8109_vm2 = vmmov %vm8096_vm0 }
0x1369   : > { %v3745_v42 = vmul.f32 %v3740_v52, %v3725_v40  ;;  %vm8114_vm0 = vmmov %vm8098_vm3 }
0x136b   : > { %v3748_v46 = vpack.c.bf16 %v3745_v42, %v3745_v42 }
0x136f   : > { %4758 = vmatmul.mubr.msk.bf16.gmra.mrb[124].mxu1 %vm3779_vm7, %v3748_v46 }
0x1430   : > { %v3823_v49 = vpop.f32.mrb[116].mxu1 }
0x1431   : > { %v3824_v32 = vadd.f32 %v4234_v15, %v3823_v49  ;;  %v4751_v2 = vpop.f32.mrb[117].mxu1 }
0x1432   : > { %v3826_v51 = vpop.f32.mrb[118].mxu1 }
0x1433   : > { %v3845_v7 = vadd.f32 %v3824_v32, %v7807_v21  ;;  %v3827_v56 = vadd.f32 %v4234_v15, %v3826_v51  ;;  %v4752_v48 = vpop.f32.mrb[119].mxu1 }
0x1435   : > { %3850 = vst.msk [vmem:[%s861_s3] sm:$0xff] %vm8108_vm9, %v3845_v7  ;;  %v3846_v36 = vadd.f32 %v3827_v56, %v7810_v43 }
0x1437   : > { %3851 = vst.msk [vmem:[%s861_s3 + $0x8] sm:$0xff] %vm8109_vm2, %v3846_v36 }
0x143a   : > { %v3831_v19 = vpop.f32.mrb[120].mxu1 }
0x143b   : > { %v3832_v38 = vadd.f32 %v4234_v15, %v3831_v19  ;;  %v4755_v10 = vpop.f32.mrb[121].mxu1 }
0x143c   : > { %v3834_v5 = vpop.f32.mrb[122].mxu1 }
0x143d   : > { %v3847_v35 = vadd.f32 %v3832_v38, %v7817_v63  ;;  %v3835_v17 = vadd.f32 %v4234_v15, %v3834_v5  ;;  %v4756_v21 = vpop.f32.mrb[123].mxu1 }
0x143f   : > { %3852 = vst.msk [vmem:[%s861_s3 + $0x10] sm:$0xff] %vm8110_vm4, %v3847_v35  ;;  %v3848_v29 = vadd.f32 %v3835_v17, %v7820_v30 }
0x1441   : > { %3853 = vst.msk [vmem:[%s861_s3 + $0x18] sm:$0xff] %vm8111_vm11, %v3848_v29 }
0x1442   : > { %v3839_v43 = vpop.f32.mrb[124].mxu1 }
0x1443   : > { %v3840_v20 = vadd.f32 %v4234_v15, %v3839_v43  ;;  %v4759_v8 = vpop.f32.mrb[125].mxu1 }
0x1444   : > { %v3842_v63 = vpop.f32.mrb[126].mxu1 }
0x1445   : > { %v3849_v57 = vadd.f32 %v3840_v20, %v7827_v6  ;;  %v4760_v34 = vpop.f32.mrb[127].mxu1 }
0x1447   : > { %3854 = vst.msk [vmem:[%s861_s3 + $0x20] sm:$0x1] %vm8114_vm0, %v3849_v57 }
0x1448   : > { %5786 = shalt.err (!%p5783_p0)
}
0x1449   : > { %s5787_s3 = scalar_lea.hbm %s7876_s23, 640  ;;  %s5791_s2 = scalar_lea.hbm %s8113_s24, 1280 }
0x144a   : > { %p5788_p2 = scmp.ne.s32.totalorder %s7876_s23, %s5787_s3  ;;  %p5792_p10 = scmp.lt.u32.totalorder %s7876_s23, %s8113_s24 }
0x144b   : > { %p5793_p11 = scmp.lt.u32.totalorder %s5791_s2, %s5787_s3  ;;  %p5795_p6 = scmp.lt.u32.totalorder %s5787_s3, %s7876_s23 }
0x144c   : > { %p5789_p8 = pnand %p5788_p2, %p8115_p7 }
0x144d   : > { %p5794_p3 = por %p5793_p11, %p5792_p10 }
0x144e   : > { %p5790_p4 = pneg %p5789_p8 }
0x144f   : > { %p5796_p5 = por %p5795_p6, %p5794_p3 }
0x1451   : > { %p5797_p9 = pnand %p5796_p5, %p5790_p4 }
0x1453   : > { %5800 = shalt.err (!%p5797_p9)
}
0x1454   : > { %s5918_s26 = smov 128   ;;  %s8116_s1 = smov 8  }
0x1455   : > { %4843 = dma.vmem_to_hbm [thread:$0]  (%p8115_p7), %s7870_s6, 640, %s7876_s23, %s3856_s4, %s5918_s26, %s5918_s26, %s8116_s1  }
0x1456 PF: > { %s8117_s25 = sld [smem:[#allocation45_spill]]  ;;  %s8118_s5 = sld [smem:[#allocation48_spill]] }
0x1457   : > { %p8119_p12 = scmp.ne.s32.totalorder %s8020_s29, 0 }
0x145c   : > { %s3884_s7 = sand.u32 1, %s8117_s25   ;;  %p8120_p1 = scmp.ge.s32.totalorder %s8118_s5, 2 }
0x145d   : > { %s3885_s3 = scalar_lea.sflag [#allocation5], %s3884_s7 }
0x145e   : > { %p4905_p13 = pnand %p8120_p1, %p8119_p12 }
0x1460   : > { %5858 = dma.done.wait (!%p4905_p13), %s3885_s3, 640  }
0x1461   : > { %5860 = vsyncadd (!%p4905_p13), %s3885_s3, 4294966656  ;;  %s8121_s0 = sld [smem:[#allocation46_spill]]  ;;  %s8122_s30 = sld [smem:[#allocation47_spill]] }
0x1462   : > { %p41_p0 = scmp.ge.s32.totalorder %s6490_s21, 4  }
0x1464   :  { %43 = sbr.rel (!%p41_p0) target bundleno = 27 (0x1b), region = 213 }
0x146b   :  { %3890 = vsyncpa [#allocation4], 1 }
0x146c   :  { %3892 = vsyncpa [#allocation4 + $0x1], 1 }
0x146d   :  { %3893 = vsyncpa [#allocation7], 1 }
0x146e   :  { %3894 = vsyncpa [#allocation10], 1 }
0x146f   :  { %3895 = vsyncpa [#allocation13], 1 }
0x1470   :  { %3896 = vsyncpa [#allocation16], 1 }
0x1471   :  { %3897 = vsyncpa [#allocation19], 1 }
0x1472   :  { %3898 = vsyncpa [#allocation22], 1 }
0x1473   :  { %3899 = vsyncpa [#allocation25], 1 }
0x1474   :  { %3900 = vsyncpa [#allocation28], 1 }
0x1475   :  { %3901 = vsyncpa [#allocation31], 1 }
0x1476   :  { %3902 = vsyncpa [#allocation5], 1 }
0x1477   :  { %3904 = vsyncpa [#allocation5 + $0x1], 1 }

</bundles_post_ra>
